<compile_context>
chip_gen: v5e
topology: v5e:2x2
jax: 0.10.0
libtpu: 0.0.40
codegen_flags: <defaults>
</compile_context>

<pallas_src>
import functools

import jax
import jax.numpy as jnp
from jax.experimental import pallas as pl
from jax.experimental.pallas import tpu as pltpu

# ----------------------------- model dimensions ------------------------------
ROBOT_DIM = 9          # px, py, vx, vy, radius, gx, gy, v_pref, theta
HUMAN_DIM = 5          # px, py, vx, vy, radius
NODE_DIM = 16          # fused node-feature width (robot cols 0..8, human cols 9..13)
X_DIM = 32             # config.gcn.X_dim
EMB_HIDDEN = 64        # config.gcn.wr_dims / wh_dims = [64, 32]
EMB2 = 2 * EMB_HIDDEN  # fused block-diagonal layer-1 width (robot block | human block)
MP_HIDDEN = 64         # config.model_predictive_rl.motion_predictor_dims = [64, 5]
OUT_W = 128            # lane-dense padded motion-predictor output width
TIME_STEP = 0.25
KINEMATICS = "holonomic"

# --------------------- packed-parameter slab bookkeeping ----------------------
(W_E1, W_E2, W_A, W_G0, W_G1, W_M1, W_M2) = range(7)          # weight slab rows
(B_E1R, B_E1H, B_E2R, B_E2H, B_M1, B_M2) = range(6)           # bias slab rows
NUM_W, NUM_B = 7, 6
SLAB_R = 128           # max weight fan-in  (rows)   -- W_E2 has 128 rows
SLAB_C = 128           # max weight fan-out (lanes)  -- W_E1 / padded W_M2 have 128 cols


def pack_params(params):
    """Pack the 15 raw weight/bias arrays into 2 pre-padded slabs (2 DMAs, not 15).

    The robot / human embedding MLPs are fused into block-diagonal weights so the
    kernel runs ONE matmul per embedding layer over all N*TB node rows.
    NOTE (review correctness concern): columns 5..127 of the W_M2 / B_M2 slab rows
    MUST stay exactly zero -- the kernel writes the full 128-lane output block and
    the wrapper slices [..., :5], relying on those padded columns being zero.
    """
    (w1r, b1r, w2r, b2r, w1h, b1h, w2h, b2h, wa, g0, g1, wm1, bm1, wm2, bm2) = params

    # fused block-diagonal node-embedding weights
    w_e1 = jnp.zeros((NODE_DIM, EMB2), jnp.float32)
    w_e1 = w_e1.at[:ROBOT_DIM, :EMB_HIDDEN].set(w1r)                       # robot block
    w_e1 = w_e1.at[ROBOT_DIM:ROBOT_DIM + HUMAN_DIM, EMB_HIDDEN:].set(w1h)  # human block
    w_e2 = jnp.zeros((EMB2, X_DIM), jnp.float32)
    w_e2 = w_e2.at[:EMB_HIDDEN, :].set(w2r)
    w_e2 = w_e2.at[EMB_HIDDEN:, :].set(w2h)

    weights = [w_e1, w_e2, wa, g0, g1, wm1, wm2]
    wslab = jnp.zeros((NUM_W, SLAB_R, SLAB_C), jnp.bfloat16)
    for i, w in enumerate(weights):
        r, c = w.shape
        wslab = wslab.at[i, :r, :c].set(w.astype(jnp.bfloat16))

    # biases stay f32; the embedding layers carry per-node-type (robot/human) rows.
    b_e1r = jnp.zeros((EMB2,), jnp.float32).at[:EMB_HIDDEN].set(b1r.reshape(-1))
    b_e1h = jnp.zeros((EMB2,), jnp.float32).at[EMB_HIDDEN:].set(b1h.reshape(-1))
    biases = [b_e1r, b_e1h, b2r.reshape(-1), b2h.reshape(-1),
              bm1.reshape(-1), bm2.reshape(-1)]
    bslab = jnp.zeros((NUM_B, SLAB_C), jnp.float32)
    for i, b in enumerate(biases):
        bslab = bslab.at[i, : b.shape[0]].set(b.astype(jnp.float32))
    return wslab, bslab


# --------------------------------- kernel ------------------------------------
def _state_predictor_kernel(nodes_ref, w_ref, b_ref, out_ref):
    f32, bf16 = jnp.float32, jnp.bfloat16
    N, TB, _ = nodes_ref.shape        # agents on leading axis, batch tile on sublanes
    NH = N - 1

    def weight(i, r, c):              # static zero-cost view of the bf16 weight slab
        return w_ref[i, :r, :c]

    def bias(i, c):                   # (1, c) f32 row of the bias slab
        return b_ref[i:i + 1, :c]

    def mm(x, wi, r, c):              # bf16 MXU operands, f32 accumulation
        return jnp.dot(x.astype(bf16), weight(wi, r, c), preferred_element_type=f32)

    def per_node_bias(bi_robot, bi_human, c):
        # (N, 1, c): node 0 gets the robot bias row, nodes 1..NH the human row.
        br = bias(bi_robot, c)[None]                                  # (1, 1, c)
        bh = bias(bi_human, c)[None]                                  # (1, 1, c)
        return jnp.concatenate([br, jnp.broadcast_to(bh, (NH, 1, c))], axis=0)

    nodes = nodes_ref[...].reshape(N * TB, NODE_DIM)   # free sublane regrouping (TB % 8 == 0)

    # ---- fused block-diagonal 2-layer node embedding (2 big MXU matmuls) ----
    e1 = mm(nodes, W_E1, NODE_DIM, EMB2).reshape(N, TB, EMB2)
    e1 = jnp.maximum(e1 + per_node_bias(B_E1R, B_E1H, EMB2), 0.0)
    X = mm(e1.reshape(N * TB, EMB2), W_E2, EMB2, X_DIM).reshape(N, TB, X_DIM)
    X = jnp.maximum(X + per_node_bias(B_E2R, B_E2H, X_DIM), 0.0)      # (N, TB, X_DIM)

    # ---- embedded-gaussian similarity; softmax vectorized over the key axis ----
    # X @ Wa is one MXU matmul over all N*TB rows; the per-element N x N bilinear
    # stays on the VPU/XLU (broadcast-multiply + lane reduce).
    XWa = mm(X.reshape(N * TB, X_DIM), W_A, X_DIM, X_DIM).reshape(N, TB, X_DIM)
    logits = jnp.concatenate(
        [jnp.sum(XWa * X[j][None], axis=-1, keepdims=True) for j in range(N)],
        axis=-1)                                                      # (N, TB, N): [i,b,j]
    p = jnp.exp(logits - jnp.max(logits, axis=-1, keepdims=True))
    inv = pl.reciprocal(jnp.sum(p, axis=-1, keepdims=True), approx=False)  # exact parity
    A = p * inv                                                       # A[i, b, j]

    # hoist the 1 -> X_DIM lane broadcast of the attention columns out of the GCN loop
    a_b = [jnp.broadcast_to(A[:, :, j:j + 1], (N, TB, X_DIM)) for j in range(N)]

    # ---- 2 GCN layers with skip connections (aggregation on the VPU) ----
    H = X
    for gi in (W_G0, W_G1):
        AH = a_b[0] * H[0][None]
        for j in range(1, N):
            AH = AH + a_b[j] * H[j][None]
        HW = jnp.maximum(mm(AH.reshape(N * TB, X_DIM), gi, X_DIM, X_DIM), 0.0)
        H = HW.reshape(N, TB, X_DIM) + H

    # ---- human motion predictor (robot row skipped); lane-dense 128-wide output ----
    Hh = H[1:].reshape(NH * TB, X_DIM)                                # humans only
    M = jnp.maximum(mm(Hh, W_M1, X_DIM, MP_HIDDEN) + bias(B_M1, MP_HIDDEN), 0.0)
    M = mm(M, W_M2, MP_HIDDEN, OUT_W) + bias(B_M2, OUT_W)             # cols 5..127 exactly 0
    out_ref[...] = M.reshape(NH, TB, OUT_W)                           # unmasked full-width store


# -------------------------------- wrapper -------------------------------------
@functools.partial(jax.jit, static_argnames=("batch_tile", "cores_per_chip"))
def predict_next_human_states(robot_state, human_states, wslab, bslab, *,
                              batch_tile=512, cores_per_chip=1):
    """(B,1,ROBOT_DIM), (B,NH,HUMAN_DIM) + packed slabs -> (B, NH, HUMAN_DIM).

    cores_per_chip=1 (default) targets single-TensorCore chips (v5e/v6e): B <= batch_tile
    runs as ONE grid step.  Pass cores_per_chip=2 for v7x so both TensorCores get a
    "parallel" batch tile.
    """
    B, _, _ = robot_state.shape
    _, nh, _ = human_states.shape
    n = nh + 1

    grid_b = max(1, pl.cdiv(B, batch_tile))
    if cores_per_chip > 1 and B >= cores_per_chip:
        grid_b = cores_per_chip * pl.cdiv(grid_b, cores_per_chip)
    tb = 8 * pl.cdiv(pl.cdiv(B, grid_b), 8)        # batch tile, multiple of 8 (sublanes)
    bp = grid_b * tb

    # Single (N, B, NODE_DIM) node-feature slab feeding the fused block-diagonal MLP:
    # robot features in cols 0..8 of node 0, human features in cols 9..13 of nodes 1..NH.
    robot_feat = jnp.pad(robot_state[:, 0, :], ((0, 0), (0, NODE_DIM - ROBOT_DIM)))
    human_feat = jnp.pad(jnp.transpose(human_states, (1, 0, 2)),
                         ((0, 0), (0, 0), (ROBOT_DIM, NODE_DIM - ROBOT_DIM - HUMAN_DIM)))
    nodes = jnp.concatenate([robot_feat[None], human_feat], axis=0)   # (N, B, NODE_DIM)
    if bp != B:
        # padded batch columns only produce garbage columns that are sliced off below
        # (there is no cross-batch mixing anywhere in the graph model).
        nodes = jnp.pad(nodes, ((0, 0), (0, bp - B), (0, 0)))

    out = pl.pallas_call(
        _state_predictor_kernel,
        out_shape=jax.ShapeDtypeStruct((nh, bp, OUT_W), jnp.float32),
        grid_spec=pltpu.PrefetchScalarGridSpec(
            num_scalar_prefetch=0,
            grid=(grid_b,),
            in_specs=[
                pl.BlockSpec((n, tb, NODE_DIM), lambda b: (0, b, 0)),
                pl.BlockSpec(wslab.shape, lambda b: (0, 0, 0)),       # fetched once
                pl.BlockSpec(bslab.shape, lambda b: (0, 0)),          # fetched once
            ],
            out_specs=pl.BlockSpec((nh, tb, OUT_W), lambda b: (0, b, 0)),
        ),
        compiler_params=pltpu.CompilerParams(
            dimension_semantics=("parallel",),
            vmem_limit_bytes=32 * 1024 * 1024,
        ),
    )(nodes, wslab, bslab)

    # Drop the zero lane padding (cols 5..127) and the padded batch tail in XLA.
    return jnp.transpose(out[:, :B, :HUMAN_DIM], (1, 0, 2))


def compute_next_state(robot_state, action, time_step=TIME_STEP, kinematics=KINEMATICS):
    """Plain-JAX glue (scalar, batch==1 kinematics) mirroring StatePredictor.compute_next_state."""
    if robot_state.shape[0] != 1:
        raise NotImplementedError
    ns = robot_state.reshape(-1)                      # squeeze -> (ROBOT_DIM,)
    if kinematics == "holonomic":
        vx, vy = action
        ns = ns.at[0].add(vx * time_step)
        ns = ns.at[1].add(vy * time_step)
        ns = ns.at[2].set(vx)
        ns = ns.at[3].set(vy)
    else:
        v, r = action
        ns = ns.at[7].add(r)
        ns = ns.at[0].add(jnp.cos(ns[7]) * v * time_step)
        ns = ns.at[1].add(jnp.sin(ns[7]) * v * time_step)
        ns = ns.at[2].set(jnp.cos(ns[7]) * v)
        ns = ns.at[3].set(jnp.sin(ns[7]) * v)
    return ns[None, None, :]


def state_predictor_forward(state, action, wslab, bslab, detach=False):
    """Mirrors StatePredictor.forward: returns [next_robot_state, next_human_states]."""
    # TODO(synk): `detach` is a no-op in this inference-only JAX port (no autograd graph).
    robot_state, human_states = state
    assert robot_state.ndim == 3
    next_human_states = predict_next_human_states(robot_state, human_states, wslab, bslab)
    next_robot_state = None if action is None else compute_next_state(robot_state, action)
    return [next_robot_state, next_human_states]


# ----------------------- deterministic parameter init -------------------------
def init_params(key, scale=0.1):
    shapes = [
        (ROBOT_DIM, EMB_HIDDEN), (1, EMB_HIDDEN),      # w_r layer 1
        (EMB_HIDDEN, X_DIM),     (1, X_DIM),           # w_r layer 2
        (HUMAN_DIM, EMB_HIDDEN), (1, EMB_HIDDEN),      # w_h layer 1
        (EMB_HIDDEN, X_DIM),     (1, X_DIM),           # w_h layer 2
        (X_DIM, X_DIM),                                # w_a (similarity)
        (X_DIM, X_DIM),                                # GCN W0
        (X_DIM, X_DIM),                                # GCN W1
        (X_DIM, MP_HIDDEN),      (1, MP_HIDDEN),       # motion predictor layer 1
        (MP_HIDDEN, HUMAN_DIM),  (1, HUMAN_DIM),       # motion predictor layer 2
    ]
    keys = jax.random.split(key, len(shapes))
    return [scale * jax.random.normal(k, s, dtype=jnp.float32)
            for k, s in zip(keys, shapes)]


# ----------------------------- pure-JAX references -----------------------------
def reference_next_human_states(robot_state, human_states, params,
                                matmul_dtype=jnp.float32):
    """Reference on the RAW (unfused) params.

    matmul_dtype=bfloat16 reproduces the kernel's bf16-at-the-MXU casts; the attention
    bilinear and the A@H aggregation are computed with explicit f32 elementwise ops so
    TPU default matmul precision cannot leak into the comparison.
    """
    (w1r, b1r, w2r, b2r, w1h, b1h, w2h, b2h, wa, g0, g1, wm1, bm1, wm2, bm2) = params

    def mm(a, w):
        return jnp.dot(a.astype(matmul_dtype), w.astype(matmul_dtype),
                       preferred_element_type=jnp.float32)

    def lin(x, w, b, relu=True):
        y = mm(x, w) + b
        return jnp.maximum(y, 0.0) if relu else y

    er = lin(lin(robot_state, w1r, b1r), w2r, b2r)            # (B, 1, X)
    eh = lin(lin(human_states, w1h, b1h), w2h, b2h)           # (B, NH, X)
    X = jnp.concatenate([er, eh], axis=1)                     # (B, N, X)

    XWa = mm(X, wa)                                           # (B, N, X)
    logits = jnp.sum(XWa[:, :, None, :] * X[:, None, :, :], axis=-1)   # (B, N, N), pure f32
    p = jnp.exp(logits - jnp.max(logits, axis=-1, keepdims=True))
    A = p / jnp.sum(p, axis=-1, keepdims=True)

    H = X
    for g in (g0, g1):
        AH = jnp.sum(A[..., None] * H[:, None, :, :], axis=2)          # (B, N, X), pure f32
        H = jnp.maximum(mm(AH, g), 0.0) + H
    M = lin(lin(H, wm1, bm1), wm2, bm2, relu=False)           # (B, N, HUMAN_DIM)
    return M[:, 1:, :]


# ----------------------------------- main --------------------------------------
if __name__ == "__main__":
    key = jax.random.PRNGKey(0)
    k_r, k_h, k_p = jax.random.split(key, 3)

    B, NH = 64, 5
    robot_state = jax.random.normal(k_r, (B, 1, ROBOT_DIM), dtype=jnp.float32)
    human_states = jax.random.normal(k_h, (B, NH, HUMAN_DIM), dtype=jnp.float32)
    params = init_params(k_p)
    wslab, bslab = pack_params(params)

    # Batched call (action=None, as in the original module when batch > 1).
    _, next_humans = state_predictor_forward((robot_state, human_states), None,
                                             wslab, bslab)
    next_humans = jax.block_until_ready(next_humans)

    # Odd batch size -> exercises the batch-padding path (B=13 pads to 16).
    next_humans_small = predict_next_human_states(robot_state[:13], human_states[:13],
                                                  wslab, bslab)
    next_humans_small = jax.block_until_ready(next_humans_small)

    # Batch-1 call with an action to exercise compute_next_state (holonomic).
    action = (0.5, -0.3)  # (vx, vy)
    next_robot_1, next_humans_1 = state_predictor_forward(
        (robot_state[:1], human_states[:1]), action, wslab, bslab)
    next_robot_1 = jax.block_until_ready(next_robot_1)
    next_humans_1 = jax.block_until_ready(next_humans_1)

    # Correctness: tight vs a bf16-matmul-matched reference, loose vs full f32.
    ref_bf16 = reference_next_human_states(robot_state, human_states, params,
                                           matmul_dtype=jnp.bfloat16)
    ref_f32 = reference_next_human_states(robot_state, human_states, params)

    assert next_humans.shape == (B, NH, HUMAN_DIM)
    assert next_robot_1.shape == (1, 1, ROBOT_DIM)
    assert jnp.allclose(next_humans, ref_bf16, rtol=1e-2, atol=1e-2), \
        "mismatch vs bf16-matched reference"
    assert jnp.allclose(next_humans, ref_f32, rtol=5e-2, atol=5e-2), \
        "mismatch vs f32 reference"
    assert jnp.allclose(next_humans_small, ref_bf16[:13], rtol=1e-2, atol=1e-2), \
        "padded-batch mismatch vs bf16-matched reference"
    assert jnp.allclose(next_humans_1, ref_f32[:1], rtol=5e-2, atol=5e-2), \
        "batch-1 mismatch vs f32 reference"

    print("KERNEL_OK")
</pallas_src>

<mosaic_0001>
module attributes {stable_mosaic.version = 11 : i64} {
  func.func @_state_predictor_kernel(%arg0: i32, %arg1: memref<6x64x16xf32, #tpu.memory_space<vmem>>, %arg2: memref<7x128x128xbf16, #tpu.memory_space<vmem>>, %arg3: memref<6x128xf32, #tpu.memory_space<vmem>>, %arg4: memref<5x64x128xf32, #tpu.memory_space<vmem>>) attributes {dimension_semantics = [#tpu.dimension_semantics<parallel>], iteration_bounds = array<i64: 1>, scalar_prefetch = 0 : i64, scratch_operands = 0 : i64, tpu.core_type = #tpu.core_type<tc>, window_params = [{transform_indices = @transform_0, window_bounds = array<i64: 6, 64, 16>}, {pipeline_mode = #tpu.pipeline_mode<synchronous>, transform_indices = @transform_1, window_bounds = array<i64: 7, 128, 128>}, {pipeline_mode = #tpu.pipeline_mode<synchronous>, transform_indices = @transform_2, window_bounds = array<i64: 6, 128>}, {transform_indices = @transform_3, window_bounds = array<i64: 5, 64, 128>}]} {
    %c0 = arith.constant 0 : index
    %c0_0 = arith.constant 0 : index
    %c0_1 = arith.constant 0 : index
    %0 = vector.load %arg1[%c0, %c0_0, %c0_1] : memref<6x64x16xf32, #tpu.memory_space<vmem>>, vector<6x64x16xf32>
    %1 = vector.shape_cast %0 : vector<6x64x16xf32> to vector<384x16xf32>
    %2 = arith.truncf %1 : vector<384x16xf32> to vector<384x16xbf16>
    %c0_2 = arith.constant 0 : index
    %c0_3 = arith.constant 0 : index
    %c0_4 = arith.constant 0 : index
    %3 = vector.load %arg2[%c0_2, %c0_3, %c0_4] : memref<7x128x128xbf16, #tpu.memory_space<vmem>>, vector<1x16x128xbf16>
    %4 = vector.shape_cast %3 : vector<1x16x128xbf16> to vector<16x128xbf16>
    %cst = arith.constant dense<0.000000e+00> : vector<384x128xf32>
    %5 = tpu.matmul %2, %4, %cst {dimension_numbers = #tpu.dot_dimension_numbers<[1], [0], [0], [1], [0, 0, 1, 1], [], []>} : vector<384x16xbf16>, vector<16x128xbf16>, vector<384x128xf32> -> vector<384x128xf32>
    %6 = vector.shape_cast %5 : vector<384x128xf32> to vector<6x64x128xf32>
    %c0_5 = arith.constant 0 : index
    %c0_6 = arith.constant 0 : index
    %7 = vector.load %arg3[%c0_5, %c0_6] : memref<6x128xf32, #tpu.memory_space<vmem>>, vector<1x128xf32>
    %8 = vector.shape_cast %7 : vector<1x128xf32> to vector<1x1x128xf32>
    %c1 = arith.constant 1 : index
    %c0_7 = arith.constant 0 : index
    %9 = vector.load %arg3[%c1, %c0_7] : memref<6x128xf32, #tpu.memory_space<vmem>>, vector<1x128xf32>
    %10 = vector.shape_cast %9 : vector<1x128xf32> to vector<1x1x128xf32>
    %11 = vector.shape_cast %10 : vector<1x1x128xf32> to vector<1x1x128xf32>
    %12 = vector.broadcast %11 : vector<1x1x128xf32> to vector<5x1x128xf32>
    %13 = tpu.concatenate %8, %12 in 0 : vector<1x1x128xf32>, vector<5x1x128xf32> -> vector<6x1x128xf32>
    %14 = vector.broadcast %13 : vector<6x1x128xf32> to vector<6x64x128xf32>
    %15 = arith.addf %6, %14 : vector<6x64x128xf32>
    %cst_8 = arith.constant 0.000000e+00 : f32
    %16 = vector.broadcast %cst_8 : f32 to vector<6x64x128xf32>
    %17 = arith.maximumf %15, %16 : vector<6x64x128xf32>
    %18 = vector.shape_cast %17 : vector<6x64x128xf32> to vector<384x128xf32>
    %19 = arith.truncf %18 : vector<384x128xf32> to vector<384x128xbf16>
    %c1_9 = arith.constant 1 : index
    %c0_10 = arith.constant 0 : index
    %c0_11 = arith.constant 0 : index
    %20 = vector.load %arg2[%c1_9, %c0_10, %c0_11] : memref<7x128x128xbf16, #tpu.memory_space<vmem>>, vector<1x128x32xbf16>
    %21 = vector.shape_cast %20 : vector<1x128x32xbf16> to vector<128x32xbf16>
    %cst_12 = arith.constant dense<0.000000e+00> : vector<384x32xf32>
    %22 = tpu.matmul %19, %21, %cst_12 {dimension_numbers = #tpu.dot_dimension_numbers<[1], [0], [0], [1], [0, 0, 1, 1], [], []>} : vector<384x128xbf16>, vector<128x32xbf16>, vector<384x32xf32> -> vector<384x32xf32>
    %23 = vector.shape_cast %22 : vector<384x32xf32> to vector<6x64x32xf32>
    %c2 = arith.constant 2 : index
    %c0_13 = arith.constant 0 : index
    %24 = vector.load %arg3[%c2, %c0_13] : memref<6x128xf32, #tpu.memory_space<vmem>>, vector<1x32xf32>
    %25 = vector.shape_cast %24 : vector<1x32xf32> to vector<1x1x32xf32>
    %c3 = arith.constant 3 : index
    %c0_14 = arith.constant 0 : index
    %26 = vector.load %arg3[%c3, %c0_14] : memref<6x128xf32, #tpu.memory_space<vmem>>, vector<1x32xf32>
    %27 = vector.shape_cast %26 : vector<1x32xf32> to vector<1x1x32xf32>
    %28 = vector.shape_cast %27 : vector<1x1x32xf32> to vector<1x1x32xf32>
    %29 = vector.broadcast %28 : vector<1x1x32xf32> to vector<5x1x32xf32>
    %30 = tpu.concatenate %25, %29 in 0 : vector<1x1x32xf32>, vector<5x1x32xf32> -> vector<6x1x32xf32>
    %31 = vector.broadcast %30 : vector<6x1x32xf32> to vector<6x64x32xf32>
    %32 = arith.addf %23, %31 : vector<6x64x32xf32>
    %cst_15 = arith.constant 0.000000e+00 : f32
    %33 = vector.broadcast %cst_15 : f32 to vector<6x64x32xf32>
    %34 = arith.maximumf %32, %33 : vector<6x64x32xf32>
    %35 = vector.shape_cast %34 : vector<6x64x32xf32> to vector<384x32xf32>
    %36 = arith.truncf %35 : vector<384x32xf32> to vector<384x32xbf16>
    %c2_16 = arith.constant 2 : index
    %c0_17 = arith.constant 0 : index
    %c0_18 = arith.constant 0 : index
    %37 = vector.load %arg2[%c2_16, %c0_17, %c0_18] : memref<7x128x128xbf16, #tpu.memory_space<vmem>>, vector<1x32x32xbf16>
    %38 = vector.shape_cast %37 : vector<1x32x32xbf16> to vector<32x32xbf16>
    %cst_19 = arith.constant dense<0.000000e+00> : vector<384x32xf32>
    %39 = tpu.matmul %36, %38, %cst_19 {dimension_numbers = #tpu.dot_dimension_numbers<[1], [0], [0], [1], [0, 0, 1, 1], [], []>} : vector<384x32xbf16>, vector<32x32xbf16>, vector<384x32xf32> -> vector<384x32xf32>
    %40 = vector.shape_cast %39 : vector<384x32xf32> to vector<6x64x32xf32>
    %41 = vector.extract_strided_slice %34 {offsets = [0, 0, 0], sizes = [1, 64, 32], strides = [1, 1, 1]} : vector<6x64x32xf32> to vector<1x64x32xf32>
    %42 = vector.shape_cast %41 : vector<1x64x32xf32> to vector<64x32xf32>
    %43 = vector.shape_cast %42 : vector<64x32xf32> to vector<1x64x32xf32>
    %44 = vector.broadcast %43 : vector<1x64x32xf32> to vector<6x64x32xf32>
    %45 = arith.mulf %40, %44 : vector<6x64x32xf32>
    %cst_20 = arith.constant dense<0.000000e+00> : vector<6x64xf32>
    %46 = vector.multi_reduction <add>, %45, %cst_20 [2] : vector<6x64x32xf32> to vector<6x64xf32>
    %47 = vector.shape_cast %46 : vector<6x64xf32> to vector<6x64x1xf32>
    %48 = vector.extract_strided_slice %34 {offsets = [1, 0, 0], sizes = [1, 64, 32], strides = [1, 1, 1]} : vector<6x64x32xf32> to vector<1x64x32xf32>
    %49 = vector.shape_cast %48 : vector<1x64x32xf32> to vector<64x32xf32>
    %50 = vector.shape_cast %49 : vector<64x32xf32> to vector<1x64x32xf32>
    %51 = vector.broadcast %50 : vector<1x64x32xf32> to vector<6x64x32xf32>
    %52 = arith.mulf %40, %51 : vector<6x64x32xf32>
    %cst_21 = arith.constant dense<0.000000e+00> : vector<6x64xf32>
    %53 = vector.multi_reduction <add>, %52, %cst_21 [2] : vector<6x64x32xf32> to vector<6x64xf32>
    %54 = vector.shape_cast %53 : vector<6x64xf32> to vector<6x64x1xf32>
    %55 = vector.extract_strided_slice %34 {offsets = [2, 0, 0], sizes = [1, 64, 32], strides = [1, 1, 1]} : vector<6x64x32xf32> to vector<1x64x32xf32>
    %56 = vector.shape_cast %55 : vector<1x64x32xf32> to vector<64x32xf32>
    %57 = vector.shape_cast %56 : vector<64x32xf32> to vector<1x64x32xf32>
    %58 = vector.broadcast %57 : vector<1x64x32xf32> to vector<6x64x32xf32>
    %59 = arith.mulf %40, %58 : vector<6x64x32xf32>
    %cst_22 = arith.constant dense<0.000000e+00> : vector<6x64xf32>
    %60 = vector.multi_reduction <add>, %59, %cst_22 [2] : vector<6x64x32xf32> to vector<6x64xf32>
    %61 = vector.shape_cast %60 : vector<6x64xf32> to vector<6x64x1xf32>
    %62 = vector.extract_strided_slice %34 {offsets = [3, 0, 0], sizes = [1, 64, 32], strides = [1, 1, 1]} : vector<6x64x32xf32> to vector<1x64x32xf32>
    %63 = vector.shape_cast %62 : vector<1x64x32xf32> to vector<64x32xf32>
    %64 = vector.shape_cast %63 : vector<64x32xf32> to vector<1x64x32xf32>
    %65 = vector.broadcast %64 : vector<1x64x32xf32> to vector<6x64x32xf32>
    %66 = arith.mulf %40, %65 : vector<6x64x32xf32>
    %cst_23 = arith.constant dense<0.000000e+00> : vector<6x64xf32>
    %67 = vector.multi_reduction <add>, %66, %cst_23 [2] : vector<6x64x32xf32> to vector<6x64xf32>
    %68 = vector.shape_cast %67 : vector<6x64xf32> to vector<6x64x1xf32>
    %69 = vector.extract_strided_slice %34 {offsets = [4, 0, 0], sizes = [1, 64, 32], strides = [1, 1, 1]} : vector<6x64x32xf32> to vector<1x64x32xf32>
    %70 = vector.shape_cast %69 : vector<1x64x32xf32> to vector<64x32xf32>
    %71 = vector.shape_cast %70 : vector<64x32xf32> to vector<1x64x32xf32>
    %72 = vector.broadcast %71 : vector<1x64x32xf32> to vector<6x64x32xf32>
    %73 = arith.mulf %40, %72 : vector<6x64x32xf32>
    %cst_24 = arith.constant dense<0.000000e+00> : vector<6x64xf32>
    %74 = vector.multi_reduction <add>, %73, %cst_24 [2] : vector<6x64x32xf32> to vector<6x64xf32>
    %75 = vector.shape_cast %74 : vector<6x64xf32> to vector<6x64x1xf32>
    %76 = vector.extract_strided_slice %34 {offsets = [5, 0, 0], sizes = [1, 64, 32], strides = [1, 1, 1]} : vector<6x64x32xf32> to vector<1x64x32xf32>
    %77 = vector.shape_cast %76 : vector<1x64x32xf32> to vector<64x32xf32>
    %78 = vector.shape_cast %77 : vector<64x32xf32> to vector<1x64x32xf32>
    %79 = vector.broadcast %78 : vector<1x64x32xf32> to vector<6x64x32xf32>
    %80 = arith.mulf %40, %79 : vector<6x64x32xf32>
    %cst_25 = arith.constant dense<0.000000e+00> : vector<6x64xf32>
    %81 = vector.multi_reduction <add>, %80, %cst_25 [2] : vector<6x64x32xf32> to vector<6x64xf32>
    %82 = vector.shape_cast %81 : vector<6x64xf32> to vector<6x64x1xf32>
    %83 = tpu.concatenate %47, %54, %61, %68, %75, %82 in 2 : vector<6x64x1xf32>, vector<6x64x1xf32>, vector<6x64x1xf32>, vector<6x64x1xf32>, vector<6x64x1xf32>, vector<6x64x1xf32> -> vector<6x64x6xf32>
    %cst_26 = arith.constant dense<0xFF800000> : vector<6x64xf32>
    %84 = vector.multi_reduction <maximumf>, %83, %cst_26 [2] : vector<6x64x6xf32> to vector<6x64xf32>
    %85 = vector.shape_cast %84 : vector<6x64xf32> to vector<6x64x1xf32>
    %86 = vector.broadcast %85 : vector<6x64x1xf32> to vector<6x64x6xf32>
    %87 = arith.subf %83, %86 : vector<6x64x6xf32>
    %88 = math.exp %87 : vector<6x64x6xf32>
    %cst_27 = arith.constant dense<0.000000e+00> : vector<6x64xf32>
    %89 = vector.multi_reduction <add>, %88, %cst_27 [2] : vector<6x64x6xf32> to vector<6x64xf32>
    %90 = vector.shape_cast %89 : vector<6x64xf32> to vector<6x64x1xf32>
    %91 = tpu.reciprocal %90 : vector<6x64x1xf32> -> vector<6x64x1xf32>
    %92 = vector.broadcast %91 : vector<6x64x1xf32> to vector<6x64x6xf32>
    %93 = arith.mulf %88, %92 : vector<6x64x6xf32>
    %94 = vector.extract_strided_slice %93 {offsets = [0, 0, 0], sizes = [6, 64, 1], strides = [1, 1, 1]} : vector<6x64x6xf32> to vector<6x64x1xf32>
    %95 = vector.shape_cast %94 : vector<6x64x1xf32> to vector<6x64x1xf32>
    %96 = vector.broadcast %95 : vector<6x64x1xf32> to vector<6x64x32xf32>
    %97 = vector.extract_strided_slice %93 {offsets = [0, 0, 1], sizes = [6, 64, 1], strides = [1, 1, 1]} : vector<6x64x6xf32> to vector<6x64x1xf32>
    %98 = vector.shape_cast %97 : vector<6x64x1xf32> to vector<6x64x1xf32>
    %99 = vector.broadcast %98 : vector<6x64x1xf32> to vector<6x64x32xf32>
    %100 = vector.extract_strided_slice %93 {offsets = [0, 0, 2], sizes = [6, 64, 1], strides = [1, 1, 1]} : vector<6x64x6xf32> to vector<6x64x1xf32>
    %101 = vector.shape_cast %100 : vector<6x64x1xf32> to vector<6x64x1xf32>
    %102 = vector.broadcast %101 : vector<6x64x1xf32> to vector<6x64x32xf32>
    %103 = vector.extract_strided_slice %93 {offsets = [0, 0, 3], sizes = [6, 64, 1], strides = [1, 1, 1]} : vector<6x64x6xf32> to vector<6x64x1xf32>
    %104 = vector.shape_cast %103 : vector<6x64x1xf32> to vector<6x64x1xf32>
    %105 = vector.broadcast %104 : vector<6x64x1xf32> to vector<6x64x32xf32>
    %106 = vector.extract_strided_slice %93 {offsets = [0, 0, 4], sizes = [6, 64, 1], strides = [1, 1, 1]} : vector<6x64x6xf32> to vector<6x64x1xf32>
    %107 = vector.shape_cast %106 : vector<6x64x1xf32> to vector<6x64x1xf32>
    %108 = vector.broadcast %107 : vector<6x64x1xf32> to vector<6x64x32xf32>
    %109 = vector.extract_strided_slice %93 {offsets = [0, 0, 5], sizes = [6, 64, 1], strides = [1, 1, 1]} : vector<6x64x6xf32> to vector<6x64x1xf32>
    %110 = vector.shape_cast %109 : vector<6x64x1xf32> to vector<6x64x1xf32>
    %111 = vector.broadcast %110 : vector<6x64x1xf32> to vector<6x64x32xf32>
    %112 = vector.extract_strided_slice %34 {offsets = [0, 0, 0], sizes = [1, 64, 32], strides = [1, 1, 1]} : vector<6x64x32xf32> to vector<1x64x32xf32>
    %113 = vector.shape_cast %112 : vector<1x64x32xf32> to vector<64x32xf32>
    %114 = vector.shape_cast %113 : vector<64x32xf32> to vector<1x64x32xf32>
    %115 = vector.broadcast %114 : vector<1x64x32xf32> to vector<6x64x32xf32>
    %116 = arith.mulf %96, %115 : vector<6x64x32xf32>
    %117 = vector.extract_strided_slice %34 {offsets = [1, 0, 0], sizes = [1, 64, 32], strides = [1, 1, 1]} : vector<6x64x32xf32> to vector<1x64x32xf32>
    %118 = vector.shape_cast %117 : vector<1x64x32xf32> to vector<64x32xf32>
    %119 = vector.shape_cast %118 : vector<64x32xf32> to vector<1x64x32xf32>
    %120 = vector.broadcast %119 : vector<1x64x32xf32> to vector<6x64x32xf32>
    %121 = arith.mulf %99, %120 : vector<6x64x32xf32>
    %122 = arith.addf %116, %121 : vector<6x64x32xf32>
    %123 = vector.extract_strided_slice %34 {offsets = [2, 0, 0], sizes = [1, 64, 32], strides = [1, 1, 1]} : vector<6x64x32xf32> to vector<1x64x32xf32>
    %124 = vector.shape_cast %123 : vector<1x64x32xf32> to vector<64x32xf32>
    %125 = vector.shape_cast %124 : vector<64x32xf32> to vector<1x64x32xf32>
    %126 = vector.broadcast %125 : vector<1x64x32xf32> to vector<6x64x32xf32>
    %127 = arith.mulf %102, %126 : vector<6x64x32xf32>
    %128 = arith.addf %122, %127 : vector<6x64x32xf32>
    %129 = vector.extract_strided_slice %34 {offsets = [3, 0, 0], sizes = [1, 64, 32], strides = [1, 1, 1]} : vector<6x64x32xf32> to vector<1x64x32xf32>
    %130 = vector.shape_cast %129 : vector<1x64x32xf32> to vector<64x32xf32>
    %131 = vector.shape_cast %130 : vector<64x32xf32> to vector<1x64x32xf32>
    %132 = vector.broadcast %131 : vector<1x64x32xf32> to vector<6x64x32xf32>
    %133 = arith.mulf %105, %132 : vector<6x64x32xf32>
    %134 = arith.addf %128, %133 : vector<6x64x32xf32>
    %135 = vector.extract_strided_slice %34 {offsets = [4, 0, 0], sizes = [1, 64, 32], strides = [1, 1, 1]} : vector<6x64x32xf32> to vector<1x64x32xf32>
    %136 = vector.shape_cast %135 : vector<1x64x32xf32> to vector<64x32xf32>
    %137 = vector.shape_cast %136 : vector<64x32xf32> to vector<1x64x32xf32>
    %138 = vector.broadcast %137 : vector<1x64x32xf32> to vector<6x64x32xf32>
    %139 = arith.mulf %108, %138 : vector<6x64x32xf32>
    %140 = arith.addf %134, %139 : vector<6x64x32xf32>
    %141 = vector.extract_strided_slice %34 {offsets = [5, 0, 0], sizes = [1, 64, 32], strides = [1, 1, 1]} : vector<6x64x32xf32> to vector<1x64x32xf32>
    %142 = vector.shape_cast %141 : vector<1x64x32xf32> to vector<64x32xf32>
    %143 = vector.shape_cast %142 : vector<64x32xf32> to vector<1x64x32xf32>
    %144 = vector.broadcast %143 : vector<1x64x32xf32> to vector<6x64x32xf32>
    %145 = arith.mulf %111, %144 : vector<6x64x32xf32>
    %146 = arith.addf %140, %145 : vector<6x64x32xf32>
    %147 = vector.shape_cast %146 : vector<6x64x32xf32> to vector<384x32xf32>
    %148 = arith.truncf %147 : vector<384x32xf32> to vector<384x32xbf16>
    %c3_28 = arith.constant 3 : index
    %c0_29 = arith.constant 0 : index
    %c0_30 = arith.constant 0 : index
    %149 = vector.load %arg2[%c3_28, %c0_29, %c0_30] : memref<7x128x128xbf16, #tpu.memory_space<vmem>>, vector<1x32x32xbf16>
    %150 = vector.shape_cast %149 : vector<1x32x32xbf16> to vector<32x32xbf16>
    %cst_31 = arith.constant dense<0.000000e+00> : vector<384x32xf32>
    %151 = tpu.matmul %148, %150, %cst_31 {dimension_numbers = #tpu.dot_dimension_numbers<[1], [0], [0], [1], [0, 0, 1, 1], [], []>} : vector<384x32xbf16>, vector<32x32xbf16>, vector<384x32xf32> -> vector<384x32xf32>
    %cst_32 = arith.constant 0.000000e+00 : f32
    %152 = vector.broadcast %cst_32 : f32 to vector<384x32xf32>
    %153 = arith.maximumf %151, %152 : vector<384x32xf32>
    %154 = vector.shape_cast %153 : vector<384x32xf32> to vector<6x64x32xf32>
    %155 = arith.addf %154, %34 : vector<6x64x32xf32>
    %156 = vector.extract_strided_slice %155 {offsets = [0, 0, 0], sizes = [1, 64, 32], strides = [1, 1, 1]} : vector<6x64x32xf32> to vector<1x64x32xf32>
    %157 = vector.shape_cast %156 : vector<1x64x32xf32> to vector<64x32xf32>
    %158 = vector.shape_cast %157 : vector<64x32xf32> to vector<1x64x32xf32>
    %159 = vector.broadcast %158 : vector<1x64x32xf32> to vector<6x64x32xf32>
    %160 = arith.mulf %96, %159 : vector<6x64x32xf32>
    %161 = vector.extract_strided_slice %155 {offsets = [1, 0, 0], sizes = [1, 64, 32], strides = [1, 1, 1]} : vector<6x64x32xf32> to vector<1x64x32xf32>
    %162 = vector.shape_cast %161 : vector<1x64x32xf32> to vector<64x32xf32>
    %163 = vector.shape_cast %162 : vector<64x32xf32> to vector<1x64x32xf32>
    %164 = vector.broadcast %163 : vector<1x64x32xf32> to vector<6x64x32xf32>
    %165 = arith.mulf %99, %164 : vector<6x64x32xf32>
    %166 = arith.addf %160, %165 : vector<6x64x32xf32>
    %167 = vector.extract_strided_slice %155 {offsets = [2, 0, 0], sizes = [1, 64, 32], strides = [1, 1, 1]} : vector<6x64x32xf32> to vector<1x64x32xf32>
    %168 = vector.shape_cast %167 : vector<1x64x32xf32> to vector<64x32xf32>
    %169 = vector.shape_cast %168 : vector<64x32xf32> to vector<1x64x32xf32>
    %170 = vector.broadcast %169 : vector<1x64x32xf32> to vector<6x64x32xf32>
    %171 = arith.mulf %102, %170 : vector<6x64x32xf32>
    %172 = arith.addf %166, %171 : vector<6x64x32xf32>
    %173 = vector.extract_strided_slice %155 {offsets = [3, 0, 0], sizes = [1, 64, 32], strides = [1, 1, 1]} : vector<6x64x32xf32> to vector<1x64x32xf32>
    %174 = vector.shape_cast %173 : vector<1x64x32xf32> to vector<64x32xf32>
    %175 = vector.shape_cast %174 : vector<64x32xf32> to vector<1x64x32xf32>
    %176 = vector.broadcast %175 : vector<1x64x32xf32> to vector<6x64x32xf32>
    %177 = arith.mulf %105, %176 : vector<6x64x32xf32>
    %178 = arith.addf %172, %177 : vector<6x64x32xf32>
    %179 = vector.extract_strided_slice %155 {offsets = [4, 0, 0], sizes = [1, 64, 32], strides = [1, 1, 1]} : vector<6x64x32xf32> to vector<1x64x32xf32>
    %180 = vector.shape_cast %179 : vector<1x64x32xf32> to vector<64x32xf32>
    %181 = vector.shape_cast %180 : vector<64x32xf32> to vector<1x64x32xf32>
    %182 = vector.broadcast %181 : vector<1x64x32xf32> to vector<6x64x32xf32>
    %183 = arith.mulf %108, %182 : vector<6x64x32xf32>
    %184 = arith.addf %178, %183 : vector<6x64x32xf32>
    %185 = vector.extract_strided_slice %155 {offsets = [5, 0, 0], sizes = [1, 64, 32], strides = [1, 1, 1]} : vector<6x64x32xf32> to vector<1x64x32xf32>
    %186 = vector.shape_cast %185 : vector<1x64x32xf32> to vector<64x32xf32>
    %187 = vector.shape_cast %186 : vector<64x32xf32> to vector<1x64x32xf32>
    %188 = vector.broadcast %187 : vector<1x64x32xf32> to vector<6x64x32xf32>
    %189 = arith.mulf %111, %188 : vector<6x64x32xf32>
    %190 = arith.addf %184, %189 : vector<6x64x32xf32>
    %191 = vector.shape_cast %190 : vector<6x64x32xf32> to vector<384x32xf32>
    %192 = arith.truncf %191 : vector<384x32xf32> to vector<384x32xbf16>
    %c4 = arith.constant 4 : index
    %c0_33 = arith.constant 0 : index
    %c0_34 = arith.constant 0 : index
    %193 = vector.load %arg2[%c4, %c0_33, %c0_34] : memref<7x128x128xbf16, #tpu.memory_space<vmem>>, vector<1x32x32xbf16>
    %194 = vector.shape_cast %193 : vector<1x32x32xbf16> to vector<32x32xbf16>
    %cst_35 = arith.constant dense<0.000000e+00> : vector<384x32xf32>
    %195 = tpu.matmul %192, %194, %cst_35 {dimension_numbers = #tpu.dot_dimension_numbers<[1], [0], [0], [1], [0, 0, 1, 1], [], []>} : vector<384x32xbf16>, vector<32x32xbf16>, vector<384x32xf32> -> vector<384x32xf32>
    %cst_36 = arith.constant 0.000000e+00 : f32
    %196 = vector.broadcast %cst_36 : f32 to vector<384x32xf32>
    %197 = arith.maximumf %195, %196 : vector<384x32xf32>
    %198 = vector.shape_cast %197 : vector<384x32xf32> to vector<6x64x32xf32>
    %199 = arith.addf %198, %155 : vector<6x64x32xf32>
    %200 = vector.extract_strided_slice %199 {offsets = [1, 0, 0], sizes = [5, 64, 32], strides = [1, 1, 1]} : vector<6x64x32xf32> to vector<5x64x32xf32>
    %201 = vector.shape_cast %200 : vector<5x64x32xf32> to vector<320x32xf32>
    %202 = arith.truncf %201 : vector<320x32xf32> to vector<320x32xbf16>
    %c5 = arith.constant 5 : index
    %c0_37 = arith.constant 0 : index
    %c0_38 = arith.constant 0 : index
    %203 = vector.load %arg2[%c5, %c0_37, %c0_38] : memref<7x128x128xbf16, #tpu.memory_space<vmem>>, vector<1x32x64xbf16>
    %204 = vector.shape_cast %203 : vector<1x32x64xbf16> to vector<32x64xbf16>
    %cst_39 = arith.constant dense<0.000000e+00> : vector<320x64xf32>
    %205 = tpu.matmul %202, %204, %cst_39 {dimension_numbers = #tpu.dot_dimension_numbers<[1], [0], [0], [1], [0, 0, 1, 1], [], []>} : vector<320x32xbf16>, vector<32x64xbf16>, vector<320x64xf32> -> vector<320x64xf32>
    %c4_40 = arith.constant 4 : index
    %c0_41 = arith.constant 0 : index
    %206 = vector.load %arg3[%c4_40, %c0_41] : memref<6x128xf32, #tpu.memory_space<vmem>>, vector<1x64xf32>
    %207 = vector.broadcast %206 : vector<1x64xf32> to vector<320x64xf32>
    %208 = arith.addf %205, %207 : vector<320x64xf32>
    %cst_42 = arith.constant 0.000000e+00 : f32
    %209 = vector.broadcast %cst_42 : f32 to vector<320x64xf32>
    %210 = arith.maximumf %208, %209 : vector<320x64xf32>
    %211 = arith.truncf %210 : vector<320x64xf32> to vector<320x64xbf16>
    %c6 = arith.constant 6 : index
    %c0_43 = arith.constant 0 : index
    %c0_44 = arith.constant 0 : index
    %212 = vector.load %arg2[%c6, %c0_43, %c0_44] : memref<7x128x128xbf16, #tpu.memory_space<vmem>>, vector<1x64x128xbf16>
    %213 = vector.shape_cast %212 : vector<1x64x128xbf16> to vector<64x128xbf16>
    %cst_45 = arith.constant dense<0.000000e+00> : vector<320x128xf32>
    %214 = tpu.matmul %211, %213, %cst_45 {dimension_numbers = #tpu.dot_dimension_numbers<[1], [0], [0], [1], [0, 0, 1, 1], [], []>} : vector<320x64xbf16>, vector<64x128xbf16>, vector<320x128xf32> -> vector<320x128xf32>
    %c5_46 = arith.constant 5 : index
    %c0_47 = arith.constant 0 : index
    %215 = vector.load %arg3[%c5_46, %c0_47] : memref<6x128xf32, #tpu.memory_space<vmem>>, vector<1x128xf32>
    %216 = vector.broadcast %215 : vector<1x128xf32> to vector<320x128xf32>
    %217 = arith.addf %214, %216 : vector<320x128xf32>
    %218 = vector.shape_cast %217 : vector<320x128xf32> to vector<5x64x128xf32>
    %c0_48 = arith.constant 0 : index
    %c0_49 = arith.constant 0 : index
    %c0_50 = arith.constant 0 : index
    %219 = vector.load %arg4[%c0_48, %c0_49, %c0_50] : memref<5x64x128xf32, #tpu.memory_space<vmem>>, vector<5x64x128xf32>
    tpu.vector_store %arg4[%c0_48, %c0_49, %c0_50], %218 {strides = array<i32>} : memref<5x64x128xf32, #tpu.memory_space<vmem>>, vector<5x64x128xf32>,
    return
  }
  func.func @transform_0(%arg0: i32) -> (i32, i32, i32) {
    %c0_i32 = arith.constant 0 : i32
    %c0_i32_0 = arith.constant 0 : i32
    %c0_i32_1 = arith.constant 0 : i32
    return %c0_i32, %arg0, %c0_i32_0 : i32, i32, i32
  }
  func.func @transform_1(%arg0: i32) -> (i32, i32, i32) {
    %c0_i32 = arith.constant 0 : i32
    %c0_i32_0 = arith.constant 0 : i32
    %c0_i32_1 = arith.constant 0 : i32
    %c0_i32_2 = arith.constant 0 : i32
    return %c0_i32, %c0_i32_0, %c0_i32_1 : i32, i32, i32
  }
  func.func @transform_2(%arg0: i32) -> (i32, i32) {
    %c0_i32 = arith.constant 0 : i32
    %c0_i32_0 = arith.constant 0 : i32
    %c0_i32_1 = arith.constant 0 : i32
    return %c0_i32, %c0_i32_0 : i32, i32
  }
  func.func @transform_3(%arg0: i32) -> (i32, i32, i32) {
    %c0_i32 = arith.constant 0 : i32
    %c0_i32_0 = arith.constant 0 : i32
    %c0_i32_1 = arith.constant 0 : i32
    return %c0_i32, %arg0, %c0_i32_0 : i32, i32, i32
  }
}

</mosaic_0001>

<bundles_post_ra>
// kernel: predict_next_human_states.1
= control target key start
LH: loop header
LB: loop body
LE: loop exit
PB: predicated region body
PF: predicated region fallthrough
CT: control target
= control target key end

     0   :  { %vm95_vm0 = vcmask 130048   ;;  %vm756_vm1 = vcmask 261120   ;;  %vm2110_vm2 = vcmask 7168   ;;  %vm2159_vm3 = vcmask 15360   ;;  %s15067_s1 = inlined_call_operand.vmem [shape: bf16[7,128,128], index: 1, kind: input, shape index: {}]   ;;  %s15068_s0 = inlined_call_operand.vmem [shape: f32[6,64,16], index: 0, kind: input, shape index: {}]   ;;  %s15069_s2 = inlined_call_operand.vmem [shape: f32[6,128], index: 2, kind: input, shape index: {}]   ;;  %s15070_s3 = inlined_call_operand.vmem [shape: f32[5,64,128], index: 3, kind: output, shape index: {}]  }
   0x1   :  { %v7193_v0 = vld [vmem:[%s15067_s1] sm:$0xff]  ;;  %v16_v2 = vld [vmem:[%s15068_s0 + $0x8] sm:$0xff]  ;;  %v49_v4 = vld [vmem:[%s15068_s0 + $0x110] sm:$0xff]  ;;  %vm2208_vm4 = vcmask 23552   ;;  %vm2257_vm5 = vcmask 31744   ;;  %vm2306_vm6 = vcmask 39936  }
   0x2   :  { %v15_v1 = vld [vmem:[%s15068_s0] sm:$0xff]  ;;  %175 = vmatpush.bf16.msra.mxu0 %v7193_v0  ;;  %7214 = vmatpush.bf16.msra.mxu1 %v7193_v0  ;;  %v50_v5 = vld [vmem:[%s15068_s0 + $0x118] sm:$0xff]  ;;  %v7200_v8 = vld [vmem:[%s15067_s1 + $0x70] sm:$0xff]  ;;  %vm2355_vm7 = vcmask 48128  }
   0x3   :  { %v63_v3 = vpack.c.bf16 %v16_v2, %v15_v1  ;;  %v7201_v6 = vld [vmem:[%s15067_s1 + $0x78] sm:$0xff]  ;;  %v80_v7 = vpack.c.bf16 %v50_v5, %v49_v4  ;;  %v17_v9 = vld [vmem:[%s15068_s0 + $0x10] sm:$0xff]  ;;  %v51_v11 = vld [vmem:[%s15068_s0 + $0x120] sm:$0xff] }
   0x4   :  { %v18_v10 = vld [vmem:[%s15068_s0 + $0x18] sm:$0xff]  ;;  %v52_v12 = vld [vmem:[%s15068_s0 + $0x128] sm:$0xff]  ;;  %v19_v16 = vld [vmem:[%s15068_s0 + $0x20] sm:$0xff] }
   0x5   :  { %6937 = vmatmul.msk.bf16.vlgmr.msra.gmra.mxu0 %vm95_vm0, %v63_v3  ;;  %6954 = vmatmul.msk.bf16.vlgmr.msra.gmra.mxu1 %vm95_vm0, %v80_v7  ;;  %v64_v13 = vpack.c.bf16 %v18_v10, %v17_v9  ;;  %v81_v14 = vpack.c.bf16 %v52_v12, %v51_v11  ;;  %v7199_v15 = vld [vmem:[%s15067_s1 + $0x68] sm:$0xff]  ;;  %v53_v18 = vld [vmem:[%s15068_s0 + $0x130] sm:$0xff]  ;;  %v54_v19 = vld [vmem:[%s15068_s0 + $0x138] sm:$0xff] }
   0x6   :  { %486 = vmatpush.bf16.msrb.mxu1 %v7201_v6  ;;  %v20_v17 = vld [vmem:[%s15068_s0 + $0x28] sm:$0xff]  ;;  %v82_v21 = vpack.c.bf16 %v54_v19, %v53_v18  ;;  %v7198_v22 = vld [vmem:[%s15067_s1 + $0x60] sm:$0xff]  ;;  %v21_v23 = vld [vmem:[%s15068_s0 + $0x30] sm:$0xff] }
   0x7   :  { %v65_v20 = vpack.c.bf16 %v20_v17, %v19_v16  ;;  %v22_v24 = vld [vmem:[%s15068_s0 + $0x38] sm:$0xff]  ;;  %v55_v25 = vld [vmem:[%s15068_s0 + $0x140] sm:$0xff]  ;;  %v56_v26 = vld [vmem:[%s15068_s0 + $0x148] sm:$0xff] }
   0x8   :  { %v66_v27 = vpack.c.bf16 %v22_v24, %v21_v23  ;;  %v83_v28 = vpack.c.bf16 %v56_v26, %v55_v25  ;;  %v7197_v29 = vld [vmem:[%s15067_s1 + $0x58] sm:$0xff]  ;;  %v23_v30 = vld [vmem:[%s15068_s0 + $0x40] sm:$0xff]  ;;  %v24_v31 = vld [vmem:[%s15068_s0 + $0x48] sm:$0xff] }
   0x9   :  { %v57_v32 = vld [vmem:[%s15068_s0 + $0x150] sm:$0xff]  ;;  %v58_v33 = vld [vmem:[%s15068_s0 + $0x158] sm:$0xff]  ;;  %v67_v34 = vpack.c.bf16 %v24_v31, %v23_v30  ;;  %v59_v39 = vld [vmem:[%s15068_s0 + $0x160] sm:$0xff] }
   0xa   :  { %487 = vmatpush.bf16.msrb.mxu1 %v7200_v8  ;;  %v84_v35 = vpack.c.bf16 %v58_v33, %v57_v32  ;;  %v7196_v36 = vld [vmem:[%s15067_s1 + $0x50] sm:$0xff]  ;;  %v26_v38 = vld [vmem:[%s15068_s0 + $0x58] sm:$0xff]  ;;  %v60_v40 = vld [vmem:[%s15068_s0 + $0x168] sm:$0xff] }
   0xb   :  { %v25_v37 = vld [vmem:[%s15068_s0 + $0x50] sm:$0xff]  ;;  %v85_v42 = vpack.c.bf16 %v60_v40, %v59_v39  ;;  %v7195_v43 = vld [vmem:[%s15067_s1 + $0x48] sm:$0xff]  ;;  %v27_v44 = vld [vmem:[%s15068_s0 + $0x60] sm:$0xff] }
   0xc   :  { %v68_v41 = vpack.c.bf16 %v26_v38, %v25_v37  ;;  %v28_v45 = vld [vmem:[%s15068_s0 + $0x68] sm:$0xff]  ;;  %v61_v46 = vld [vmem:[%s15068_s0 + $0x170] sm:$0xff]  ;;  %v62_v47 = vld [vmem:[%s15068_s0 + $0x178] sm:$0xff] }
   0xd   :  { %v69_v48 = vpack.c.bf16 %v28_v45, %v27_v44  ;;  %v86_v49 = vpack.c.bf16 %v62_v47, %v61_v46  ;;  %v7194_v50 = vld [vmem:[%s15067_s1 + $0x40] sm:$0xff]  ;;  %v29_v51 = vld [vmem:[%s15068_s0 + $0x70] sm:$0xff]  ;;  %v30_v52 = vld [vmem:[%s15068_s0 + $0x78] sm:$0xff] }
   0xe   :  { %488 = vmatpush.bf16.msrb.mxu1 %v7199_v15  ;;  %v70_v53 = vpack.c.bf16 %v30_v52, %v29_v51  ;;  %v31_v54 = vld [vmem:[%s15068_s0 + $0x80] sm:$0xff]  ;;  %v32_v55 = vld [vmem:[%s15068_s0 + $0x88] sm:$0xff]  ;;  %v33_v1 = vld [vmem:[%s15068_s0 + $0x90] sm:$0xff] }
   0xf   :  { %v71_v56 = vpack.c.bf16 %v32_v55, %v31_v54  ;;  %v7392_v59 = vld [vmem:[%s15069_s2] ss:$0 sm:$0xff]  ;;  %v34_v2 = vld [vmem:[%s15068_s0 + $0x98] sm:$0xff]  ;;  %v37_v25 = vld [vmem:[%s15068_s0 + $0xb0] sm:$0xff] }
  0x10   :  { %v72_v5 = vpack.c.bf16 %v34_v2, %v33_v1  ;;  %v38_v26 = vld [vmem:[%s15068_s0 + $0xb8] sm:$0xff]  ;;  %v40_v37 = vld [vmem:[%s15068_s0 + $0xc8] sm:$0xff] }
  0x12   :  { %489 = vmatpush.bf16.msrb.mxu1 %v7198_v22 }
  0x15   :  { %6938 = vmatmul.msk.bf16.gmra.mxu0 %vm95_vm0, %v64_v13  ;;  %6955 = vmatmul.msk.bf16.gmra.mxu1 %vm95_vm0, %v81_v14  ;;  %v35_v13 = vld [vmem:[%s15068_s0 + $0xa0] sm:$0xff]  ;;  %v36_v14 = vld [vmem:[%s15068_s0 + $0xa8] sm:$0xff] }
  0x16   :  { %490 = vmatpush.bf16.msrb.mxu1 %v7197_v29  ;;  %v73_v16 = vpack.c.bf16 %v36_v14, %v35_v13 }
  0x1a   :  { %491 = vmatpush.bf16.msrb.mxu1 %v7196_v36  ;;  %v39_v36 = vld [vmem:[%s15068_s0 + $0xc0] sm:$0xff] }
  0x1b   :  { %v75_v40 = vpack.c.bf16 %v40_v37, %v39_v36 }
  0x1e   :  { %492 = vmatpush.bf16.msrb.mxu1 %v7195_v43 }
  0x22   :  { %493 = vmatpush.bf16.msrb.mxu1 %v7194_v50  ;;  %v42_v50 = vld [vmem:[%s15068_s0 + $0xd8] sm:$0xff] }
  0x25   :  { %6939 = vmatmul.msk.bf16.gmra.mxu0 %vm95_vm0, %v65_v20  ;;  %6956 = vmatmul.msk.bf16.gmra.mxu1 %vm95_vm0, %v82_v21 }
  0x35   :  { %6940 = vmatmul.msk.bf16.gmra.mxu0 %vm95_vm0, %v66_v27  ;;  %6957 = vmatmul.msk.bf16.gmra.mxu1 %vm95_vm0, %v83_v28  ;;  %v74_v28 = vpack.c.bf16 %v38_v26, %v37_v25  ;;  %v47_v25 = vld [vmem:[%s15068_s0 + $0x100] sm:$0xff]  ;;  %v48_v26 = vld [vmem:[%s15068_s0 + $0x108] sm:$0xff] }
  0x45   :  { %6941 = vmatmul.msk.bf16.gmra.mxu0 %vm95_vm0, %v67_v34  ;;  %6958 = vmatmul.msk.bf16.gmra.mxu1 %vm95_vm0, %v84_v35 }
  0x55   :  { %6942 = vmatmul.msk.bf16.gmra.mxu0 %vm95_vm0, %v68_v41  ;;  %6959 = vmatmul.msk.bf16.gmra.mxu1 %vm95_vm0, %v85_v42  ;;  %v7803_v42 = vld [vmem:[%s15069_s2 + $0x1] ss:$0 sm:$0xff] }
  0x65   :  { %6943 = vmatmul.msk.bf16.gmra.mxu0 %vm95_vm0, %v69_v48  ;;  %6960 = vmatmul.msk.bf16.gmra.mxu1 %vm95_vm0, %v86_v49  ;;  %v41_v49 = vld [vmem:[%s15068_s0 + $0xd0] sm:$0xff] }
  0x66   :  { %v76_v52 = vpack.c.bf16 %v42_v50, %v41_v49 }
  0x75   :  { %6944 = vmatmul.msk.bf16.gmra.mxu0 %vm95_vm0, %v70_v53 }
  0x82   :  { %v177_v57 = vpop.f32.mrf.mxu0  ;;  %v7754_v58 = vpop.f32.mrf.mxu1 }
  0x83   :  { %v301_v60 = vadd.f32 %v7392_v59, %v177_v57 }
  0x85   :  { %6945 = vmatmul.msk.bf16.gmra.mxu0 %vm95_vm0, %v71_v56  ;;  %v349_v63 = vmax.f32 %v301_v60, 0.0 }
  0x8a   :  { %v179_v61 = vpop.f32.mrf.mxu0  ;;  %v7766_v3 = vpop.f32.mrf.mxu1 }
  0x8b   :  { %v302_v62 = vadd.f32 %v7392_v59, %v179_v61 }
  0x8d   :  { %v350_v0 = vmax.f32 %v302_v62, 0.0  ;;  %v43_v62 = vld [vmem:[%s15068_s0 + $0xe0] sm:$0xff] }
  0x8f   :  { %v397_v4 = vpack.c.bf16 %v350_v0, %v349_v63  ;;  %v44_v63 = vld [vmem:[%s15068_s0 + $0xe8] sm:$0xff] }
  0x90   :  { %v77_v1 = vpack.c.bf16 %v44_v63, %v43_v62 }
  0x91   :  { %494 = vmatmul.bf16.vlgmr.msrb.gmra.mxu1 %v397_v4 }
  0x92   :  { %v182_v6 = vpop.f32.mrf.mxu0  ;;  %v7769_v7 = vpop.f32.mrf.mxu1 }
  0x93   :  { %v303_v8 = vadd.f32 %v7392_v59, %v182_v6 }
  0x95   :  { %6946 = vmatmul.msk.bf16.gmra.mxu0 %vm95_vm0, %v72_v5  ;;  %v351_v11 = vmax.f32 %v303_v8, 0.0 }
  0x9a   :  { %v184_v9 = vpop.f32.mrf.mxu0  ;;  %v7777_v18 = vpop.f32.mrf.mxu1 }
  0x9b   :  { %v304_v10 = vadd.f32 %v7392_v59, %v184_v9 }
  0x9d   :  { %v352_v12 = vmax.f32 %v304_v10, 0.0 }
  0x9f   :  { %v398_v15 = vpack.c.bf16 %v352_v12, %v351_v11  ;;  %v45_v11 = vld [vmem:[%s15068_s0 + $0xf0] sm:$0xff]  ;;  %v46_v12 = vld [vmem:[%s15068_s0 + $0xf8] sm:$0xff] }
  0xa0   :  { %v78_v14 = vpack.c.bf16 %v46_v12, %v45_v11 }
  0xa1   :  { %499 = vmatmul.bf16.gmra.mxu1 %v398_v15 }
  0xa2   :  { %v187_v17 = vpop.f32.mrf.mxu0  ;;  %v7780_v22 = vpop.f32.mrf.mxu1 }
  0xa3   :  { %v305_v19 = vadd.f32 %v7392_v59, %v187_v17 }
  0xa5   :  { %6947 = vmatmul.msk.bf16.gmra.mxu0 %vm95_vm0, %v73_v16  ;;  %v353_v23 = vmax.f32 %v305_v19, 0.0 }
  0xaa   :  { %v189_v20 = vpop.f32.mrf.mxu0  ;;  %v7789_v30 = vpop.f32.mrf.mxu1 }
  0xab   :  { %v306_v21 = vadd.f32 %v7392_v59, %v189_v20 }
  0xad   :  { %v354_v24 = vmax.f32 %v306_v21, 0.0 }
  0xaf   :  { %v399_v27 = vpack.c.bf16 %v354_v24, %v353_v23 }
  0xb1   :  { %504 = vmatmul.bf16.gmra.mxu1 %v399_v27 }
  0xb2   :  { %v192_v29 = vpop.f32.mrf.mxu0  ;;  %v7797_v39 = vpop.f32.mrf.mxu1 }
  0xb3   :  { %v307_v31 = vadd.f32 %v7392_v59, %v192_v29 }
  0xb5   :  { %6948 = vmatmul.msk.bf16.gmra.mxu0 %vm95_vm0, %v74_v28  ;;  %v355_v34 = vmax.f32 %v307_v31, 0.0  ;;  %v79_v28 = vpack.c.bf16 %v48_v26, %v47_v25 }
  0xba   :  { %v194_v32 = vpop.f32.mrf.mxu0  ;;  %v7806_v45 = vpop.f32.mrf.mxu1 }
  0xbb   :  { %v308_v33 = vadd.f32 %v7392_v59, %v194_v32 }
  0xbd   :  { %v356_v35 = vmax.f32 %v308_v33, 0.0 }
  0xbf   :  { %v400_v38 = vpack.c.bf16 %v356_v35, %v355_v34 }
  0xc1   :  { %509 = vmatmul.bf16.gmra.mxu1 %v400_v38 }
  0xc2   :  { %v197_v41 = vpop.f32.mrf.mxu0  ;;  %v7815_v54 = vpop.f32.mrf.mxu1 }
  0xc3   :  { %v309_v43 = vadd.f32 %v7803_v42, %v197_v41 }
  0xc5   :  { %6949 = vmatmul.msk.bf16.gmra.mxu0 %vm95_vm0, %v75_v40  ;;  %v357_v47 = vmax.f32 %v309_v43, 0.0 }
  0xca   :  { %v199_v44 = vpop.f32.mrf.mxu0  ;;  %v7820_v61 = vpop.f32.mrf.mxu1 }
  0xcb   :  { %v310_v46 = vadd.f32 %v7803_v42, %v199_v44 }
  0xcd   :  { %v358_v48 = vmax.f32 %v310_v46, 0.0 }
  0xcf   :  { %v401_v51 = vpack.c.bf16 %v358_v48, %v357_v47 }
  0xd1   :  { %514 = vmatmul.bf16.gmra.mxu1 %v401_v51 }
  0xd2   :  { %v202_v53 = vpop.f32.mrf.mxu0  ;;  %v7830_v5 = vpop.f32.mrf.mxu1 }
  0xd3   :  { %v311_v55 = vadd.f32 %v7803_v42, %v202_v53 }
  0xd5   :  { %6950 = vmatmul.msk.bf16.gmra.mxu0 %vm95_vm0, %v76_v52  ;;  %v359_v57 = vmax.f32 %v311_v55, 0.0 }
  0xda   :  { %v204_v56 = vpop.f32.mrf.mxu0  ;;  %v7839_v15 = vpop.f32.mrf.mxu1 }
  0xdb   :  { %v312_v59 = vadd.f32 %v7803_v42, %v204_v56 }
  0xdd   :  { %v360_v60 = vmax.f32 %v312_v59, 0.0 }
  0xdf   :  { %v402_v0 = vpack.c.bf16 %v360_v60, %v359_v57  ;;  %v7203_v60 = vld [vmem:[%s15067_s1 + $0x88] sm:$0xff] }
  0xe0   :  { %835 = vmatpush.bf16.msra.mxu1 %v7203_v60  ;;  %7215 = vmatpush.bf16.msra.mxu2 %v7203_v60 }
  0xe1   :  { %519 = vmatmul.bf16.gmra.mxu1 %v402_v0 }
  0xe2   :  { %v207_v2 = vpop.f32.mrf.mxu0  ;;  %v7844_v23 = vpop.f32.mrf.mxu1 }
  0xe3   :  { %v313_v4 = vadd.f32 %v7803_v42, %v207_v2 }
  0xe5   :  { %6951 = vmatmul.msk.bf16.gmra.mxu0 %vm95_vm0, %v77_v1  ;;  %v361_v8 = vmax.f32 %v313_v4, 0.0  ;;  %v7202_v4 = vld [vmem:[%s15067_s1 + $0x80] sm:$0xff] }
  0xe6   :  { %7216 = vmatpush.bf16.msra.mxu2 %v7202_v4  ;;  %836 = vmatpush.bf16.msra.mxu1 %v7202_v4 }
  0xea   :  { %v209_v6 = vpop.f32.mrf.mxu0  ;;  %v7853_v31 = vpop.f32.mrf.mxu1 }
  0xeb   :  { %v314_v9 = vadd.f32 %v7803_v42, %v209_v6 }
  0xed   :  { %v362_v10 = vmax.f32 %v314_v9, 0.0 }
  0xef   :  { %v403_v13 = vpack.c.bf16 %v362_v10, %v361_v8  ;;  %v7884_v10 = vld [vmem:[%s15069_s2 + $0x2] ss:$0 sm:$0xff] }
  0xf1   :  { %524 = vmatmul.bf16.gmra.mxu1 %v403_v13 }
  0xf2   :  { %v212_v16 = vpop.f32.mrf.mxu0 }
  0xf3   :  { %v315_v17 = vadd.f32 %v7803_v42, %v212_v16 }
  0xf5   :  { %6952 = vmatmul.msk.bf16.gmra.mxu0 %vm95_vm0, %v78_v14  ;;  %v363_v20 = vmax.f32 %v315_v17, 0.0 }
  0xfa   :  { %v214_v19 = vpop.f32.mrf.mxu0 }
  0xfb   :  { %v316_v21 = vadd.f32 %v7803_v42, %v214_v19 }
  0xfd   :  { %v364_v24 = vmax.f32 %v316_v21, 0.0 }
  0xff   :  { %v404_v27 = vpack.c.bf16 %v364_v24, %v363_v20 }
 0x101   :  { %529 = vmatmul.bf16.gmra.mxu1 %v404_v27 }
 0x102   :  { %v217_v29 = vpop.f32.mrf.mxu0 }
 0x103   :  { %v317_v32 = vadd.f32 %v7803_v42, %v217_v29  ;;  %v7897_v29 = vld [vmem:[%s15069_s2 + $0x3] ss:$0 sm:$0xff] }
 0x105   :  { %6953 = vmatmul.msk.bf16.gmra.mxu0 %vm95_vm0, %v79_v28  ;;  %v365_v34 = vmax.f32 %v317_v32, 0.0 }
 0x10a   :  { %v219_v33 = vpop.f32.mrf.mxu0 }
 0x10b   :  { %v318_v35 = vadd.f32 %v7803_v42, %v219_v33 }
 0x10d   :  { %v366_v36 = vmax.f32 %v318_v35, 0.0 }
 0x10e   :  { %v7857_v37 = vpop.f32.mrf.mxu1 }
 0x10f   :  { %v405_v38 = vpack.c.bf16 %v366_v36, %v365_v34 }
 0x111   :  { %534 = vmatmul.bf16.gmra.mxu1 %v405_v38 }
 0x112   :  { %v222_v40 = vpop.f32.mrf.mxu0 }
 0x113   :  { %v319_v43 = vadd.f32 %v7803_v42, %v222_v40 }
 0x115   :  { %v367_v46 = vmax.f32 %v319_v43, 0.0 }
 0x116   :  { %v7859_v41 = vpop.f32.mrf.mxu1 }
 0x11a   :  { %v224_v44 = vpop.f32.mrf.mxu0 }
 0x11b   :  { %v320_v47 = vadd.f32 %v7803_v42, %v224_v44 }
 0x11d   :  { %v368_v48 = vmax.f32 %v320_v47, 0.0 }
 0x11e   :  { %v7863_v49 = vpop.f32.mrf.mxu1 }
 0x11f   :  { %v406_v50 = vpack.c.bf16 %v368_v48, %v367_v46 }
 0x121   :  { %539 = vmatmul.bf16.gmra.mxu1 %v406_v50 }
 0x122   :  { %v227_v51 = vpop.f32.mrf.mxu0 }
 0x123   :  { %v321_v53 = vadd.f32 %v7803_v42, %v227_v51 }
 0x125   :  { %v369_v56 = vmax.f32 %v321_v53, 0.0 }
 0x126   :  { %v7865_v52 = vpop.f32.mrf.mxu1 }
 0x12a   :  { %v229_v55 = vpop.f32.mrf.mxu0 }
 0x12b   :  { %v322_v57 = vadd.f32 %v7803_v42, %v229_v55 }
 0x12d   :  { %v370_v59 = vmax.f32 %v322_v57, 0.0 }
 0x12e   :  { %v7872_v62 = vpop.f32.mrf.mxu1 }
 0x12f   :  { %v407_v63 = vpack.c.bf16 %v370_v59, %v369_v56 }
 0x131   :  { %544 = vmatmul.bf16.gmra.mxu1 %v407_v63 }
 0x132   :  { %v232_v0 = vpop.f32.mrf.mxu0 }
 0x133   :  { %v323_v2 = vadd.f32 %v7803_v42, %v232_v0 }
 0x135   :  { %v371_v8 = vmax.f32 %v323_v2, 0.0 }
 0x136   :  { %v7874_v1 = vpop.f32.mrf.mxu1 }
 0x13a   :  { %v234_v6 = vpop.f32.mrf.mxu0 }
 0x13b   :  { %v324_v9 = vadd.f32 %v7803_v42, %v234_v6 }
 0x13d   :  { %v372_v11 = vmax.f32 %v324_v9, 0.0 }
 0x13e   :  { %v510_v12 = vpop.f32.mrf.mxu1 }
 0x13f   :  { %v7887_v13 = vadd.f32 %v7884_v10, %v510_v12  ;;  %v408_v14 = vpack.c.bf16 %v372_v11, %v371_v8 }
 0x141   :  { %549 = vmatmul.bf16.gmra.mxu1 %v408_v14 }
 0x142   :  { %v237_v16 = vpop.f32.mrf.mxu0 }
 0x143   :  { %v325_v19 = vadd.f32 %v7803_v42, %v237_v16 }
 0x145   :  { %v373_v24 = vmax.f32 %v325_v19, 0.0 }
 0x146   :  { %v512_v17 = vpop.f32.mrf.mxu1 }
 0x147   :  { %v7891_v20 = vadd.f32 %v7884_v10, %v512_v17 }
 0x14a   :  { %v239_v21 = vpop.f32.mrf.mxu0 }
 0x14b   :  { %v326_v25 = vadd.f32 %v7803_v42, %v239_v21 }
 0x14d   :  { %v374_v26 = vmax.f32 %v326_v25, 0.0 }
 0x14e   :  { %v515_v27 = vpop.f32.mrf.mxu1 }
 0x14f   :  { %v409_v28 = vpack.c.bf16 %v374_v26, %v373_v24  ;;  %v627_v33 = vadd.f32 %v7897_v29, %v515_v27 }
 0x151   :  { %554 = vmatmul.bf16.gmra.mxu1 %v409_v28  ;;  %v7902_v38 = vmax.f32 %v627_v33, 0.0 }
 0x152   :  { %v242_v32 = vpop.f32.mrf.mxu0 }
 0x153   :  { %v327_v35 = vadd.f32 %v7803_v42, %v242_v32  ;;  %15728 = vst [vmem:[#allocation2_spill] sm:$0xff] %v7902_v38 }
 0x155   :  { %v375_v44 = vmax.f32 %v327_v35, 0.0 }
 0x156   :  { %v517_v34 = vpop.f32.mrf.mxu1 }
 0x157   :  { %v628_v36 = vadd.f32 %v7897_v29, %v517_v34 }
 0x159   :  { %v7904_v40 = vmax.f32 %v628_v36, 0.0 }
 0x15a   :  { %v244_v43 = vpop.f32.mrf.mxu0 }
 0x15b   :  { %15729 = vst [vmem:[#allocation3_spill] sm:$0xff] %v7904_v40  ;;  %v328_v46 = vadd.f32 %v7803_v42, %v244_v43  ;;  %v719_v47 = vpack.c.bf16 %v7904_v40, %v7902_v38 }
 0x15d   :  { %v376_v48 = vmax.f32 %v328_v46, 0.0  ;;  %7025 = vmatmul.msk.bf16.vlgmr.msra.gmra.mxu2 %vm756_vm1, %v719_v47 }
 0x15e   :  { %v520_v50 = vpop.f32.mrf.mxu1 }
 0x15f   :  { %v410_v51 = vpack.c.bf16 %v376_v48, %v375_v44  ;;  %v629_v55 = vadd.f32 %v7897_v29, %v520_v50 }
 0x161   :  { %559 = vmatmul.bf16.gmra.mxu1 %v410_v51  ;;  %v7913_v60 = vmax.f32 %v629_v55, 0.0 }
 0x162   :  { %v247_v53 = vpop.f32.mrf.mxu0 }
 0x163   :  { %v329_v57 = vadd.f32 %v7803_v42, %v247_v53  ;;  %15730 = vst [vmem:[#allocation4_spill] sm:$0xff] %v7913_v60 }
 0x165   :  { %v377_v2 = vmax.f32 %v329_v57, 0.0 }
 0x166   :  { %v522_v56 = vpop.f32.mrf.mxu1 }
 0x167   :  { %v630_v59 = vadd.f32 %v7897_v29, %v522_v56 }
 0x169   :  { %v7915_v63 = vmax.f32 %v630_v59, 0.0 }
 0x16a   :  { %v249_v0 = vpop.f32.mrf.mxu0 }
 0x16b   :  { %15731 = vst [vmem:[#allocation5_spill] sm:$0xff] %v7915_v63  ;;  %v330_v4 = vadd.f32 %v7803_v42, %v249_v0  ;;  %v720_v6 = vpack.c.bf16 %v7915_v63, %v7913_v60 }
 0x16d   :  { %v378_v8 = vmax.f32 %v330_v4, 0.0  ;;  %7026 = vmatmul.msk.bf16.gmra.mxu2 %vm756_vm1, %v720_v6  ;;  %v335_v4 = vadd.f32 %v7803_v42, %v7754_v58  ;;  %v336_v6 = vadd.f32 %v7803_v42, %v7766_v3  ;;  %v337_v3 = vadd.f32 %v7803_v42, %v7769_v7 }
 0x16e   :  { %v525_v9 = vpop.f32.mrf.mxu1 }
 0x16f   :  { %v411_v11 = vpack.c.bf16 %v378_v8, %v377_v2  ;;  %v631_v14 = vadd.f32 %v7897_v29, %v525_v9 }
 0x171   :  { %564 = vmatmul.bf16.gmra.mxu1 %v411_v11  ;;  %v7922_v17 = vmax.f32 %v631_v14, 0.0  ;;  %v384_v14 = vmax.f32 %v336_v6, 0.0 }
 0x172   :  { %v252_v12 = vpop.f32.mrf.mxu0 }
 0x173   :  { %15732 = vst [vmem:[#allocation6_spill] sm:$0xff] %v7922_v17  ;;  %v331_v19 = vadd.f32 %v7803_v42, %v252_v12  ;;  %v383_v12 = vmax.f32 %v335_v4, 0.0  ;;  %v342_v4 = vadd.f32 %v7803_v42, %v7806_v45  ;;  %v343_v45 = vadd.f32 %v7803_v42, %v7815_v54 }
 0x175   :  { %v379_v26 = vmax.f32 %v331_v19, 0.0 }
 0x176   :  { %v527_v16 = vpop.f32.mrf.mxu1 }
 0x177   :  { %v632_v21 = vadd.f32 %v7897_v29, %v527_v16 }
 0x179   :  { %v7926_v24 = vmax.f32 %v632_v21, 0.0  ;;  %v414_v21 = vpack.c.bf16 %v384_v14, %v383_v12 }
 0x17a   :  { %v254_v25 = vpop.f32.mrf.mxu0 }
 0x17b   :  { %15733 = vst [vmem:[#allocation7_spill] sm:$0xff] %v7926_v24  ;;  %v332_v27 = vadd.f32 %v7803_v42, %v254_v25  ;;  %v721_v28 = vpack.c.bf16 %v7926_v24, %v7922_v17 }
 0x17d   :  { %v380_v32 = vmax.f32 %v332_v27, 0.0  ;;  %7027 = vmatmul.msk.bf16.gmra.mxu2 %vm756_vm1, %v721_v28 }
 0x17e   :  { %v530_v33 = vpop.f32.mrf.mxu1 }
 0x17f   :  { %v412_v34 = vpack.c.bf16 %v380_v32, %v379_v26  ;;  %v633_v36 = vadd.f32 %v7897_v29, %v530_v33  ;;  %v338_v26 = vadd.f32 %v7803_v42, %v7777_v18  ;;  %v385_v33 = vmax.f32 %v337_v3, 0.0 }
 0x180   :  { %v339_v18 = vadd.f32 %v7803_v42, %v7780_v22  ;;  %v344_v3 = vadd.f32 %v7803_v42, %v7820_v61 }
 0x181   :  { %569 = vmatmul.bf16.gmra.mxu1 %v412_v34  ;;  %v7933_v44 = vmax.f32 %v633_v36, 0.0  ;;  %v386_v34 = vmax.f32 %v338_v26, 0.0 }
 0x182   :  { %v257_v35 = vpop.f32.mrf.mxu0 }
 0x183   :  { %15734 = vst [vmem:[#allocation8_spill] sm:$0xff] %v7933_v44  ;;  %v333_v46 = vadd.f32 %v7803_v42, %v257_v35 }
 0x185   :  { %v381_v51 = vmax.f32 %v333_v46, 0.0 }
 0x186   :  { %v532_v43 = vpop.f32.mrf.mxu1 }
 0x187   :  { %v634_v47 = vadd.f32 %v7897_v29, %v532_v43  ;;  %v415_v43 = vpack.c.bf16 %v386_v34, %v385_v33  ;;  %v391_v34 = vmax.f32 %v343_v45, 0.0 }
 0x189   :  { %v7937_v48 = vmax.f32 %v634_v47, 0.0  ;;  %v340_v47 = vadd.f32 %v7803_v42, %v7789_v30  ;;  %v341_v30 = vadd.f32 %v7803_v42, %v7797_v39 }
 0x18a   :  { %v259_v50 = vpop.f32.mrf.mxu0 }
 0x18b   :  { %15735 = vst [vmem:[#allocation9_spill] sm:$0xff] %v7937_v48  ;;  %v334_v53 = vadd.f32 %v7803_v42, %v259_v50  ;;  %v722_v55 = vpack.c.bf16 %v7937_v48, %v7933_v44  ;;  %v389_v14 = vmax.f32 %v341_v30, 0.0 }
 0x18d   :  { %v382_v56 = vmax.f32 %v334_v53, 0.0  ;;  %7028 = vmatmul.msk.bf16.gmra.mxu2 %vm756_vm1, %v722_v55  ;;  %v387_v55 = vmax.f32 %v339_v18, 0.0 }
 0x18e   :  { %v535_v57 = vpop.f32.mrf.mxu1 }
 0x18f   :  { %v413_v59 = vpack.c.bf16 %v382_v56, %v381_v51  ;;  %v635_v0 = vadd.f32 %v7897_v29, %v535_v57  ;;  %v388_v56 = vmax.f32 %v340_v47, 0.0  ;;  %v620_v47 = vadd.f32 %v7884_v10, %v7859_v41 }
 0x191   :  { %574 = vmatmul.bf16.gmra.mxu1 %v413_v59  ;;  %v7948_v8 = vmax.f32 %v635_v0, 0.0  ;;  %v416_v0 = vpack.c.bf16 %v388_v56, %v387_v55  ;;  %v345_v55 = vadd.f32 %v7803_v42, %v7830_v5  ;;  %v346_v56 = vadd.f32 %v7803_v42, %v7839_v15 }
 0x192   :  { %v621_v15 = vadd.f32 %v7884_v10, %v7863_v49 }
 0x193   :  { %15736 = vst [vmem:[#allocation10_spill] sm:$0xff] %v7948_v8 }
 0x196   :  { %v537_v2 = vpop.f32.mrf.mxu1 }
 0x197   :  { %v636_v9 = vadd.f32 %v7897_v29, %v537_v2 }
 0x199   :  { %v7951_v11 = vmax.f32 %v636_v9, 0.0 }
 0x19b   :  { %15737 = vst [vmem:[#allocation11_spill] sm:$0xff] %v7951_v11  ;;  %v723_v16 = vpack.c.bf16 %v7951_v11, %v7948_v8 }
 0x19d   :  { %7029 = vmatmul.msk.bf16.gmra.mxu2 %vm756_vm1, %v723_v16  ;;  %v390_v16 = vmax.f32 %v342_v4, 0.0  ;;  %v393_v4 = vmax.f32 %v345_v55, 0.0 }
 0x19e   :  { %v540_v19 = vpop.f32.mrf.mxu1 }
 0x19f   :  { %v637_v58 = vadd.f32 %v7897_v29, %v540_v19 }
 0x1a1   :  { %579 = vmatmul.bf16.gmra.mxu1 %v414_v21  ;;  %v7961_v27 = vmax.f32 %v637_v58, 0.0  ;;  %v417_v58 = vpack.c.bf16 %v390_v16, %v389_v14 }
 0x1a3   :  { %15738 = vst [vmem:[#allocation12_spill] sm:$0xff] %v7961_v27 }
 0x1a6   :  { %v542_v25 = vpop.f32.mrf.mxu1 }
 0x1a7   :  { %v638_v28 = vadd.f32 %v7897_v29, %v542_v25 }
 0x1a9   :  { %v7964_v32 = vmax.f32 %v638_v28, 0.0 }
 0x1ab   :  { %15739 = vst [vmem:[#allocation13_spill] sm:$0xff] %v7964_v32  ;;  %v724_v35 = vpack.c.bf16 %v7964_v32, %v7961_v27 }
 0x1ad   :  { %7030 = vmatmul.msk.bf16.gmra.mxu2 %vm756_vm1, %v724_v35  ;;  %v392_v35 = vmax.f32 %v344_v3, 0.0 }
 0x1ae   :  { %v545_v36 = vpop.f32.mrf.mxu1 }
 0x1af   :  { %v639_v7 = vadd.f32 %v7897_v29, %v545_v36  ;;  %v619_v36 = vadd.f32 %v7884_v10, %v7857_v37  ;;  %v418_v61 = vpack.c.bf16 %v392_v35, %v391_v34 }
 0x1b1   :  { %584 = vmatmul.bf16.gmra.mxu1 %v415_v43  ;;  %v7974_v50 = vmax.f32 %v639_v7, 0.0  ;;  %v8010_v7 = vmax.f32 %v619_v36, 0.0 }
 0x1b3   :  { %15740 = vst [vmem:[#allocation14_spill] sm:$0xff] %v7974_v50 }
 0x1b4   :  { %15746 = vst [vmem:[#allocation20_spill] sm:$0xff] %v8010_v7 }
 0x1b6   :  { %v547_v46 = vpop.f32.mrf.mxu1 }
 0x1b7   :  { %v640_v51 = vadd.f32 %v7897_v29, %v547_v46 }
 0x1b9   :  { %v7977_v53 = vmax.f32 %v640_v51, 0.0 }
 0x1bb   :  { %15741 = vst [vmem:[#allocation15_spill] sm:$0xff] %v7977_v53  ;;  %v725_v57 = vpack.c.bf16 %v7977_v53, %v7974_v50 }
 0x1bd   :  { %7031 = vmatmul.msk.bf16.gmra.mxu2 %vm756_vm1, %v725_v57 }
 0x1be   :  { %v550_v59 = vpop.f32.mrf.mxu1 }
 0x1bf   :  { %v641_v22 = vadd.f32 %v7897_v29, %v550_v59  ;;  %v8024_v59 = vmax.f32 %v620_v47, 0.0 }
 0x1c1   :  { %589 = vmatmul.bf16.gmra.mxu1 %v416_v0  ;;  %v7987_v6 = vmax.f32 %v641_v22, 0.0  ;;  %15747 = vst [vmem:[#allocation21_spill] sm:$0xff] %v8024_v59 }
 0x1c3   :  { %15742 = vst [vmem:[#allocation16_spill] sm:$0xff] %v7987_v6 }
 0x1c6   :  { %v552_v2 = vpop.f32.mrf.mxu1 }
 0x1c7   :  { %v642_v9 = vadd.f32 %v7897_v29, %v552_v2 }
 0x1c9   :  { %v7990_v12 = vmax.f32 %v642_v9, 0.0  ;;  %v394_v9 = vmax.f32 %v346_v56, 0.0 }
 0x1cb   :  { %15743 = vst [vmem:[#allocation17_spill] sm:$0xff] %v7990_v12  ;;  %v726_v19 = vpack.c.bf16 %v7990_v12, %v7987_v6 }
 0x1cd   :  { %7032 = vmatmul.msk.bf16.gmra.mxu2 %vm756_vm1, %v726_v19 }
 0x1ce   :  { %v555_v21 = vpop.f32.mrf.mxu1 }
 0x1cf   :  { %v643_v39 = vadd.f32 %v7897_v29, %v555_v21 }
 0x1d1   :  { %594 = vmatmul.bf16.gmra.mxu1 %v417_v58  ;;  %v8000_v26 = vmax.f32 %v643_v39, 0.0  ;;  %v8044_v58 = vmax.f32 %v621_v15, 0.0  ;;  %v419_v39 = vpack.c.bf16 %v394_v9, %v393_v4 }
 0x1d3   :  { %15744 = vst [vmem:[#allocation18_spill] sm:$0xff] %v8000_v26 }
 0x1d4   :  { %15750 = vst [vmem:[#allocation24_spill] sm:$0xff] %v8044_v58 }
 0x1d6   :  { %v557_v25 = vpop.f32.mrf.mxu1 }
 0x1d7   :  { %v644_v28 = vadd.f32 %v7897_v29, %v557_v25 }
 0x1d9   :  { %v8003_v33 = vmax.f32 %v644_v28, 0.0 }
 0x1db   :  { %15745 = vst [vmem:[#allocation19_spill] sm:$0xff] %v8003_v33  ;;  %v727_v43 = vpack.c.bf16 %v8003_v33, %v8000_v26 }
 0x1dd   :  { %7033 = vmatmul.msk.bf16.gmra.mxu2 %vm756_vm1, %v727_v43  ;;  %v347_v43 = vadd.f32 %v7803_v42, %v7844_v23 }
 0x1de   :  { %v560_v54 = vpop.f32.mrf.mxu1 }
 0x1df   :  { %v645_v37 = vadd.f32 %v7897_v29, %v560_v54  ;;  %v348_v54 = vadd.f32 %v7803_v42, %v7853_v31  ;;  %v622_v42 = vadd.f32 %v7884_v10, %v7865_v52 }
 0x1e0   :  { %v8012_v46 = vpop.f32.mrf.mxu2 }
 0x1e1   :  { %599 = vmatmul.bf16.gmra.mxu1 %v418_v61  ;;  %v966_v18 = vmul.f32 %v8012_v46, %v8010_v7  ;;  %v8026_v0 = vmax.f32 %v645_v37, 0.0  ;;  %v1158_v41 = vmul.f32 %v8012_v46, %v7902_v38  ;;  %v1350_v49 = vmul.f32 %v8012_v46, %v7948_v8 }
 0x1e2   :  { %v1542_v56 = vmul.f32 %v8012_v46, %v8000_v26  ;;  %v396_v31 = vmax.f32 %v348_v54, 0.0  ;;  %v8083_v9 = vmax.f32 %v622_v42, 0.0 }
 0x1e3   :  { %v1030_v51 = vsel %vm756_vm1, %v966_v18, 0.0  ;;  %15748 = vst [vmem:[#allocation22_spill] sm:$0xff] %v8026_v0  ;;  %v1222_v14 = vsel %vm756_vm1, %v1158_v41, 0.0  ;;  %v1414_v36 = vsel %vm756_vm1, %v1350_v49, 0.0 }
 0x1e4   :  { %1031 = vadd.xlane.f32.xlu2 %v1030_v51  ;;  %v1606_v4 = vsel %vm756_vm1, %v1542_v56, 0.0  ;;  %15753 = vst [vmem:[#allocation27_spill] sm:$0xff] %v8083_v9 }
 0x1e6   :  { %v562_v57 = vpop.f32.mrf.mxu1 }
 0x1e7   :  { %v646_v22 = vadd.f32 %v7897_v29, %v562_v57  ;;  %v395_v57 = vmax.f32 %v347_v43, 0.0 }
 0x1e8   :  { %v8031_v2 = vpop.f32.mrf.mxu2 }
 0x1e9   :  { %v8033_v30 = vmax.f32 %v646_v22, 0.0  ;;  %v967_v5 = vmul.f32 %v8031_v2, %v8024_v59  ;;  %v1159_v25 = vmul.f32 %v8031_v2, %v7904_v40  ;;  %v1351_v51 = vmul.f32 %v8031_v2, %v7951_v11 }
 0x1eb   :  { %15749 = vst [vmem:[#allocation23_spill] sm:$0xff] %v8033_v30  ;;  %v1033_v16 = vsel %vm756_vm1, %v967_v5, 0.0  ;;  %v728_v19 = vpack.c.bf16 %v8033_v30, %v8026_v0  ;;  %v1225_v34 = vsel %vm756_vm1, %v1159_v25, 0.0  ;;  %v1417_v41 = vsel %vm756_vm1, %v1351_v51, 0.0 }
 0x1ec   :  { %1223 = vadd.xlane.f32.xlu2 %v1222_v14  ;;  %1034 = vadd.xlane.f32.xlu0 %v1033_v16  ;;  %v420_v14 = vpack.c.bf16 %v396_v31, %v395_v57  ;;  %v1543_v16 = vmul.f32 %v8031_v2, %v8003_v33 }
 0x1ed   :  { %7034 = vmatmul.msk.bf16.gmra.mxu2 %vm756_vm1, %v728_v19 }
 0x1ee   :  { %v565_v21 = vpop.f32.mrf.mxu1 }
 0x1ef   :  { %v647_v28 = vadd.f32 %v7897_v29, %v565_v21  ;;  %v623_v21 = vadd.f32 %v7884_v10, %v7872_v62 }
 0x1f0   :  { %v8048_v45 = vpop.f32.mrf.mxu2 }
 0x1f1   :  { %604 = vmatmul.bf16.gmra.mxu1 %v419_v39  ;;  %v968_v3 = vmul.f32 %v8048_v45, %v8044_v58  ;;  %v8062_v18 = vmax.f32 %v647_v28, 0.0  ;;  %v1160_v37 = vmul.f32 %v8048_v45, %v7913_v60  ;;  %v1352_v52 = vmul.f32 %v8048_v45, %v7961_v27 }
 0x1f2   :  { %v1544_v54 = vmul.f32 %v8048_v45, %v8026_v0 }
 0x1f3   :  { %v1036_v35 = vsel %vm756_vm1, %v968_v3, 0.0  ;;  %15751 = vst [vmem:[#allocation25_spill] sm:$0xff] %v8062_v18  ;;  %v1228_v22 = vsel %vm756_vm1, %v1160_v37, 0.0  ;;  %v1420_v49 = vsel %vm756_vm1, %v1352_v52, 0.0  ;;  %v1609_v3 = vsel %vm756_vm1, %v1543_v16, 0.0 }
 0x1f4   :  { %1226 = vadd.xlane.f32.xlu0 %v1225_v34  ;;  %1037 = vadd.xlane.f32.xlu1 %v1036_v35  ;;  %v8099_v34 = vmax.f32 %v623_v21, 0.0  ;;  %v1612_v56 = vsel %vm756_vm1, %v1544_v54, 0.0 }
 0x1f5   :  { %1415 = vadd.xlane.f32.xlu2 %v1414_v36 }
 0x1f6   :  { %v567_v61 = vpop.f32.mrf.mxu1  ;;  %15754 = vst [vmem:[#allocation28_spill] sm:$0xff] %v8099_v34 }
 0x1f7   :  { %v648_v47 = vadd.f32 %v7897_v29, %v567_v61 }
 0x1f8   :  { %v8069_v55 = vpop.f32.mrf.mxu2 }
 0x1f9   :  { %v8073_v23 = vmax.f32 %v648_v47, 0.0  ;;  %v969_v19 = vmul.f32 %v8069_v55, %v8083_v9  ;;  %v1161_v61 = vmul.f32 %v8069_v55, %v7915_v63  ;;  %v624_v47 = vadd.f32 %v7884_v10, %v7874_v1 }
 0x1fa   :  { %v715_v10 = vpack.c.bf16 %v8024_v59, %v8010_v7 }
 0x1fb   :  { %15752 = vst [vmem:[#allocation26_spill] sm:$0xff] %v8073_v23  ;;  %v729_v5 = vpack.c.bf16 %v8073_v23, %v8062_v18  ;;  %v1039_v28 = vsel %vm756_vm1, %v969_v19, 0.0  ;;  %v1231_v31 = vsel %vm756_vm1, %v1161_v61, 0.0 }
 0x1fc   :  { %1229 = vadd.xlane.f32.xlu1 %v1228_v22  ;;  %1418 = vadd.xlane.f32.xlu0 %v1417_v41  ;;  %v8121_v22 = vmax.f32 %v624_v47, 0.0 }
 0x1fd   :  { %1607 = vadd.xlane.f32.xlu2 %v1606_v4  ;;  %7035 = vmatmul.msk.bf16.gmra.mxu2 %vm756_vm1, %v729_v5  ;;  %v1353_v4 = vmul.f32 %v8069_v55, %v7964_v32 }
 0x1fe   :  { %v570_v15 = vpop.f32.mrf.mxu1  ;;  %15757 = vst [vmem:[#allocation31_spill] sm:$0xff] %v8121_v22 }
 0x1ff   :  { %v649_v25 = vadd.f32 %v7897_v29, %v570_v15  ;;  %v1423_v52 = vsel %vm756_vm1, %v1353_v4, 0.0 }
 0x200   :  { %v8093_v39 = vpop.f32.mrf.mxu2 }
 0x201   :  { %609 = vmatmul.bf16.gmra.mxu1 %v420_v14  ;;  %v8101_v36 = vmax.f32 %v649_v25, 0.0  ;;  %v970_v43 = vmul.f32 %v8093_v39, %v8099_v34  ;;  %v1162_v41 = vmul.f32 %v8093_v39, %v7922_v17  ;;  %v1354_v25 = vmul.f32 %v8093_v39, %v7974_v50 }
 0x203   :  { %15755 = vst [vmem:[#allocation29_spill] sm:$0xff] %v8101_v36  ;;  %v1042_v51 = vsel %vm756_vm1, %v970_v43, 0.0  ;;  %v1234_v15 = vsel %vm756_vm1, %v1162_v41, 0.0  ;;  %v1426_v43 = vsel %vm756_vm1, %v1354_v25, 0.0 }
 0x204   :  { %1421 = vadd.xlane.f32.xlu1 %v1420_v49  ;;  %1610 = vadd.xlane.f32.xlu0 %v1609_v3 }
 0x205   :  { %1040 = vadd.xlane.f32.xlu2 %v1039_v28  ;;  %v1545_v28 = vmul.f32 %v8069_v55, %v8033_v30 }
 0x206   :  { %v572_v35 = vpop.f32.mrf.mxu1 }
 0x207   :  { %v650_v62 = vadd.f32 %v7897_v29, %v572_v35  ;;  %v1615_v47 = vsel %vm756_vm1, %v1545_v28, 0.0 }
 0x208   :  { %v8118_v42 = vpop.f32.mrf.mxu2 }
 0x209   :  { %v8112_v37 = vmax.f32 %v650_v62, 0.0  ;;  %v971_v5 = vmul.f32 %v8118_v42, %v8121_v22  ;;  %v1163_v49 = vmul.f32 %v8118_v42, %v7926_v24 }
 0x20b   :  { %15756 = vst [vmem:[#allocation30_spill] sm:$0xff] %v8112_v37  ;;  %v730_v57 = vpack.c.bf16 %v8112_v37, %v8101_v36  ;;  %v1045_v14 = vsel %vm756_vm1, %v971_v5, 0.0  ;;  %v1237_v54 = vsel %vm756_vm1, %v1163_v49, 0.0 }
 0x20c   :  { %1043 = vadd.xlane.f32.xlu0 %v1042_v51  ;;  %1613 = vadd.xlane.f32.xlu1 %v1612_v56  ;;  %v8157_v51 = vmax.f32 %v7887_v13, 0.0 }
 0x20d   :  { %1232 = vadd.xlane.f32.xlu2 %v1231_v31  ;;  %7036 = vmatmul.msk.bf16.gmra.mxu2 %vm756_vm1, %v730_v57  ;;  %v716_v57 = vpack.c.bf16 %v8083_v9, %v8044_v58  ;;  %v1355_v31 = vmul.f32 %v8118_v42, %v7977_v53 }
 0x20e   :  { %v575_v1 = vpop.f32.mrf.mxu1  ;;  %15760 = vst [vmem:[#allocation34_spill] sm:$0xff] %v8157_v51 }
 0x20f   :  { %v651_v16 = vadd.f32 %v7897_v29, %v575_v1  ;;  %v1546_v1 = vmul.f32 %v8093_v39, %v8062_v18  ;;  %v1429_v13 = vsel %vm756_vm1, %v1355_v31, 0.0 }
 0x210   :  { %v8142_v3 = vpop.f32.mrf.mxu2 }
 0x211   :  { %7021 = vmatmul.msk.bf16.vlgmr.msra.gmra.mxu1 %vm756_vm1, %v715_v10  ;;  %v8146_v35 = vmax.f32 %v651_v16, 0.0  ;;  %v972_v10 = vmul.f32 %v8142_v3, %v8157_v51  ;;  %v1618_v5 = vsel %vm756_vm1, %v1546_v1, 0.0  ;;  %v1164_v25 = vmul.f32 %v8142_v3, %v7933_v44 }
 0x213   :  { %15758 = vst [vmem:[#allocation32_spill] sm:$0xff] %v8146_v35  ;;  %v1048_v4 = vsel %vm756_vm1, %v972_v10, 0.0  ;;  %v1356_v10 = vmul.f32 %v8142_v3, %v7987_v6 }
 0x214   :  { %1235 = vadd.xlane.f32.xlu0 %v1234_v15  ;;  %1046 = vadd.xlane.f32.xlu1 %v1045_v14  ;;  %v8174_v15 = vmax.f32 %v7891_v20, 0.0 }
 0x215   :  { %1424 = vadd.xlane.f32.xlu2 %v1423_v52 }
 0x216   :  { %v577_v19 = vpop.f32.mrf.mxu1  ;;  %15761 = vst [vmem:[#allocation35_spill] sm:$0xff] %v8174_v15 }
 0x217   :  { %v652_v21 = vadd.f32 %v7897_v29, %v577_v19 }
 0x218   :  { %v8168_v41 = vpop.f32.mrf.mxu2 }
 0x219   :  { %v8148_v62 = vmax.f32 %v652_v21, 0.0  ;;  %v973_v19 = vmul.f32 %v8168_v41, %v8174_v15  ;;  %v1547_v21 = vmul.f32 %v8118_v42, %v8073_v23  ;;  %v1165_v31 = vmul.f32 %v8168_v41, %v7937_v48 }
 0x21b   :  { %15759 = vst [vmem:[#allocation33_spill] sm:$0xff] %v8148_v62  ;;  %v731_v61 = vpack.c.bf16 %v8148_v62, %v8146_v35  ;;  %v1051_v20 = vsel %vm756_vm1, %v973_v19, 0.0  ;;  %v1357_v19 = vmul.f32 %v8168_v41, %v7990_v12 }
 0x21c   :  { %1427 = vadd.xlane.f32.xlu0 %v1426_v43  ;;  %1238 = vadd.xlane.f32.xlu1 %v1237_v54  ;;  %v1621_v43 = vsel %vm756_vm1, %v1547_v21, 0.0 }
 0x21d   :  { %1616 = vadd.xlane.f32.xlu2 %v1615_v47  ;;  %7037 = vmatmul.msk.bf16.gmra.mxu2 %vm756_vm1, %v731_v61  ;;  %v1240_v47 = vsel %vm756_vm1, %v1164_v25, 0.0  ;;  %v1548_v25 = vmul.f32 %v8142_v3, %v8101_v36 }
 0x21e   :  { %v580_v56 = vpop.f32.mrf.mxu1 }
 0x21f   :  { %v653_v14 = vadd.f32 %v7897_v29, %v580_v56 }
 0x220   :  { %v8192_v61 = vpop.f32.mrf.mxu2 }
 0x221   :  { %7022 = vmatmul.msk.bf16.gmra.mxu1 %vm756_vm1, %v716_v57  ;;  %v8184_v49 = vmax.f32 %v653_v14, 0.0  ;;  %v717_v57 = vpack.c.bf16 %v8121_v22, %v8099_v34  ;;  %v974_v1 = vmul.f32 %v8192_v61, %v8010_v7  ;;  %v1166_v21 = vmul.f32 %v8192_v61, %v7902_v38 }
 0x223   :  { %15762 = vst [vmem:[#allocation36_spill] sm:$0xff] %v8184_v49 }
 0x224   :  { %1430 = vadd.xlane.f32.xlu1 %v1429_v13  ;;  %1619 = vadd.xlane.f32.xlu0 %v1618_v5  ;;  %v1243_v13 = vsel %vm756_vm1, %v1165_v31, 0.0  ;;  %v1054_v5 = vsel %vm756_vm1, %v974_v1, 0.0  ;;  %v718_v1 = vpack.c.bf16 %v8174_v15, %v8157_v51 }
 0x225   :  { %1049 = vadd.xlane.f32.xlu2 %v1048_v4  ;;  %v1432_v4 = vsel %vm756_vm1, %v1356_v10, 0.0  ;;  %v1358_v10 = vmul.f32 %v8192_v61, %v7948_v8 }
 0x226   :  { %v582_v52 = vpop.f32.mrf.mxu1 }
 0x227   :  { %v654_v16 = vadd.f32 %v7897_v29, %v582_v52 }
 0x229   :  { %v8186_v28 = vmax.f32 %v654_v16, 0.0 }
 0x22b   :  { %15763 = vst [vmem:[#allocation37_spill] sm:$0xff] %v8186_v28  ;;  %v732_v54 = vpack.c.bf16 %v8186_v28, %v8184_v49 }
 0x22c   :  { %1052 = vadd.xlane.f32.xlu0 %v1051_v20  ;;  %1622 = vadd.xlane.f32.xlu1 %v1621_v43 }
 0x22d   :  { %1241 = vadd.xlane.f32.xlu2 %v1240_v47  ;;  %7038 = vmatmul.msk.bf16.gmra.mxu2 %vm756_vm1, %v732_v54  ;;  %v1435_v54 = vsel %vm756_vm1, %v1357_v19, 0.0  ;;  %v1246_v47 = vsel %vm756_vm1, %v1166_v21, 0.0 }
 0x22e   :  { %v585_v56 = vpop.f32.mrf.mxu1 }
 0x22f   :  { %v655_v14 = vadd.f32 %v7897_v29, %v585_v56 }
 0x231   :  { %7023 = vmatmul.msk.bf16.gmra.mxu1 %vm756_vm1, %v717_v57  ;;  %v8216_v20 = vmax.f32 %v655_v14, 0.0  ;;  %v1624_v57 = vsel %vm756_vm1, %v1548_v25, 0.0  ;;  %v1438_v14 = vsel %vm756_vm1, %v1358_v10, 0.0 }
 0x233   :  { %15764 = vst [vmem:[#allocation38_spill] sm:$0xff] %v8216_v20 }
 0x234   :  { %1244 = vadd.xlane.f32.xlu0 %v1243_v13  ;;  %1055 = vadd.xlane.f32.xlu1 %v1054_v5  ;;  %v1549_v13 = vmul.f32 %v8168_v41, %v8112_v37  ;;  %v1734_v5 = vmul.f32 %v8012_v46, %v8146_v35 }
 0x235   :  { %1433 = vadd.xlane.f32.xlu2 %v1432_v4  ;;  %v8235_v4 = vpop.f32.mrf.mxu2 }
 0x236   :  { %v587_v52 = vpop.f32.mrf.mxu1 }
 0x237   :  { %v656_v16 = vadd.f32 %v7897_v29, %v587_v52  ;;  %v1627_v52 = vsel %vm756_vm1, %v1549_v13, 0.0 }
 0x239   :  { %v8218_v43 = vmax.f32 %v656_v16, 0.0  ;;  %v1798_v16 = vsel %vm756_vm1, %v1734_v5, 0.0 }
 0x23b   :  { %15765 = vst [vmem:[#allocation39_spill] sm:$0xff] %v8218_v43  ;;  %v733_v56 = vpack.c.bf16 %v8218_v43, %v8216_v20 }
 0x23c   :  { %1436 = vadd.xlane.f32.xlu0 %v1435_v54  ;;  %1247 = vadd.xlane.f32.xlu1 %v1246_v47  ;;  %v1550_v54 = vmul.f32 %v8192_v61, %v8000_v26  ;;  %v1735_v47 = vmul.f32 %v8031_v2, %v8148_v62 }
 0x23d   :  { %1625 = vadd.xlane.f32.xlu2 %v1624_v57  ;;  %7039 = vmatmul.msk.bf16.gmra.mxu2 %vm756_vm1, %v733_v56  ;;  %v975_v56 = vmul.f32 %v8235_v4, %v8024_v59  ;;  %v8256_v5 = vpop.f32.mrf.mxu2 }
 0x23e   :  { %v590_v31 = vpop.f32.mrf.mxu1  ;;  %v1630_v10 = vsel %vm756_vm1, %v1550_v54, 0.0 }
 0x23f   :  { %v657_v19 = vadd.f32 %v7897_v29, %v590_v31  ;;  %v1801_v31 = vsel %vm756_vm1, %v1735_v47, 0.0 }
 0x241   :  { %7024 = vmatmul.msk.bf16.gmra.mxu1 %vm756_vm1, %v718_v1  ;;  %v8248_v57 = vmax.f32 %v657_v19, 0.0  ;;  %v976_v19 = vmul.f32 %v8256_v5, %v8044_v58  ;;  %v1551_v58 = vmul.f32 %v8235_v4, %v8003_v33 }
 0x243   :  { %15766 = vst [vmem:[#allocation40_spill] sm:$0xff] %v8248_v57  ;;  %v1060_v54 = vsel %vm756_vm1, %v976_v19, 0.0  ;;  %v1359_v19 = vmul.f32 %v8235_v4, %v7951_v11 }
 0x244   :  { %1439 = vadd.xlane.f32.xlu1 %v1438_v14  ;;  %1628 = vadd.xlane.f32.xlu0 %v1627_v52  ;;  %v1057_v14 = vsel %vm756_vm1, %v975_v56, 0.0 }
 0x245   :  { %1799 = vadd.xlane.f32.xlu2 %v1798_v16  ;;  %v1742_v16 = vmul.f32 %v8192_v61, %v8146_v35 }
 0x246   :  { %v592_v21 = vpop.f32.mrf.mxu1 }
 0x247   :  { %v658_v25 = vadd.f32 %v7897_v29, %v592_v21  ;;  %v1167_v21 = vmul.f32 %v8235_v4, %v7904_v40 }
 0x249   :  { %v8250_v1 = vmax.f32 %v658_v25, 0.0  ;;  %v1822_v25 = vsel %vm756_vm1, %v1742_v16, 0.0  ;;  %v1249_v47 = vsel %vm756_vm1, %v1167_v21, 0.0  ;;  %v1736_v16 = vmul.f32 %v8048_v45, %v8184_v49 }
 0x24b   :  { %15767 = vst [vmem:[#allocation41_spill] sm:$0xff] %v8250_v1  ;;  %v734_v13 = vpack.c.bf16 %v8250_v1, %v8248_v57 }
 0x24c   :  { %1631 = vadd.xlane.f32.xlu1 %v1630_v10  ;;  %1802 = vadd.xlane.f32.xlu0 %v1801_v31 }
 0x24d   :  { %1058 = vadd.xlane.f32.xlu2 %v1057_v14  ;;  %7040 = vmatmul.msk.bf16.gmra.mxu2 %vm756_vm1, %v734_v13  ;;  %v1168_v14 = vmul.f32 %v8256_v5, %v7913_v60 }
 0x24e   :  { %v595_v52 = vpop.f32.mrf.mxu1 }
 0x24f   :  { %v659_v56 = vadd.f32 %v7897_v29, %v595_v52  ;;  %v1252_v52 = vsel %vm756_vm1, %v1168_v14, 0.0  ;;  %v1360_v14 = vmul.f32 %v8256_v5, %v7961_v27 }
 0x254   :  { %1823 = vadd.xlane.f32.xlu1 %v1822_v25  ;;  %1061 = vadd.xlane.f32.xlu0 %v1060_v54  ;;  %v8279_v25 = vmax.f32 %v659_v56, 0.0  ;;  %v1804_v54 = vsel %vm756_vm1, %v1736_v16, 0.0 }
 0x255   :  { %1250 = vadd.xlane.f32.xlu2 %v1249_v47 }
 0x256   :  { %v597_v10 = vpop.f32.mrf.mxu1  ;;  %15769 = vst [vmem:[#allocation43_spill] sm:$0xff] %v8279_v25 }
 0x257   :  { %v660_v31 = vadd.f32 %v7897_v29, %v597_v10  ;;  %v8271_v13 = vpop.xlane.xlu2 %1031  ;;  %v8287_v10 = vpop.f32.mrf.mxu2 }
 0x258   :  { %15768 = vst [vmem:[#allocation42_spill] sm:$0xff] %v8271_v13  ;;  %v1441_v13 = vsel %vm756_vm1, %v1359_v19, 0.0  ;;  %v977_v16 = vmul.f32 %v8287_v10, %v8083_v9  ;;  %v1444_v19 = vsel %vm756_vm1, %v1360_v14, 0.0  ;;  %v1552_v9 = vmul.f32 %v8256_v5, %v8026_v0 }
 0x259   :  { %v8281_v21 = vmax.f32 %v660_v31, 0.0  ;;  %v1169_v14 = vmul.f32 %v8287_v10, %v7915_v63 }
 0x25b   :  { %15770 = vst [vmem:[#allocation44_spill] sm:$0xff] %v8281_v21  ;;  %v735_v47 = vpack.c.bf16 %v8281_v21, %v8279_v25 }
 0x25c   :  { %1253 = vadd.xlane.f32.xlu0 %v1252_v52  ;;  %1805 = vadd.xlane.f32.xlu1 %v1804_v54  ;;  %v1633_v52 = vsel %vm756_vm1, %v1551_v58, 0.0  ;;  %v1743_v58 = vmul.f32 %v8235_v4, %v8148_v62 }
 0x25d   :  { %1442 = vadd.xlane.f32.xlu2 %v1441_v13  ;;  %7041 = vmatmul.msk.bf16.gmra.mxu2 %vm756_vm1, %v735_v47  ;;  %v1063_v13 = vsel %vm756_vm1, %v977_v16, 0.0 }
 0x25e   :  { %v600_v56 = vpop.f32.mrf.mxu1 }
 0x25f   :  { %v8291_v60 = vpop.xlane.xlu2 %1223  ;;  %v8293_v31 = vpop.xlane.xlu0 %1034  ;;  %v661_v54 = vadd.f32 %v7897_v29, %v600_v56 }
 0x260   :  { %15771 = vst [vmem:[#allocation45_spill] sm:$0xff] %v8291_v60 }
 0x261   :  { %15772 = vst [vmem:[#allocation46_spill] sm:$0xff] %v8293_v31  ;;  %v8318_v56 = vmax.f32 %v661_v54, 0.0 }
 0x263   :  { %15776 = vst [vmem:[#allocation50_spill] sm:$0xff] %v8318_v56 }
 0x264   :  { %1445 = vadd.xlane.f32.xlu0 %v1444_v19  ;;  %1064 = vadd.xlane.f32.xlu1 %v1063_v13  ;;  %v1636_v13 = vsel %vm756_vm1, %v1552_v9, 0.0  ;;  %v1744_v9 = vmul.f32 %v8256_v5, %v8184_v49 }
 0x265   :  { %1634 = vadd.xlane.f32.xlu2 %v1633_v52  ;;  %v1255_v52 = vsel %vm756_vm1, %v1169_v14, 0.0  ;;  %v1361_v14 = vmul.f32 %v8287_v10, %v7964_v32  ;;  %v1553_v32 = vmul.f32 %v8287_v10, %v8033_v30 }
 0x266   :  { %v602_v47 = vpop.f32.mrf.mxu1 }
 0x267   :  { %v662_v31 = vadd.f32 %v7897_v29, %v602_v47  ;;  %v8306_v60 = vpop.xlane.xlu0 %1226  ;;  %v8308_v27 = vpop.xlane.xlu1 %1037 }
 0x268   :  { %15773 = vst [vmem:[#allocation47_spill] sm:$0xff] %v8306_v60  ;;  %v8314_v16 = vpop.xlane.xlu2 %1415  ;;  %v8328_v60 = vpop.f32.mrf.mxu2 }
 0x269   :  { %15774 = vst [vmem:[#allocation48_spill] sm:$0xff] %v8308_v27  ;;  %v8320_v19 = vmax.f32 %v662_v31, 0.0  ;;  %v1825_v27 = vsel %vm756_vm1, %v1743_v58, 0.0  ;;  %v1828_v58 = vsel %vm756_vm1, %v1744_v9, 0.0  ;;  %v1738_v9 = vmul.f32 %v8093_v39, %v8216_v20 }
 0x26a   :  { %15775 = vst [vmem:[#allocation49_spill] sm:$0xff] %v8314_v16 }
 0x26b   :  { %15777 = vst [vmem:[#allocation51_spill] sm:$0xff] %v8320_v19  ;;  %v736_v47 = vpack.c.bf16 %v8320_v19, %v8318_v56 }
 0x26c   :  { %1637 = vadd.xlane.f32.xlu0 %v1636_v13  ;;  %1256 = vadd.xlane.f32.xlu1 %v1255_v52  ;;  %v1447_v13 = vsel %vm756_vm1, %v1361_v14, 0.0 }
 0x26d   :  { %1826 = vadd.xlane.f32.xlu2 %v1825_v27  ;;  %7042 = vmatmul.msk.bf16.gmra.mxu2 %vm756_vm1, %v736_v47  ;;  %v1737_v27 = vmul.f32 %v8069_v55, %v8186_v28 }
 0x26e   :  { %v605_v54 = vpop.f32.mrf.mxu1 }
 0x26f   :  { %v8330_v16 = vpop.xlane.xlu1 %1229  ;;  %v8332_v31 = vpop.xlane.xlu0 %1418  ;;  %v1807_v52 = vsel %vm756_vm1, %v1737_v27, 0.0  ;;  %v663_v47 = vadd.f32 %v7897_v29, %v605_v54  ;;  %v978_v27 = vmul.f32 %v8328_v60, %v8099_v34 }
 0x270   :  { %15778 = vst [vmem:[#allocation52_spill] sm:$0xff] %v8330_v16  ;;  %v8338_v0 = vpop.xlane.xlu2 %1607  ;;  %v8359_v54 = vpop.f32.mrf.mxu2 }
 0x271   :  { %15779 = vst [vmem:[#allocation53_spill] sm:$0xff] %v8332_v31 }
 0x272   :  { %15780 = vst [vmem:[#allocation54_spill] sm:$0xff] %v8338_v0 }
 0x274   :  { %1829 = vadd.xlane.f32.xlu0 %v1828_v58  ;;  %1448 = vadd.xlane.f32.xlu1 %v1447_v13  ;;  %v8361_v58 = vmax.f32 %v663_v47, 0.0  ;;  %v1639_v13 = vsel %vm756_vm1, %v1553_v32, 0.0  ;;  %v1745_v32 = vmul.f32 %v8287_v10, %v8186_v28 }
 0x275   :  { %1808 = vadd.xlane.f32.xlu2 %v1807_v52  ;;  %v1810_v52 = vsel %vm756_vm1, %v1738_v9, 0.0 }
 0x276   :  { %v607_v16 = vpop.f32.mrf.mxu1  ;;  %15784 = vst [vmem:[#allocation58_spill] sm:$0xff] %v8361_v58 }
 0x277   :  { %v664_v31 = vadd.f32 %v7897_v29, %v607_v16  ;;  %v8347_v49 = vpop.xlane.xlu1 %1421  ;;  %v8349_v0 = vpop.xlane.xlu0 %1610 }
 0x278   :  { %15781 = vst [vmem:[#allocation55_spill] sm:$0xff] %v8347_v49  ;;  %v8355_v14 = vpop.xlane.xlu2 %1040 }
 0x279   :  { %15782 = vst [vmem:[#allocation56_spill] sm:$0xff] %v8349_v0  ;;  %v8363_v16 = vmax.f32 %v664_v31, 0.0  ;;  %v1066_v0 = vsel %vm756_vm1, %v978_v27, 0.0  ;;  %v979_v31 = vmul.f32 %v8359_v54, %v8121_v22  ;;  %v1170_v27 = vmul.f32 %v8328_v60, %v7922_v17 }
 0x27a   :  { %15783 = vst [vmem:[#allocation57_spill] sm:$0xff] %v8355_v14  ;;  %v1171_v17 = vmul.f32 %v8359_v54, %v7926_v24 }
 0x27b   :  { %15785 = vst [vmem:[#allocation59_spill] sm:$0xff] %v8363_v16  ;;  %v737_v49 = vpack.c.bf16 %v8363_v16, %v8361_v58 }
 0x27c   :  { %1640 = vadd.xlane.f32.xlu1 %v1639_v13  ;;  %1811 = vadd.xlane.f32.xlu0 %v1810_v52  ;;  %v8383_v13 = vpop.f32.mrf.mxu2  ;;  %v1258_v52 = vsel %vm756_vm1, %v1170_v27, 0.0  ;;  %v1362_v27 = vmul.f32 %v8328_v60, %v7974_v50 }
 0x27d   :  { %1067 = vadd.xlane.f32.xlu2 %v1066_v0  ;;  %7043 = vmatmul.msk.bf16.gmra.mxu2 %vm756_vm1, %v737_v49  ;;  %v1831_v0 = vsel %vm756_vm1, %v1745_v32, 0.0  ;;  %v1069_v49 = vsel %vm756_vm1, %v979_v31, 0.0  ;;  %v1739_v32 = vmul.f32 %v8118_v42, %v8218_v43 }
 0x27e   :  { %v610_v14 = vpop.f32.mrf.mxu1 }
 0x27f   :  { %v8371_v30 = vpop.xlane.xlu0 %1043  ;;  %v8373_v47 = vpop.xlane.xlu1 %1613 }
 0x280   :  { %15786 = vst [vmem:[#allocation60_spill] sm:$0xff] %v8371_v30  ;;  %v8379_v9 = vpop.xlane.xlu2 %1232  ;;  %v665_v30 = vadd.f32 %v7897_v29, %v610_v14 }
 0x281   :  { %15787 = vst [vmem:[#allocation61_spill] sm:$0xff] %v8373_v47 }
 0x282   :  { %15788 = vst [vmem:[#allocation62_spill] sm:$0xff] %v8379_v9  ;;  %v8402_v14 = vmax.f32 %v665_v30, 0.0 }
 0x284   :  { %1832 = vadd.xlane.f32.xlu1 %v1831_v0  ;;  %1070 = vadd.xlane.f32.xlu0 %v1069_v49  ;;  %15792 = vst [vmem:[#allocation66_spill] sm:$0xff] %v8402_v14 }
 0x285   :  { %1259 = vadd.xlane.f32.xlu2 %v1258_v52  ;;  %v1450_v52 = vsel %vm756_vm1, %v1362_v27, 0.0  ;;  %v1554_v27 = vmul.f32 %v8328_v60, %v8062_v18 }
 0x286   :  { %v612_v47 = vpop.f32.mrf.mxu1 }
 0x287   :  { %v666_v22 = vadd.f32 %v7897_v29, %v612_v47  ;;  %v8390_v9 = vpop.xlane.xlu0 %1235  ;;  %v8392_v28 = vpop.xlane.xlu1 %1046  ;;  %v1261_v29 = vsel %vm756_vm1, %v1171_v17, 0.0  ;;  %v1813_v47 = vsel %vm756_vm1, %v1739_v32, 0.0  ;;  %v1363_v17 = vmul.f32 %v8359_v54, %v7977_v53 }
 0x288   :  { %15789 = vst [vmem:[#allocation63_spill] sm:$0xff] %v8390_v9  ;;  %v8398_v31 = vpop.xlane.xlu2 %1424  ;;  %v8411_v9 = vpop.f32.mrf.mxu2  ;;  %v980_v32 = vmul.f32 %v8383_v13, %v8157_v51 }
 0x289   :  { %15790 = vst [vmem:[#allocation64_spill] sm:$0xff] %v8392_v28  ;;  %v8404_v0 = vmax.f32 %v666_v22, 0.0 }
 0x28a   :  { %15791 = vst [vmem:[#allocation65_spill] sm:$0xff] %v8398_v31 }
 0x28b   :  { %15793 = vst [vmem:[#allocation67_spill] sm:$0xff] %v8404_v0  ;;  %v738_v49 = vpack.c.bf16 %v8404_v0, %v8402_v14 }
 0x28c   :  { %1262 = vadd.xlane.f32.xlu0 %v1261_v29  ;;  %1814 = vadd.xlane.f32.xlu1 %v1813_v47  ;;  %v1453_v29 = vsel %vm756_vm1, %v1363_v17, 0.0  ;;  %v1072_v47 = vsel %vm756_vm1, %v980_v32, 0.0  ;;  %v1746_v17 = vmul.f32 %v8328_v60, %v8216_v20 }
 0x28d   :  { %1451 = vadd.xlane.f32.xlu2 %v1450_v52  ;;  %7044 = vmatmul.msk.bf16.gmra.mxu2 %vm756_vm1, %v738_v49  ;;  %v1642_v49 = vsel %vm756_vm1, %v1554_v27, 0.0 }
 0x28f   :  { %v8414_v30 = vpop.xlane.xlu0 %1427  ;;  %v8416_v22 = vpop.xlane.xlu1 %1238 }
 0x290   :  { %15794 = vst [vmem:[#allocation68_spill] sm:$0xff] %v8414_v30  ;;  %v8422_v28 = vpop.xlane.xlu2 %1616 }
 0x291   :  { %15795 = vst [vmem:[#allocation69_spill] sm:$0xff] %v8416_v22  ;;  %v1555_v22 = vmul.f32 %v8359_v54, %v8073_v23 }
 0x292   :  { %15796 = vst [vmem:[#allocation70_spill] sm:$0xff] %v8422_v28  ;;  %v1172_v28 = vmul.f32 %v8383_v13, %v7933_v44 }
 0x293   :  { %v1645_v32 = vsel %vm756_vm1, %v1555_v22, 0.0 }
 0x294   :  { %1454 = vadd.xlane.f32.xlu0 %v1453_v29  ;;  %1073 = vadd.xlane.f32.xlu1 %v1072_v47  ;;  %v1264_v27 = vsel %vm756_vm1, %v1172_v28, 0.0  ;;  %v1834_v29 = vsel %vm756_vm1, %v1746_v17, 0.0  ;;  %v1740_v28 = vmul.f32 %v8142_v3, %v8248_v57 }
 0x295   :  { %1643 = vadd.xlane.f32.xlu2 %v1642_v49 }
 0x297   :  { %v8429_v52 = vpop.xlane.xlu1 %1430  ;;  %v8431_v30 = vpop.xlane.xlu0 %1619 }
 0x298   :  { %15797 = vst [vmem:[#allocation71_spill] sm:$0xff] %v8429_v52  ;;  %v8437_v31 = vpop.xlane.xlu2 %1049  ;;  %v1364_v52 = vmul.f32 %v8383_v13, %v7987_v6 }
 0x299   :  { %15798 = vst [vmem:[#allocation72_spill] sm:$0xff] %v8431_v30  ;;  %v1747_v30 = vmul.f32 %v8359_v54, %v8218_v43 }
 0x29a   :  { %15799 = vst [vmem:[#allocation73_spill] sm:$0xff] %v8437_v31  ;;  %v1456_v17 = vsel %vm756_vm1, %v1364_v52, 0.0 }
 0x29b   :  { %v1837_v22 = vsel %vm756_vm1, %v1747_v30, 0.0  ;;  %v1926_v30 = vmul.f32 %v8012_v46, %v8279_v25 }
 0x29c   :  { %1646 = vadd.xlane.f32.xlu0 %v1645_v32  ;;  %1265 = vadd.xlane.f32.xlu1 %v1264_v27  ;;  %v1816_v32 = vsel %vm756_vm1, %v1740_v28, 0.0 }
 0x29d   :  { %1835 = vadd.xlane.f32.xlu2 %v1834_v29 }
 0x29f   :  { %v8444_v47 = vpop.xlane.xlu0 %1052  ;;  %v8446_v49 = vpop.xlane.xlu1 %1622 }
 0x2a0   :  { %15800 = vst [vmem:[#allocation74_spill] sm:$0xff] %v8444_v47  ;;  %v8452_v31 = vpop.xlane.xlu2 %1241  ;;  %v1556_v47 = vmul.f32 %v8383_v13, %v8101_v36 }
 0x2a1   :  { %15801 = vst [vmem:[#allocation75_spill] sm:$0xff] %v8446_v49  ;;  %v1741_v49 = vmul.f32 %v8168_v41, %v8250_v1 }
 0x2a2   :  { %15802 = vst [vmem:[#allocation76_spill] sm:$0xff] %v8452_v31  ;;  %v1648_v52 = vsel %vm756_vm1, %v1556_v47, 0.0  ;;  %v981_v47 = vmul.f32 %v8411_v9, %v8174_v15 }
 0x2a3   :  { %v1819_v28 = vsel %vm756_vm1, %v1741_v49, 0.0 }
 0x2a4   :  { %1838 = vadd.xlane.f32.xlu0 %v1837_v22  ;;  %1457 = vadd.xlane.f32.xlu1 %v1456_v17  ;;  %v1990_v22 = vsel %vm756_vm1, %v1926_v30, 0.0 }
 0x2a5   :  { %1817 = vadd.xlane.f32.xlu2 %v1816_v32 }
 0x2a7   :  { %v8459_v27 = vpop.xlane.xlu0 %1244  ;;  %v8461_v29 = vpop.xlane.xlu1 %1055 }
 0x2a8   :  { %15803 = vst [vmem:[#allocation77_spill] sm:$0xff] %v8459_v27  ;;  %v8467_v31 = vpop.xlane.xlu2 %1433  ;;  %v1927_v27 = vmul.f32 %v8031_v2, %v8281_v21  ;;  %v1934_v2 = vmul.f32 %v8192_v61, %v8279_v25 }
 0x2a9   :  { %15804 = vst [vmem:[#allocation78_spill] sm:$0xff] %v8461_v29  ;;  %v1748_v29 = vmul.f32 %v8383_v13, %v8248_v57 }
 0x2aa   :  { %15805 = vst [vmem:[#allocation79_spill] sm:$0xff] %v8467_v31  ;;  %v1993_v30 = vsel %vm756_vm1, %v1927_v27, 0.0  ;;  %v1173_v27 = vmul.f32 %v8411_v9, %v7937_v48 }
 0x2ab   :  { %v1840_v49 = vsel %vm756_vm1, %v1748_v29, 0.0 }
 0x2ac   :  { %1649 = vadd.xlane.f32.xlu1 %v1648_v52  ;;  %1820 = vadd.xlane.f32.xlu0 %v1819_v28  ;;  %v8488_v52 = vpop.f32.mrf.mxu2  ;;  %v1075_v28 = vsel %vm756_vm1, %v981_v47, 0.0 }
 0x2ad   :  { %1991 = vadd.xlane.f32.xlu2 %v1990_v22 }
 0x2af   :  { %v8474_v17 = vpop.xlane.xlu0 %1436  ;;  %v8476_v32 = vpop.xlane.xlu1 %1247 }
 0x2b0   :  { %15806 = vst [vmem:[#allocation80_spill] sm:$0xff] %v8474_v17  ;;  %v8482_v46 = vpop.xlane.xlu2 %1625  ;;  %v982_v17 = vmul.f32 %v8488_v52, %v8010_v7 }
 0x2b1   :  { %15807 = vst [vmem:[#allocation81_spill] sm:$0xff] %v8476_v32 }
 0x2b2   :  { %15808 = vst [vmem:[#allocation82_spill] sm:$0xff] %v8482_v46  ;;  %v1078_v47 = vsel %vm756_vm1, %v982_v17, 0.0  ;;  %v1365_v17 = vmul.f32 %v8411_v9, %v7990_v12 }
 0x2b4   :  { %1841 = vadd.xlane.f32.xlu1 %v1840_v49  ;;  %1994 = vadd.xlane.f32.xlu0 %v1993_v30  ;;  %v2014_v49 = vsel %vm756_vm1, %v1934_v2, 0.0  ;;  %v1267_v30 = vsel %vm756_vm1, %v1173_v27, 0.0 }
 0x2b5   :  { %1076 = vadd.xlane.f32.xlu2 %v1075_v28 }
 0x2b7   :  { %v8491_v22 = vpop.xlane.xlu1 %1439  ;;  %v8493_v32 = vpop.xlane.xlu0 %1628 }
 0x2b8   :  { %15809 = vst [vmem:[#allocation83_spill] sm:$0xff] %v8491_v22  ;;  %v8499_v29 = vpop.xlane.xlu2 %1799  ;;  %v1174_v22 = vmul.f32 %v8488_v52, %v7902_v38 }
 0x2b9   :  { %15810 = vst [vmem:[#allocation84_spill] sm:$0xff] %v8493_v32  ;;  %v1928_v32 = vmul.f32 %v8048_v45, %v8318_v56  ;;  %v1366_v45 = vmul.f32 %v8488_v52, %v7948_v8 }
 0x2ba   :  { %15811 = vst [vmem:[#allocation85_spill] sm:$0xff] %v8499_v29  ;;  %v1270_v2 = vsel %vm756_vm1, %v1174_v22, 0.0 }
 0x2bb   :  { %v1996_v27 = vsel %vm756_vm1, %v1928_v32, 0.0  ;;  %v1557_v32 = vmul.f32 %v8411_v9, %v8112_v37 }
 0x2bc   :  { %2015 = vadd.xlane.f32.xlu1 %v2014_v49  ;;  %1079 = vadd.xlane.f32.xlu0 %v1078_v47  ;;  %v8520_v49 = vpop.f32.mrf.mxu2  ;;  %v1459_v47 = vsel %vm756_vm1, %v1365_v17, 0.0  ;;  %v1462_v17 = vsel %vm756_vm1, %v1366_v45, 0.0 }
 0x2bd   :  { %1268 = vadd.xlane.f32.xlu2 %v1267_v30 }
 0x2bf   :  { %v8506_v28 = vpop.xlane.xlu1 %1631  ;;  %v8508_v61 = vpop.xlane.xlu0 %1802 }
 0x2c0   :  { %15812 = vst [vmem:[#allocation86_spill] sm:$0xff] %v8506_v28  ;;  %v8514_v46 = vpop.xlane.xlu2 %1058 }
 0x2c1   :  { %15813 = vst [vmem:[#allocation87_spill] sm:$0xff] %v8508_v61 }
 0x2c2   :  { %15814 = vst [vmem:[#allocation88_spill] sm:$0xff] %v8514_v46  ;;  %v983_v46 = vmul.f32 %v8520_v49, %v8024_v59 }
 0x2c4   :  { %1271 = vadd.xlane.f32.xlu0 %v1270_v2  ;;  %1997 = vadd.xlane.f32.xlu1 %v1996_v27  ;;  %v1081_v2 = vsel %vm756_vm1, %v983_v46, 0.0  ;;  %v1651_v27 = vsel %vm756_vm1, %v1557_v32, 0.0  ;;  %v1749_v46 = vmul.f32 %v8411_v9, %v8250_v1 }
 0x2c5   :  { %1460 = vadd.xlane.f32.xlu2 %v1459_v47 }
 0x2c7   :  { %v8523_v30 = vpop.xlane.xlu1 %1823  ;;  %v8525_v28 = vpop.xlane.xlu0 %1061 }
 0x2c8   :  { %15815 = vst [vmem:[#allocation89_spill] sm:$0xff] %v8523_v30  ;;  %v8531_v22 = vpop.xlane.xlu2 %1250  ;;  %v1558_v30 = vmul.f32 %v8488_v52, %v8000_v26 }
 0x2c9   :  { %15816 = vst [vmem:[#allocation90_spill] sm:$0xff] %v8525_v28 }
 0x2ca   :  { %15817 = vst [vmem:[#allocation91_spill] sm:$0xff] %v8531_v22  ;;  %v1175_v22 = vmul.f32 %v8520_v49, %v7904_v40  ;;  %v1654_v45 = vsel %vm756_vm1, %v1558_v30, 0.0  ;;  %v1935_v30 = vmul.f32 %v8235_v4, %v8281_v21 }
 0x2cc   :  { %1463 = vadd.xlane.f32.xlu0 %v1462_v17  ;;  %1082 = vadd.xlane.f32.xlu1 %v1081_v2  ;;  %v1273_v32 = vsel %vm756_vm1, %v1175_v22, 0.0  ;;  %v1843_v17 = vsel %vm756_vm1, %v1749_v46, 0.0 }
 0x2cd   :  { %1652 = vadd.xlane.f32.xlu2 %v1651_v27 }
 0x2cf   :  { %v8538_v47 = vpop.xlane.xlu0 %1253  ;;  %v8540_v28 = vpop.xlane.xlu1 %1805 }
 0x2d0   :  { %15818 = vst [vmem:[#allocation92_spill] sm:$0xff] %v8538_v47  ;;  %v8546_v31 = vpop.xlane.xlu2 %1442  ;;  %v1750_v47 = vmul.f32 %v8488_v52, %v8146_v35 }
 0x2d1   :  { %15819 = vst [vmem:[#allocation93_spill] sm:$0xff] %v8540_v28 }
 0x2d2   :  { %15820 = vst [vmem:[#allocation94_spill] sm:$0xff] %v8546_v31  ;;  %v1367_v31 = vmul.f32 %v8520_v49, %v7951_v11  ;;  %v1846_v22 = vsel %vm756_vm1, %v1750_v47, 0.0 }
 0x2d4   :  { %1655 = vadd.xlane.f32.xlu0 %v1654_v45  ;;  %1274 = vadd.xlane.f32.xlu1 %v1273_v32  ;;  %v1465_v46 = vsel %vm756_vm1, %v1367_v31, 0.0  ;;  %v2017_v45 = vsel %vm756_vm1, %v1935_v30, 0.0  ;;  %v1929_v31 = vmul.f32 %v8069_v55, %v8320_v19  ;;  %v1751_v55 = vmul.f32 %v8520_v49, %v8148_v62 }
 0x2d5   :  { %1844 = vadd.xlane.f32.xlu2 %v1843_v17 }
 0x2d7   :  { %v8553_v2 = vpop.xlane.xlu0 %1445  ;;  %v8555_v27 = vpop.xlane.xlu1 %1064 }
 0x2d8   :  { %15821 = vst [vmem:[#allocation95_spill] sm:$0xff] %v8553_v2  ;;  %v8561_v28 = vpop.xlane.xlu2 %1634  ;;  %v1942_v2 = vmul.f32 %v8488_v52, %v8279_v25 }
 0x2d9   :  { %15822 = vst [vmem:[#allocation96_spill] sm:$0xff] %v8555_v27  ;;  %v1559_v27 = vmul.f32 %v8520_v49, %v8003_v33 }
 0x2da   :  { %15823 = vst [vmem:[#allocation97_spill] sm:$0xff] %v8561_v28  ;;  %v2038_v47 = vsel %vm756_vm1, %v1942_v2, 0.0 }
 0x2db   :  { %v1657_v30 = vsel %vm756_vm1, %v1559_v27, 0.0  ;;  %v15830_v27 = vld [vmem:[#allocation24_spill] sm:$0xff] }
 0x2dc   :  { %1847 = vadd.xlane.f32.xlu0 %v1846_v22  ;;  %1466 = vadd.xlane.f32.xlu1 %v1465_v46  ;;  %v1999_v22 = vsel %vm756_vm1, %v1929_v31, 0.0  ;;  %v8583_v46 = vpop.f32.mrf.mxu2 }
 0x2dd   :  { %2018 = vadd.xlane.f32.xlu2 %v2017_v45 }
 0x2df   :  { %v8568_v32 = vpop.xlane.xlu0 %1637  ;;  %v8570_v17 = vpop.xlane.xlu1 %1256 }
 0x2e0   :  { %15824 = vst [vmem:[#allocation98_spill] sm:$0xff] %v8568_v32  ;;  %v8576_v4 = vpop.xlane.xlu2 %1826  ;;  %v1936_v32 = vmul.f32 %v8256_v5, %v8318_v56 }
 0x2e1   :  { %15825 = vst [vmem:[#allocation99_spill] sm:$0xff] %v8570_v17  ;;  %v1930_v17 = vmul.f32 %v8093_v39, %v8361_v58  ;;  %v1937_v39 = vmul.f32 %v8287_v10, %v8320_v19 }
 0x2e2   :  { %15826 = vst [vmem:[#allocation100_spill] sm:$0xff] %v8576_v4  ;;  %v2020_v31 = vsel %vm756_vm1, %v1936_v32, 0.0  ;;  %v15834_v32 = vld [vmem:[#allocation4_spill] sm:$0xff] }
 0x2e4   :  { %2039 = vadd.xlane.f32.xlu0 %v2038_v47  ;;  %1658 = vadd.xlane.f32.xlu1 %v1657_v30  ;;  %v984_v47 = vmul.f32 %v8583_v46, %v15830_v27  ;;  %v1849_v30 = vsel %vm756_vm1, %v1751_v55, 0.0  ;;  %v1176_v55 = vmul.f32 %v8583_v46, %v15834_v32 }
 0x2e5   :  { %2000 = vadd.xlane.f32.xlu2 %v1999_v22 }
 0x2e6   :  { %v1084_v22 = vsel %vm756_vm1, %v984_v47, 0.0  ;;  %v2002_v47 = vsel %vm756_vm1, %v1930_v17, 0.0  ;;  %v15839_v17 = vld [vmem:[#allocation12_spill] sm:$0xff] }
 0x2e7   :  { %v8585_v52 = vpop.xlane.xlu0 %1829  ;;  %v8587_v45 = vpop.xlane.xlu1 %1448 }
 0x2e8   :  { %15827 = vst [vmem:[#allocation101_spill] sm:$0xff] %v8585_v52  ;;  %v8593_v2 = vpop.xlane.xlu2 %1808 }
 0x2e9   :  { %15828 = vst [vmem:[#allocation102_spill] sm:$0xff] %v8587_v45  ;;  %v1943_v45 = vmul.f32 %v8520_v49, %v8281_v21 }
 0x2ea   :  { %15829 = vst [vmem:[#allocation103_spill] sm:$0xff] %v8593_v2 }
 0x2ec   :  { %2021 = vadd.xlane.f32.xlu0 %v2020_v31  ;;  %1850 = vadd.xlane.f32.xlu1 %v1849_v30  ;;  %v2041_v31 = vsel %vm756_vm1, %v1943_v45, 0.0  ;;  %v8614_v30 = vpop.f32.mrf.mxu2 }
 0x2ed   :  { %1085 = vadd.xlane.f32.xlu2 %v1084_v22  ;;  %v1276_v22 = vsel %vm756_vm1, %v1176_v55, 0.0 }
 0x2ef   :  { %v8600_v52 = vpop.xlane.xlu1 %1640  ;;  %v8602_v5 = vpop.xlane.xlu0 %1811 }
 0x2f0   :  { %15831 = vst [vmem:[#allocation104_spill] sm:$0xff] %v8600_v52  ;;  %v8608_v4 = vpop.xlane.xlu2 %1067 }
 0x2f1   :  { %15832 = vst [vmem:[#allocation105_spill] sm:$0xff] %v8602_v5  ;;  %v1368_v5 = vmul.f32 %v8583_v46, %v15839_v17 }
 0x2f2   :  { %15833 = vst [vmem:[#allocation106_spill] sm:$0xff] %v8608_v4  ;;  %v15837_v4 = vld [vmem:[#allocation27_spill] sm:$0xff] }
 0x2f3   :  { %v985_v28 = vmul.f32 %v8614_v30, %v15837_v4 }
 0x2f4   :  { %2042 = vadd.xlane.f32.xlu1 %v2041_v31  ;;  %2003 = vadd.xlane.f32.xlu0 %v2002_v47  ;;  %v2023_v31 = vsel %vm756_vm1, %v1937_v39, 0.0  ;;  %v1468_v47 = vsel %vm756_vm1, %v1368_v5, 0.0  ;;  %v15843_v39 = vld [vmem:[#allocation22_spill] sm:$0xff] }
 0x2f5   :  { %1277 = vadd.xlane.f32.xlu2 %v1276_v22  ;;  %v1087_v55 = vsel %vm756_vm1, %v985_v28, 0.0  ;;  %v1560_v28 = vmul.f32 %v8583_v46, %v15843_v39 }
 0x2f7   :  { %v8617_v49 = vpop.xlane.xlu1 %1832  ;;  %v8619_v52 = vpop.xlane.xlu0 %1070 }
 0x2f8   :  { %15835 = vst [vmem:[#allocation107_spill] sm:$0xff] %v8617_v49  ;;  %v8625_v45 = vpop.xlane.xlu2 %1259  ;;  %v1931_v49 = vmul.f32 %v8118_v42, %v8363_v16  ;;  %v15846_v42 = vld [vmem:[#allocation13_spill] sm:$0xff] }
 0x2f9   :  { %15836 = vst [vmem:[#allocation108_spill] sm:$0xff] %v8619_v52  ;;  %v1177_v52 = vmul.f32 %v8614_v30, %v7915_v63 }
 0x2fa   :  { %15838 = vst [vmem:[#allocation109_spill] sm:$0xff] %v8625_v45  ;;  %v2005_v5 = vsel %vm756_vm1, %v1931_v49, 0.0  ;;  %v15848_v49 = vld [vmem:[#allocation36_spill] sm:$0xff] }
 0x2fb   :  { %v1752_v61 = vmul.f32 %v8583_v46, %v15848_v49 }
 0x2fc   :  { %2024 = vadd.xlane.f32.xlu1 %v2023_v31  ;;  %1088 = vadd.xlane.f32.xlu0 %v1087_v55  ;;  %v1279_v31 = vsel %vm756_vm1, %v1177_v52, 0.0  ;;  %v8646_v55 = vpop.f32.mrf.mxu2 }
 0x2fd   :  { %1469 = vadd.xlane.f32.xlu2 %v1468_v47  ;;  %v1660_v47 = vsel %vm756_vm1, %v1560_v28, 0.0  ;;  %v986_v2 = vmul.f32 %v8646_v55, %v8099_v34 }
 0x2ff   :  { %v8632_v22 = vpop.xlane.xlu0 %1262  ;;  %v8634_v10 = vpop.xlane.xlu1 %1814 }
 0x300   :  { %15840 = vst [vmem:[#allocation110_spill] sm:$0xff] %v8632_v22  ;;  %v8640_v45 = vpop.xlane.xlu2 %1451 }
 0x301   :  { %15841 = vst [vmem:[#allocation111_spill] sm:$0xff] %v8634_v10 }
 0x302   :  { %15842 = vst [vmem:[#allocation112_spill] sm:$0xff] %v8640_v45  ;;  %v1369_v45 = vmul.f32 %v8614_v30, %v15846_v42 }
 0x304   :  { %1280 = vadd.xlane.f32.xlu0 %v1279_v31  ;;  %2006 = vadd.xlane.f32.xlu1 %v2005_v5  ;;  %v1471_v28 = vsel %vm756_vm1, %v1369_v45, 0.0  ;;  %v1090_v31 = vsel %vm756_vm1, %v986_v2, 0.0  ;;  %v1852_v5 = vsel %vm756_vm1, %v1752_v61, 0.0  ;;  %v1944_v2 = vmul.f32 %v8583_v46, %v8318_v56 }
 0x305   :  { %1661 = vadd.xlane.f32.xlu2 %v1660_v47 }
 0x307   :  { %v8649_v22 = vpop.xlane.xlu0 %1454  ;;  %v8651_v10 = vpop.xlane.xlu1 %1073 }
 0x308   :  { %15844 = vst [vmem:[#allocation113_spill] sm:$0xff] %v8649_v22  ;;  %v8657_v52 = vpop.xlane.xlu2 %1643  ;;  %v15851_v22 = vld [vmem:[#allocation23_spill] sm:$0xff] }
 0x309   :  { %15845 = vst [vmem:[#allocation114_spill] sm:$0xff] %v8651_v10  ;;  %v1561_v29 = vmul.f32 %v8614_v30, %v15851_v22 }
 0x30a   :  { %15847 = vst [vmem:[#allocation115_spill] sm:$0xff] %v8657_v52  ;;  %v15852_v52 = vld [vmem:[#allocation6_spill] sm:$0xff] }
 0x30b   :  { %v1178_v34 = vmul.f32 %v8646_v55, %v15852_v52  ;;  %v1663_v61 = vsel %vm756_vm1, %v1561_v29, 0.0 }
 0x30c   :  { %1472 = vadd.xlane.f32.xlu0 %v1471_v28  ;;  %1091 = vadd.xlane.f32.xlu1 %v1090_v31  ;;  %v2044_v28 = vsel %vm756_vm1, %v1944_v2, 0.0 }
 0x30d   :  { %1853 = vadd.xlane.f32.xlu2 %v1852_v5  ;;  %v1282_v45 = vsel %vm756_vm1, %v1178_v34, 0.0  ;;  %v1938_v34 = vmul.f32 %v8328_v60, %v8361_v58 }
 0x30f   :  { %v8664_v47 = vpop.xlane.xlu0 %1646  ;;  %v8666_v10 = vpop.xlane.xlu1 %1265 }
 0x310   :  { %15849 = vst [vmem:[#allocation116_spill] sm:$0xff] %v8664_v47  ;;  %v8672_v42 = vpop.xlane.xlu2 %1835 }
 0x311   :  { %15850 = vst [vmem:[#allocation117_spill] sm:$0xff] %v8666_v10  ;;  %v15856_v10 = vld [vmem:[#allocation37_spill] sm:$0xff] }
 0x312   :  { %15853 = vst [vmem:[#allocation118_spill] sm:$0xff] %v8672_v42  ;;  %v1753_v47 = vmul.f32 %v8614_v30, %v15856_v10  ;;  %v1370_v42 = vmul.f32 %v8646_v55, %v7974_v50 }
 0x314   :  { %1664 = vadd.xlane.f32.xlu0 %v1663_v61  ;;  %1283 = vadd.xlane.f32.xlu1 %v1282_v45  ;;  %v1855_v29 = vsel %vm756_vm1, %v1753_v47, 0.0  ;;  %v1474_v2 = vsel %vm756_vm1, %v1370_v42, 0.0  ;;  %v2026_v61 = vsel %vm756_vm1, %v1938_v34, 0.0  ;;  %v1932_v42 = vmul.f32 %v8142_v3, %v8402_v14 }
 0x315   :  { %2045 = vadd.xlane.f32.xlu2 %v2044_v28  ;;  %v1754_v3 = vmul.f32 %v8646_v55, %v8216_v20 }
 0x317   :  { %v8679_v31 = vpop.xlane.xlu0 %1838  ;;  %v8681_v5 = vpop.xlane.xlu1 %1457 }
 0x318   :  { %15854 = vst [vmem:[#allocation119_spill] sm:$0xff] %v8679_v31  ;;  %v8687_v46 = vpop.xlane.xlu2 %1817  ;;  %v1562_v31 = vmul.f32 %v8646_v55, %v8062_v18 }
 0x319   :  { %15855 = vst [vmem:[#allocation120_spill] sm:$0xff] %v8681_v5  ;;  %v1945_v5 = vmul.f32 %v8614_v30, %v8320_v19 }
 0x31a   :  { %15857 = vst [vmem:[#allocation121_spill] sm:$0xff] %v8687_v46  ;;  %v1666_v34 = vsel %vm756_vm1, %v1562_v31, 0.0  ;;  %v15862_v31 = vld [vmem:[#allocation31_spill] sm:$0xff] }
 0x31b   :  { %v2047_v47 = vsel %vm756_vm1, %v1945_v5, 0.0 }
 0x31c   :  { %1856 = vadd.xlane.f32.xlu0 %v1855_v29  ;;  %1475 = vadd.xlane.f32.xlu1 %v1474_v2  ;;  %v2008_v29 = vsel %vm756_vm1, %v1932_v42, 0.0  ;;  %v8709_v2 = vpop.f32.mrf.mxu2 }
 0x31d   :  { %2027 = vadd.xlane.f32.xlu2 %v2026_v61 }
 0x31f   :  { %v8694_v45 = vpop.xlane.xlu1 %1649  ;;  %v8696_v28 = vpop.xlane.xlu0 %1820 }
 0x320   :  { %15858 = vst [vmem:[#allocation122_spill] sm:$0xff] %v8694_v45  ;;  %v8702_v60 = vpop.xlane.xlu2 %1991  ;;  %v1939_v45 = vmul.f32 %v8359_v54, %v8363_v16 }
 0x321   :  { %15859 = vst [vmem:[#allocation123_spill] sm:$0xff] %v8696_v28  ;;  %v1946_v28 = vmul.f32 %v8646_v55, %v8361_v58 }
 0x322   :  { %v2029_v42 = vsel %vm756_vm1, %v1939_v45, 0.0  ;;  %v1179_v45 = vmul.f32 %v8709_v2, %v7926_v24 }
 0x324   :  { %2048 = vadd.xlane.f32.xlu0 %v2047_v47  ;;  %1667 = vadd.xlane.f32.xlu1 %v1666_v34  ;;  %v987_v47 = vmul.f32 %v8709_v2, %v15862_v31  ;;  %v1858_v34 = vsel %vm756_vm1, %v1754_v3, 0.0  ;;  %v8738_v3 = vpop.f32.mrf.mxu1 }
 0x325   :  { %2009 = vadd.xlane.f32.xlu2 %v2008_v29 }
 0x326   :  { %v1093_v29 = vsel %vm756_vm1, %v987_v47, 0.0  ;;  %v2050_v47 = vsel %vm756_vm1, %v1946_v28, 0.0  ;;  %v1371_v28 = vmul.f32 %v8709_v2, %v7977_v53 }
 0x327   :  { %v8711_v30 = vpop.xlane.xlu1 %1841  ;;  %v8713_v61 = vpop.xlane.xlu0 %1994 }
 0x328   :  { %15860 = vst [vmem:[#allocation124_spill] sm:$0xff] %v8711_v30  ;;  %v8719_v5 = vpop.xlane.xlu2 %1076 }
 0x329   :  { %15861 = vst [vmem:[#allocation125_spill] sm:$0xff] %v8719_v5  ;;  %v1933_v5 = vmul.f32 %v8168_v41, %v8404_v0  ;;  %v1940_v41 = vmul.f32 %v8383_v13, %v8402_v14 }
 0x32c   :  { %2030 = vadd.xlane.f32.xlu0 %v2029_v42  ;;  %1859 = vadd.xlane.f32.xlu1 %v1858_v34  ;;  %v2011_v42 = vsel %vm756_vm1, %v1933_v5, 0.0  ;;  %v1285_v34 = vsel %vm756_vm1, %v1179_v45, 0.0  ;;  %v2032_v5 = vsel %vm756_vm1, %v1940_v41, 0.0 }
 0x32d   :  { %1094 = vadd.xlane.f32.xlu2 %v1093_v29 }
 0x32f   :  { %v8726_v30 = vpop.xlane.xlu1 %2015  ;;  %v8728_v54 = vpop.xlane.xlu0 %1079 }
 0x330   :  { %15863 = vst [vmem:[#allocation126_spill] sm:$0xff] %v8726_v30  ;;  %v8734_v46 = vpop.xlane.xlu2 %1268 }
 0x331   :  { %15864 = vst [vmem:[#allocation127_spill] sm:$0xff] %v8728_v54  ;;  %v958_v54 = vmul.f32 %v8738_v3, %v8010_v7 }
 0x332   :  { %15865 = vst [vmem:[#allocation128_spill] sm:$0xff] %v8734_v46 }
 0x333   :  { %v1006_v45 = vsel %vm756_vm1, %v958_v54, 0.0  ;;  %v1563_v54 = vmul.f32 %v8709_v2, %v8073_v23 }
 0x334   :  { %2051 = vadd.xlane.f32.xlu1 %v2050_v47  ;;  %2012 = vadd.xlane.f32.xlu0 %v2011_v42  ;;  %v8757_v47 = vpop.f32.mrf.mxu1  ;;  %v1477_v42 = vsel %vm756_vm1, %v1371_v28, 0.0 }
 0x335   :  { %1286 = vadd.xlane.f32.xlu2 %v1285_v34 }
 0x337   :  { %v8743_v55 = vpop.xlane.xlu0 %1271  ;;  %v8745_v29 = vpop.xlane.xlu1 %1997 }
 0x338   :  { %15866 = vst [vmem:[#allocation129_spill] sm:$0xff] %v8743_v55  ;;  %v8751_v46 = vpop.xlane.xlu2 %1460  ;;  %v1151_v55 = vmul.f32 %v8757_v47, %v7904_v40 }
 0x339   :  { %15867 = vst [vmem:[#allocation130_spill] sm:$0xff] %v8745_v29 }
 0x33a   :  { %15868 = vst [vmem:[#allocation131_spill] sm:$0xff] %v8751_v46  ;;  %v1150_v46 = vmul.f32 %v8738_v3, %v7902_v38 }
 0x33c   :  { %2033 = vadd.xlane.f32.xlu1 %v2032_v5  ;;  %1007 = vadd.xlane.f32.xlu0 %v1006_v45  ;;  %v1201_v5 = vsel %vm756_vm1, %v1151_v55, 0.0  ;;  %v1198_v28 = vsel %vm756_vm1, %v1150_v46, 0.0  ;;  %v1669_v45 = vsel %vm756_vm1, %v1563_v54, 0.0  ;;  %v1755_v46 = vmul.f32 %v8709_v2, %v8218_v43 }
 0x33d   :  { %1478 = vadd.xlane.f32.xlu2 %v1477_v42 }
 0x33f   :  { %v8760_v13 = vpop.xlane.xlu0 %1463  ;;  %v8762_v34 = vpop.xlane.xlu1 %1082 }
 0x340   :  { %15869 = vst [vmem:[#allocation132_spill] sm:$0xff] %v8760_v13  ;;  %v8768_v41 = vpop.xlane.xlu2 %1652 }
 0x341   :  { %15870 = vst [vmem:[#allocation133_spill] sm:$0xff] %v8762_v34  ;;  %v1343_v34 = vmul.f32 %v8757_v47, %v7951_v11 }
 0x342   :  { %15871 = vst [vmem:[#allocation134_spill] sm:$0xff] %v8768_v41  ;;  %v1342_v41 = vmul.f32 %v8738_v3, %v7948_v8 }
 0x343   :  { %v1393_v55 = vsel %vm756_vm1, %v1343_v34, 0.0  ;;  %v1947_v34 = vmul.f32 %v8709_v2, %v8363_v16 }
 0x344   :  { %1202 = vadd.xlane.f32.xlu1 %v1201_v5  ;;  %1199 = vadd.xlane.f32.xlu0 %v1198_v28  ;;  %v1390_v54 = vsel %vm756_vm1, %v1342_v41, 0.0  ;;  %v1861_v5 = vsel %vm756_vm1, %v1755_v46, 0.0 }
 0x345   :  { %1670 = vadd.xlane.f32.xlu2 %v1669_v45 }
 0x347   :  { %v8775_v42 = vpop.xlane.xlu0 %1655  ;;  %v8777_v13 = vpop.xlane.xlu1 %1274 }
 0x348   :  { %15872 = vst [vmem:[#allocation135_spill] sm:$0xff] %v8775_v42  ;;  %v8783_v30 = vpop.xlane.xlu2 %1844  ;;  %v1535_v42 = vmul.f32 %v8757_v47, %v8003_v33 }
 0x349   :  { %15873 = vst [vmem:[#allocation136_spill] sm:$0xff] %v8777_v13  ;;  %v1534_v13 = vmul.f32 %v8738_v3, %v8000_v26 }
 0x34a   :  { %15874 = vst [vmem:[#allocation137_spill] sm:$0xff] %v8783_v30  ;;  %v1585_v41 = vsel %vm756_vm1, %v1535_v42, 0.0  ;;  %v8817_v42 = vpop.f32.mrf.mxu2 }
 0x34b   :  { %v1582_v46 = vsel %vm756_vm1, %v1534_v13, 0.0  ;;  %v1941_v13 = vmul.f32 %v8411_v9, %v8404_v0  ;;  %v1919_v9 = vmul.f32 %v8757_v47, %v8281_v21 }
 0x34c   :  { %1394 = vadd.xlane.f32.xlu1 %v1393_v55  ;;  %1391 = vadd.xlane.f32.xlu0 %v1390_v54  ;;  %v2053_v55 = vsel %vm756_vm1, %v1947_v34, 0.0 }
 0x34d   :  { %1862 = vadd.xlane.f32.xlu2 %v1861_v5 }
 0x34f   :  { %v8790_v28 = vpop.xlane.xlu0 %1847  ;;  %v8792_v45 = vpop.xlane.xlu1 %1466 }
 0x350   :  { %15875 = vst [vmem:[#allocation138_spill] sm:$0xff] %v8790_v28  ;;  %v8798_v30 = vpop.xlane.xlu2 %2018  ;;  %v1727_v28 = vmul.f32 %v8757_v47, %v8148_v62 }
 0x351   :  { %15876 = vst [vmem:[#allocation139_spill] sm:$0xff] %v8792_v45  ;;  %v1726_v45 = vmul.f32 %v8738_v3, %v8146_v35 }
 0x352   :  { %15877 = vst [vmem:[#allocation140_spill] sm:$0xff] %v8798_v30  ;;  %v1777_v34 = vsel %vm756_vm1, %v1727_v28, 0.0  ;;  %v1918_v30 = vmul.f32 %v8738_v3, %v8279_v25 }
 0x354   :  { %1586 = vadd.xlane.f32.xlu1 %v1585_v41  ;;  %1583 = vadd.xlane.f32.xlu0 %v1582_v46  ;;  %v1774_v41 = vsel %vm756_vm1, %v1726_v45, 0.0  ;;  %v2035_v46 = vsel %vm756_vm1, %v1941_v13, 0.0  ;;  %v1969_v13 = vsel %vm756_vm1, %v1919_v9, 0.0 }
 0x355   :  { %2054 = vadd.xlane.f32.xlu2 %v2053_v55  ;;  %v8822_v55 = vpop.f32.mrf.mxu1 }
 0x356   :  { %v1152_v45 = vmul.f32 %v8822_v55, %v15834_v32 }
 0x357   :  { %v8805_v54 = vpop.xlane.xlu0 %2039  ;;  %v8807_v5 = vpop.xlane.xlu1 %1658 }
 0x358   :  { %15878 = vst [vmem:[#allocation141_spill] sm:$0xff] %v8805_v54  ;;  %v8813_v2 = vpop.xlane.xlu2 %2000 }
 0x359   :  { %15879 = vst [vmem:[#allocation142_spill] sm:$0xff] %v8807_v5 }
 0x35c   :  { %1778 = vadd.xlane.f32.xlu1 %v1777_v34  ;;  %1775 = vadd.xlane.f32.xlu0 %v1774_v41  ;;  %v1966_v34 = vsel %vm756_vm1, %v1918_v30, 0.0  ;;  %v8838_v41 = vpop.f32.mrf.mxu2  ;;  %v1344_v30 = vmul.f32 %v8822_v55, %v15839_v17 }
 0x35d   :  { %2036 = vadd.xlane.f32.xlu2 %v2035_v46  ;;  %v1204_v46 = vsel %vm756_vm1, %v1152_v45, 0.0  ;;  %v989_v3 = vmul.f32 %v8838_v41, %v8174_v15 }
 0x35f   :  { %v8824_v54 = vpop.xlane.xlu0 %2021  ;;  %v8826_v5 = vpop.xlane.xlu1 %1850 }
 0x360   :  { %15880 = vst [vmem:[#allocation143_spill] sm:$0xff] %v8824_v54  ;;  %v8832_v28 = vpop.xlane.xlu2 %1085 }
 0x361   :  { %15881 = vst [vmem:[#allocation144_spill] sm:$0xff] %v8826_v5 }
 0x362   :  { %15882 = vst [vmem:[#allocation145_spill] sm:$0xff] %v8832_v28  ;;  %v988_v28 = vmul.f32 %v8817_v42, %v8157_v51 }
 0x364   :  { %1970 = vadd.xlane.f32.xlu1 %v1969_v13  ;;  %1967 = vadd.xlane.f32.xlu0 %v1966_v34  ;;  %v1099_v13 = vsel %vm756_vm1, %v989_v3, 0.0  ;;  %v1096_v45 = vsel %vm756_vm1, %v988_v28, 0.0  ;;  %v1396_v34 = vsel %vm756_vm1, %v1344_v30, 0.0  ;;  %v1536_v28 = vmul.f32 %v8822_v55, %v15843_v39 }
 0x365   :  { %1205 = vadd.xlane.f32.xlu2 %v1204_v46 }
 0x367   :  { %v8841_v5 = vpop.xlane.xlu1 %2042  ;;  %v8843_v54 = vpop.xlane.xlu0 %2003 }
 0x368   :  { %15883 = vst [vmem:[#allocation146_spill] sm:$0xff] %v8841_v5  ;;  %v8849_v9 = vpop.xlane.xlu2 %1277 }
 0x369   :  { %15884 = vst [vmem:[#allocation147_spill] sm:$0xff] %v8843_v54  ;;  %v1181_v54 = vmul.f32 %v8838_v41, %v7937_v48 }
 0x36a   :  { %15885 = vst [vmem:[#allocation148_spill] sm:$0xff] %v8849_v9  ;;  %v1180_v9 = vmul.f32 %v8817_v42, %v7933_v44 }
 0x36b   :  { %v1291_v3 = vsel %vm756_vm1, %v1181_v54, 0.0  ;;  %v1728_v54 = vmul.f32 %v8822_v55, %v15848_v49 }
 0x36c   :  { %1100 = vadd.xlane.f32.xlu1 %v1099_v13  ;;  %1097 = vadd.xlane.f32.xlu0 %v1096_v45  ;;  %v1288_v30 = vsel %vm756_vm1, %v1180_v9, 0.0  ;;  %v1588_v13 = vsel %vm756_vm1, %v1536_v28, 0.0 }
 0x36d   :  { %1397 = vadd.xlane.f32.xlu2 %v1396_v34 }
 0x36f   :  { %v8856_v46 = vpop.xlane.xlu1 %2024  ;;  %v8858_v5 = vpop.xlane.xlu0 %1088 }
 0x370   :  { %15886 = vst [vmem:[#allocation149_spill] sm:$0xff] %v8856_v46  ;;  %v8864_v29 = vpop.xlane.xlu2 %1469 }
 0x371   :  { %15887 = vst [vmem:[#allocation150_spill] sm:$0xff] %v8858_v5  ;;  %v1373_v5 = vmul.f32 %v8838_v41, %v7990_v12 }
 0x372   :  { %15888 = vst [vmem:[#allocation151_spill] sm:$0xff] %v8864_v29  ;;  %v1372_v29 = vmul.f32 %v8817_v42, %v7987_v6 }
 0x373   :  { %v1483_v9 = vsel %vm756_vm1, %v1373_v5, 0.0 }
 0x374   :  { %1292 = vadd.xlane.f32.xlu1 %v1291_v3  ;;  %1289 = vadd.xlane.f32.xlu0 %v1288_v30  ;;  %v1480_v28 = vsel %vm756_vm1, %v1372_v29, 0.0  ;;  %v1780_v3 = vsel %vm756_vm1, %v1728_v54, 0.0  ;;  %v1920_v29 = vmul.f32 %v8822_v55, %v8318_v56 }
 0x375   :  { %1589 = vadd.xlane.f32.xlu2 %v1588_v13 }
 0x377   :  { %v8871_v45 = vpop.xlane.xlu0 %1280  ;;  %v8873_v34 = vpop.xlane.xlu1 %2006 }
 0x378   :  { %15889 = vst [vmem:[#allocation152_spill] sm:$0xff] %v8871_v45  ;;  %v8879_v46 = vpop.xlane.xlu2 %1661  ;;  %v1565_v45 = vmul.f32 %v8838_v41, %v8112_v37 }
 0x379   :  { %15890 = vst [vmem:[#allocation153_spill] sm:$0xff] %v8873_v34 }
 0x37a   :  { %15891 = vst [vmem:[#allocation154_spill] sm:$0xff] %v8879_v46  ;;  %v1564_v46 = vmul.f32 %v8817_v42, %v8101_v36  ;;  %v1675_v5 = vsel %vm756_vm1, %v1565_v45, 0.0 }
 0x37c   :  { %1484 = vadd.xlane.f32.xlu1 %v1483_v9  ;;  %1481 = vadd.xlane.f32.xlu0 %v1480_v28  ;;  %v1672_v54 = vsel %vm756_vm1, %v1564_v46, 0.0  ;;  %v1972_v9 = vsel %vm756_vm1, %v1920_v29, 0.0  ;;  %v8901_v28 = vpop.f32.mrf.mxu2 }
 0x37d   :  { %1781 = vadd.xlane.f32.xlu2 %v1780_v3  ;;  %v990_v46 = vmul.f32 %v8901_v28, %v8010_v7 }
 0x37f   :  { %v8886_v30 = vpop.xlane.xlu0 %1472  ;;  %v8888_v13 = vpop.xlane.xlu1 %1091 }
 0x380   :  { %15892 = vst [vmem:[#allocation155_spill] sm:$0xff] %v8886_v30  ;;  %v8894_v34 = vpop.xlane.xlu2 %1853  ;;  %v1757_v30 = vmul.f32 %v8838_v41, %v8250_v1 }
 0x381   :  { %15893 = vst [vmem:[#allocation156_spill] sm:$0xff] %v8888_v13 }
 0x382   :  { %15894 = vst [vmem:[#allocation157_spill] sm:$0xff] %v8894_v34  ;;  %v1756_v34 = vmul.f32 %v8817_v42, %v8248_v57  ;;  %v1867_v29 = vsel %vm756_vm1, %v1757_v30, 0.0 }
 0x384   :  { %1676 = vadd.xlane.f32.xlu1 %v1675_v5  ;;  %1673 = vadd.xlane.f32.xlu0 %v1672_v54  ;;  %v1864_v5 = vsel %vm756_vm1, %v1756_v34, 0.0  ;;  %v1102_v54 = vsel %vm756_vm1, %v990_v46, 0.0  ;;  %v1182_v34 = vmul.f32 %v8901_v28, %v7902_v38 }
 0x385   :  { %1973 = vadd.xlane.f32.xlu2 %v1972_v9 }
 0x387   :  { %v8903_v3 = vpop.xlane.xlu0 %1664  ;;  %v8905_v13 = vpop.xlane.xlu1 %1283 }
 0x388   :  { %15895 = vst [vmem:[#allocation158_spill] sm:$0xff] %v8903_v3  ;;  %v8911_v45 = vpop.xlane.xlu2 %2045  ;;  %v1949_v3 = vmul.f32 %v8838_v41, %v8404_v0 }
 0x389   :  { %15896 = vst [vmem:[#allocation159_spill] sm:$0xff] %v8905_v13 }
 0x38a   :  { %15897 = vst [vmem:[#allocation160_spill] sm:$0xff] %v8911_v45  ;;  %v1948_v45 = vmul.f32 %v8817_v42, %v8402_v14  ;;  %v2059_v30 = vsel %vm756_vm1, %v1949_v3, 0.0  ;;  %v960_v42 = vmul.f32 %v8822_v55, %v15830_v27  ;;  %v1374_v3 = vmul.f32 %v8901_v28, %v7948_v8 }
 0x38c   :  { %1868 = vadd.xlane.f32.xlu1 %v1867_v29  ;;  %1865 = vadd.xlane.f32.xlu0 %v1864_v5  ;;  %v2056_v46 = vsel %vm756_vm1, %v1948_v45, 0.0  ;;  %v1294_v29 = vsel %vm756_vm1, %v1182_v34, 0.0  ;;  %v845_v45 = vpop.f32.mrf.mxu1  ;;  %v1012_v34 = vsel %vm756_vm1, %v960_v42, 0.0  ;;  %v1566_v42 = vmul.f32 %v8901_v28, %v8000_v26 }
 0x38d   :  { %1103 = vadd.xlane.f32.xlu2 %v1102_v54  ;;  %v959_v54 = vmul.f32 %v8757_v47, %v8024_v59  ;;  %v961_v47 = vmul.f32 %v845_v45, %v15837_v4 }
 0x38f   :  { %v8918_v9 = vpop.xlane.xlu0 %1856  ;;  %v8920_v13 = vpop.xlane.xlu1 %1475 }
 0x390   :  { %15898 = vst [vmem:[#allocation161_spill] sm:$0xff] %v8918_v9  ;;  %v8926_v7 = vpop.xlane.xlu2 %2027 }
 0x391   :  { %15899 = vst [vmem:[#allocation162_spill] sm:$0xff] %v8920_v13 }
 0x392   :  { %15900 = vst [vmem:[#allocation163_spill] sm:$0xff] %v8926_v7 }
 0x394   :  { %2060 = vadd.xlane.f32.xlu1 %v2059_v30  ;;  %2057 = vadd.xlane.f32.xlu0 %v2056_v46  ;;  %v1009_v30 = vsel %vm756_vm1, %v959_v54, 0.0  ;;  %v1486_v46 = vsel %vm756_vm1, %v1374_v3, 0.0  ;;  %v1015_v54 = vsel %vm756_vm1, %v961_v47, 0.0  ;;  %v848_v3 = vpop.f32.mrf.mxu1  ;;  %v1758_v47 = vmul.f32 %v8901_v28, %v8146_v35 }
 0x395   :  { %1295 = vadd.xlane.f32.xlu2 %v1294_v29  ;;  %v1154_v9 = vmul.f32 %v848_v3, %v15852_v52 }
 0x397   :  { %v8933_v5 = vpop.xlane.xlu0 %2048  ;;  %v8935_v41 = vpop.xlane.xlu1 %1667 }
 0x398   :  { %15901 = vst [vmem:[#allocation164_spill] sm:$0xff] %v8933_v5  ;;  %v8941_v13 = vpop.xlane.xlu2 %2009 }
 0x399   :  { %15902 = vst [vmem:[#allocation165_spill] sm:$0xff] %v8935_v41  ;;  %v1153_v41 = vmul.f32 %v845_v45, %v7915_v63 }
 0x39a   :  { %15903 = vst [vmem:[#allocation166_spill] sm:$0xff] %v8941_v13 }
 0x39c   :  { %1013 = vadd.xlane.f32.xlu1 %v1012_v34  ;;  %1010 = vadd.xlane.f32.xlu0 %v1009_v30  ;;  %v1207_v34 = vsel %vm756_vm1, %v1153_v41, 0.0  ;;  %v1678_v30 = vsel %vm756_vm1, %v1566_v42, 0.0  ;;  %v1210_v41 = vsel %vm756_vm1, %v1154_v9, 0.0  ;;  %v1870_v42 = vsel %vm756_vm1, %v1758_v47, 0.0 }
 0x39d   :  { %1487 = vadd.xlane.f32.xlu2 %v1486_v46  ;;  %v1950_v9 = vmul.f32 %v8901_v28, %v8279_v25  ;;  %v15917_v28 = vld [vmem:[#allocation28_spill] sm:$0xff] }
 0x39e   :  { %v962_v13 = vmul.f32 %v848_v3, %v15917_v28 }
 0x39f   :  { %v8948_v29 = vpop.xlane.xlu0 %2030  ;;  %v8950_v55 = vpop.xlane.xlu1 %1859  ;;  %v2062_v47 = vsel %vm756_vm1, %v1950_v9, 0.0 }
 0x3a0   :  { %15904 = vst [vmem:[#allocation167_spill] sm:$0xff] %v8948_v29  ;;  %v8954_v5 = vpop.xlane.xlu2 %1094  ;;  %v1018_v9 = vsel %vm756_vm1, %v962_v13, 0.0 }
 0x3a1   :  { %15905 = vst [vmem:[#allocation168_spill] sm:$0xff] %v8950_v55 }
 0x3a2   :  { %15906 = vst [vmem:[#allocation169_spill] sm:$0xff] %v8954_v5  ;;  %v15909_v5 = vld [vmem:[#allocation13_spill] sm:$0xff] }
 0x3a3   :  { %v1345_v29 = vmul.f32 %v845_v45, %v15909_v5 }
 0x3a4   :  { %1016 = vadd.xlane.f32.xlu1 %v1015_v54  ;;  %1208 = vadd.xlane.f32.xlu0 %v1207_v34 }
 0x3a5   :  { %1679 = vadd.xlane.f32.xlu2 %v1678_v30  ;;  %v1399_v54 = vsel %vm756_vm1, %v1345_v29, 0.0 }
 0x3a7   :  { %v8961_v46 = vpop.xlane.xlu1 %2051  ;;  %v8963_v55 = vpop.xlane.xlu0 %2012 }
 0x3a8   :  { %15907 = vst [vmem:[#allocation170_spill] sm:$0xff] %v8961_v46  ;;  %v8967_v7 = vpop.xlane.xlu2 %1286  ;;  %v1346_v46 = vmul.f32 %v848_v3, %v7974_v50 }
 0x3a9   :  { %15908 = vst [vmem:[#allocation171_spill] sm:$0xff] %v8963_v55 }
 0x3aa   :  { %15910 = vst [vmem:[#allocation172_spill] sm:$0xff] %v8967_v7  ;;  %v1537_v7 = vmul.f32 %v845_v45, %v15851_v22  ;;  %v1402_v29 = vsel %vm756_vm1, %v1346_v46, 0.0 }
 0x3ac   :  { %1211 = vadd.xlane.f32.xlu1 %v1210_v41  ;;  %1400 = vadd.xlane.f32.xlu0 %v1399_v54  ;;  %v1591_v41 = vsel %vm756_vm1, %v1537_v7, 0.0 }
 0x3ad   :  { %1871 = vadd.xlane.f32.xlu2 %v1870_v42 }
 0x3af   :  { %v8974_v34 = vpop.xlane.xlu1 %2033  ;;  %v8976_v30 = vpop.xlane.xlu0 %1007 }
 0x3b0   :  { %15911 = vst [vmem:[#allocation173_spill] sm:$0xff] %v8974_v34  ;;  %v8980_v55 = vpop.xlane.xlu2 %1478  ;;  %v1538_v34 = vmul.f32 %v848_v3, %v8062_v18 }
 0x3b1   :  { %15912 = vst [vmem:[#allocation174_spill] sm:$0xff] %v8976_v30 }
 0x3b2   :  { %15913 = vst [vmem:[#allocation175_spill] sm:$0xff] %v8980_v55  ;;  %v1729_v55 = vmul.f32 %v845_v45, %v15856_v10  ;;  %v1594_v46 = vsel %vm756_vm1, %v1538_v34, 0.0  ;;  %v9011_v34 = vpop.f32.mrf.mxu2 }
 0x3b4   :  { %1403 = vadd.xlane.f32.xlu1 %v1402_v29  ;;  %1592 = vadd.xlane.f32.xlu0 %v1591_v41  ;;  %v1783_v7 = vsel %vm756_vm1, %v1729_v55, 0.0  ;;  %v8999_v29 = vpop.f32.mrf.mxu1 }
 0x3b5   :  { %2063 = vadd.xlane.f32.xlu2 %v2062_v47  ;;  %v963_v55 = vmul.f32 %v8999_v29, %v15862_v31 }
 0x3b7   :  { %v8987_v54 = vpop.xlane.xlu1 %1202  ;;  %v8989_v42 = vpop.xlane.xlu0 %1199 }
 0x3b8   :  { %15914 = vst [vmem:[#allocation176_spill] sm:$0xff] %v8987_v54  ;;  %v8993_v30 = vpop.xlane.xlu2 %1670  ;;  %v1730_v54 = vmul.f32 %v848_v3, %v8216_v20 }
 0x3b9   :  { %15915 = vst [vmem:[#allocation177_spill] sm:$0xff] %v8989_v42 }
 0x3ba   :  { %15916 = vst [vmem:[#allocation178_spill] sm:$0xff] %v8993_v30  ;;  %v1921_v30 = vmul.f32 %v845_v45, %v8320_v19  ;;  %v1786_v13 = vsel %vm756_vm1, %v1730_v54, 0.0  ;;  %v1922_v45 = vmul.f32 %v848_v3, %v8361_v58  ;;  %v1155_v54 = vmul.f32 %v8999_v29, %v7926_v24 }
 0x3bc   :  { %1595 = vadd.xlane.f32.xlu1 %v1594_v46  ;;  %1784 = vadd.xlane.f32.xlu0 %v1783_v7  ;;  %v1975_v46 = vsel %vm756_vm1, %v1921_v30, 0.0  ;;  %v1021_v7 = vsel %vm756_vm1, %v963_v55, 0.0  ;;  %v1978_v30 = vsel %vm756_vm1, %v1922_v45, 0.0 }
 0x3bd   :  { %1019 = vadd.xlane.f32.xlu2 %v1018_v9 }
 0x3bf   :  { %v9001_v41 = vpop.xlane.xlu1 %1394  ;;  %v9003_v47 = vpop.xlane.xlu0 %1391 }
 0x3c0   :  { %15918 = vst [vmem:[#allocation179_spill] sm:$0xff] %v9001_v41  ;;  %v9007_v42 = vpop.xlane.xlu2 %1862 }
 0x3c1   :  { %15919 = vst [vmem:[#allocation180_spill] sm:$0xff] %v9003_v47 }
 0x3c2   :  { %15920 = vst [vmem:[#allocation181_spill] sm:$0xff] %v9007_v42  ;;  %v991_v42 = vmul.f32 %v9011_v34, %v8024_v59 }
 0x3c4   :  { %1787 = vadd.xlane.f32.xlu1 %v1786_v13  ;;  %1976 = vadd.xlane.f32.xlu0 %v1975_v46  ;;  %v1105_v55 = vsel %vm756_vm1, %v991_v42, 0.0  ;;  %v9029_v13 = vpop.f32.mrf.mxu2  ;;  %v1213_v46 = vsel %vm756_vm1, %v1155_v54, 0.0  ;;  %v1347_v42 = vmul.f32 %v8999_v29, %v7977_v53 }
 0x3c5   :  { %1022 = vadd.xlane.f32.xlu2 %v1021_v7 }
 0x3c7   :  { %v9016_v9 = vpop.xlane.xlu1 %1586  ;;  %v9018_v41 = vpop.xlane.xlu0 %1583 }
 0x3c8   :  { %15921 = vst [vmem:[#allocation182_spill] sm:$0xff] %v9016_v9  ;;  %v9023_v47 = vpop.xlane.xlu2 %2054  ;;  %v1183_v9 = vmul.f32 %v9011_v34, %v7904_v40 }
 0x3c9   :  { %15922 = vst [vmem:[#allocation183_spill] sm:$0xff] %v9018_v41 }
 0x3ca   :  { %15923 = vst [vmem:[#allocation184_spill] sm:$0xff] %v9023_v47  ;;  %v992_v47 = vmul.f32 %v9029_v13, %v15830_v27  ;;  %v1297_v54 = vsel %vm756_vm1, %v1183_v9, 0.0 }
 0x3cc   :  { %1979 = vadd.xlane.f32.xlu1 %v1978_v30  ;;  %1106 = vadd.xlane.f32.xlu0 %v1105_v55  ;;  %v1108_v30 = vsel %vm756_vm1, %v992_v47, 0.0  ;;  %v1405_v55 = vsel %vm756_vm1, %v1347_v42, 0.0  ;;  %v1539_v47 = vmul.f32 %v8999_v29, %v8073_v23 }
 0x3cd   :  { %1214 = vadd.xlane.f32.xlu2 %v1213_v46 }
 0x3cf   :  { %v9032_v3 = vpop.xlane.xlu1 %1778  ;;  %v9034_v7 = vpop.xlane.xlu0 %1775 }
 0x3d0   :  { %15924 = vst [vmem:[#allocation185_spill] sm:$0xff] %v9032_v3  ;;  %v9040_v45 = vpop.xlane.xlu2 %2036 }
 0x3d1   :  { %15925 = vst [vmem:[#allocation186_spill] sm:$0xff] %v9034_v7  ;;  %v1184_v7 = vmul.f32 %v9029_v13, %v15834_v32 }
 0x3d2   :  { %15926 = vst [vmem:[#allocation187_spill] sm:$0xff] %v9040_v45  ;;  %v1375_v45 = vmul.f32 %v9011_v34, %v7951_v11 }
 0x3d3   :  { %v1300_v9 = vsel %vm756_vm1, %v1184_v7, 0.0  ;;  %v1731_v7 = vmul.f32 %v8999_v29, %v8218_v43 }
 0x3d4   :  { %1109 = vadd.xlane.f32.xlu1 %v1108_v30  ;;  %1298 = vadd.xlane.f32.xlu0 %v1297_v54  ;;  %v1489_v42 = vsel %vm756_vm1, %v1375_v45, 0.0  ;;  %v1597_v30 = vsel %vm756_vm1, %v1539_v47, 0.0 }
 0x3d5   :  { %1406 = vadd.xlane.f32.xlu2 %v1405_v55 }
 0x3d7   :  { %v9047_v46 = vpop.xlane.xlu1 %1970  ;;  %v9049_v3 = vpop.xlane.xlu0 %1967 }
 0x3d8   :  { %15927 = vst [vmem:[#allocation188_spill] sm:$0xff] %v9047_v46  ;;  %v9055_v41 = vpop.xlane.xlu2 %1205  ;;  %v1376_v46 = vmul.f32 %v9029_v13, %v15839_v17 }
 0x3d9   :  { %15928 = vst [vmem:[#allocation189_spill] sm:$0xff] %v9049_v3  ;;  %v1567_v3 = vmul.f32 %v9011_v34, %v8003_v33 }
 0x3da   :  { %15929 = vst [vmem:[#allocation190_spill] sm:$0xff] %v9055_v41  ;;  %v1492_v45 = vsel %vm756_vm1, %v1376_v46, 0.0 }
 0x3db   :  { %v1681_v47 = vsel %vm756_vm1, %v1567_v3, 0.0  ;;  %v1923_v3 = vmul.f32 %v8999_v29, %v8363_v16  ;;  %v1951_v29 = vmul.f32 %v9011_v34, %v8281_v21 }
 0x3dc   :  { %1301 = vadd.xlane.f32.xlu1 %v1300_v9  ;;  %1490 = vadd.xlane.f32.xlu0 %v1489_v42  ;;  %v1789_v9 = vsel %vm756_vm1, %v1731_v7, 0.0 }
 0x3dd   :  { %1598 = vadd.xlane.f32.xlu2 %v1597_v30 }
 0x3df   :  { %v9062_v54 = vpop.xlane.xlu1 %1100  ;;  %v9064_v55 = vpop.xlane.xlu0 %1097 }
 0x3e0   :  { %15930 = vst [vmem:[#allocation191_spill] sm:$0xff] %v9062_v54  ;;  %v9070_v41 = vpop.xlane.xlu2 %1397  ;;  %v1568_v54 = vmul.f32 %v9029_v13, %v15843_v39 }
 0x3e1   :  { %15931 = vst [vmem:[#allocation192_spill] sm:$0xff] %v9064_v55  ;;  %v1759_v55 = vmul.f32 %v9011_v34, %v8148_v62  ;;  %v1952_v34 = vmul.f32 %v9029_v13, %v8318_v56 }
 0x3e2   :  { %15932 = vst [vmem:[#allocation193_spill] sm:$0xff] %v9070_v41  ;;  %v1684_v46 = vsel %vm756_vm1, %v1568_v54, 0.0 }
 0x3e3   :  { %v1873_v7 = vsel %vm756_vm1, %v1759_v55, 0.0 }
 0x3e4   :  { %1493 = vadd.xlane.f32.xlu1 %v1492_v45  ;;  %1682 = vadd.xlane.f32.xlu0 %v1681_v47  ;;  %v1981_v45 = vsel %vm756_vm1, %v1923_v3, 0.0  ;;  %v9092_v47 = vpop.f32.mrf.mxu2  ;;  %v9106_v3 = vpop.f32.mrf.mxu1 }
 0x3e5   :  { %1790 = vadd.xlane.f32.xlu2 %v1789_v9  ;;  %v993_v55 = vmul.f32 %v9092_v47, %v15837_v4 }
 0x3e7   :  { %v9077_v42 = vpop.xlane.xlu1 %1292  ;;  %v9079_v30 = vpop.xlane.xlu0 %1289 }
 0x3e8   :  { %15933 = vst [vmem:[#allocation194_spill] sm:$0xff] %v9077_v42  ;;  %v9085_v41 = vpop.xlane.xlu2 %1589 }
 0x3e9   :  { %15934 = vst [vmem:[#allocation195_spill] sm:$0xff] %v9079_v30  ;;  %v1760_v30 = vmul.f32 %v9029_v13, %v15848_v49 }
 0x3ea   :  { %15935 = vst [vmem:[#allocation196_spill] sm:$0xff] %v9085_v41 }
 0x3ec   :  { %1685 = vadd.xlane.f32.xlu1 %v1684_v46  ;;  %1874 = vadd.xlane.f32.xlu0 %v1873_v7  ;;  %v1876_v46 = vsel %vm756_vm1, %v1760_v30, 0.0  ;;  %v2065_v7 = vsel %vm756_vm1, %v1951_v29, 0.0  ;;  %v1185_v30 = vmul.f32 %v9092_v47, %v7915_v63  ;;  %v2068_v29 = vsel %vm756_vm1, %v1952_v34, 0.0 }
 0x3ed   :  { %1982 = vadd.xlane.f32.xlu2 %v1981_v45  ;;  %v1111_v45 = vsel %vm756_vm1, %v993_v55, 0.0 }
 0x3ef   :  { %v9094_v9 = vpop.xlane.xlu1 %1484  ;;  %v9096_v42 = vpop.xlane.xlu0 %1481 }
 0x3f0   :  { %15936 = vst [vmem:[#allocation197_spill] sm:$0xff] %v9094_v9  ;;  %v9102_v54 = vpop.xlane.xlu2 %1781 }
 0x3f1   :  { %15937 = vst [vmem:[#allocation198_spill] sm:$0xff] %v9096_v42 }
 0x3f2   :  { %15938 = vst [vmem:[#allocation199_spill] sm:$0xff] %v9102_v54  ;;  %v964_v54 = vmul.f32 %v9106_v3, %v8157_v51 }
 0x3f4   :  { %1877 = vadd.xlane.f32.xlu1 %v1876_v46  ;;  %2066 = vadd.xlane.f32.xlu0 %v2065_v7  ;;  %v1024_v55 = vsel %vm756_vm1, %v964_v54, 0.0  ;;  %v9125_v46 = vpop.f32.mrf.mxu1  ;;  %v1303_v7 = vsel %vm756_vm1, %v1185_v30, 0.0  ;;  %v1377_v54 = vmul.f32 %v9092_v47, %v15909_v5 }
 0x3f5   :  { %1112 = vadd.xlane.f32.xlu2 %v1111_v45 }
 0x3f7   :  { %v9111_v9 = vpop.xlane.xlu1 %1676  ;;  %v9113_v42 = vpop.xlane.xlu0 %1673 }
 0x3f8   :  { %15939 = vst [vmem:[#allocation200_spill] sm:$0xff] %v9111_v9  ;;  %v9119_v41 = vpop.xlane.xlu2 %1973  ;;  %v965_v9 = vmul.f32 %v9125_v46, %v8174_v15 }
 0x3f9   :  { %15940 = vst [vmem:[#allocation201_spill] sm:$0xff] %v9113_v42  ;;  %v1156_v42 = vmul.f32 %v9106_v3, %v7933_v44 }
 0x3fa   :  { %15941 = vst [vmem:[#allocation202_spill] sm:$0xff] %v9119_v41 }
 0x3fb   :  { %v1216_v30 = vsel %vm756_vm1, %v1156_v42, 0.0  ;;  %v1569_v42 = vmul.f32 %v9092_v47, %v15851_v22 }
 0x3fc   :  { %2069 = vadd.xlane.f32.xlu1 %v2068_v29  ;;  %1025 = vadd.xlane.f32.xlu0 %v1024_v55  ;;  %v1027_v29 = vsel %vm756_vm1, %v965_v9, 0.0  ;;  %v1495_v55 = vsel %vm756_vm1, %v1377_v54, 0.0 }
 0x3fd   :  { %1304 = vadd.xlane.f32.xlu2 %v1303_v7 }
 0x3ff   :  { %v9128_v13 = vpop.xlane.xlu1 %1868  ;;  %v9130_v45 = vpop.xlane.xlu0 %1865 }
 0x400   :  { %15942 = vst [vmem:[#allocation203_spill] sm:$0xff] %v9128_v13  ;;  %v9136_v34 = vpop.xlane.xlu2 %1103 }
 0x401   :  { %15943 = vst [vmem:[#allocation204_spill] sm:$0xff] %v9130_v45  ;;  %v1157_v45 = vmul.f32 %v9125_v46, %v7937_v48 }
 0x402   :  { %15944 = vst [vmem:[#allocation205_spill] sm:$0xff] %v9136_v34  ;;  %v1348_v34 = vmul.f32 %v9106_v3, %v7987_v6 }
 0x403   :  { %v1219_v9 = vsel %vm756_vm1, %v1157_v45, 0.0  ;;  %v1761_v45 = vmul.f32 %v9092_v47, %v15856_v10 }
 0x404   :  { %1028 = vadd.xlane.f32.xlu1 %v1027_v29  ;;  %1217 = vadd.xlane.f32.xlu0 %v1216_v30  ;;  %v1408_v54 = vsel %vm756_vm1, %v1348_v34, 0.0  ;;  %v1687_v29 = vsel %vm756_vm1, %v1569_v42, 0.0  ;;  %v9170_v34 = vpop.f32.mrf.mxu2 }
 0x405   :  { %1496 = vadd.xlane.f32.xlu2 %v1495_v55 }
 0x407   :  { %v9143_v7 = vpop.xlane.xlu1 %2060  ;;  %v9145_v13 = vpop.xlane.xlu0 %2057 }
 0x408   :  { %15945 = vst [vmem:[#allocation206_spill] sm:$0xff] %v9143_v7  ;;  %v9151_v41 = vpop.xlane.xlu2 %1295  ;;  %v1349_v7 = vmul.f32 %v9125_v46, %v7990_v12 }
 0x409   :  { %15946 = vst [vmem:[#allocation207_spill] sm:$0xff] %v9145_v13  ;;  %v1540_v13 = vmul.f32 %v9106_v3, %v8101_v36 }
 0x40a   :  { %15947 = vst [vmem:[#allocation208_spill] sm:$0xff] %v9151_v41  ;;  %v1411_v42 = vsel %vm756_vm1, %v1349_v7, 0.0 }
 0x40c   :  { %1220 = vadd.xlane.f32.xlu1 %v1219_v9  ;;  %1409 = vadd.xlane.f32.xlu0 %v1408_v54  ;;  %v1600_v9 = vsel %vm756_vm1, %v1540_v13, 0.0  ;;  %v1879_v54 = vsel %vm756_vm1, %v1761_v45, 0.0  ;;  %v1953_v13 = vmul.f32 %v9092_v47, %v8320_v19  ;;  %v9187_v7 = vpop.f32.mrf.mxu2  ;;  %v15956_v47 = vld [vmem:[#allocation49_spill] sm:$0xff]  ;;  %v15957_v19 = vld [vmem:[#allocation54_spill] sm:$0xff] }
 0x40d   :  { %1688 = vadd.xlane.f32.xlu2 %v1687_v29 }
 0x40f   :  { %v9158_v30 = vpop.xlane.xlu1 %1013  ;;  %v9160_v55 = vpop.xlane.xlu0 %1010 }
 0x410   :  { %15948 = vst [vmem:[#allocation209_spill] sm:$0xff] %v9158_v30  ;;  %v9166_v41 = vpop.xlane.xlu2 %1487  ;;  %v1732_v30 = vmul.f32 %v9106_v3, %v8248_v57 }
 0x411   :  { %15949 = vst [vmem:[#allocation210_spill] sm:$0xff] %v9160_v55 }
 0x412   :  { %15950 = vst [vmem:[#allocation211_spill] sm:$0xff] %v9166_v41  ;;  %v1541_v41 = vmul.f32 %v9125_v46, %v8112_v37 }
 0x414   :  { %1412 = vadd.xlane.f32.xlu1 %v1411_v42  ;;  %1601 = vadd.xlane.f32.xlu0 %v1600_v9  ;;  %v1603_v45 = vsel %vm756_vm1, %v1541_v41, 0.0  ;;  %v1792_v42 = vsel %vm756_vm1, %v1732_v30, 0.0  ;;  %v2071_v9 = vsel %vm756_vm1, %v1953_v13, 0.0  ;;  %v1733_v13 = vmul.f32 %v9125_v46, %v8250_v1 }
 0x415   :  { %1880 = vadd.xlane.f32.xlu2 %v1879_v54  ;;  %v15954_v54 = vld [vmem:[#allocation45_spill] sm:$0xff] }
 0x417   :  { %v9175_v29 = vpop.xlane.xlu1 %1016  ;;  %v9177_v55 = vpop.xlane.xlu0 %1208 }
 0x418   :  { %15951 = vst [vmem:[#allocation212_spill] sm:$0xff] %v9175_v29  ;;  %v9183_v10 = vpop.xlane.xlu2 %1679  ;;  %v15955_v29 = vld [vmem:[#allocation42_spill] sm:$0xff] }
 0x419   :  { %15952 = vst [vmem:[#allocation213_spill] sm:$0xff] %v9177_v55 }
 0x41a   :  { %15953 = vst [vmem:[#allocation214_spill] sm:$0xff] %v9183_v10  ;;  %v2119_v10 = vsel %vm2110_vm2, %v15955_v29, %v15954_v54  ;;  %v15960_v29 = vld [vmem:[#allocation85_spill] sm:$0xff] }
 0x41b   :  { %v2168_v55 = vsel %vm2159_vm3, %v2119_v10, %v15956_v47 }
 0x41c   :  { %1604 = vadd.xlane.f32.xlu1 %v1603_v45  ;;  %1793 = vadd.xlane.f32.xlu0 %v1792_v42  ;;  %v2217_v41 = vsel %vm2208_vm4, %v2168_v55, %v15957_v19  ;;  %v1924_v45 = vmul.f32 %v9106_v3, %v8402_v14  ;;  %v1795_v19 = vsel %vm756_vm1, %v1733_v13, 0.0  ;;  %v9219_v3 = vpop.f32.mrf.mxu2  ;;  %v1925_v13 = vmul.f32 %v9125_v46, %v8404_v0 }
 0x41d   :  { %2072 = vadd.xlane.f32.xlu2 %v2071_v9  ;;  %v2266_v42 = vsel %vm2257_vm5, %v2217_v41, %v15960_v29  ;;  %v1186_v46 = vmul.f32 %v9170_v34, %v15852_v52 }
 0x41e   :  { %v9213_v10 = vsel %vm2306_vm6, %v2266_v42, %v8702_v60  ;;  %v1984_v55 = vsel %vm756_vm1, %v1924_v45, 0.0  ;;  %v994_v60 = vmul.f32 %v9170_v34, %v15917_v28  ;;  %v996_v45 = vmul.f32 %v9219_v3, %v8157_v51 }
 0x41f   :  { %v9199_v56 = vpop.xlane.xlu1 %1211  ;;  %v9201_v30 = vpop.xlane.xlu0 %1400  ;;  %15962 = vst [vmem:[#allocation54_spill] sm:$0xff] %v9213_v10  ;;  %v2380_v54 = vsel %vm2355_vm7, %v9213_v10, -inf }
 0x420   :  { %15958 = vst [vmem:[#allocation45_spill] sm:$0xff] %v9199_v56  ;;  %v9209_v9 = vpop.xlane.xlu2 %1871  ;;  %v1114_v42 = vsel %vm756_vm1, %v994_v60, 0.0  ;;  %v1188_v60 = vmul.f32 %v9219_v3, %v7933_v44  ;;  %v1379_v56 = vmul.f32 %v9187_v7, %v7977_v53 }
 0x421   :  { %15959 = vst [vmem:[#allocation42_spill] sm:$0xff] %v9201_v30  ;;  %v15986_v30 = vld [vmem:[#allocation56_spill] sm:$0xff] }
 0x422   :  { %15961 = vst [vmem:[#allocation49_spill] sm:$0xff] %v9209_v9 }
 0x424   :  { %1796 = vadd.xlane.f32.xlu1 %v1795_v19  ;;  %1985 = vadd.xlane.f32.xlu0 %v1984_v55  ;;  %v1987_v19 = vsel %vm756_vm1, %v1925_v13, 0.0  ;;  %v1120_v55 = vsel %vm756_vm1, %v996_v45, 0.0  ;;  %v1306_v13 = vsel %vm756_vm1, %v1186_v46, 0.0 }
 0x425   :  { %2381 = vmax.xlane.f32.xlu2 %v2380_v54 }
 0x427   :  { %v9221_v47 = vpop.xlane.xlu1 %1403  ;;  %v9223_v41 = vpop.xlane.xlu0 %1592 }
 0x428   :  { %15963 = vst [vmem:[#allocation85_spill] sm:$0xff] %v9221_v47  ;;  %v9229_v29 = vpop.xlane.xlu2 %2063  ;;  %v1187_v47 = vmul.f32 %v9187_v7, %v7926_v24 }
 0x429   :  { %15964 = vst [vmem:[#allocation215_spill] sm:$0xff] %v9223_v41  ;;  %v15985_v41 = vld [vmem:[#allocation57_spill] sm:$0xff] }
 0x42a   :  { %15965 = vst [vmem:[#allocation216_spill] sm:$0xff] %v9229_v29  ;;  %v995_v29 = vmul.f32 %v9187_v7, %v15862_v31 }
 0x42c   :  { %1115 = vadd.xlane.f32.xlu0 %v1114_v42  ;;  %1988 = vadd.xlane.f32.xlu1 %v1987_v19  ;;  %v1117_v45 = vsel %vm756_vm1, %v995_v29, 0.0  ;;  %v1312_v42 = vsel %vm756_vm1, %v1188_v60, 0.0  ;;  %v1380_v29 = vmul.f32 %v9219_v3, %v7987_v6  ;;  %v1309_v60 = vsel %vm756_vm1, %v1187_v47, 0.0 }
 0x42d   :  { %1121 = vadd.xlane.f32.xlu2 %v1120_v55  ;;  %v1572_v47 = vmul.f32 %v9219_v3, %v8101_v36 }
 0x42f   :  { %v9236_v54 = vpop.xlane.xlu1 %1595  ;;  %v9238_v10 = vpop.xlane.xlu0 %1784 }
 0x430   :  { %15966 = vst [vmem:[#allocation217_spill] sm:$0xff] %v9236_v54  ;;  %v9244_v9 = vpop.xlane.xlu2 %1019  ;;  %v1378_v54 = vmul.f32 %v9170_v34, %v7974_v50 }
 0x431   :  { %15967 = vst [vmem:[#allocation218_spill] sm:$0xff] %v9238_v10  ;;  %v15984_v10 = vld [vmem:[#allocation62_spill] sm:$0xff] }
 0x432   :  { %15968 = vst [vmem:[#allocation219_spill] sm:$0xff] %v9244_v9  ;;  %v1498_v46 = vsel %vm756_vm1, %v1378_v54, 0.0 }
 0x434   :  { %1307 = vadd.xlane.f32.xlu0 %v1306_v13  ;;  %1118 = vadd.xlane.f32.xlu1 %v1117_v45  ;;  %v1504_v13 = vsel %vm756_vm1, %v1380_v29, 0.0  ;;  %v1501_v29 = vsel %vm756_vm1, %v1379_v56, 0.0  ;;  %v1764_v56 = vmul.f32 %v9219_v3, %v8248_v57  ;;  %v15988_v57 = vld [vmem:[#allocation70_spill] sm:$0xff] }
 0x435   :  { %1313 = vadd.xlane.f32.xlu2 %v1312_v42 }
 0x437   :  { %v9251_v19 = vpop.xlane.xlu1 %1787  ;;  %v9253_v55 = vpop.xlane.xlu0 %1976 }
 0x438   :  { %15969 = vst [vmem:[#allocation220_spill] sm:$0xff] %v9251_v19  ;;  %v9259_v9 = vpop.xlane.xlu2 %1022  ;;  %v1570_v19 = vmul.f32 %v9170_v34, %v8062_v18 }
 0x439   :  { %15970 = vst [vmem:[#allocation221_spill] sm:$0xff] %v9253_v55 }
 0x43a   :  { %15971 = vst [vmem:[#allocation222_spill] sm:$0xff] %v9259_v9  ;;  %v1690_v54 = vsel %vm756_vm1, %v1570_v19, 0.0  ;;  %v9293_v19 = vpop.f32.mrf.mxu2 }
 0x43c   :  { %1499 = vadd.xlane.f32.xlu0 %v1498_v46  ;;  %1310 = vadd.xlane.f32.xlu1 %v1309_v60  ;;  %v1696_v46 = vsel %vm756_vm1, %v1572_v47, 0.0 }
 0x43d   :  { %1505 = vadd.xlane.f32.xlu2 %v1504_v13 }
 0x43f   :  { %v9266_v45 = vpop.xlane.xlu1 %1979  ;;  %v9268_v42 = vpop.xlane.xlu0 %1106 }
 0x440   :  { %15972 = vst [vmem:[#allocation223_spill] sm:$0xff] %v9266_v45  ;;  %v9274_v9 = vpop.xlane.xlu2 %1214  ;;  %v1571_v45 = vmul.f32 %v9187_v7, %v8073_v23 }
 0x441   :  { %15973 = vst [vmem:[#allocation224_spill] sm:$0xff] %v9268_v42  ;;  %v1762_v42 = vmul.f32 %v9170_v34, %v8216_v20 }
 0x442   :  { %15974 = vst [vmem:[#allocation225_spill] sm:$0xff] %v9274_v9 }
 0x443   :  { %v1882_v47 = vsel %vm756_vm1, %v1762_v42, 0.0  ;;  %v9310_v42 = vpop.f32.mrf.mxu2 }
 0x444   :  { %1691 = vadd.xlane.f32.xlu0 %v1690_v54  ;;  %1502 = vadd.xlane.f32.xlu1 %v1501_v29  ;;  %v1693_v54 = vsel %vm756_vm1, %v1571_v45, 0.0  ;;  %v1888_v29 = vsel %vm756_vm1, %v1764_v56, 0.0  ;;  %v1956_v45 = vmul.f32 %v9219_v3, %v8402_v14  ;;  %v2122_v3 = vsel %vm2110_vm2, %v15985_v41, %v15984_v10  ;;  %v15991_v41 = vld [vmem:[#allocation103_spill] sm:$0xff] }
 0x445   :  { %1697 = vadd.xlane.f32.xlu2 %v1696_v46  ;;  %v1955_v10 = vmul.f32 %v9187_v7, %v8363_v16 }
 0x447   :  { %v9281_v60 = vpop.xlane.xlu1 %1109  ;;  %v9283_v13 = vpop.xlane.xlu0 %1298 }
 0x448   :  { %15975 = vst [vmem:[#allocation226_spill] sm:$0xff] %v9281_v60  ;;  %v9289_v9 = vpop.xlane.xlu2 %1406 }
 0x449   :  { %15976 = vst [vmem:[#allocation227_spill] sm:$0xff] %v9283_v13  ;;  %v1954_v13 = vmul.f32 %v9170_v34, %v8361_v58  ;;  %v2080_v34 = vsel %vm756_vm1, %v1956_v45, 0.0  ;;  %v15989_v45 = vld [vmem:[#allocation87_spill] sm:$0xff] }
 0x44a   :  { %15977 = vst [vmem:[#allocation228_spill] sm:$0xff] %v9289_v9  ;;  %v1763_v9 = vmul.f32 %v9187_v7, %v8218_v43  ;;  %v15995_v7 = vld [vmem:[#allocation48_spill] sm:$0xff] }
 0x44b   :  { %v2074_v56 = vsel %vm756_vm1, %v1954_v13, 0.0 }
 0x44c   :  { %1883 = vadd.xlane.f32.xlu0 %v1882_v47  ;;  %1694 = vadd.xlane.f32.xlu1 %v1693_v54  ;;  %v1885_v47 = vsel %vm756_vm1, %v1763_v9, 0.0  ;;  %v15981_v54 = vld [vmem:[#allocation47_spill] sm:$0xff]  ;;  %v15987_v9 = vld [vmem:[#allocation65_spill] sm:$0xff] }
 0x44d   :  { %1889 = vadd.xlane.f32.xlu2 %v1888_v29  ;;  %v15982_v29 = vld [vmem:[#allocation46_spill] sm:$0xff]  ;;  %v2171_v14 = vsel %vm2159_vm3, %v2122_v3, %v15987_v9 }
 0x44f   :  { %v9298_v46 = vpop.xlane.xlu1 %1301  ;;  %v9300_v60 = vpop.xlane.xlu0 %1490 }
 0x450   :  { %15978 = vst [vmem:[#allocation229_spill] sm:$0xff] %v9298_v46  ;;  %v9306_v55 = vpop.xlane.xlu2 %1598  ;;  %v2120_v46 = vsel %vm2110_vm2, %v15982_v29, %v15981_v54  ;;  %v2220_v54 = vsel %vm2208_vm4, %v2171_v14, %v15988_v57  ;;  %v2077_v29 = vsel %vm756_vm1, %v1955_v10, 0.0 }
 0x451   :  { %15979 = vst [vmem:[#allocation230_spill] sm:$0xff] %v9300_v60  ;;  %v15983_v60 = vld [vmem:[#allocation53_spill] sm:$0xff] }
 0x452   :  { %15980 = vst [vmem:[#allocation231_spill] sm:$0xff] %v9306_v55  ;;  %v2169_v55 = vsel %vm2159_vm3, %v2120_v46, %v15983_v60  ;;  %v2269_v46 = vsel %vm2257_vm5, %v2220_v54, %v15991_v41  ;;  %v9359_v54 = vpop.f32.mrf.mxu2 }
 0x453   :  { %v2218_v13 = vsel %vm2208_vm4, %v2169_v55, %v15986_v30  ;;  %v9347_v57 = vsel %vm2306_vm6, %v2269_v46, %v8813_v2  ;;  %v15997_v2 = vld [vmem:[#allocation61_spill] sm:$0xff] }
 0x454   :  { %2075 = vadd.xlane.f32.xlu0 %v2074_v56  ;;  %1886 = vadd.xlane.f32.xlu1 %v1885_v47  ;;  %v2267_v56 = vsel %vm2257_vm5, %v2218_v13, %v15989_v45  ;;  %15993 = vst [vmem:[#allocation53_spill] sm:$0xff] %v9347_v57  ;;  %v2389_v13 = vsel %vm2355_vm7, %v9347_v57, -inf  ;;  %v1382_v57 = vmul.f32 %v9310_v42, %v7948_v8 }
 0x455   :  { %2081 = vadd.xlane.f32.xlu2 %v2080_v34  ;;  %v9341_v30 = vsel %vm2306_vm6, %v2267_v56, %v8713_v61  ;;  %v15994_v34 = vld [vmem:[#allocation52_spill] sm:$0xff]  ;;  %v15996_v61 = vld [vmem:[#allocation55_spill] sm:$0xff]  ;;  %v15998_v56 = vld [vmem:[#allocation93_spill] sm:$0xff]  ;;  %v1765_v8 = vmul.f32 %v9293_v19, %v8250_v1 }
 0x456   :  { %15992 = vst [vmem:[#allocation46_spill] sm:$0xff] %v9341_v30  ;;  %v2383_v14 = vsel %vm2355_vm7, %v9341_v30, -inf  ;;  %v2121_v3 = vsel %vm2110_vm2, %v15995_v7, %v15994_v34  ;;  %v1190_v30 = vmul.f32 %v9310_v42, %v7902_v38  ;;  %v1573_v38 = vmul.f32 %v9293_v19, %v8112_v37 }
 0x457   :  { %v9331_v47 = vpop.xlane.xlu1 %1493  ;;  %v9333_v60 = vpop.xlane.xlu0 %1682  ;;  %v2170_v9 = vsel %vm2159_vm3, %v2121_v3, %v15996_v61  ;;  %v999_v3 = vmul.f32 %v9359_v54, %v8024_v59 }
 0x458   :  { %15990 = vst [vmem:[#allocation47_spill] sm:$0xff] %v9331_v47  ;;  %v9343_v55 = vpop.xlane.xlu2 %1790  ;;  %v2219_v45 = vsel %vm2208_vm4, %v2170_v9, %v15997_v2 }
 0x459   :  { %v2268_v10 = vsel %vm2257_vm5, %v2219_v45, %v15998_v56  ;;  %v1129_v9 = vsel %vm756_vm1, %v999_v3, 0.0  ;;  %v1189_v56 = vmul.f32 %v9293_v19, %v7937_v48 }
 0x45b   :  { %v1315_v3 = vsel %vm756_vm1, %v1189_v56, 0.0  ;;  %v1383_v56 = vmul.f32 %v9359_v54, %v7951_v11 }
 0x45c   :  { %2384 = vmax.xlane.f32.xlu0 %v2383_v14  ;;  %2078 = vadd.xlane.f32.xlu1 %v2077_v29  ;;  %v997_v14 = vmul.f32 %v9293_v19, %v8174_v15  ;;  %v16000_v29 = vld [vmem:[#allocation130_spill] sm:$0xff] }
 0x45d   :  { %2390 = vmax.xlane.f32.xlu2 %v2389_v13  ;;  %v9373_v34 = vsel %vm2306_vm6, %v2268_v10, %v16000_v29  ;;  %v16003_v10 = vld [vmem:[#allocation20_spill] sm:$0xff] }
 0x45e   :  { %16001 = vst [vmem:[#allocation57_spill] sm:$0xff] %v9373_v34  ;;  %v1123_v13 = vsel %vm756_vm1, %v997_v14, 0.0  ;;  %v2386_v61 = vsel %vm2355_vm7, %v9373_v34, -inf  ;;  %v998_v29 = vmul.f32 %v9310_v42, %v16003_v10  ;;  %v1191_v14 = vmul.f32 %v9359_v54, %v7904_v40 }
 0x45f   :  { %v9365_v41 = vpop.xlane.xlu1 %1685  ;;  %v9367_v46 = vpop.xlane.xlu0 %1874  ;;  %v1381_v10 = vmul.f32 %v9293_v19, %v7990_v12 }
 0x460   :  { %15999 = vst [vmem:[#allocation62_spill] sm:$0xff] %v9365_v41  ;;  %v9375_v7 = vpop.xlane.xlu2 %1982 }
 0x464   :  { %1124 = vadd.xlane.f32.xlu0 %v1123_v13  ;;  %2387 = vmax.xlane.f32.xlu1 %v2386_v61  ;;  %v1126_v13 = vsel %vm756_vm1, %v998_v29, 0.0  ;;  %v1321_v61 = vsel %vm756_vm1, %v1191_v14, 0.0  ;;  %v1507_v29 = vsel %vm756_vm1, %v1381_v10, 0.0  ;;  %v1318_v14 = vsel %vm756_vm1, %v1190_v30, 0.0  ;;  %v9425_v10 = vpop.f32.mrf.mxu2 }
 0x465   :  { %1130 = vadd.xlane.f32.xlu2 %v1129_v9  ;;  %v1575_v30 = vmul.f32 %v9359_v54, %v8003_v33  ;;  %v1574_v33 = vmul.f32 %v9310_v42, %v8000_v26  ;;  %v1957_v26 = vmul.f32 %v9293_v19, %v8404_v0 }
 0x467   :  { %v9383_v2 = vpop.xlane.xlu1 %1877  ;;  %v9385_v45 = vpop.xlane.xlu0 %2066 }
 0x468   :  { %16002 = vst [vmem:[#allocation56_spill] sm:$0xff] %v9383_v2  ;;  %v9391_v59 = vpop.xlane.xlu2 %1112 }
 0x46c   :  { %1316 = vadd.xlane.f32.xlu0 %v1315_v3  ;;  %1127 = vadd.xlane.f32.xlu1 %v1126_v13  ;;  %v1513_v3 = vsel %vm756_vm1, %v1383_v56, 0.0  ;;  %v1699_v56 = vsel %vm756_vm1, %v1573_v38, 0.0  ;;  %v1767_v38 = vmul.f32 %v9359_v54, %v8148_v62  ;;  %v1766_v62 = vmul.f32 %v9310_v42, %v8146_v35 }
 0x46d   :  { %1322 = vadd.xlane.f32.xlu2 %v1321_v61  ;;  %v1000_v35 = vmul.f32 %v9425_v10, %v15830_v27 }
 0x46f   :  { %v9398_v9 = vpop.xlane.xlu1 %2069  ;;  %v9400_v34 = vpop.xlane.xlu0 %1025 }
 0x470   :  { %16004 = vst [vmem:[#allocation65_spill] sm:$0xff] %v9398_v9  ;;  %v9406_v40 = vpop.xlane.xlu2 %1304 }
 0x474   :  { %1508 = vadd.xlane.f32.xlu0 %v1507_v29  ;;  %1319 = vadd.xlane.f32.xlu1 %v1318_v14  ;;  %v1510_v29 = vsel %vm756_vm1, %v1382_v57, 0.0  ;;  %v1705_v14 = vsel %vm756_vm1, %v1575_v30, 0.0  ;;  %v9442_v57 = vpop.f32.mrf.mxu2  ;;  %v1891_v30 = vsel %vm756_vm1, %v1765_v8, 0.0  ;;  %v1959_v8 = vmul.f32 %v9359_v54, %v8281_v21 }
 0x475   :  { %1514 = vadd.xlane.f32.xlu2 %v1513_v3  ;;  %v1958_v54 = vmul.f32 %v9310_v42, %v8279_v25  ;;  %v1192_v42 = vmul.f32 %v9425_v10, %v15834_v32  ;;  %v1001_v21 = vmul.f32 %v9442_v57, %v15837_v4  ;;  %v1384_v32 = vmul.f32 %v9425_v10, %v15839_v17 }
 0x476   :  { %v1193_v4 = vmul.f32 %v9442_v57, %v7915_v63  ;;  %v1576_v17 = vmul.f32 %v9425_v10, %v15843_v39  ;;  %v1385_v63 = vmul.f32 %v9442_v57, %v15909_v5  ;;  %v1768_v39 = vmul.f32 %v9425_v10, %v15848_v49 }
 0x477   :  { %v9413_v13 = vpop.xlane.xlu1 %1028  ;;  %v9415_v61 = vpop.xlane.xlu0 %1217  ;;  %v1577_v5 = vmul.f32 %v9442_v57, %v15851_v22  ;;  %v16009_v22 = vld [vmem:[#allocation50_spill] sm:$0xff] }
 0x478   :  { %v9421_v11 = vpop.xlane.xlu2 %1496  ;;  %v1960_v25 = vmul.f32 %v9425_v10, %v16009_v22  ;;  %v16012_v10 = vld [vmem:[#allocation73_spill] sm:$0xff] }
 0x47c   :  { %1700 = vadd.xlane.f32.xlu0 %v1699_v56  ;;  %1511 = vadd.xlane.f32.xlu1 %v1510_v29  ;;  %v1702_v56 = vsel %vm756_vm1, %v1574_v33, 0.0  ;;  %v1897_v29 = vsel %vm756_vm1, %v1767_v38, 0.0  ;;  %v2083_v33 = vsel %vm756_vm1, %v1957_v26, 0.0  ;;  %v1894_v38 = vsel %vm756_vm1, %v1766_v62, 0.0 }
 0x47d   :  { %1706 = vadd.xlane.f32.xlu2 %v1705_v14 }
 0x47f   :  { %v9430_v3 = vpop.xlane.xlu1 %1220  ;;  %v9432_v9 = vpop.xlane.xlu0 %1409 }
 0x480   :  { %v9438_v2 = vpop.xlane.xlu2 %1688 }
 0x484   :  { %1892 = vadd.xlane.f32.xlu0 %v1891_v30  ;;  %1703 = vadd.xlane.f32.xlu1 %v1702_v56  ;;  %v2089_v30 = vsel %vm756_vm1, %v1959_v8, 0.0  ;;  %v9462_v56 = vpop.f32.mrf.mxu2  ;;  %v1132_v8 = vsel %vm756_vm1, %v1000_v35, 0.0 }
 0x485   :  { %1898 = vadd.xlane.f32.xlu2 %v1897_v29  ;;  %v1002_v62 = vmul.f32 %v9462_v56, %v15917_v28  ;;  %v1194_v35 = vmul.f32 %v9462_v56, %v15852_v52 }
 0x487   :  { %v9447_v14 = vpop.xlane.xlu1 %1412  ;;  %v9449_v41 = vpop.xlane.xlu0 %1601 }
 0x488   :  { %v9455_v47 = vpop.xlane.xlu2 %1880 }
 0x48c   :  { %2084 = vadd.xlane.f32.xlu0 %v2083_v33  ;;  %1895 = vadd.xlane.f32.xlu1 %v1894_v38  ;;  %v2086_v33 = vsel %vm756_vm1, %v1958_v54, 0.0  ;;  %v1138_v38 = vsel %vm756_vm1, %v1002_v62, 0.0  ;;  %v1324_v54 = vsel %vm756_vm1, %v1192_v42, 0.0  ;;  %v1135_v62 = vsel %vm756_vm1, %v1001_v21, 0.0 }
 0x48d   :  { %2090 = vadd.xlane.f32.xlu2 %v2089_v30  ;;  %v1386_v21 = vmul.f32 %v9462_v56, %v7974_v50  ;;  %v1516_v42 = vsel %vm756_vm1, %v1384_v32, 0.0  ;;  %v1708_v32 = vsel %vm756_vm1, %v1576_v17, 0.0  ;;  %v9536_v17 = vpop.f32.mrf.mxu2 }
 0x48f   :  { %v9464_v19 = vpop.xlane.xlu1 %1604  ;;  %v9466_v29 = vpop.xlane.xlu0 %1793 }
 0x490   :  { %v9472_v26 = vpop.xlane.xlu2 %2072 }
 0x494   :  { %1133 = vadd.xlane.f32.xlu0 %v1132_v8  ;;  %2087 = vadd.xlane.f32.xlu1 %v2086_v33  ;;  %v1330_v8 = vsel %vm756_vm1, %v1194_v35, 0.0  ;;  %v1327_v35 = vsel %vm756_vm1, %v1193_v4, 0.0  ;;  %v1578_v4 = vmul.f32 %v9462_v56, %v8062_v18 }
 0x495   :  { %1139 = vadd.xlane.f32.xlu2 %v1138_v38 }
 0x497   :  { %v9479_v30 = vpop.xlane.xlu1 %1796  ;;  %v9481_v27 = vpop.xlane.xlu0 %1985 }
 0x498   :  { %v9487_v28 = vpop.xlane.xlu2 %2381 }
 0x49c   :  { %1325 = vadd.xlane.f32.xlu0 %v1324_v54  ;;  %1136 = vadd.xlane.f32.xlu1 %v1135_v62  ;;  %v1522_v54 = vsel %vm756_vm1, %v1386_v21, 0.0  ;;  %v1519_v21 = vsel %vm756_vm1, %v1385_v63, 0.0  ;;  %v1770_v63 = vmul.f32 %v9462_v56, %v8216_v20 }
 0x49d   :  { %1331 = vadd.xlane.f32.xlu2 %v1330_v8 }
 0x49f   :  { %v9494_v33 = vpop.xlane.xlu0 %1115  ;;  %v9496_v38 = vpop.xlane.xlu1 %1988 }
 0x4a0   :  { %v9502_v52 = vpop.xlane.xlu2 %1121 }
 0x4a4   :  { %1517 = vadd.xlane.f32.xlu0 %v1516_v42  ;;  %1328 = vadd.xlane.f32.xlu1 %v1327_v35  ;;  %v1714_v42 = vsel %vm756_vm1, %v1578_v4, 0.0  ;;  %v1900_v4 = vsel %vm756_vm1, %v1768_v39, 0.0  ;;  %v1962_v39 = vmul.f32 %v9462_v56, %v8361_v58 }
 0x4a5   :  { %1523 = vadd.xlane.f32.xlu2 %v1522_v54 }
 0x4a7   :  { %v9509_v62 = vpop.xlane.xlu0 %1307  ;;  %v9511_v8 = vpop.xlane.xlu1 %1118 }
 0x4a8   :  { %16005 = vst [vmem:[#allocation70_spill] sm:$0xff] %v9511_v8  ;;  %v9517_v50 = vpop.xlane.xlu2 %1313  ;;  %v16010_v8 = vld [vmem:[#allocation37_spill] sm:$0xff] }
 0x4a9   :  { %v1769_v20 = vmul.f32 %v9442_v57, %v16010_v8  ;;  %v16013_v8 = vld [vmem:[#allocation79_spill] sm:$0xff] }
 0x4ac   :  { %1709 = vadd.xlane.f32.xlu0 %v1708_v32  ;;  %1520 = vadd.xlane.f32.xlu1 %v1519_v21  ;;  %v1711_v32 = vsel %vm756_vm1, %v1577_v5, 0.0  ;;  %v1906_v21 = vsel %vm756_vm1, %v1770_v63, 0.0  ;;  %v9553_v5 = vpop.f32.mrf.mxu2  ;;  %v2092_v63 = vsel %vm756_vm1, %v1960_v25, 0.0 }
 0x4ad   :  { %1715 = vadd.xlane.f32.xlu2 %v1714_v42 }
 0x4af   :  { %v9524_v35 = vpop.xlane.xlu0 %1499  ;;  %v9526_v54 = vpop.xlane.xlu1 %1310 }
 0x4b0   :  { %16006 = vst [vmem:[#allocation87_spill] sm:$0xff] %v9526_v54  ;;  %v9532_v18 = vpop.xlane.xlu2 %1505 }
 0x4b4   :  { %1901 = vadd.xlane.f32.xlu0 %v1900_v4  ;;  %1712 = vadd.xlane.f32.xlu1 %v1711_v32  ;;  %v1903_v4 = vsel %vm756_vm1, %v1769_v20, 0.0  ;;  %v2098_v32 = vsel %vm756_vm1, %v1962_v39, 0.0  ;;  %v1003_v20 = vmul.f32 %v9536_v17, %v15862_v31  ;;  %v16017_v39 = vld [vmem:[#allocation51_spill] sm:$0xff] }
 0x4b5   :  { %1907 = vadd.xlane.f32.xlu2 %v1906_v21  ;;  %v16011_v21 = vld [vmem:[#allocation76_spill] sm:$0xff] }
 0x4b6   :  { %v2125_v22 = vsel %vm2110_vm2, %v16012_v10, %v16011_v21  ;;  %v16019_v10 = vld [vmem:[#allocation166_spill] sm:$0xff] }
 0x4b7   :  { %v9541_v42 = vpop.xlane.xlu0 %1691  ;;  %v9543_v49 = vpop.xlane.xlu1 %1502 }
 0x4b8   :  { %16007 = vst [vmem:[#allocation103_spill] sm:$0xff] %v9541_v42  ;;  %v9549_v54 = vpop.xlane.xlu2 %1697  ;;  %v16014_v42 = vld [vmem:[#allocation82_spill] sm:$0xff] }
 0x4b9   :  { %16008 = vst [vmem:[#allocation52_spill] sm:$0xff] %v9543_v49  ;;  %v2174_v49 = vsel %vm2159_vm3, %v2125_v22, %v16013_v8 }
 0x4ba   :  { %v2223_v56 = vsel %vm2208_vm4, %v2174_v49, %v16014_v42  ;;  %v1141_v49 = vsel %vm756_vm1, %v1003_v20, 0.0  ;;  %v16021_v42 = vld [vmem:[#allocation69_spill] sm:$0xff] }
 0x4bc   :  { %2093 = vadd.xlane.f32.xlu0 %v2092_v63  ;;  %1904 = vadd.xlane.f32.xlu1 %v1903_v4  ;;  %v1961_v63 = vmul.f32 %v9442_v57, %v16017_v39  ;;  %v16018_v4 = vld [vmem:[#allocation121_spill] sm:$0xff]  ;;  %v9590_v39 = vpop.f32.mrf.mxu2 }
 0x4bd   :  { %2099 = vadd.xlane.f32.xlu2 %v2098_v32  ;;  %v2272_v21 = vsel %vm2257_vm5, %v2223_v56, %v16018_v4  ;;  %v16023_v56 = vld [vmem:[#allocation71_spill] sm:$0xff] }
 0x4be   :  { %v9579_v22 = vsel %vm2306_vm6, %v2272_v21, %v16019_v10  ;;  %v2095_v8 = vsel %vm756_vm1, %v1961_v63, 0.0  ;;  %v16024_v21 = vld [vmem:[#allocation75_spill] sm:$0xff] }
 0x4bf   :  { %v9565_v58 = vpop.xlane.xlu0 %1883  ;;  %v9567_v25 = vpop.xlane.xlu1 %1694  ;;  %16020 = vst [vmem:[#allocation61_spill] sm:$0xff] %v9579_v22  ;;  %v2398_v57 = vsel %vm2355_vm7, %v9579_v22, -inf  ;;  %v16025_v10 = vld [vmem:[#allocation111_spill] sm:$0xff]  ;;  %v16037_v22 = vld [vmem:[#allocation209_spill] sm:$0xff] }
 0x4c0   :  { %16015 = vst [vmem:[#allocation48_spill] sm:$0xff] %v9565_v58  ;;  %v9575_v32 = vpop.xlane.xlu2 %1889 }
 0x4c1   :  { %16016 = vst [vmem:[#allocation55_spill] sm:$0xff] %v9567_v25  ;;  %v16022_v25 = vld [vmem:[#allocation64_spill] sm:$0xff] }
 0x4c2   :  { %v2124_v31 = vsel %vm2110_vm2, %v16022_v25, %v16021_v42 }
 0x4c3   :  { %v2173_v4 = vsel %vm2159_vm3, %v2124_v31, %v16023_v56 }
 0x4c4   :  { %1142 = vadd.xlane.f32.xlu0 %v1141_v49  ;;  %2096 = vadd.xlane.f32.xlu1 %v2095_v8  ;;  %v2222_v20 = vsel %vm2208_vm4, %v2173_v4, %v16024_v21  ;;  %v1195_v49 = vmul.f32 %v9536_v17, %v7926_v24  ;;  %v16026_v8 = vld [vmem:[#allocation153_spill] sm:$0xff]  ;;  %v1196_v24 = vmul.f32 %v9553_v5, %v7933_v44 }
 0x4c5   :  { %2399 = vmax.xlane.f32.xlu2 %v2398_v57  ;;  %v2271_v63 = vsel %vm2257_vm5, %v2222_v20, %v16025_v10  ;;  %v1005_v57 = vmul.f32 %v9590_v39, %v8174_v15  ;;  %v1771_v44 = vmul.f32 %v9536_v17, %v8218_v43  ;;  %v1580_v43 = vmul.f32 %v9553_v5, %v8101_v36 }
 0x4c6   :  { %v9604_v42 = vsel %vm2306_vm6, %v2271_v63, %v16026_v8  ;;  %v1333_v56 = vsel %vm756_vm1, %v1195_v49, 0.0  ;;  %v1387_v63 = vmul.f32 %v9536_v17, %v7977_v53  ;;  %v1004_v8 = vmul.f32 %v9553_v5, %v8157_v51 }
 0x4c7   :  { %v9596_v58 = vpop.xlane.xlu0 %2075  ;;  %v9598_v25 = vpop.xlane.xlu1 %1886  ;;  %16027 = vst [vmem:[#allocation93_spill] sm:$0xff] %v9604_v42  ;;  %v2395_v4 = vsel %vm2355_vm7, %v9604_v42, -inf  ;;  %v1147_v21 = vsel %vm756_vm1, %v1005_v57, 0.0  ;;  %v1197_v49 = vmul.f32 %v9590_v39, %v7937_v48  ;;  %v1579_v51 = vmul.f32 %v9536_v17, %v8073_v23  ;;  %v16036_v42 = vld [vmem:[#allocation190_spill] sm:$0xff] }
 0x4c8   :  { %v9606_v31 = vpop.xlane.xlu2 %2081  ;;  %v1144_v57 = vsel %vm756_vm1, %v1004_v8, 0.0  ;;  %v1388_v23 = vmul.f32 %v9553_v5, %v7987_v6  ;;  %v1963_v6 = vmul.f32 %v9536_v17, %v8363_v16  ;;  %v16035_v16 = vld [vmem:[#allocation180_spill] sm:$0xff] }
 0x4c9   :  { %v1717_v8 = vsel %vm756_vm1, %v1579_v51, 0.0  ;;  %v1909_v51 = vsel %vm756_vm1, %v1771_v44, 0.0  ;;  %v1773_v44 = vmul.f32 %v9590_v39, %v8250_v1  ;;  %v16038_v1 = vld [vmem:[#allocation183_spill] sm:$0xff] }
 0x4cb   :  { %v1915_v17 = vsel %vm756_vm1, %v1773_v44, 0.0 }
 0x4cc   :  { %1334 = vadd.xlane.f32.xlu0 %v1333_v56  ;;  %2396 = vmax.xlane.f32.xlu1 %v2395_v4  ;;  %v1525_v56 = vsel %vm756_vm1, %v1387_v63, 0.0  ;;  %v1339_v4 = vsel %vm756_vm1, %v1197_v49, 0.0  ;;  %v1389_v63 = vmul.f32 %v9590_v39, %v7990_v12  ;;  %v1336_v49 = vsel %vm756_vm1, %v1196_v24, 0.0 }
 0x4cd   :  { %1148 = vadd.xlane.f32.xlu2 %v1147_v21  ;;  %v1581_v24 = vmul.f32 %v9590_v39, %v8112_v37 }
 0x4cf   :  { %v9614_v20 = vpop.xlane.xlu0 %2384  ;;  %v9616_v10 = vpop.xlane.xlu1 %2078 }
 0x4d0   :  { %16028 = vst [vmem:[#allocation130_spill] sm:$0xff] %v9614_v20  ;;  %v9622_v15 = vpop.xlane.xlu2 %2390  ;;  %v16053_v20 = vld [vmem:[#allocation105_spill] sm:$0xff] }
 0x4d1   :  { %16029 = vst [vmem:[#allocation76_spill] sm:$0xff] %v9616_v10 }
 0x4d4   :  { %1526 = vadd.xlane.f32.xlu0 %v1525_v56  ;;  %1145 = vadd.xlane.f32.xlu1 %v1144_v57  ;;  %v1531_v56 = vsel %vm756_vm1, %v1389_v63, 0.0  ;;  %v1528_v63 = vsel %vm756_vm1, %v1388_v23, 0.0  ;;  %v2101_v23 = vsel %vm756_vm1, %v1963_v6, 0.0 }
 0x4d5   :  { %1340 = vadd.xlane.f32.xlu2 %v1339_v4 }
 0x4d7   :  { %v9629_v21 = vpop.xlane.xlu0 %1124  ;;  %v9631_v53 = vpop.xlane.xlu1 %2387 }
 0x4d8   :  { %16030 = vst [vmem:[#allocation73_spill] sm:$0xff] %v9631_v53  ;;  %v9637_v48 = vpop.xlane.xlu2 %1130 }
 0x4dc   :  { %1718 = vadd.xlane.f32.xlu0 %v1717_v8  ;;  %1337 = vadd.xlane.f32.xlu1 %v1336_v49  ;;  %v1723_v8 = vsel %vm756_vm1, %v1581_v24, 0.0  ;;  %v1720_v24 = vsel %vm756_vm1, %v1580_v43, 0.0  ;;  %v16039_v43 = vld [vmem:[#allocation186_spill] sm:$0xff] }
 0x4dd   :  { %1532 = vadd.xlane.f32.xlu2 %v1531_v56 }
 0x4df   :  { %v9644_v57 = vpop.xlane.xlu0 %1316  ;;  %v9646_v4 = vpop.xlane.xlu1 %1127 }
 0x4e0   :  { %16031 = vst [vmem:[#allocation79_spill] sm:$0xff] %v9646_v4  ;;  %v9652_v12 = vpop.xlane.xlu2 %1322  ;;  %v2113_v4 = vsel %vm2110_vm2, %v16037_v22, %v16036_v42 }
 0x4e4   :  { %1910 = vadd.xlane.f32.xlu0 %v1909_v51  ;;  %1529 = vadd.xlane.f32.xlu1 %v1528_v63  ;;  %v16033_v51 = vld [vmem:[#allocation177_spill] sm:$0xff]  ;;  %v16034_v63 = vld [vmem:[#allocation174_spill] sm:$0xff] }
 0x4e5   :  { %1724 = vadd.xlane.f32.xlu2 %v1723_v8  ;;  %v2111_v8 = vsel %vm2110_vm2, %v16034_v63, %v16033_v51  ;;  %v16042_v51 = vld [vmem:[#allocation189_spill] sm:$0xff] }
 0x4e6   :  { %v2160_v36 = vsel %vm2159_vm3, %v2111_v8, %v16035_v16  ;;  %v16044_v63 = vld [vmem:[#allocation193_spill] sm:$0xff] }
 0x4e7   :  { %v9659_v49 = vpop.xlane.xlu0 %1508  ;;  %v9661_v56 = vpop.xlane.xlu1 %1319  ;;  %v2209_v6 = vsel %vm2208_vm4, %v2160_v36, %v16038_v1  ;;  %v2162_v22 = vsel %vm2159_vm3, %v2113_v4, %v16044_v63  ;;  %v1965_v36 = vmul.f32 %v9590_v39, %v8404_v0  ;;  %v16045_v1 = vld [vmem:[#allocation196_spill] sm:$0xff] }
 0x4e8   :  { %16032 = vst [vmem:[#allocation82_spill] sm:$0xff] %v9661_v56  ;;  %v9667_v37 = vpop.xlane.xlu2 %1514  ;;  %v2258_v56 = vsel %vm2257_vm5, %v2209_v6, %v16039_v43  ;;  %v2211_v8 = vsel %vm2208_vm4, %v2162_v22, %v16045_v1  ;;  %v16046_v43 = vld [vmem:[#allocation63_spill] sm:$0xff]  ;;  %v16050_v63 = vld [vmem:[#allocation68_spill] sm:$0xff] }
 0x4e9   :  { %v9694_v16 = vsel %vm2306_vm6, %v2258_v56, %v16042_v51  ;;  %v16048_v51 = vld [vmem:[#allocation176_spill] sm:$0xff]  ;;  %v2107_v39 = vsel %vm756_vm1, %v1965_v36, 0.0  ;;  %v16057_v36 = vld [vmem:[#allocation66_spill] sm:$0xff] }
 0x4ea   :  { %16043 = vst [vmem:[#allocation166_spill] sm:$0xff] %v9694_v16  ;;  %v16051_v1 = vld [vmem:[#allocation72_spill] sm:$0xff] }
 0x4ec   :  { %2102 = vadd.xlane.f32.xlu0 %v2101_v23  ;;  %1721 = vadd.xlane.f32.xlu1 %v1720_v24  ;;  %v16041_v24 = vld [vmem:[#allocation40_spill] sm:$0xff] }
 0x4ed   :  { %1916 = vadd.xlane.f32.xlu2 %v1915_v17  ;;  %v1772_v44 = vmul.f32 %v9553_v5, %v16041_v24  ;;  %v2356_v17 = vsel %vm2355_vm7, %v9694_v16, -inf  ;;  %v16047_v24 = vld [vmem:[#allocation60_spill] sm:$0xff] }
 0x4ee   :  { %v2123_v56 = vsel %vm2110_vm2, %v16047_v24, %v16046_v43  ;;  %v16054_v43 = vld [vmem:[#allocation179_spill] sm:$0xff] }
 0x4ef   :  { %v9686_v53 = vpop.xlane.xlu0 %1700  ;;  %v9688_v23 = vpop.xlane.xlu1 %1511  ;;  %v1912_v6 = vsel %vm756_vm1, %v1772_v44, 0.0  ;;  %v2172_v22 = vsel %vm2159_vm3, %v2123_v56, %v16050_v63  ;;  %v16052_v44 = vld [vmem:[#allocation199_spill] sm:$0xff]  ;;  %v1964_v56 = vmul.f32 %v9553_v5, %v16057_v36  ;;  %v16064_v5 = vld [vmem:[#allocation74_spill] sm:$0xff]  ;;  %v16067_v36 = vld [vmem:[#allocation88_spill] sm:$0xff] }
 0x4f0   :  { %16040 = vst [vmem:[#allocation121_spill] sm:$0xff] %v9688_v23  ;;  %v9698_v42 = vpop.xlane.xlu2 %1706  ;;  %v16049_v23 = vld [vmem:[#allocation210_spill] sm:$0xff]  ;;  %v2221_v0 = vsel %vm2208_vm4, %v2172_v22, %v16051_v1  ;;  %v2260_v16 = vsel %vm2257_vm5, %v2211_v8, %v16052_v44  ;;  %v16063_v44 = vld [vmem:[#allocation77_spill] sm:$0xff] }
 0x4f1   :  { %v2112_v4 = vsel %vm2110_vm2, %v16049_v23, %v16048_v51  ;;  %v2270_v24 = vsel %vm2257_vm5, %v2221_v0, %v16053_v20  ;;  %v16058_v51 = vld [vmem:[#allocation147_spill] sm:$0xff]  ;;  %v16060_v8 = vld [vmem:[#allocation202_spill] sm:$0xff]  ;;  %v2104_v1 = vsel %vm756_vm1, %v1964_v56, 0.0 }
 0x4f2   :  { %v2161_v23 = vsel %vm2159_vm3, %v2112_v4, %v16054_v43  ;;  %v9738_v22 = vsel %vm2306_vm6, %v2260_v16, %v16060_v8  ;;  %v16062_v0 = vld [vmem:[#allocation182_spill] sm:$0xff]  ;;  %v2126_v43 = vsel %vm2110_vm2, %v16064_v5, %v16063_v44  ;;  %v16066_v8 = vld [vmem:[#allocation91_spill] sm:$0xff] }
 0x4f3   :  { %16061 = vst [vmem:[#allocation75_spill] sm:$0xff] %v9738_v22  ;;  %v2210_v20 = vsel %vm2208_vm4, %v2161_v23, %v16062_v0  ;;  %v2128_v23 = vsel %vm2110_vm2, %v16067_v36, %v16066_v8  ;;  %v16068_v0 = vld [vmem:[#allocation185_spill] sm:$0xff]  ;;  %v16070_v44 = vld [vmem:[#allocation94_spill] sm:$0xff]  ;;  %v16075_v36 = vld [vmem:[#allocation100_spill] sm:$0xff] }
 0x4f4   :  { %2357 = vmax.xlane.f32.xlu0 %v2356_v17  ;;  %1913 = vadd.xlane.f32.xlu1 %v1912_v6  ;;  %v2259_v56 = vsel %vm2257_vm5, %v2210_v20, %v16068_v0  ;;  %v16076_v20 = vld [vmem:[#allocation171_spill] sm:$0xff]  ;;  %v16080_v0 = vld [vmem:[#allocation140_spill] sm:$0xff] }
 0x4f5   :  { %2108 = vadd.xlane.f32.xlu2 %v2107_v39  ;;  %v9732_v39 = vsel %vm2306_vm6, %v2270_v24, %v16058_v51  ;;  %v2362_v24 = vsel %vm2355_vm7, %v9738_v22, -inf  ;;  %v16065_v51 = vld [vmem:[#allocation80_spill] sm:$0xff]  ;;  %v16072_v22 = vld [vmem:[#allocation123_spill] sm:$0xff] }
 0x4f6   :  { %16059 = vst [vmem:[#allocation71_spill] sm:$0xff] %v9732_v39  ;;  %v2392_v4 = vsel %vm2355_vm7, %v9732_v39, -inf  ;;  %v2175_v16 = vsel %vm2159_vm3, %v2126_v43, %v16065_v51  ;;  %v16069_v39 = vld [vmem:[#allocation84_spill] sm:$0xff] }
 0x4f7   :  { %v9724_v17 = vpop.xlane.xlu0 %1892  ;;  %v9726_v6 = vpop.xlane.xlu1 %1703 }
 0x4f8   :  { %16055 = vst [vmem:[#allocation69_spill] sm:$0xff] %v9724_v17  ;;  %v9734_v63 = vpop.xlane.xlu2 %1898 }
 0x4f9   :  { %16056 = vst [vmem:[#allocation64_spill] sm:$0xff] %v9726_v6  ;;  %v2224_v6 = vsel %vm2208_vm4, %v2175_v16, %v16069_v39  ;;  %v16078_v16 = vld [vmem:[#allocation188_spill] sm:$0xff] }
 0x4fa   :  { %v2273_v43 = vsel %vm2257_vm5, %v2224_v6, %v16072_v22 }
 0x4fb   :  { %v9773_v8 = vsel %vm2306_vm6, %v2273_v43, %v16076_v20  ;;  %v16084_v43 = vld [vmem:[#allocation213_spill] sm:$0xff] }
 0x4fc   :  { %2393 = vmax.xlane.f32.xlu0 %v2392_v4  ;;  %2105 = vadd.xlane.f32.xlu1 %v2104_v1  ;;  %v2177_v4 = vsel %vm2159_vm3, %v2128_v23, %v16070_v44  ;;  %v16071_v1 = vld [vmem:[#allocation97_spill] sm:$0xff]  ;;  %16077 = vst [vmem:[#allocation177_spill] sm:$0xff] %v9773_v8  ;;  %v9779_v23 = vsel %vm2306_vm6, %v2259_v56, %v16078_v16  ;;  %v2401_v22 = vsel %vm2355_vm7, %v9773_v8, -inf  ;;  %v16088_v8 = vld [vmem:[#allocation106_spill] sm:$0xff] }
 0x4fd   :  { %2363 = vmax.xlane.f32.xlu2 %v2362_v24  ;;  %v2226_v5 = vsel %vm2208_vm4, %v2177_v4, %v16071_v1  ;;  %16079 = vst [vmem:[#allocation174_spill] sm:$0xff] %v9779_v23  ;;  %v2359_v44 = vsel %vm2355_vm7, %v9779_v23, -inf  ;;  %v16082_v4 = vld [vmem:[#allocation81_spill] sm:$0xff]  ;;  %v16083_v1 = vld [vmem:[#allocation78_spill] sm:$0xff] }
 0x4fe   :  { %v2275_v24 = vsel %vm2257_vm5, %v2226_v5, %v16075_v36  ;;  %v2127_v5 = vsel %vm2110_vm2, %v16083_v1, %v16082_v4  ;;  %v16085_v36 = vld [vmem:[#allocation212_spill] sm:$0xff]  ;;  %v16090_v4 = vld [vmem:[#allocation86_spill] sm:$0xff] }
 0x4ff   :  { %v9765_v51 = vpop.xlane.xlu0 %2084  ;;  %v9767_v10 = vpop.xlane.xlu1 %1895  ;;  %v9783_v6 = vsel %vm2306_vm6, %v2275_v24, %v16080_v0  ;;  %v2114_v20 = vsel %vm2110_vm2, %v16085_v36, %v16084_v43  ;;  %v16086_v24 = vld [vmem:[#allocation83_spill] sm:$0xff]  ;;  %v16087_v0 = vld [vmem:[#allocation109_spill] sm:$0xff]  ;;  %v16091_v43 = vld [vmem:[#allocation112_spill] sm:$0xff] }
 0x500   :  { %16073 = vst [vmem:[#allocation111_spill] sm:$0xff] %v9765_v51  ;;  %v9775_v39 = vpop.xlane.xlu2 %2090  ;;  %v2407_v56 = vsel %vm2355_vm7, %v9783_v6, -inf  ;;  %v2176_v16 = vsel %vm2159_vm3, %v2127_v5, %v16086_v24  ;;  %v2131_v23 = vsel %vm2110_vm2, %v16088_v8, %v16087_v0  ;;  %v16094_v24 = vld [vmem:[#allocation115_spill] sm:$0xff]  ;;  %v16095_v8 = vld [vmem:[#allocation218_spill] sm:$0xff] }
 0x501   :  { %16074 = vst [vmem:[#allocation153_spill] sm:$0xff] %v9767_v10  ;;  %v16089_v10 = vld [vmem:[#allocation42_spill] sm:$0xff]  ;;  %v2225_v1 = vsel %vm2208_vm4, %v2176_v16, %v16090_v4 }
 0x502   :  { %16081 = vst [vmem:[#allocation180_spill] sm:$0xff] %v9783_v6  ;;  %v2163_v51 = vsel %vm2159_vm3, %v2114_v20, %v16089_v10  ;;  %v16093_v6 = vld [vmem:[#allocation89_spill] sm:$0xff] }
 0x503   :  { %v2274_v5 = vsel %vm2257_vm5, %v2225_v1, %v16093_v6 }
 0x504   :  { %2402 = vmax.xlane.f32.xlu0 %v2401_v22  ;;  %2360 = vmax.xlane.f32.xlu1 %v2359_v44  ;;  %v2180_v22 = vsel %vm2159_vm3, %v2131_v23, %v16091_v43  ;;  %v16092_v44 = vld [vmem:[#allocation215_spill] sm:$0xff]  ;;  %v16099_v23 = vld [vmem:[#allocation126_spill] sm:$0xff] }
 0x505   :  { %2408 = vmax.xlane.f32.xlu2 %v2407_v56  ;;  %v2212_v36 = vsel %vm2208_vm4, %v2163_v51, %v16092_v44  ;;  %v2229_v17 = vsel %vm2208_vm4, %v2180_v22, %v16094_v24  ;;  %v16098_v56 = vld [vmem:[#allocation118_spill] sm:$0xff]  ;;  %v9824_v4 = vsel %vm2306_vm6, %v2274_v5, %v16099_v23  ;;  %v16101_v51 = vld [vmem:[#allocation221_spill] sm:$0xff]  ;;  %v16104_v43 = vld [vmem:[#allocation163_spill] sm:$0xff] }
 0x506   :  { %v2261_v0 = vsel %vm2257_vm5, %v2212_v36, %v16095_v8  ;;  %v2278_v16 = vsel %vm2257_vm5, %v2229_v17, %v16098_v56  ;;  %16100 = vst [vmem:[#allocation183_spill] sm:$0xff] %v9824_v4  ;;  %v2404_v17 = vsel %vm2355_vm7, %v9824_v4, -inf  ;;  %v16106_v36 = vld [vmem:[#allocation92_spill] sm:$0xff]  ;;  %v16107_v24 = vld [vmem:[#allocation90_spill] sm:$0xff]  ;;  %v16108_v8 = vld [vmem:[#allocation99_spill] sm:$0xff] }
 0x507   :  { %v9816_v10 = vpop.xlane.xlu0 %1133  ;;  %v9818_v20 = vpop.xlane.xlu1 %2087  ;;  %v9828_v6 = vsel %vm2306_vm6, %v2261_v0, %v16101_v51  ;;  %v9834_v22 = vsel %vm2306_vm6, %v2278_v16, %v16104_v43  ;;  %v2129_v5 = vsel %vm2110_vm2, %v16107_v24, %v16106_v36  ;;  %v16109_v56 = vld [vmem:[#allocation96_spill] sm:$0xff]  ;;  %v16110_v23 = vld [vmem:[#allocation95_spill] sm:$0xff]  ;;  %v16111_v43 = vld [vmem:[#allocation102_spill] sm:$0xff] }
 0x508   :  { %16096 = vst [vmem:[#allocation190_spill] sm:$0xff] %v9816_v10  ;;  %v9830_v1 = vpop.xlane.xlu2 %1139  ;;  %v2365_v44 = vsel %vm2355_vm7, %v9828_v6, -inf  ;;  %v2130_v0 = vsel %vm2110_vm2, %v16109_v56, %v16108_v8  ;;  %v2416_v16 = vsel %vm2355_vm7, %v9834_v22, -inf  ;;  %v2178_v51 = vsel %vm2159_vm3, %v2129_v5, %v16110_v23  ;;  %v16112_v4 = vld [vmem:[#allocation225_spill] sm:$0xff]  ;;  %v16114_v36 = vld [vmem:[#allocation98_spill] sm:$0xff]  ;;  %v16115_v8 = vld [vmem:[#allocation104_spill] sm:$0xff] }
 0x509   :  { %16097 = vst [vmem:[#allocation209_spill] sm:$0xff] %v9818_v20  ;;  %v2227_v24 = vsel %vm2208_vm4, %v2178_v51, %v16114_v36  ;;  %v16118_v23 = vld [vmem:[#allocation107_spill] sm:$0xff]  ;;  %v16125_v36 = vld [vmem:[#allocation45_spill] sm:$0xff] }
 0x50a   :  { %16102 = vst [vmem:[#allocation186_spill] sm:$0xff] %v9828_v6  ;;  %v2179_v6 = vsel %vm2159_vm3, %v2130_v0, %v16111_v43  ;;  %v16119_v43 = vld [vmem:[#allocation231_spill] sm:$0xff] }
 0x50b   :  { %16103 = vst [vmem:[#allocation189_spill] sm:$0xff] %v9830_v1  ;;  %v16113_v1 = vld [vmem:[#allocation222_spill] sm:$0xff] }
 0x50c   :  { %16105 = vst [vmem:[#allocation193_spill] sm:$0xff] %v9834_v22  ;;  %2366 = vmax.xlane.f32.xlu0 %v2365_v44  ;;  %2405 = vmax.xlane.f32.xlu1 %v2404_v17  ;;  %v2116_v20 = vsel %vm2110_vm2, %v16113_v1, %v16112_v4  ;;  %v2228_v44 = vsel %vm2208_vm4, %v2179_v6, %v16115_v8  ;;  %v16116_v17 = vld [vmem:[#allocation228_spill] sm:$0xff]  ;;  %v16117_v22 = vld [vmem:[#allocation101_spill] sm:$0xff] }
 0x50d   :  { %2417 = vmax.xlane.f32.xlu2 %v2416_v16  ;;  %v2165_v56 = vsel %vm2159_vm3, %v2116_v20, %v16116_v17  ;;  %v2276_v5 = vsel %vm2257_vm5, %v2227_v24, %v16117_v22  ;;  %v2277_v0 = vsel %vm2257_vm5, %v2228_v44, %v16118_v23  ;;  %v16121_v16 = vld [vmem:[#allocation143_spill] sm:$0xff]  ;;  %v16123_v6 = vld [vmem:[#allocation149_spill] sm:$0xff] }
 0x50e   :  { %v2214_v10 = vsel %vm2208_vm4, %v2165_v56, %v16119_v43  ;;  %v9873_v51 = vsel %vm2306_vm6, %v2276_v5, %v16121_v16  ;;  %v9877_v20 = vsel %vm2306_vm6, %v2277_v0, %v16123_v6  ;;  %v16126_v22 = vld [vmem:[#allocation219_spill] sm:$0xff]  ;;  %v16128_v56 = vld [vmem:[#allocation85_spill] sm:$0xff]  ;;  %v16129_v43 = vld [vmem:[#allocation110_spill] sm:$0xff] }
 0x50f   :  { %v9867_v4 = vpop.xlane.xlu0 %1325  ;;  %v9869_v1 = vpop.xlane.xlu1 %1136  ;;  %16122 = vst [vmem:[#allocation63_spill] sm:$0xff] %v9873_v51  ;;  %v2115_v24 = vsel %vm2110_vm2, %v16126_v22, %v16125_v36  ;;  %v2263_v8 = vsel %vm2257_vm5, %v2214_v10, %v9343_v55  ;;  %v2410_v23 = vsel %vm2355_vm7, %v9873_v51, -inf  ;;  %v2413_v0 = vsel %vm2355_vm7, %v9877_v20, -inf  ;;  %v16130_v16 = vld [vmem:[#allocation108_spill] sm:$0xff]  ;;  %v16133_v22 = vld [vmem:[#allocation125_spill] sm:$0xff] }
 0x510   :  { %16120 = vst [vmem:[#allocation196_spill] sm:$0xff] %v9869_v1  ;;  %v9884_v44 = vpop.xlane.xlu2 %1331  ;;  %v9888_v17 = vsel %vm2306_vm6, %v2263_v8, %v9375_v7  ;;  %v2164_v5 = vsel %vm2159_vm3, %v2115_v24, %v16128_v56  ;;  %v2132_v6 = vsel %vm2110_vm2, %v16130_v16, %v16129_v43  ;;  %v16131_v7 = vld [vmem:[#allocation113_spill] sm:$0xff]  ;;  %v16132_v36 = vld [vmem:[#allocation128_spill] sm:$0xff] }
 0x511   :  { %16124 = vst [vmem:[#allocation60_spill] sm:$0xff] %v9877_v20  ;;  %v2371_v55 = vsel %vm2355_vm7, %v9888_v17, -inf  ;;  %v2181_v10 = vsel %vm2159_vm3, %v2132_v6, %v16131_v7  ;;  %v2134_v24 = vsel %vm2110_vm2, %v16133_v22, %v16132_v36  ;;  %v16134_v8 = vld [vmem:[#allocation116_spill] sm:$0xff]  ;;  %v16135_v20 = vld [vmem:[#allocation131_spill] sm:$0xff]  ;;  %v16136_v43 = vld [vmem:[#allocation217_spill] sm:$0xff] }
 0x512   :  { %16127 = vst [vmem:[#allocation176_spill] sm:$0xff] %v9888_v17  ;;  %v2230_v56 = vsel %vm2208_vm4, %v2181_v10, %v16134_v8  ;;  %v2183_v51 = vsel %vm2159_vm3, %v2134_v24, %v16135_v20  ;;  %v16138_v17 = vld [vmem:[#allocation134_spill] sm:$0xff]  ;;  %v16139_v7 = vld [vmem:[#allocation220_spill] sm:$0xff]  ;;  %v16140_v10 = vld [vmem:[#allocation137_spill] sm:$0xff] }
 0x513   :  { %v2232_v6 = vsel %vm2208_vm4, %v2183_v51, %v16138_v17  ;;  %v16141_v20 = vld [vmem:[#allocation167_spill] sm:$0xff] }
 0x514   :  { %2411 = vmax.xlane.f32.xlu0 %v2410_v23  ;;  %2414 = vmax.xlane.f32.xlu1 %v2413_v0  ;;  %v2213_v23 = vsel %vm2208_vm4, %v2164_v5, %v16136_v43  ;;  %v16137_v0 = vld [vmem:[#allocation119_spill] sm:$0xff]  ;;  %v2281_v22 = vsel %vm2257_vm5, %v2232_v6, %v16140_v10  ;;  %v16148_v6 = vld [vmem:[#allocation114_spill] sm:$0xff]  ;;  %v16149_v10 = vld [vmem:[#allocation120_spill] sm:$0xff] }
 0x515   :  { %2372 = vmax.xlane.f32.xlu2 %v2371_v55  ;;  %v2279_v16 = vsel %vm2257_vm5, %v2230_v56, %v16137_v0  ;;  %v2262_v1 = vsel %vm2257_vm5, %v2213_v23, %v16139_v7  ;;  %v16143_v5 = vld [vmem:[#allocation223_spill] sm:$0xff]  ;;  %v16147_v0 = vld [vmem:[#allocation117_spill] sm:$0xff] }
 0x516   :  { %v9926_v24 = vsel %vm2306_vm6, %v2279_v16, %v16141_v20  ;;  %v9930_v8 = vsel %vm2306_vm6, %v2262_v1, %v16143_v5  ;;  %v16145_v51 = vld [vmem:[#allocation187_spill] sm:$0xff]  ;;  %v2133_v16 = vsel %vm2110_vm2, %v16148_v6, %v16147_v0  ;;  %v2117_v1 = vsel %vm2110_vm2, %v9400_v34, %v9415_v61  ;;  %v16150_v20 = vld [vmem:[#allocation148_spill] sm:$0xff]  ;;  %v16151_v5 = vld [vmem:[#allocation145_spill] sm:$0xff] }
 0x517   :  { %v9918_v36 = vpop.xlane.xlu0 %1517  ;;  %v9920_v55 = vpop.xlane.xlu1 %1328  ;;  %16142 = vst [vmem:[#allocation210_spill] sm:$0xff] %v9926_v24  ;;  %v9936_v17 = vsel %vm2306_vm6, %v2281_v22, %v16145_v51  ;;  %v2419_v43 = vsel %vm2355_vm7, %v9926_v24, -inf  ;;  %v2368_v23 = vsel %vm2355_vm7, %v9930_v8, -inf  ;;  %v2182_v22 = vsel %vm2159_vm3, %v2133_v16, %v16149_v10  ;;  %v16152_v0 = vld [vmem:[#allocation122_spill] sm:$0xff]  ;;  %v16153_v34 = vld [vmem:[#allocation151_spill] sm:$0xff] }
 0x518   :  { %16144 = vst [vmem:[#allocation68_spill] sm:$0xff] %v9930_v8  ;;  %v9932_v56 = vpop.xlane.xlu2 %1523  ;;  %v2425_v7 = vsel %vm2355_vm7, %v9936_v17, -inf  ;;  %v2137_v51 = vsel %vm2110_vm2, %v16151_v5, %v16150_v20  ;;  %v2166_v8 = vsel %vm2159_vm3, %v2117_v1, %v9432_v9  ;;  %v2231_v6 = vsel %vm2208_vm4, %v2182_v22, %v16152_v0  ;;  %v16155_v10 = vld [vmem:[#allocation154_spill] sm:$0xff]  ;;  %v16157_v5 = vld [vmem:[#allocation173_spill] sm:$0xff]  ;;  %v16160_v0 = vld [vmem:[#allocation160_spill] sm:$0xff] }
 0x519   :  { %16146 = vst [vmem:[#allocation72_spill] sm:$0xff] %v9936_v17  ;;  %v2186_v61 = vsel %vm2159_vm3, %v2137_v51, %v16153_v34  ;;  %v16162_v34 = vld [vmem:[#allocation129_spill] sm:$0xff] }
 0x51a   :  { %v2235_v17 = vsel %vm2208_vm4, %v2186_v61, %v16155_v10  ;;  %v16163_v61 = vld [vmem:[#allocation127_spill] sm:$0xff] }
 0x51c   :  { %2420 = vmax.xlane.f32.xlu0 %v2419_v43  ;;  %2369 = vmax.xlane.f32.xlu1 %v2368_v23  ;;  %v2215_v43 = vsel %vm2208_vm4, %v2166_v8, %v9449_v41  ;;  %v16154_v23 = vld [vmem:[#allocation124_spill] sm:$0xff] }
 0x51d   :  { %2426 = vmax.xlane.f32.xlu2 %v2425_v7  ;;  %v2280_v16 = vsel %vm2257_vm5, %v2231_v6, %v16154_v23  ;;  %v2264_v20 = vsel %vm2257_vm5, %v2215_v43, %v9466_v29  ;;  %v16156_v7 = vld [vmem:[#allocation157_spill] sm:$0xff]  ;;  %v2135_v43 = vsel %vm2110_vm2, %v16163_v61, %v16162_v34  ;;  %v16164_v23 = vld [vmem:[#allocation136_spill] sm:$0xff]  ;;  %v16170_v34 = vld [vmem:[#allocation135_spill] sm:$0xff] }
 0x51e   :  { %v2284_v22 = vsel %vm2257_vm5, %v2235_v17, %v16156_v7  ;;  %v9977_v51 = vsel %vm2306_vm6, %v2280_v16, %v16157_v5  ;;  %v9981_v41 = vsel %vm2306_vm6, %v2264_v20, %v9481_v27  ;;  %v16165_v16 = vld [vmem:[#allocation133_spill] sm:$0xff]  ;;  %v16166_v20 = vld [vmem:[#allocation132_spill] sm:$0xff] }
 0x51f   :  { %v9969_v9 = vpop.xlane.xlu0 %1709  ;;  %v9971_v1 = vpop.xlane.xlu1 %1520  ;;  %16158 = vst [vmem:[#allocation199_spill] sm:$0xff] %v9977_v51  ;;  %v9987_v29 = vsel %vm2306_vm6, %v2284_v22, %v16160_v0  ;;  %v2374_v6 = vsel %vm2355_vm7, %v9981_v41, -inf  ;;  %v2422_v17 = vsel %vm2355_vm7, %v9977_v51, -inf  ;;  %v2136_v27 = vsel %vm2110_vm2, %v16165_v16, %v16164_v23  ;;  %v16167_v22 = vld [vmem:[#allocation139_spill] sm:$0xff]  ;;  %v16168_v0 = vld [vmem:[#allocation172_spill] sm:$0xff]  ;;  %v16169_v51 = vld [vmem:[#allocation169_spill] sm:$0xff] }
 0x520   :  { %16159 = vst [vmem:[#allocation105_spill] sm:$0xff] %v9981_v41  ;;  %v9983_v8 = vpop.xlane.xlu2 %1715  ;;  %v2434_v10 = vsel %vm2355_vm7, %v9987_v29, -inf  ;;  %v2184_v7 = vsel %vm2159_vm3, %v2135_v43, %v16166_v20  ;;  %v2185_v5 = vsel %vm2159_vm3, %v2136_v27, %v16167_v22  ;;  %v2140_v41 = vsel %vm2110_vm2, %v16169_v51, %v16168_v0  ;;  %v16171_v23 = vld [vmem:[#allocation142_spill] sm:$0xff]  ;;  %v16174_v20 = vld [vmem:[#allocation144_spill] sm:$0xff] }
 0x521   :  { %16161 = vst [vmem:[#allocation179_spill] sm:$0xff] %v9987_v29  ;;  %v2233_v61 = vsel %vm2208_vm4, %v2184_v7, %v16170_v34  ;;  %v16173_v29 = vld [vmem:[#allocation138_spill] sm:$0xff]  ;;  %v16176_v7 = vld [vmem:[#allocation141_spill] sm:$0xff] }
 0x522   :  { %v2282_v43 = vsel %vm2257_vm5, %v2233_v61, %v16173_v29  ;;  %v16175_v22 = vld [vmem:[#allocation178_spill] sm:$0xff]  ;;  %v16179_v34 = vld [vmem:[#allocation181_spill] sm:$0xff] }
 0x523   :  { %v10026_v0 = vsel %vm2306_vm6, %v2282_v43, %v16176_v7  ;;  %v16182_v43 = vld [vmem:[#allocation152_spill] sm:$0xff]  ;;  %v16184_v7 = vld [vmem:[#allocation155_spill] sm:$0xff] }
 0x524   :  { %2375 = vmax.xlane.f32.xlu0 %v2374_v6  ;;  %2423 = vmax.xlane.f32.xlu1 %v2422_v17  ;;  %v2234_v6 = vsel %vm2208_vm4, %v2185_v5, %v16171_v23  ;;  %v16172_v17 = vld [vmem:[#allocation175_spill] sm:$0xff]  ;;  %v16177_v5 = vld [vmem:[#allocation146_spill] sm:$0xff]  ;;  %v16180_v23 = vld [vmem:[#allocation184_spill] sm:$0xff] }
 0x525   :  { %2435 = vmax.xlane.f32.xlu2 %v2434_v10  ;;  %v2189_v16 = vsel %vm2159_vm3, %v2140_v41, %v16172_v17  ;;  %v2283_v27 = vsel %vm2257_vm5, %v2234_v6, %v16174_v20  ;;  %v2428_v17 = vsel %vm2355_vm7, %v10026_v0, -inf  ;;  %v16183_v20 = vld [vmem:[#allocation150_spill] sm:$0xff] }
 0x526   :  { %v2238_v24 = vsel %vm2208_vm4, %v2189_v16, %v16175_v22  ;;  %v10030_v41 = vsel %vm2306_vm6, %v2283_v27, %v16177_v5  ;;  %v2138_v27 = vsel %vm2110_vm2, %v16183_v20, %v16182_v43  ;;  %v16187_v43 = vld [vmem:[#allocation158_spill] sm:$0xff] }
 0x527   :  { %v10020_v51 = vpop.xlane.xlu0 %1901  ;;  %v10022_v10 = vpop.xlane.xlu1 %1712  ;;  %16178 = vst [vmem:[#allocation147_spill] sm:$0xff] %v10030_v41  ;;  %v2287_v29 = vsel %vm2257_vm5, %v2238_v24, %v16179_v34  ;;  %v2431_v16 = vsel %vm2355_vm7, %v10030_v41, -inf  ;;  %v2118_v24 = vsel %vm2110_vm2, %v9413_v13, %v9430_v3  ;;  %v2187_v5 = vsel %vm2159_vm3, %v2138_v27, %v16184_v7  ;;  %v16185_v34 = vld [vmem:[#allocation208_spill] sm:$0xff]  ;;  %v16188_v13 = vld [vmem:[#allocation211_spill] sm:$0xff]  ;;  %v16190_v7 = vld [vmem:[#allocation214_spill] sm:$0xff] }
 0x528   :  { %v10034_v61 = vpop.xlane.xlu2 %1907  ;;  %v10038_v6 = vsel %vm2306_vm6, %v2287_v29, %v16180_v23  ;;  %v16186_v29 = vld [vmem:[#allocation205_spill] sm:$0xff]  ;;  %v2167_v41 = vsel %vm2159_vm3, %v2118_v24, %v9447_v14  ;;  %v2236_v20 = vsel %vm2208_vm4, %v2187_v5, %v16187_v43  ;;  %v16193_v43 = vld [vmem:[#allocation216_spill] sm:$0xff] }
 0x529   :  { %16181 = vst [vmem:[#allocation202_spill] sm:$0xff] %v10038_v6  ;;  %v2443_v22 = vsel %vm2355_vm7, %v10038_v6, -inf  ;;  %v2143_v23 = vsel %vm2110_vm2, %v16186_v29, %v16185_v34  ;;  %v16192_v29 = vld [vmem:[#allocation49_spill] sm:$0xff] }
 0x52a   :  { %v2192_v3 = vsel %vm2159_vm3, %v2143_v23, %v16188_v13 }
 0x52b   :  { %v2241_v6 = vsel %vm2208_vm4, %v2192_v3, %v16190_v7  ;;  %v16194_v3 = vld [vmem:[#allocation159_spill] sm:$0xff] }
 0x52c   :  { %2429 = vmax.xlane.f32.xlu0 %v2428_v17  ;;  %2432 = vmax.xlane.f32.xlu1 %v2431_v16  ;;  %v2216_v17 = vsel %vm2208_vm4, %v2167_v41, %v9464_v19  ;;  %v16189_v16 = vld [vmem:[#allocation161_spill] sm:$0xff]  ;;  %v2290_v19 = vsel %vm2257_vm5, %v2241_v6, %v16192_v29  ;;  %v16199_v29 = vld [vmem:[#allocation198_spill] sm:$0xff] }
 0x52d   :  { %2444 = vmax.xlane.f32.xlu2 %v2443_v22  ;;  %v2285_v27 = vsel %vm2257_vm5, %v2236_v20, %v16189_v16  ;;  %v2265_v34 = vsel %vm2257_vm5, %v2216_v17, %v9479_v30  ;;  %v16191_v22 = vld [vmem:[#allocation164_spill] sm:$0xff]  ;;  %v10089_v30 = vsel %vm2306_vm6, %v2290_v19, %v16193_v43  ;;  %v16196_v16 = vld [vmem:[#allocation195_spill] sm:$0xff]  ;;  %v2146_v43 = vsel %vm2110_vm2, %v9391_v59, %v9406_v40 }
 0x52e   :  { %v10077_v5 = vsel %vm2306_vm6, %v2285_v27, %v16191_v22  ;;  %v10083_v41 = vsel %vm2306_vm6, %v2265_v34, %v9496_v38  ;;  %v16195_v17 = vld [vmem:[#allocation156_spill] sm:$0xff]  ;;  %v2452_v7 = vsel %vm2355_vm7, %v10089_v30, -inf  ;;  %v16198_v34 = vld [vmem:[#allocation162_spill] sm:$0xff] }
 0x52f   :  { %v10071_v14 = vpop.xlane.xlu0 %2093  ;;  %v10073_v24 = vpop.xlane.xlu1 %1904  ;;  %v2437_v20 = vsel %vm2355_vm7, %v10077_v5, -inf  ;;  %v2377_v13 = vsel %vm2355_vm7, %v10083_v41, -inf  ;;  %v2139_v6 = vsel %vm2110_vm2, %v16195_v17, %v16194_v3  ;;  %v16197_v27 = vld [vmem:[#allocation192_spill] sm:$0xff]  ;;  %v16200_v3 = vld [vmem:[#allocation165_spill] sm:$0xff] }
 0x530   :  { %v10085_v23 = vpop.xlane.xlu2 %2099  ;;  %v2141_v38 = vsel %vm2110_vm2, %v16197_v27, %v16196_v16  ;;  %v2188_v22 = vsel %vm2159_vm3, %v2139_v6, %v16198_v34  ;;  %v16201_v16 = vld [vmem:[#allocation201_spill] sm:$0xff]  ;;  %v16202_v27 = vld [vmem:[#allocation168_spill] sm:$0xff] }
 0x531   :  { %v2190_v19 = vsel %vm2159_vm3, %v2141_v38, %v16199_v29  ;;  %v2237_v17 = vsel %vm2208_vm4, %v2188_v22, %v16200_v3  ;;  %v16203_v34 = vld [vmem:[#allocation204_spill] sm:$0xff] }
 0x532   :  { %v2286_v6 = vsel %vm2257_vm5, %v2237_v17, %v16202_v27 }
 0x534   :  { %2438 = vmax.xlane.f32.xlu0 %v2437_v20  ;;  %2378 = vmax.xlane.f32.xlu1 %v2377_v13  ;;  %v2239_v20 = vsel %vm2208_vm4, %v2190_v19, %v16201_v16  ;;  %v2195_v13 = vsel %vm2159_vm3, %v2146_v43, %v9421_v11  ;;  %v16205_v19 = vld [vmem:[#allocation207_spill] sm:$0xff] }
 0x535   :  { %2453 = vmax.xlane.f32.xlu2 %v2452_v7  ;;  %v2288_v38 = vsel %vm2257_vm5, %v2239_v20, %v16203_v34  ;;  %v2244_v29 = vsel %vm2208_vm4, %v2195_v13, %v9438_v2  ;;  %v16204_v7 = vld [vmem:[#allocation170_spill] sm:$0xff]  ;;  %v16207_v13 = vld [vmem:[#allocation191_spill] sm:$0xff]  ;;  %v16209_v34 = vld [vmem:[#allocation224_spill] sm:$0xff] }
 0x536   :  { %v10128_v22 = vsel %vm2306_vm6, %v2286_v6, %v16204_v7  ;;  %v10132_v11 = vsel %vm2306_vm6, %v2288_v38, %v16205_v19  ;;  %v2293_v43 = vsel %vm2257_vm5, %v2244_v29, %v9455_v47  ;;  %v16206_v20 = vld [vmem:[#allocation194_spill] sm:$0xff]  ;;  %v16208_v6 = vld [vmem:[#allocation227_spill] sm:$0xff]  ;;  %v16210_v38 = vld [vmem:[#allocation197_spill] sm:$0xff] }
 0x537   :  { %v10122_v40 = vpop.xlane.xlu0 %1142  ;;  %v10124_v59 = vpop.xlane.xlu1 %2096  ;;  %v10140_v2 = vsel %vm2306_vm6, %v2293_v43, %v9472_v26  ;;  %v2446_v17 = vsel %vm2355_vm7, %v10132_v11, -inf  ;;  %v2440_v16 = vsel %vm2355_vm7, %v10128_v22, -inf  ;;  %v2142_v27 = vsel %vm2110_vm2, %v16207_v13, %v16206_v20  ;;  %v16211_v7 = vld [vmem:[#allocation230_spill] sm:$0xff]  ;;  %v16212_v20 = vld [vmem:[#allocation200_spill] sm:$0xff] }
 0x538   :  { %v10136_v3 = vpop.xlane.xlu2 %2399  ;;  %v2144_v47 = vsel %vm2110_vm2, %v16209_v34, %v16208_v6  ;;  %v2461_v26 = vsel %vm2355_vm7, %v10140_v2, -inf  ;;  %v2191_v29 = vsel %vm2159_vm3, %v2142_v27, %v16210_v38  ;;  %v2149_v43 = vsel %vm2110_vm2, %v9502_v52, %v9517_v50  ;;  %v16213_v6 = vld [vmem:[#allocation203_spill] sm:$0xff] }
 0x539   :  { %v2193_v19 = vsel %vm2159_vm3, %v2144_v47, %v16211_v7  ;;  %v2240_v13 = vsel %vm2208_vm4, %v2191_v29, %v16212_v20  ;;  %v16217_v20 = vld [vmem:[#allocation226_spill] sm:$0xff] }
 0x53a   :  { %v2289_v27 = vsel %vm2257_vm5, %v2240_v13, %v16213_v6  ;;  %v2152_v6 = vsel %vm2110_vm2, %v9637_v48, %v9652_v12 }
 0x53c   :  { %2447 = vmax.xlane.f32.xlu0 %v2446_v17  ;;  %2441 = vmax.xlane.f32.xlu1 %v2440_v16  ;;  %v2242_v17 = vsel %vm2208_vm4, %v2193_v19, %v9333_v60  ;;  %v2198_v16 = vsel %vm2159_vm3, %v2149_v43, %v9532_v18 }
 0x53d   :  { %2462 = vmax.xlane.f32.xlu2 %v2461_v26  ;;  %v2291_v34 = vsel %vm2257_vm5, %v2242_v17, %v9367_v46  ;;  %v2247_v47 = vsel %vm2208_vm4, %v2198_v16, %v9549_v54  ;;  %v16214_v26 = vld [vmem:[#allocation206_spill] sm:$0xff] }
 0x53e   :  { %v10179_v38 = vsel %vm2306_vm6, %v2289_v27, %v16214_v26  ;;  %v10183_v18 = vsel %vm2306_vm6, %v2291_v34, %v9385_v45  ;;  %v2296_v60 = vsel %vm2257_vm5, %v2247_v47, %v9575_v32  ;;  %v16215_v54 = vld [vmem:[#allocation54_spill] sm:$0xff]  ;;  %v16216_v45 = vld [vmem:[#allocation229_spill] sm:$0xff]  ;;  %v2147_v32 = vsel %vm2110_vm2, %v9494_v33, %v9509_v62  ;;  %v16220_v33 = vld [vmem:[#allocation103_spill] sm:$0xff] }
 0x53f   :  { %v10173_v50 = vpop.xlane.xlu0 %1334  ;;  %v10175_v52 = vpop.xlane.xlu1 %2396  ;;  %v10191_v46 = vsel %vm2306_vm6, %v2296_v60, %v9606_v31  ;;  %v2508_v7 = vsub.f32 %v16215_v54, %v9487_v28  ;;  %v2455_v19 = vsel %vm2355_vm7, %v10183_v18, -inf  ;;  %v2449_v43 = vsel %vm2355_vm7, %v10179_v38, -inf  ;;  %v16218_v28 = vld [vmem:[#allocation47_spill] sm:$0xff]  ;;  %v16219_v27 = vld [vmem:[#allocation62_spill] sm:$0xff]  ;;  %v16221_v26 = vld [vmem:[#allocation56_spill] sm:$0xff] }
 0x540   :  { %v10187_v29 = vpop.xlane.xlu2 %1148  ;;  %v2145_v13 = vsel %vm2110_vm2, %v16217_v20, %v16216_v45  ;;  %v2470_v31 = vsel %vm2355_vm7, %v10191_v46, -inf  ;;  %v2196_v16 = vsel %vm2159_vm3, %v2147_v32, %v9524_v35  ;;  %v2201_v47 = vsel %vm2159_vm3, %v2152_v6, %v9667_v37  ;;  %v16223_v45 = vld [vmem:[#allocation65_spill] sm:$0xff] }
 0x541   :  { %v2194_v17 = vsel %vm2159_vm3, %v2145_v13, %v16218_v28  ;;  %v2245_v62 = vsel %vm2208_vm4, %v2196_v16, %v16220_v33  ;;  %v2564_v54 = vmul.f32 1.442695, %v2508_v7  ;;  %v2250_v48 = vsel %vm2208_vm4, %v2201_v47, %v9698_v42  ;;  %v16224_v32 = vld [vmem:[#allocation53_spill] sm:$0xff]  ;;  %v16226_v16 = vld [vmem:[#allocation70_spill] sm:$0xff]  ;;  %v16228_v33 = vld [vmem:[#allocation55_spill] sm:$0xff] }
 0x542   :  { %v2243_v34 = vsel %vm2208_vm4, %v2194_v17, %v16219_v27  ;;  %v2299_v7 = vsel %vm2257_vm5, %v2250_v48, %v9734_v63  ;;  %v16225_v17 = vld [vmem:[#allocation87_spill] sm:$0xff]  ;;  %v2150_v6 = vsel %vm2110_vm2, %v9629_v21, %v9644_v57 }
 0x543   :  { %v2292_v60 = vsel %vm2257_vm5, %v2243_v34, %v16221_v26  ;;  %v10244_v42 = vsel %vm2306_vm6, %v2299_v7, %v9775_v39  ;;  %7398 = vpow2.f32 %v2564_v54  ;;  %v2148_v63 = vsel %vm2110_vm2, %v16226_v16, %v16225_v17  ;;  %v16229_v26 = vld [vmem:[#allocation69_spill] sm:$0xff]  ;;  %v16231_v48 = vld [vmem:[#allocation111_spill] sm:$0xff] }
 0x544   :  { %2456 = vmax.xlane.f32.xlu0 %v2455_v19  ;;  %2450 = vmax.xlane.f32.xlu1 %v2449_v43  ;;  %v16222_v19 = vld [vmem:[#allocation48_spill] sm:$0xff]  ;;  %v10232_v20 = vsel %vm2306_vm6, %v2292_v60, %v16223_v45  ;;  %v2479_v39 = vsel %vm2355_vm7, %v10244_v42, -inf  ;;  %v2199_v34 = vsel %vm2159_vm3, %v2150_v6, %v9659_v49  ;;  %v16236_v6 = vld [vmem:[#allocation82_spill] sm:$0xff] }
 0x545   :  { %2471 = vmax.xlane.f32.xlu2 %v2470_v31  ;;  %v2294_v35 = vsel %vm2257_vm5, %v2245_v62, %v16222_v19  ;;  %v2511_v31 = vsub.f32 %v16224_v32, %v9622_v15  ;;  %v16227_v15 = vld [vmem:[#allocation52_spill] sm:$0xff]  ;;  %v2248_v47 = vsel %vm2208_vm4, %v2199_v34, %v9686_v53  ;;  %v16233_v32 = vld [vmem:[#allocation46_spill] sm:$0xff] }
 0x546   :  { %v10236_v37 = vsel %vm2306_vm6, %v2294_v35, %v9596_v58  ;;  %v2458_v58 = vsel %vm2355_vm7, %v10232_v20, -inf  ;;  %v2197_v27 = vsel %vm2159_vm3, %v2148_v63, %v16227_v15  ;;  %v2297_v60 = vsel %vm2257_vm5, %v2248_v47, %v16229_v26  ;;  %v16230_v35 = vld [vmem:[#allocation76_spill] sm:$0xff]  ;;  %v16239_v47 = vld [vmem:[#allocation121_spill] sm:$0xff] }
 0x547   :  { %v10226_v12 = vpop.xlane.xlu0 %1526  ;;  %v10228_v43 = vpop.xlane.xlu1 %1145  ;;  %v2464_v28 = vsel %vm2355_vm7, %v10236_v37, -inf  ;;  %v2246_v62 = vsel %vm2208_vm4, %v2197_v27, %v16228_v33  ;;  %v2570_v57 = vmul.f32 1.442695, %v2511_v31  ;;  %v10282_v45 = vsel %vm2306_vm6, %v2297_v60, %v16231_v48  ;;  %v16238_v27 = vld [vmem:[#allocation190_spill] sm:$0xff]  ;;  %v16240_v60 = vld [vmem:[#allocation64_spill] sm:$0xff]  ;;  %v16241_v48 = vld [vmem:[#allocation153_spill] sm:$0xff] }
 0x548   :  { %v10240_v13 = vpop.xlane.xlu2 %1340  ;;  %v2295_v21 = vsel %vm2257_vm5, %v2246_v62, %v9598_v25  ;;  %v16232_v25 = vld [vmem:[#allocation130_spill] sm:$0xff]  ;;  %v2473_v16 = vsel %vm2355_vm7, %v10282_v45, -inf  ;;  %v2153_v34 = vsel %vm2110_vm2, %v16238_v27, %v9867_v4 }
 0x549   :  { %v10278_v49 = vsel %vm2306_vm6, %v2295_v21, %v16230_v35  ;;  %v10286_v7 = vpop.eup %7398  ;;  %v2509_v31 = vsub.f32 %v16233_v32, %v16232_v25  ;;  %7400 = vpow2.f32 %v2570_v57  ;;  %v2202_v57 = vsel %vm2159_vm3, %v2153_v34, %v9918_v36 }
 0x54a   :  { %v2467_v63 = vsel %vm2355_vm7, %v10278_v49, -inf  ;;  %v2668_v33 = vsel %vm2355_vm7, %v10286_v7, 0.0  ;;  %v2251_v4 = vsel %vm2208_vm4, %v2202_v57, %v9969_v9  ;;  %v16243_v9 = vld [vmem:[#allocation61_spill] sm:$0xff] }
 0x54b   :  { %v2566_v62 = vmul.f32 1.442695, %v2509_v31  ;;  %v2300_v32 = vsel %vm2257_vm5, %v2251_v4, %v10020_v51 }
 0x54c   :  { %2465 = vmax.xlane.f32.xlu0 %v2464_v28  ;;  %2459 = vmax.xlane.f32.xlu1 %v2458_v58  ;;  %v16234_v28 = vld [vmem:[#allocation73_spill] sm:$0xff] }
 0x54d   :  { %2480 = vmax.xlane.f32.xlu2 %v2479_v39  ;;  %v16235_v58 = vld [vmem:[#allocation57_spill] sm:$0xff]  ;;  %v16237_v39 = vld [vmem:[#allocation79_spill] sm:$0xff]  ;;  %7402 = vpow2.f32 %v2566_v62 }
 0x54e   :  { %v2510_v17 = vsub.f32 %v16235_v58, %v16234_v28  ;;  %v2151_v15 = vsel %vm2110_vm2, %v16237_v39, %v16236_v6  ;;  %v16242_v58 = vld [vmem:[#allocation209_spill] sm:$0xff]  ;;  %v2514_v6 = vsub.f32 %v16243_v9, %v10136_v3 }
 0x54f   :  { %v10272_v54 = vpop.xlane.xlu0 %1718  ;;  %v10274_v19 = vpop.xlane.xlu1 %1337  ;;  %v2200_v21 = vsel %vm2159_vm3, %v2151_v15, %v16239_v47  ;;  %v16244_v15 = vld [vmem:[#allocation189_spill] sm:$0xff] }
 0x550   :  { %v10284_v53 = vpop.xlane.xlu2 %1532  ;;  %v2568_v26 = vmul.f32 1.442695, %v2510_v17  ;;  %v2249_v35 = vsel %vm2208_vm4, %v2200_v21, %v16240_v60  ;;  %v10324_v17 = vsel %vm2306_vm6, %v2300_v32, %v10071_v14  ;;  %v2155_v27 = vsel %vm2110_vm2, %v16244_v15, %v9884_v44 }
 0x551   :  { %v2298_v25 = vsel %vm2257_vm5, %v2249_v35, %v16241_v48  ;;  %v2482_v51 = vsel %vm2355_vm7, %v10324_v17, -inf  ;;  %v2204_v34 = vsel %vm2159_vm3, %v2155_v27, %v9932_v56  ;;  %v2576_v62 = vmul.f32 1.442695, %v2514_v6  ;;  %v16245_v56 = vld [vmem:[#allocation93_spill] sm:$0xff]  ;;  %v16246_v48 = vld [vmem:[#allocation196_spill] sm:$0xff] }
 0x552   :  { %v10320_v36 = vsel %vm2306_vm6, %v2298_v25, %v16242_v58  ;;  %7404 = vpow2.f32 %v2568_v26  ;;  %v2513_v35 = vsub.f32 %v16245_v56, %v10175_v52  ;;  %v2154_v25 = vsel %vm2110_vm2, %v16246_v48, %v9920_v55 }
 0x553   :  { %v2476_v39 = vsel %vm2355_vm7, %v10320_v36, -inf  ;;  %7406 = vpow2.f32 %v2576_v62  ;;  %v2203_v52 = vsel %vm2159_vm3, %v2154_v25, %v9971_v1  ;;  %v2158_v27 = vsel %vm2110_vm2, %v10187_v29, %v10240_v13  ;;  %v16249_v25 = vld [vmem:[#allocation75_spill] sm:$0xff] }
 0x554   :  { %2474 = vmax.xlane.f32.xlu0 %v2473_v16  ;;  %2468 = vmax.xlane.f32.xlu1 %v2467_v63  ;;  %v10326_v63 = vpop.eup %7400  ;;  %v2252_v58 = vsel %vm2208_vm4, %v2203_v52, %v10022_v10  ;;  %v2574_v55 = vmul.f32 1.442695, %v2513_v35  ;;  %v16248_v35 = vld [vmem:[#allocation71_spill] sm:$0xff] }
 0x555   :  { %2669 = vadd.xlane.f32.xlu2 %v2668_v33  ;;  %v2677_v14 = vsel %vm2355_vm7, %v10326_v63, 0.0  ;;  %v10341_v3 = vpop.eup %7402  ;;  %v2253_v33 = vsel %vm2208_vm4, %v2204_v34, %v9983_v8  ;;  %v2207_v34 = vsel %vm2159_vm3, %v2158_v27, %v10284_v53 }
 0x556   :  { %v2302_v26 = vsel %vm2257_vm5, %v2253_v33, %v10034_v61  ;;  %v2671_v8 = vsel %vm2355_vm7, %v10341_v3, 0.0  ;;  %v2156_v61 = vsel %vm2110_vm2, %v10122_v40, %v10173_v50  ;;  %v2301_v40 = vsel %vm2257_vm5, %v2252_v58, %v10073_v24 }
 0x557   :  { %v1911_v31 = vpop.xlane.xlu0 %1910  ;;  %v10316_v28 = vpop.xlane.xlu1 %1529  ;;  %v10353_v44 = vsel %vm2306_vm6, %v2302_v26, %v10085_v23  ;;  %v2205_v32 = vsel %vm2159_vm3, %v2156_v61, %v10226_v12  ;;  %v10382_v1 = vsel %vm2306_vm6, %v2301_v40, %v10124_v59  ;;  %7408 = vpow2.f32 %v2574_v55 }
 0x558   :  { %v1725_v16 = vpop.xlane.xlu2 %1724  ;;  %v10347_v57 = vpop.eup %7404  ;;  %v2488_v23 = vsel %vm2355_vm7, %v10353_v44, -inf  ;;  %v2254_v9 = vsel %vm2208_vm4, %v2205_v32, %v10272_v54 }
 0x559   :  { %v2674_v4 = vsel %vm2355_vm7, %v10347_v57, 0.0  ;;  %v2303_v50 = vsel %vm2257_vm5, %v2254_v9, %v1911_v31  ;;  %v10388_v15 = vpop.eup %7406  ;;  %v2485_v31 = vsel %vm2355_vm7, %v10382_v1, -inf  ;;  %v2256_v33 = vsel %vm2208_vm4, %v2207_v34, %v1725_v16 }
 0x55a   :  { %v2686_v59 = vsel %vm2355_vm7, %v10388_v15, 0.0 }
 0x55c   :  { %2483 = vmax.xlane.f32.xlu0 %v2482_v51  ;;  %2477 = vmax.xlane.f32.xlu1 %v2476_v39  ;;  %v16247_v39 = vld [vmem:[#allocation166_spill] sm:$0xff] }
 0x55d   :  { %2678 = vadd.xlane.f32.xlu2 %v2677_v14  ;;  %v10402_v26 = vpop.eup %7408 }
 0x55f   :  { %v2103_v47 = vpop.xlane.xlu0 %2102  ;;  %v10345_v21 = vpop.xlane.xlu1 %1721 }
 0x560   :  { %v1917_v60 = vpop.xlane.xlu2 %1916  ;;  %v10385_v12 = vsel %vm2306_vm6, %v2303_v50, %v2103_v47 }
 0x561   :  { %v2491_v24 = vsel %vm2355_vm7, %v10385_v12, -inf  ;;  %v2305_v56 = vsel %vm2257_vm5, %v2256_v33, %v1917_v60  ;;  %v2157_v60 = vsel %vm2110_vm2, %v10228_v43, %v10274_v19  ;;  %v16250_v19 = vld [vmem:[#allocation177_spill] sm:$0xff] }
 0x562   :  { %v2206_v32 = vsel %vm2159_vm3, %v2157_v60, %v10316_v28 }
 0x563   :  { %v2255_v58 = vsel %vm2208_vm4, %v2206_v32, %v10345_v21 }
 0x564   :  { %2672 = vadd.xlane.f32.xlu0 %v2671_v8  ;;  %2675 = vadd.xlane.f32.xlu1 %v2674_v4 }
 0x565   :  { %2489 = vmax.xlane.f32.xlu2 %v2488_v23  ;;  %v2683_v23 = vsel %vm2355_vm7, %v10402_v26, 0.0 }
 0x567   :  { %v2358_v6 = vpop.xlane.xlu0 %2357  ;;  %v1914_v51 = vpop.xlane.xlu1 %1913 }
 0x568   :  { %v2500_v10 = vsub.f32 %v16247_v39, %v2358_v6  ;;  %v2109_v14 = vpop.xlane.xlu2 %2108  ;;  %v2304_v55 = vsel %vm2257_vm5, %v2255_v58, %v1914_v51  ;;  %v16251_v6 = vld [vmem:[#allocation174_spill] sm:$0xff] }
 0x569   :  { %v10407_v48 = vsel %vm2306_vm6, %v2305_v56, %v2109_v14  ;;  %v16252_v14 = vld [vmem:[#allocation180_spill] sm:$0xff] }
 0x56a   :  { %v2548_v54 = vmul.f32 1.442695, %v2500_v10  ;;  %v2497_v52 = vsel %vm2355_vm7, %v10407_v48, -inf }
 0x56c   :  { %7410 = vpow2.f32 %v2548_v54  ;;  %2492 = vmax.xlane.f32.xlu0 %v2491_v24  ;;  %2486 = vmax.xlane.f32.xlu1 %v2485_v31 }
 0x56d   :  { %2687 = vadd.xlane.f32.xlu2 %v2686_v59 }
 0x56f   :  { %v2394_v62 = vpop.xlane.xlu0 %2393  ;;  %v2106_v47 = vpop.xlane.xlu1 %2105 }
 0x570   :  { %v2512_v8 = vsub.f32 %v16248_v35, %v2394_v62  ;;  %v2364_v4 = vpop.xlane.xlu2 %2363  ;;  %v10427_v43 = vsel %vm2306_vm6, %v2304_v55, %v2106_v47  ;;  %v16253_v47 = vld [vmem:[#allocation186_spill] sm:$0xff]  ;;  %v16254_v35 = vld [vmem:[#allocation183_spill] sm:$0xff] }
 0x571   :  { %v2502_v29 = vsub.f32 %v16249_v25, %v2364_v4  ;;  %v2494_v27 = vsel %vm2355_vm7, %v10427_v43, -inf  ;;  %v16255_v25 = vld [vmem:[#allocation193_spill] sm:$0xff] }
 0x572   :  { %v10410_v13 = vpop.eup %7410  ;;  %v2572_v61 = vmul.f32 1.442695, %v2512_v8 }
 0x573   :  { %v2552_v53 = vmul.f32 1.442695, %v2502_v29  ;;  %v2644_v16 = vsel %vm2355_vm7, %v10410_v13, 0.0 }
 0x574   :  { %7412 = vpow2.f32 %v2572_v61  ;;  %2645 = vadd.xlane.f32.xlu0 %v2644_v16  ;;  %2684 = vadd.xlane.f32.xlu1 %v2683_v23 }
 0x575   :  { %7414 = vpow2.f32 %v2552_v53  ;;  %2498 = vmax.xlane.f32.xlu2 %v2497_v52 }
 0x577   :  { %v2403_v9 = vpop.xlane.xlu0 %2402  ;;  %v2361_v40 = vpop.xlane.xlu1 %2360 }
 0x578   :  { %v2515_v50 = vsub.f32 %v16250_v19, %v2403_v9  ;;  %v2501_v39 = vsub.f32 %v16251_v6, %v2361_v40  ;;  %v2409_v10 = vpop.xlane.xlu2 %2408  ;;  %v16256_v19 = vld [vmem:[#allocation63_spill] sm:$0xff]  ;;  %v16257_v6 = vld [vmem:[#allocation60_spill] sm:$0xff] }
 0x579   :  { %v2517_v54 = vsub.f32 %v16252_v14, %v2409_v10  ;;  %v16258_v14 = vld [vmem:[#allocation176_spill] sm:$0xff] }
 0x57a   :  { %v10432_v28 = vpop.eup %7412  ;;  %v2578_v24 = vmul.f32 1.442695, %v2515_v50  ;;  %v2550_v31 = vmul.f32 1.442695, %v2501_v39 }
 0x57b   :  { %v10434_v59 = vpop.eup %7414  ;;  %v2582_v21 = vmul.f32 1.442695, %v2517_v54  ;;  %v2680_v51 = vsel %vm2355_vm7, %v10432_v28, 0.0 }
 0x57c   :  { %7416 = vpow2.f32 %v2578_v24  ;;  %2681 = vadd.xlane.f32.xlu0 %v2680_v51  ;;  %2495 = vmax.xlane.f32.xlu1 %v2494_v27  ;;  %v2650_v34 = vsel %vm2355_vm7, %v10434_v59, 0.0 }
 0x57d   :  { %7418 = vpow2.f32 %v2550_v31  ;;  %2651 = vadd.xlane.f32.xlu2 %v2650_v34 }
 0x57e   :  { %7420 = vpow2.f32 %v2582_v21 }
 0x57f   :  { %v2367_v33 = vpop.xlane.xlu0 %2366  ;;  %v2406_v62 = vpop.xlane.xlu1 %2405 }
 0x580   :  { %v2503_v56 = vsub.f32 %v16253_v47, %v2367_v33  ;;  %v2516_v8 = vsub.f32 %v16254_v35, %v2406_v62  ;;  %v2418_v4 = vpop.xlane.xlu2 %2417 }
 0x581   :  { %v2520_v29 = vsub.f32 %v16255_v25, %v2418_v4  ;;  %v16260_v25 = vld [vmem:[#allocation68_spill] sm:$0xff] }
 0x582   :  { %v10445_v61 = vpop.eup %7416  ;;  %v2554_v53 = vmul.f32 1.442695, %v2503_v56  ;;  %v2580_v16 = vmul.f32 1.442695, %v2516_v8  ;;  %v16259_v8 = vld [vmem:[#allocation210_spill] sm:$0xff] }
 0x583   :  { %v10447_v23 = vpop.eup %7418  ;;  %v2588_v60 = vmul.f32 1.442695, %v2520_v29  ;;  %v2689_v52 = vsel %vm2355_vm7, %v10445_v61, 0.0 }
 0x584   :  { %v10451_v32 = vpop.eup %7420  ;;  %7422 = vpow2.f32 %v2554_v53  ;;  %2690 = vadd.xlane.f32.xlu0 %v2689_v52  ;;  %v2647_v58 = vsel %vm2355_vm7, %v10447_v23, 0.0 }
 0x585   :  { %7424 = vpow2.f32 %v2580_v16  ;;  %2648 = vadd.xlane.f32.xlu1 %v2647_v58  ;;  %v2695_v55 = vsel %vm2355_vm7, %v10451_v32, 0.0  ;;  %v16261_v16 = vld [vmem:[#allocation72_spill] sm:$0xff] }
 0x586   :  { %7426 = vpow2.f32 %v2588_v60  ;;  %2696 = vadd.xlane.f32.xlu2 %v2695_v55 }
 0x587   :  { %v2412_v9 = vpop.xlane.xlu0 %2411  ;;  %v2415_v40 = vpop.xlane.xlu1 %2414 }
 0x588   :  { %v2518_v50 = vsub.f32 %v16256_v19, %v2412_v9  ;;  %v2519_v39 = vsub.f32 %v16257_v6, %v2415_v40  ;;  %v2373_v10 = vpop.xlane.xlu2 %2372 }
 0x589   :  { %v2505_v54 = vsub.f32 %v16258_v14, %v2373_v10 }
 0x58a   :  { %v10460_v24 = vpop.eup %7422  ;;  %v2584_v31 = vmul.f32 1.442695, %v2518_v50  ;;  %v2586_v21 = vmul.f32 1.442695, %v2519_v39 }
 0x58b   :  { %v10462_v51 = vpop.eup %7424  ;;  %v2558_v27 = vmul.f32 1.442695, %v2505_v54  ;;  %v2653_v34 = vsel %vm2355_vm7, %v10460_v24, 0.0  ;;  %v16262_v54 = vld [vmem:[#allocation105_spill] sm:$0xff] }
 0x58c   :  { %v10466_v33 = vpop.eup %7426  ;;  %7428 = vpow2.f32 %v2584_v31  ;;  %2654 = vadd.xlane.f32.xlu0 %v2653_v34  ;;  %v2692_v62 = vsel %vm2355_vm7, %v10462_v51, 0.0 }
 0x58d   :  { %7430 = vpow2.f32 %v2586_v21  ;;  %2693 = vadd.xlane.f32.xlu1 %v2692_v62  ;;  %v2704_v47 = vsel %vm2355_vm7, %v10466_v33, 0.0  ;;  %v16263_v21 = vld [vmem:[#allocation199_spill] sm:$0xff] }
 0x58e   :  { %7432 = vpow2.f32 %v2558_v27  ;;  %2705 = vadd.xlane.f32.xlu2 %v2704_v47  ;;  %v16264_v62 = vld [vmem:[#allocation179_spill] sm:$0xff] }
 0x58f   :  { %v2421_v56 = vpop.xlane.xlu0 %2420  ;;  %v2370_v35 = vpop.xlane.xlu1 %2369 }
 0x590   :  { %v2521_v4 = vsub.f32 %v16259_v8, %v2421_v56  ;;  %v2504_v29 = vsub.f32 %v16260_v25, %v2370_v35  ;;  %v2427_v53 = vpop.xlane.xlu2 %2426 }
 0x591   :  { %v2523_v60 = vsub.f32 %v16261_v16, %v2427_v53 }
 0x592   :  { %v10475_v52 = vpop.eup %7428  ;;  %v2590_v58 = vmul.f32 1.442695, %v2521_v4  ;;  %v2556_v55 = vmul.f32 1.442695, %v2504_v29 }
 0x593   :  { %v10477_v9 = vpop.eup %7430  ;;  %v2594_v40 = vmul.f32 1.442695, %v2523_v60  ;;  %v2698_v19 = vsel %vm2355_vm7, %v10475_v52, 0.0 }
 0x594   :  { %v10481_v50 = vpop.eup %7432  ;;  %7434 = vpow2.f32 %v2590_v58  ;;  %2699 = vadd.xlane.f32.xlu0 %v2698_v19  ;;  %v2701_v6 = vsel %vm2355_vm7, %v10477_v9, 0.0  ;;  %v16265_v19 = vld [vmem:[#allocation147_spill] sm:$0xff] }
 0x595   :  { %7436 = vpow2.f32 %v2556_v55  ;;  %2702 = vadd.xlane.f32.xlu1 %v2701_v6  ;;  %v2659_v39 = vsel %vm2355_vm7, %v10481_v50, 0.0 }
 0x596   :  { %7438 = vpow2.f32 %v2594_v40  ;;  %2660 = vadd.xlane.f32.xlu2 %v2659_v39 }
 0x597   :  { %v2376_v10 = vpop.xlane.xlu0 %2375  ;;  %v2424_v14 = vpop.xlane.xlu1 %2423 }
 0x598   :  { %v2506_v31 = vsub.f32 %v16262_v54, %v2376_v10  ;;  %v2522_v27 = vsub.f32 %v16263_v21, %v2424_v14  ;;  %v2436_v34 = vpop.xlane.xlu2 %2435  ;;  %v16266_v10 = vld [vmem:[#allocation202_spill] sm:$0xff] }
 0x599   :  { %v2526_v47 = vsub.f32 %v16264_v62, %v2436_v34 }
 0x59a   :  { %v10490_v56 = vpop.eup %7434  ;;  %v2560_v35 = vmul.f32 1.442695, %v2506_v31  ;;  %v2592_v8 = vmul.f32 1.442695, %v2522_v27 }
 0x59b   :  { %v10492_v4 = vpop.eup %7436  ;;  %v2600_v25 = vmul.f32 1.442695, %v2526_v47  ;;  %v2707_v29 = vsel %vm2355_vm7, %v10490_v56, 0.0 }
 0x59c   :  { %v10496_v53 = vpop.eup %7438  ;;  %7440 = vpow2.f32 %v2560_v35  ;;  %2708 = vadd.xlane.f32.xlu0 %v2707_v29  ;;  %v2656_v16 = vsel %vm2355_vm7, %v10492_v4, 0.0 }
 0x59d   :  { %7442 = vpow2.f32 %v2592_v8  ;;  %2657 = vadd.xlane.f32.xlu1 %v2656_v16  ;;  %v2713_v60 = vsel %vm2355_vm7, %v10496_v53, 0.0 }
 0x59e   :  { %7444 = vpow2.f32 %v2600_v25  ;;  %2714 = vadd.xlane.f32.xlu2 %v2713_v60 }
 0x59f   :  { %v2430_v58 = vpop.xlane.xlu0 %2429  ;;  %v2433_v55 = vpop.xlane.xlu1 %2432 }
 0x5a0   :  { %v2524_v40 = vsub.f32 %v10026_v0, %v2430_v58  ;;  %v2525_v6 = vsub.f32 %v16265_v19, %v2433_v55  ;;  %v2445_v39 = vpop.xlane.xlu2 %2444 }
 0x5a1   :  { %v2529_v14 = vsub.f32 %v16266_v10, %v2445_v39 }
 0x5a2   :  { %v10505_v54 = vpop.eup %7440  ;;  %v2596_v31 = vmul.f32 1.442695, %v2524_v40  ;;  %v2598_v21 = vmul.f32 1.442695, %v2525_v6 }
 0x5a3   :  { %v10507_v27 = vpop.eup %7442  ;;  %v2606_v34 = vmul.f32 1.442695, %v2529_v14  ;;  %v2662_v62 = vsel %vm2355_vm7, %v10505_v54, 0.0 }
 0x5a4   :  { %v10511_v47 = vpop.eup %7444  ;;  %7446 = vpow2.f32 %v2596_v31  ;;  %2663 = vadd.xlane.f32.xlu0 %v2662_v62  ;;  %v2710_v0 = vsel %vm2355_vm7, %v10507_v27, 0.0 }
 0x5a5   :  { %7448 = vpow2.f32 %v2598_v21  ;;  %2711 = vadd.xlane.f32.xlu1 %v2710_v0  ;;  %v2722_v35 = vsel %vm2355_vm7, %v10511_v47, 0.0 }
 0x5a6   :  { %7450 = vpow2.f32 %v2606_v34  ;;  %2723 = vadd.xlane.f32.xlu2 %v2722_v35 }
 0x5a7   :  { %v2439_v8 = vpop.xlane.xlu0 %2438  ;;  %v2379_v25 = vpop.xlane.xlu1 %2378 }
 0x5a8   :  { %v2527_v29 = vsub.f32 %v10077_v5, %v2439_v8  ;;  %v2507_v16 = vsub.f32 %v10083_v41, %v2379_v25  ;;  %v2454_v60 = vpop.xlane.xlu2 %2453 }
 0x5a9   :  { %v2532_v58 = vsub.f32 %v10089_v30, %v2454_v60 }
 0x5aa   :  { %v10520_v55 = vpop.eup %7446  ;;  %v2602_v40 = vmul.f32 1.442695, %v2527_v29  ;;  %v2562_v19 = vmul.f32 1.442695, %v2507_v16 }
 0x5ab   :  { %v10522_v6 = vpop.eup %7448  ;;  %v2612_v39 = vmul.f32 1.442695, %v2532_v58  ;;  %v2716_v10 = vsel %vm2355_vm7, %v10520_v55, 0.0 }
 0x5ac   :  { %v10526_v14 = vpop.eup %7450  ;;  %7452 = vpow2.f32 %v2602_v40  ;;  %2717 = vadd.xlane.f32.xlu0 %v2716_v10  ;;  %v2719_v5 = vsel %vm2355_vm7, %v10522_v6, 0.0 }
 0x5ad   :  { %16267 = vst [vmem:[#allocation182_spill] sm:$0xff] %v10526_v14  ;;  %7454 = vpow2.f32 %v2562_v19  ;;  %2720 = vadd.xlane.f32.xlu1 %v2719_v5  ;;  %v2731_v41 = vsel %vm2355_vm7, %v10526_v14, 0.0 }
 0x5ae   :  { %7456 = vpow2.f32 %v2612_v39  ;;  %2732 = vadd.xlane.f32.xlu2 %v2731_v41 }
 0x5af   :  { %v2448_v30 = vpop.xlane.xlu0 %2447  ;;  %v2442_v31 = vpop.xlane.xlu1 %2441 }
 0x5b0   :  { %v2530_v21 = vsub.f32 %v10132_v11, %v2448_v30  ;;  %v2528_v34 = vsub.f32 %v10128_v22, %v2442_v31  ;;  %v2463_v62 = vpop.xlane.xlu2 %2462 }
 0x5b1   :  { %v2535_v0 = vsub.f32 %v10140_v2, %v2463_v62 }
 0x5b2   :  { %v10535_v35 = vpop.eup %7452  ;;  %v2608_v8 = vmul.f32 1.442695, %v2530_v21  ;;  %v2604_v25 = vmul.f32 1.442695, %v2528_v34 }
 0x5b3   :  { %v10537_v29 = vpop.eup %7454  ;;  %v2618_v16 = vmul.f32 1.442695, %v2535_v0  ;;  %v2725_v60 = vsel %vm2355_vm7, %v10535_v35, 0.0 }
 0x5b4   :  { %v10541_v58 = vpop.eup %7456  ;;  %7458 = vpow2.f32 %v2608_v8  ;;  %2726 = vadd.xlane.f32.xlu0 %v2725_v60  ;;  %v2665_v22 = vsel %vm2355_vm7, %v10537_v29, 0.0 }
 0x5b5   :  { %16268 = vst [vmem:[#allocation77_spill] sm:$0xff] %v10541_v58  ;;  %7460 = vpow2.f32 %v2604_v25  ;;  %2666 = vadd.xlane.f32.xlu1 %v2665_v22  ;;  %v2740_v11 = vsel %vm2355_vm7, %v10541_v58, 0.0 }
 0x5b6   :  { %7462 = vpow2.f32 %v2618_v16  ;;  %2741 = vadd.xlane.f32.xlu2 %v2740_v11 }
 0x5b7   :  { %v2457_v2 = vpop.xlane.xlu0 %2456  ;;  %v2451_v40 = vpop.xlane.xlu1 %2450 }
 0x5b8   :  { %v2533_v19 = vsub.f32 %v10183_v18, %v2457_v2  ;;  %v2531_v39 = vsub.f32 %v10179_v38, %v2451_v40  ;;  %v2472_v10 = vpop.xlane.xlu2 %2471 }
 0x5b9   :  { %v2538_v5 = vsub.f32 %v10191_v46, %v2472_v10 }
 0x5ba   :  { %v10550_v41 = vpop.eup %7458  ;;  %v2614_v30 = vmul.f32 1.442695, %v2533_v19  ;;  %v2610_v31 = vmul.f32 1.442695, %v2531_v39 }
 0x5bb   :  { %v10552_v21 = vpop.eup %7460  ;;  %v2624_v34 = vmul.f32 1.442695, %v2538_v5  ;;  %v2734_v62 = vsel %vm2355_vm7, %v10550_v41, 0.0 }
 0x5bc   :  { %v10556_v0 = vpop.eup %7462  ;;  %7464 = vpow2.f32 %v2614_v30  ;;  %2735 = vadd.xlane.f32.xlu0 %v2734_v62  ;;  %v2728_v38 = vsel %vm2355_vm7, %v10552_v21, 0.0 }
 0x5bd   :  { %16269 = vst [vmem:[#allocation74_spill] sm:$0xff] %v10556_v0  ;;  %7466 = vpow2.f32 %v2610_v31  ;;  %2729 = vadd.xlane.f32.xlu1 %v2728_v38  ;;  %v2749_v18 = vsel %vm2355_vm7, %v10556_v0, 0.0 }
 0x5be   :  { %7468 = vpow2.f32 %v2624_v34  ;;  %2750 = vadd.xlane.f32.xlu2 %v2749_v18 }
 0x5bf   :  { %v2466_v46 = vpop.xlane.xlu0 %2465  ;;  %v2460_v8 = vpop.xlane.xlu1 %2459 }
 0x5c0   :  { %v2536_v25 = vsub.f32 %v10236_v37, %v2466_v46  ;;  %v2534_v16 = vsub.f32 %v10232_v20, %v2460_v8  ;;  %v2481_v60 = vpop.xlane.xlu2 %2480 }
 0x5c1   :  { %v2541_v22 = vsub.f32 %v10244_v42, %v2481_v60 }
 0x5c2   :  { %v10565_v11 = vpop.eup %7464  ;;  %v2620_v2 = vmul.f32 1.442695, %v2536_v25  ;;  %v2616_v40 = vmul.f32 1.442695, %v2534_v16 }
 0x5c3   :  { %v10567_v19 = vpop.eup %7466  ;;  %v2630_v39 = vmul.f32 1.442695, %v2541_v22  ;;  %v2743_v10 = vsel %vm2355_vm7, %v10565_v11, 0.0 }
 0x5c4   :  { %v10571_v5 = vpop.eup %7468  ;;  %7470 = vpow2.f32 %v2620_v2  ;;  %2744 = vadd.xlane.f32.xlu0 %v2743_v10  ;;  %v2737_v20 = vsel %vm2355_vm7, %v10567_v19, 0.0 }
 0x5c5   :  { %16270 = vst [vmem:[#allocation80_spill] sm:$0xff] %v10571_v5  ;;  %7472 = vpow2.f32 %v2616_v40  ;;  %2738 = vadd.xlane.f32.xlu1 %v2737_v20  ;;  %v2758_v37 = vsel %vm2355_vm7, %v10571_v5, 0.0 }
 0x5c6   :  { %7474 = vpow2.f32 %v2630_v39  ;;  %2759 = vadd.xlane.f32.xlu2 %v2758_v37 }
 0x5c7   :  { %v2475_v42 = vpop.xlane.xlu0 %2474  ;;  %v2469_v30 = vpop.xlane.xlu1 %2468 }
 0x5c8   :  { %v2539_v31 = vsub.f32 %v10282_v45, %v2475_v42  ;;  %v2537_v34 = vsub.f32 %v10278_v49, %v2469_v30  ;;  %v10579_v62 = vpop.xlane.xlu2 %2669 }
 0x5c9   :  { %vm2905_vm10 = vweird.f32 %v10579_v62 }
 0x5ca   :  { %v10581_v38 = vpop.eup %7470  ;;  %v2626_v18 = vmul.f32 1.442695, %v2539_v31  ;;  %v2622_v46 = vmul.f32 1.442695, %v2537_v34 }
 0x5cb   :  { %16271 = vst [vmem:[#allocation91_spill] sm:$0xff] %v10581_v38  ;;  %v10583_v8 = vpop.eup %7472  ;;  %v2752_v25 = vsel %vm2355_vm7, %v10581_v38, 0.0 }
 0x5cc   :  { %v10587_v16 = vpop.eup %7474  ;;  %7476 = vpow2.f32 %v2626_v18  ;;  %2753 = vadd.xlane.f32.xlu0 %v2752_v25  ;;  %v2746_v45 = vsel %vm2355_vm7, %v10583_v8, 0.0 }
 0x5cd   :  { %16272 = vst [vmem:[#allocation88_spill] sm:$0xff] %v10587_v16  ;;  %7478 = vpow2.f32 %v2622_v46  ;;  %2747 = vadd.xlane.f32.xlu1 %v2746_v45  ;;  %v2767_v49 = vsel %vm2355_vm7, %v10587_v16, 0.0 }
 0x5ce   :  { %2768 = vadd.xlane.f32.xlu2 %v2767_v49 }
 0x5cf   :  { %v2484_v60 = vpop.xlane.xlu0 %2483  ;;  %v2478_v22 = vpop.xlane.xlu1 %2477 }
 0x5d0   :  { %v2542_v2 = vsub.f32 %v10324_v17, %v2484_v60  ;;  %v2540_v40 = vsub.f32 %v10320_v36, %v2478_v22  ;;  %v10595_v39 = vpop.xlane.xlu2 %2678 }
 0x5d1   :  { %vm2947_vm3 = vweird.f32 %v10595_v39 }
 0x5d2   :  { %v10597_v10 = vpop.eup %7476  ;;  %v2632_v20 = vmul.f32 1.442695, %v2542_v2  ;;  %v2628_v37 = vmul.f32 1.442695, %v2540_v40 }
 0x5d3   :  { %16273 = vst [vmem:[#allocation185_spill] sm:$0xff] %v10597_v10  ;;  %v10599_v42 = vpop.eup %7478  ;;  %v2761_v30 = vsel %vm2355_vm7, %v10597_v10, 0.0 }
 0x5d4   :  { %16274 = vst [vmem:[#allocation84_spill] sm:$0xff] %v10599_v42  ;;  %7480 = vpow2.f32 %v2632_v20  ;;  %2762 = vadd.xlane.f32.xlu0 %v2761_v30  ;;  %v2755_v31 = vsel %vm2355_vm7, %v10599_v42, 0.0 }
 0x5d5   :  { %7482 = vpow2.f32 %v2628_v37  ;;  %2756 = vadd.xlane.f32.xlu1 %v2755_v31  ;;  %v15205_v31 = vmov 0  }
 0x5d6   :  { %7484 = vrcp.f32 %v10579_v62  ;;  %7226 = vset.pattern.permute.xlu2 %v15205_v31  ;;  %7225 = vset.pattern.permute.xlu0 %v15205_v31 }
 0x5d7   :  { %v10605_v17 = vpop.xlane.xlu0 %2672  ;;  %v10607_v36 = vpop.xlane.xlu1 %2675  ;;  %7227 = vset.pattern.permute.xlu1 %v15205_v31 }
 0x5d8   :  { %v2490_v34 = vpop.xlane.xlu2 %2489  ;;  %vm2933_vm5 = vweird.f32 %v10607_v36 }
 0x5d9   :  { %v2544_v25 = vsub.f32 %v10353_v44, %v2490_v34 }
 0x5da   :  { %v10609_v18 = vpop.eup %7480 }
 0x5db   :  { %16275 = vst [vmem:[#allocation94_spill] sm:$0xff] %v10609_v18  ;;  %v10611_v46 = vpop.eup %7482  ;;  %v2770_v45 = vsel %vm2355_vm7, %v10609_v18, 0.0  ;;  %v2636_v60 = vmul.f32 1.442695, %v2544_v25 }
 0x5dc   :  { %16276 = vst [vmem:[#allocation97_spill] sm:$0xff] %v10611_v46  ;;  %v2764_v49 = vsel %vm2355_vm7, %v10611_v46, 0.0  ;;  %2771 = vadd.xlane.f32.xlu0 %v2770_v45  ;;  %v10621_v30 = vpop.eup %7484 }
 0x5dd   :  { %2765 = vadd.xlane.f32.xlu1 %v2764_v49  ;;  %7486 = vpow2.f32 %v2636_v60  ;;  %v2901_v45 = vmul.f32 %v10621_v30, %v10579_v62  ;;  %vm2906_vm8 = vweird.f32 %v10621_v30 }
 0x5de   :  { %vm10667_vm11 = vmor %vm2905_vm10, %vm2906_vm8 }
 0x5df   :  { %v2493_v22 = vpop.xlane.xlu0 %2492  ;;  %v2487_v2 = vpop.xlane.xlu1 %2486 }
 0x5e0   :  { %v2545_v40 = vsub.f32 %v10385_v12, %v2493_v22  ;;  %v2543_v20 = vsub.f32 %v10382_v1, %v2487_v2  ;;  %v2902_v2 = vsub.f32 1.0, %v2901_v45 }
 0x5e2   :  { %v2638_v37 = vmul.f32 1.442695, %v2545_v40  ;;  %v2634_v44 = vmul.f32 1.442695, %v2543_v20  ;;  %v2903_v16 = vmul.f32 %v10621_v30, %v2902_v2 }
 0x5e3   :  { %v10625_v34 = vpop.eup %7486 }
 0x5e4   :  { %7488 = vpow2.f32 %v2638_v37  ;;  %16277 = vst [vmem:[#allocation123_spill] sm:$0xff] %v10625_v34  ;;  %v2776_v1 = vsel %vm2355_vm7, %v10625_v34, 0.0 }
 0x5e5   :  { %7490 = vpow2.f32 %v2634_v44  ;;  %2777 = vadd.xlane.f32.xlu2 %v2776_v1 }
 0x5e6   :  { %7492 = vrcp.f32 %v10595_v39 }
 0x5e7   :  { %7494 = vrcp.f32 %v10607_v36  ;;  %v2646_v12 = vpop.xlane.xlu0 %2645  ;;  %v10632_v25 = vpop.xlane.xlu1 %2684 }
 0x5e8   :  { %7496 = vrcp.f32 %v2646_v12  ;;  %vm2793_vm12 = vweird.f32 %v2646_v12 }
 0x5e9   :  { %7498 = vrcp.f32 %v10632_v25 }
 0x5ea   :  { %v10636_v49 = vpop.eup %7488  ;;  %7500 = vrcp.f32 %v10605_v17 }
 0x5eb   :  { %16278 = vst [vmem:[#allocation100_spill] sm:$0xff] %v10636_v49  ;;  %v10638_v60 = vpop.eup %7490  ;;  %v2779_v40 = vsel %vm2355_vm7, %v10636_v49, 0.0  ;;  %v2911_v49 = vand.u32 2147483648, %v10579_v62 }
 0x5ec   :  { %16279 = vst [vmem:[#allocation171_spill] sm:$0xff] %v10638_v60  ;;  %v10640_v22 = vpop.eup %7492  ;;  %2780 = vadd.xlane.f32.xlu0 %v2779_v40  ;;  %v2773_v37 = vsel %vm2355_vm7, %v10638_v60, 0.0  ;;  %v10656_v40 = vpop.xlane.xlu2 %2687  ;;  %v2904_v60 = vadd.f32 %v10621_v30, %v2903_v16  ;;  %v2797_v16 = vand.u32 2147483647, %v2646_v12 }
 0x5ed   :  { %v10644_v20 = vpop.eup %7494  ;;  %2774 = vadd.xlane.f32.xlu1 %v2773_v37  ;;  %v2943_v45 = vmul.f32 %v10640_v22, %v10595_v39  ;;  %vm2948_vm0 = vweird.f32 %v10640_v22 }
 0x5ee   :  { %v7497_v44 = vpop.eup %7496  ;;  %v2929_v5 = vmul.f32 %v10644_v20, %v10607_v36  ;;  %vm2798_vm15 = vcmp.eq.f32.partialorder %v2797_v16, 8.507059e+37  ;;  %vm2934_vm2 = vweird.f32 %v10644_v20  ;;  %vm10708_vm4 = vmor %vm2947_vm3, %vm2948_vm0  ;;  %vm2989_vm3 = vweird.f32 %v10656_v40 }
 0x5ef   :  { %v2789_v1 = vmul.f32 %v7497_v44, %v2646_v12  ;;  %v10648_v31 = vpop.xlane.xlu0 %2681  ;;  %v2496_v34 = vpop.xlane.xlu1 %2495  ;;  %v2944_v2 = vsub.f32 1.0, %v2943_v45  ;;  %vm2794_vm9 = vweird.f32 %v7497_v44  ;;  %vm10720_vm6 = vmor %vm2933_vm5, %vm2934_vm2 }
 0x5f0   :  { %v2546_v58 = vsub.f32 %v10427_v43, %v2496_v34  ;;  %v2930_v18 = vsub.f32 1.0, %v2929_v5  ;;  %v10663_v10 = vpop.eup %7498  ;;  %vm10677_vm13 = vmor %vm2793_vm12, %vm2794_vm9 }
 0x5f1   :  { %v2790_v0 = vsub.f32 1.0, %v2789_v1  ;;  %v2909_v1 = vand.u32 2147483647, %v10579_v62  ;;  %v2945_v5 = vmul.f32 %v10640_v22, %v2944_v2  ;;  %v10688_v38 = vpop.eup %7500  ;;  %vm2976_vm10 = vweird.f32 %v10663_v10 }
 0x5f2   :  { %v2640_v46 = vmul.f32 1.442695, %v2546_v58  ;;  %v2908_v58 = vsel %vm10667_vm11, %v10621_v30, %v2904_v60  ;;  %v2931_v42 = vmul.f32 %v10644_v20, %v2930_v18  ;;  %v2953_v18 = vand.u32 2147483648, %v10595_v39 }
 0x5f3   :  { %v2791_v37 = vmul.f32 %v7497_v44, %v2790_v0  ;;  %v2799_v0 = vand.u32 2147483648, %v2646_v12  ;;  %v2971_v12 = vmul.f32 %v10663_v10, %v10632_v25  ;;  %vm2910_vm14 = vcmp.eq.f32.partialorder %v2909_v1, 8.507059e+37 }
 0x5f4   :  { %7502 = vpow2.f32 %v2640_v46  ;;  %v10691_v2 = vpop.xlane.xlu2 %2498  ;;  %v2915_v43 = vmul.f32 %v10688_v38, %v10605_v17  ;;  %v2932_v1 = vadd.f32 %v10644_v20, %v2931_v42  ;;  %v2937_v42 = vand.u32 2147483647, %v10607_v36 }
 0x5f5   :  { %v2792_v14 = vadd.f32 %v7497_v44, %v2791_v37  ;;  %v2912_v37 = vor.u32 1.1754944e-38, %v2911_v49  ;;  %v2800_v30 = vor.u32 1.1754944e-38, %v2799_v0  ;;  %7504 = vrcp.f32 %v10656_v40 }
 0x5f6   :  { %v2946_v49 = vadd.f32 %v10640_v22, %v2945_v5  ;;  %v2972_v0 = vsub.f32 1.0, %v2971_v12  ;;  %v2939_v5 = vand.u32 2147483648, %v10607_v36  ;;  %v2916_v36 = vsub.f32 1.0, %v2915_v43 }
 0x5f7   :  { %v10671_v34 = vpop.xlane.xlu0 %2690  ;;  %v2796_v46 = vsel %vm10677_vm13, %v7497_v44, %v2792_v14  ;;  %v2913_v60 = vsel %vm2910_vm14, %v2912_v37, %v2908_v58  ;;  %v2951_v58 = vand.u32 2147483647, %v10595_v39  ;;  %vm2938_vm9 = vcmp.eq.f32.partialorder %v2937_v42, 8.507059e+37 }
 0x5f8   :  { %v10681_v62 = vpop.xlane.xlu1 %2648  ;;  %v2801_v14 = vsel %vm2798_vm15, %v2800_v30, %v2796_v46  ;;  %v10703_v16 = vmul.f32 %v10286_v7, %v2913_v60  ;;  %v2950_v7 = vsel %vm10708_vm4, %v10640_v22, %v2946_v49  ;;  %v2954_v46 = vor.u32 1.1754944e-38, %v2953_v18 }
 0x5f9   :  { %v10715_v37 = vmul.f32 %v10410_v13, %v2801_v14  ;;  %v2936_v13 = vsel %vm10720_vm6, %v10644_v20, %v2932_v1  ;;  %v2973_v60 = vmul.f32 %v10663_v10, %v2972_v0  ;;  %7506 = vrcp.f32 %v10681_v62 }
 0x5fa   :  { %v10696_v44 = vpop.eup %7502  ;;  %16285 = vst [vmem:[#allocation140_spill] sm:$0xff] %v10703_v16  ;;  %vm2952_vm8 = vcmp.eq.f32.partialorder %v2951_v58, 8.507059e+37  ;;  %v2940_v49 = vor.u32 1.1754944e-38, %v2939_v5  ;;  %v2917_v20 = vmul.f32 %v10688_v38, %v2916_v36  ;;  %v2981_v58 = vand.u32 2147483648, %v10632_v25 }
 0x5fb   :  { %16284 = vst [vmem:[#allocation188_spill] sm:$0xff] %v10696_v44  ;;  %v2782_v12 = vsel %vm2355_vm7, %v10696_v44, 0.0  ;;  %v10727_v30 = vpop.eup %7504  ;;  %v2955_v14 = vsel %vm2952_vm8, %v2954_v46, %v2950_v7  ;;  %v2974_v1 = vadd.f32 %v10663_v10, %v2973_v60  ;;  %vm2975_vm11 = vweird.f32 %v10632_v25 }
 0x5fc   :  { %16288 = vst [vmem:[#allocation81_spill] sm:$0xff] %v10715_v37  ;;  %2783 = vadd.xlane.f32.xlu1 %v2782_v12  ;;  %v2941_v43 = vsel %vm2938_vm9, %v2940_v49, %v2936_v13  ;;  %v2985_v45 = vmul.f32 %v10727_v30, %v10656_v40  ;;  %v10744_v0 = vpop.xlane.xlu2 %2651  ;;  %v10747_v39 = vmul.f32 %v10326_v63, %v2955_v14  ;;  %v2979_v7 = vand.u32 2147483647, %v10632_v25  ;;  %vm10759_vm12 = vmor %vm2975_vm11, %vm2976_vm10 }
 0x5fd   :  { %3550 = vperm.xlu2 %7226, %v10703_v16   ;;  %v10754_v42 = vmul.f32 %v10347_v57, %v2941_v43  ;;  %v2923_v46 = vand.u32 2147483647, %v10605_v17  ;;  %v2918_v63 = vadd.f32 %v10688_v38, %v2917_v20  ;;  %vm2920_vm13 = vweird.f32 %v10688_v38 }
 0x5fe   :  { %16291 = vst [vmem:[#allocation78_spill] sm:$0xff] %v10747_v39  ;;  %v2986_v12 = vsub.f32 1.0, %v2985_v45  ;;  %v2925_v57 = vand.u32 2147483648, %v10605_v17  ;;  %v2978_v25 = vsel %vm10759_vm12, %v10663_v10, %v2974_v1  ;;  %v2982_v13 = vor.u32 1.1754944e-38, %v2981_v58 }
 0x5ff   :  { %v10734_v22 = vpop.xlane.xlu0 %2654  ;;  %v10751_v5 = vpop.eup %7506  ;;  %16292 = vst [vmem:[#allocation213_spill] sm:$0xff] %v10754_v42  ;;  %vm2919_vm14 = vweird.f32 %v10605_v17  ;;  %vm2980_vm15 = vcmp.eq.f32.partialorder %v2979_v7, 8.507059e+37  ;;  %v2547_v49 = vsub.f32 %v10407_v48, %v10691_v2  ;;  %vm10783_vm2 = vcmp.eq.f32.partialorder %v2923_v46, 8.507059e+37 }
 0x600   :  { %3510 = vperm.xlu0 %7225, %v10715_v37   ;;  %v10737_v18 = vpop.xlane.xlu1 %2693  ;;  %v2803_v60 = vmul.f32 %v10751_v5, %v10681_v62  ;;  %vm10779_vm0 = vmor %vm2919_vm14, %vm2920_vm13  ;;  %v2987_v20 = vmul.f32 %v10727_v30, %v2986_v12  ;;  %v2983_v1 = vsel %vm2980_vm15, %v2982_v13, %v2978_v25  ;;  %v2926_v2 = vor.u32 1.1754944e-38, %v2925_v57 }
 0x601   :  { %7508 = vrcp.f32 %v10737_v18  ;;  %v2922_v48 = vsel %vm10779_vm0, %v10688_v38, %v2918_v63  ;;  %v2993_v46 = vand.u32 2147483647, %v10656_v40  ;;  %v2995_v12 = vand.u32 2147483648, %v10656_v40 }
 0x602   :  { %7510 = vrcp.f32 %v10648_v31  ;;  %v2804_v36 = vsub.f32 1.0, %v2803_v60  ;;  %v10802_v25 = vmul.f32 %v10402_v26, %v2983_v1  ;;  %v2642_v13 = vmul.f32 1.442695, %v2547_v49 }
 0x603   :  { %7512 = vrcp.f32 %v10744_v0  ;;  %v2927_v63 = vsel %vm10783_vm2, %v2926_v2, %v2922_v48  ;;  %v2988_v57 = vadd.f32 %v10727_v30, %v2987_v20  ;;  %vm2990_vm4 = vweird.f32 %v10727_v30 }
 0x604   :  { %7514 = vrcp.f32 %v10671_v34  ;;  %16299 = vst [vmem:[#allocation212_spill] sm:$0xff] %v10802_v25  ;;  %v10804_v45 = vpop.xlane.xlu2 %2696  ;;  %v3021_v49 = vand.u32 2147483647, %v10737_v18  ;;  %vm10818_vm6 = vcmp.eq.f32.partialorder %v2993_v46, 8.507059e+37  ;;  %v2996_v20 = vor.u32 1.1754944e-38, %v2995_v12  ;;  %vm10829_vm8 = vmor %vm2989_vm3, %vm2990_vm4 }
 0x605   :  { %3565 = vperm.xlu2 %7226, %v10747_v39   ;;  %v2805_v48 = vmul.f32 %v10751_v5, %v2804_v36  ;;  %v10825_v2 = vmul.f32 %v10341_v3, %v2927_v63  ;;  %vm3017_vm9 = vweird.f32 %v10737_v18  ;;  %v2992_v12 = vsel %vm10829_vm8, %v10727_v30, %v2988_v57 }
 0x606   :  { %vm3022_vm11 = vcmp.eq.f32.partialorder %v3021_v49, 8.507059e+37  ;;  %vm2808_vm12 = vweird.f32 %v10751_v5  ;;  %vm2961_vm13 = vweird.f32 %v10648_v31  ;;  %vm2807_vm14 = vweird.f32 %v10681_v62 }
 0x607   :  { %v10777_v14 = vpop.xlane.xlu0 %2699  ;;  %v7509_v43 = vpop.eup %7508  ;;  %16302 = vst [vmem:[#allocation83_spill] sm:$0xff] %v10825_v2  ;;  %vm10873_vm15 = vmor %vm2807_vm14, %vm2808_vm12  ;;  %v2827_v37 = vand.u32 2147483648, %v10744_v0 }
 0x608   :  { %3560 = vperm.xlu0 %7225, %v10754_v42   ;;  %v10789_v17 = vpop.xlane.xlu1 %2702  ;;  %v3013_v58 = vmul.f32 %v7509_v43, %v10737_v18  ;;  %v10796_v7 = vpop.eup %7510  ;;  %v3023_v42 = vand.u32 2147483648, %v10737_v18  ;;  %vm3018_vm5 = vweird.f32 %v7509_v43 }
 0x609   :  { %7516 = vrcp.f32 %v10789_v17  ;;  %v2957_v60 = vmul.f32 %v10796_v7, %v10648_v31  ;;  %v10816_v1 = vpop.eup %7512  ;;  %vm3019_vm10 = vmor %vm3017_vm9, %vm3018_vm5  ;;  %vm3059_vm3 = vweird.f32 %v10789_v17  ;;  %vm2962_vm4 = vweird.f32 %v10796_v7 }
 0x60a   :  { %v3014_v38 = vsub.f32 1.0, %v3013_v58  ;;  %7518 = vrcp.f32 %v10804_v45  ;;  %v10834_v46 = vpop.eup %7514  ;;  %v3024_v40 = vor.u32 1.1754944e-38, %v3023_v42  ;;  %v10853_v42 = vsel %vm10818_vm6, %v2996_v20, %v2992_v12  ;;  %vm10917_vm8 = vmor %vm2961_vm13, %vm2962_vm4 }
 0x60b   :  { %7520 = vpow2.f32 %v2642_v13  ;;  %v2958_v16 = vsub.f32 1.0, %v2957_v60  ;;  %v2817_v13 = vmul.f32 %v10816_v1, %v10744_v0  ;;  %v2999_v60 = vmul.f32 %v10834_v46, %v10671_v34 }
 0x60c   :  { %v3015_v26 = vmul.f32 %v7509_v43, %v3014_v38  ;;  %7522 = vrcp.f32 %v10734_v22  ;;  %vm3004_vm13 = vweird.f32 %v10834_v46  ;;  %vm3031_vm4 = vweird.f32 %v10804_v45 }
 0x60d   :  { %v2959_v12 = vmul.f32 %v10796_v7, %v2958_v16  ;;  %v3000_v3 = vsub.f32 1.0, %v2999_v60 }
 0x60e   :  { %v3016_v38 = vadd.f32 %v7509_v43, %v3015_v26 }
 0x60f   :  { %v7517_v63 = vpop.eup %7516  ;;  %v10844_v18 = vpop.xlane.xlu0 %2708 }
 0x610   :  { %3575 = vperm.xlu0 %7225, %v10802_v25   ;;  %v3020_v26 = vsel %vm3019_vm10, %v7509_v43, %v3016_v38  ;;  %v2806_v25 = vadd.f32 %v10751_v5, %v2805_v48  ;;  %v3055_v57 = vmul.f32 %v7517_v63, %v10789_v17  ;;  %v10849_v58 = vpop.xlane.xlu1 %2657  ;;  %v2813_v43 = vand.u32 2147483648, %v10681_v62  ;;  %v10861_v48 = vpop.eup %7518 }
 0x611   :  { %v3025_v30 = vsel %vm3022_vm11, %v3024_v40, %v3020_v26  ;;  %v2811_v38 = vand.u32 2147483647, %v10681_v62  ;;  %v10867_v20 = vpop.eup %7520  ;;  %v2818_v40 = vsub.f32 1.0, %v2817_v13  ;;  %v2825_v26 = vand.u32 2147483647, %v10744_v0 }
 0x612   :  { %v10859_v49 = vmul.f32 %v10462_v51, %v3025_v30  ;;  %v3056_v10 = vsub.f32 1.0, %v3055_v57  ;;  %v10877_v30 = vpop.xlane.xlu2 %2705  ;;  %v3065_v62 = vand.u32 2147483648, %v10789_v17  ;;  %v2810_v57 = vsel %vm10873_vm15, %v10751_v5, %v2806_v25  ;;  %v10893_v60 = vpop.eup %7522 }
 0x613   :  { %vm3060_vm0 = vweird.f32 %v7517_v63  ;;  %v3063_v13 = vand.u32 2147483647, %v10789_v17  ;;  %v2814_v36 = vor.u32 1.1754944e-38, %v2813_v43  ;;  %v3027_v39 = vmul.f32 %v10861_v48, %v10804_v45 }
 0x614   :  { %16305 = vst [vmem:[#allocation109_spill] sm:$0xff] %v10859_v49  ;;  %v3057_v16 = vmul.f32 %v7517_v63, %v3056_v10  ;;  %7524 = vrcp.f32 %v10849_v58  ;;  %vm2812_vm2 = vcmp.eq.f32.partialorder %v2811_v38, 8.507059e+37  ;;  %v2819_v5 = vmul.f32 %v10816_v1, %v2818_v40  ;;  %vm3061_vm5 = vmor %vm3059_vm3, %vm3060_vm0 }
 0x615   :  { %3555 = vperm.xlu1 %7227, %v10825_v2   ;;  %v2815_v25 = vsel %vm2812_vm2, %v2814_v36, %v2810_v57  ;;  %v3066_v10 = vor.u32 1.1754944e-38, %v3065_v62  ;;  %v2960_v43 = vadd.f32 %v10796_v7, %v2959_v12  ;;  %7526 = vrcp.f32 %v10877_v30 }
 0x616   :  { %vm3064_vm6 = vcmp.eq.f32.partialorder %v3063_v13, 8.507059e+37  ;;  %v3001_v38 = vmul.f32 %v10834_v46, %v3000_v3  ;;  %v3028_v17 = vsub.f32 1.0, %v3027_v39  ;;  %v3009_v36 = vand.u32 2147483648, %v10671_v34 }
 0x617   :  { %v10899_v44 = vpop.xlane.xlu0 %2663  ;;  %v10903_v40 = vmul.f32 %v10447_v23, %v2815_v25  ;;  %7528 = vrcp.f32 %v10777_v14  ;;  %v16311_v23 = vand.u32 2147483647, %v10648_v31  ;;  %vm2822_vm10 = vweird.f32 %v10816_v1 }
 0x618   :  { %3590 = vperm.xlu0 %7225, %v10859_v49   ;;  %v3058_v49 = vadd.f32 %v7517_v63, %v3057_v16  ;;  %v3007_v16 = vand.u32 2147483647, %v10671_v34  ;;  %v2964_v62 = vsel %vm10917_vm8, %v10796_v7, %v2960_v43  ;;  %v16314_v57 = vand.u32 2147483648, %v10648_v31 }
 0x619   :  { %16308 = vst [vmem:[#allocation106_spill] sm:$0xff] %v10903_v40  ;;  %vm10923_vm9 = vcmp.eq.f32.partialorder %v16311_v23, 8.507059e+37  ;;  %vm2821_vm11 = vweird.f32 %v10744_v0  ;;  %vm10941_vm12 = vcmp.eq.f32.partialorder %v2825_v26, 8.507059e+37  ;;  %v3029_v31 = vmul.f32 %v10861_v48, %v3028_v17 }
 0x61a   :  { %v3062_v51 = vsel %vm3061_vm5, %v7517_v63, %v3058_v49  ;;  %v10909_v63 = vpop.xlane.xlu1 %2711  ;;  %v10911_v49 = vpop.eup %7524  ;;  %v2968_v13 = vor.u32 1.1754944e-38, %v16314_v57  ;;  %vm10952_vm14 = vmor %vm2821_vm11, %vm2822_vm10  ;;  %vm3003_vm15 = vweird.f32 %v10671_v34  ;;  %vm10957_vm0 = vcmp.eq.f32.partialorder %v3007_v16, 8.507059e+37 }
 0x61b   :  { %v3067_v2 = vsel %vm3064_vm6, %v3066_v10, %v3062_v51  ;;  %v2845_v25 = vmul.f32 %v10911_v49, %v10849_v58  ;;  %v3002_v10 = vadd.f32 %v10834_v46, %v3001_v38  ;;  %v10948_v7 = vpop.xlane.xlu2 %2660  ;;  %v10950_v0 = vpop.eup %7526  ;;  %v2828_v51 = vor.u32 1.1754944e-38, %v2827_v37  ;;  %vm10969_vm2 = vmor %vm3003_vm15, %vm3004_vm13 }
 0x61c   :  { %v10907_v12 = vmul.f32 %v10477_v9, %v3067_v2  ;;  %v2820_v9 = vadd.f32 %v10816_v1, %v2819_v5  ;;  %v2831_v2 = vmul.f32 %v10893_v60, %v10734_v22  ;;  %v3010_v38 = vor.u32 1.1754944e-38, %v3009_v36 }
 0x61d   :  { %3515 = vperm.xlu1 %7227, %v10903_v40   ;;  %v2969_v39 = vsel %vm10923_vm9, %v2968_v13, %v2964_v62  ;;  %v3035_v23 = vand.u32 2147483647, %v10804_v45  ;;  %v10967_v40 = vpop.eup %7528  ;;  %vm3032_vm3 = vweird.f32 %v10861_v48  ;;  %v3037_v34 = vand.u32 2147483648, %v10804_v45 }
 0x61e   :  { %v2824_v17 = vsel %vm10952_vm14, %v10816_v1, %v2820_v9  ;;  %v2832_v57 = vsub.f32 1.0, %v2831_v2  ;;  %7530 = vrcp.f32 %v10948_v7  ;;  %v2846_v16 = vsub.f32 1.0, %v2845_v25  ;;  %vm11005_vm5 = vmor %vm3031_vm4, %vm3032_vm3 }
 0x61f   :  { %v3006_v1 = vsel %vm10969_vm2, %v10834_v46, %v3002_v10  ;;  %v3030_v36 = vadd.f32 %v10861_v48, %v3029_v31  ;;  %v3069_v3 = vmul.f32 %v10950_v0, %v10877_v30  ;;  %7532 = vrcp.f32 %v10899_v44  ;;  %v10995_v10 = vpop.xlane.xlu0 %2717 }
 0x620   :  { %3605 = vperm.xlu0 %7225, %v10907_v12   ;;  %v10984_v9 = vmul.f32 %v10432_v28, %v2969_v39  ;;  %v2829_v2 = vsel %vm10941_vm12, %v2828_v51, %v2824_v17  ;;  %v2839_v62 = vand.u32 2147483647, %v10734_v22  ;;  %v2833_v13 = vmul.f32 %v10893_v60, %v2832_v57 }
 0x621   :  { %v2841_v46 = vand.u32 2147483648, %v10734_v22  ;;  %v3041_v25 = vmul.f32 %v10967_v40, %v10777_v14  ;;  %7534 = vrcp.f32 %v10844_v18  ;;  %v10999_v28 = vmul.f32 %v10388_v15, %v10853_v42 }
 0x622   :  { %v3011_v45 = vsel %vm10957_vm0, %v3010_v38, %v3006_v1  ;;  %v2847_v31 = vmul.f32 %v10911_v49, %v2846_v16  ;;  %v11010_v43 = vpop.xlane.xlu1 %2720  ;;  %v2785_v51 = vsel %vm2355_vm7, %v10867_v20, 0.0  ;;  %v3034_v15 = vsel %vm11005_vm5, %v10861_v48, %v3030_v36 }
 0x623   :  { %vm3036_vm6 = vcmp.eq.f32.partialorder %v3035_v23, 8.507059e+37  ;;  %v3038_v42 = vor.u32 1.1754944e-38, %v3037_v34  ;;  %v3070_v26 = vsub.f32 1.0, %v3069_v3  ;;  %v11021_v39 = vmul.f32 %v10434_v59, %v2829_v2 }
 0x624   :  { %v11018_v38 = vpop.eup %7530  ;;  %vm2835_vm8 = vweird.f32 %v10734_v22  ;;  %vm2836_vm9 = vweird.f32 %v10893_v60  ;;  %vm11025_vm10 = vcmp.eq.f32.partialorder %v2839_v62, 8.507059e+37  ;;  %v11032_v48 = vmul.f32 %v10445_v61, %v3011_v45 }
 0x625   :  { %3570 = vperm.xlu1 %7227, %v10984_v9   ;;  %16325 = vst [vmem:[#allocation42_spill] sm:$0xff] %v11021_v39  ;;  %v11029_v57 = vpop.eup %7532  ;;  %v2834_v23 = vadd.f32 %v10893_v60, %v2833_v13  ;;  %v2842_v37 = vor.u32 1.1754944e-38, %v2841_v46  ;;  %v3042_v34 = vsub.f32 1.0, %v3041_v25  ;;  %v3039_v16 = vsel %vm3036_vm6, %v3038_v42, %v3034_v15  ;;  %vm11048_vm12 = vmor %vm2835_vm8, %vm2836_vm9 }
 0x626   :  { %v3077_v59 = vand.u32 2147483647, %v10877_v30  ;;  %v2848_v1 = vadd.f32 %v10911_v49, %v2847_v31  ;;  %vm2850_vm7 = vweird.f32 %v10911_v49  ;;  %v3071_v3 = vmul.f32 %v10950_v0, %v3070_v26 }
 0x627   :  { %v11038_v36 = vpop.eup %7534  ;;  %vm3073_vm11 = vweird.f32 %v10877_v30  ;;  %v3079_v61 = vand.u32 2147483648, %v10877_v30  ;;  %v2855_v2 = vand.u32 2147483648, %v10849_v58  ;;  %v2859_v13 = vmul.f32 %v11018_v38, %v10948_v7 }
 0x628   :  { %vm2849_vm13 = vweird.f32 %v10849_v58  ;;  %v2853_v46 = vand.u32 2147483647, %v10849_v58  ;;  %v2873_v25 = vmul.f32 %v11029_v57, %v10899_v44  ;;  %v11059_v45 = vmul.f32 %v10451_v32, %v3039_v16 }
 0x629   :  { %v2838_v22 = vsel %vm11048_vm12, %v10893_v60, %v2834_v23  ;;  %v3043_v5 = vmul.f32 %v10967_v40, %v3042_v34  ;;  %vm3045_vm14 = vweird.f32 %v10777_v14  ;;  %vm11068_vm15 = vmor %vm2849_vm13, %vm2850_vm7  ;;  %vm11072_vm0 = vcmp.eq.f32.partialorder %v3077_v59, 8.507059e+37  ;;  %v11087_v23 = vpop.xlane.xlu0 %2726  ;;  %v11091_v59 = vpop.xlane.xlu2 %2714 }
 0x62a   :  { %v3049_v32 = vand.u32 2147483647, %v10777_v14  ;;  %v3083_v60 = vmul.f32 %v11038_v36, %v10844_v18  ;;  %v2852_v15 = vsel %vm11068_vm15, %v10911_v49, %v2848_v1  ;;  %7536 = vrcp.f32 %v10909_v63  ;;  %v11093_v1 = vpop.xlane.xlu1 %2666 }
 0x62b   :  { %v3072_v42 = vadd.f32 %v10950_v0, %v3071_v3  ;;  %vm3074_vm2 = vweird.f32 %v10950_v0  ;;  %v2856_v26 = vor.u32 1.1754944e-38, %v2855_v2  ;;  %v2843_v34 = vsel %vm11025_vm10, %v2842_v37, %v2838_v22 }
 0x62c   :  { %v2860_v16 = vsub.f32 1.0, %v2859_v13  ;;  %vm2854_vm3 = vcmp.eq.f32.partialorder %v2853_v46, 8.507059e+37  ;;  %v2874_v49 = vsub.f32 1.0, %v2873_v25  ;;  %v3080_v62 = vor.u32 1.1754944e-38, %v3079_v61  ;;  %vm11099_vm5 = vmor %vm3073_vm11, %vm3074_vm2 }
 0x62d   :  { %3585 = vperm.xlu1 %7227, %v11032_v48   ;;  %v3044_v3 = vadd.f32 %v10967_v40, %v3043_v5  ;;  %vm3046_vm4 = vweird.f32 %v10967_v40  ;;  %v2857_v31 = vsel %vm2854_vm3, %v2856_v26, %v2852_v15  ;;  %vm11103_vm6 = vcmp.eq.f32.partialorder %v3049_v32, 8.507059e+37 }
 0x62e   :  { %2786 = vadd.xlane.f32.xlu2 %v2785_v51  ;;  %v3051_v51 = vand.u32 2147483648, %v10777_v14  ;;  %v2867_v37 = vand.u32 2147483647, %v10948_v7  ;;  %v2869_v13 = vand.u32 2147483648, %v10948_v7  ;;  %v3084_v61 = vsub.f32 1.0, %v3083_v60  ;;  %vm11120_vm8 = vmor %vm3045_vm14, %vm3046_vm4 }
 0x62f   :  { %v11110_v46 = vmul.f32 %v10460_v24, %v2843_v34  ;;  %v3076_v30 = vsel %vm11099_vm5, %v10950_v0, %v3072_v42  ;;  %7538 = vrcp.f32 %v11091_v59  ;;  %v2861_v32 = vmul.f32 %v11018_v38, %v2860_v16 }
 0x630   :  { %v3052_v25 = vor.u32 1.1754944e-38, %v3051_v51  ;;  %v11116_v22 = vpop.eup %7536  ;;  %v11126_v24 = vmul.f32 %v10492_v4, %v2857_v31  ;;  %v2875_v60 = vmul.f32 %v11029_v57, %v2874_v49  ;;  %7540 = vrcp.f32 %v10995_v10 }
 0x631   :  { %16338 = vst [vmem:[#allocation86_spill] sm:$0xff] %v11110_v46  ;;  %v3048_v0 = vsel %vm11120_vm8, %v10967_v40, %v3044_v3  ;;  %v3091_v15 = vand.u32 2147483647, %v10844_v18  ;;  %v3093_v14 = vand.u32 2147483648, %v10844_v18  ;;  %7542 = vrcp.f32 %v11093_v1  ;;  %v11162_v2 = vpop.xlane.xlu0 %2735 }
 0x632   :  { %16341 = vst [vmem:[#allocation112_spill] sm:$0xff] %v11126_v24  ;;  %vm2863_vm9 = vweird.f32 %v10948_v7  ;;  %vm11137_vm10 = vcmp.eq.f32.partialorder %v2867_v37, 8.507059e+37  ;;  %v2870_v4 = vor.u32 1.1754944e-38, %v2869_v13  ;;  %v3085_v51 = vmul.f32 %v11038_v36, %v3084_v61 }
 0x633   :  { %v3081_v40 = vsel %vm11072_vm0, %v3080_v62, %v3076_v30  ;;  %vm2864_vm7 = vweird.f32 %v11018_v38  ;;  %v3097_v26 = vmul.f32 %v11116_v22, %v10909_v63  ;;  %7544 = vrcp.f32 %v11010_v43  ;;  %v11176_v30 = vpop.xlane.xlu2 %2723 }
 0x634   :  { %v3053_v34 = vsel %vm11103_vm6, %v3052_v25, %v3048_v0  ;;  %v2862_v16 = vadd.f32 %v11018_v38, %v2861_v32  ;;  %v2876_v49 = vadd.f32 %v11029_v57, %v2875_v60  ;;  %vm2878_vm11 = vweird.f32 %v11029_v57  ;;  %vm11168_vm14 = vmor %vm2863_vm9, %vm2864_vm7  ;;  %v11178_v25 = vpop.xlane.xlu1 %2729 }
 0x635   :  { %3530 = vperm.xlu1 %7227, %v11126_v24   ;;  %v11154_v3 = vpop.eup %7538  ;;  %vm3087_vm12 = vweird.f32 %v10844_v18  ;;  %vm11157_vm13 = vcmp.eq.f32.partialorder %v3091_v15, 8.507059e+37  ;;  %v3094_v62 = vor.u32 1.1754944e-38, %v3093_v14  ;;  %v2883_v31 = vand.u32 2147483648, %v10899_v44 }
 0x636   :  { %v11164_v17 = vpop.eup %7540  ;;  %v3086_v13 = vadd.f32 %v11038_v36, %v3085_v51  ;;  %vm3088_vm15 = vweird.f32 %v11038_v36  ;;  %vm2877_vm0 = vweird.f32 %v10899_v44  ;;  %v2881_v61 = vand.u32 2147483647, %v10899_v44 }
 0x637   :  { %v7543_v5 = vpop.eup %7542  ;;  %v11181_v32 = vmul.f32 %v10466_v33, %v3081_v40  ;;  %v11184_v7 = vmul.f32 %v10475_v52, %v3053_v34  ;;  %vm11189_vm2 = vmor %vm2877_vm0, %vm2878_vm11  ;;  %v3098_v44 = vsub.f32 1.0, %v3097_v26  ;;  %v2866_v15 = vsel %vm11168_vm14, %v11018_v38, %v2862_v16 }
 0x638   :  { %v2880_v33 = vsel %vm11189_vm2, %v11029_v57, %v2876_v49  ;;  %7546 = vrcp.f32 %v11087_v23  ;;  %v2887_v52 = vmul.f32 %v7543_v5, %v11093_v1  ;;  %vm11207_vm3 = vmor %vm3087_vm12, %vm3088_vm15  ;;  %v3111_v38 = vmul.f32 %v11154_v3, %v11091_v59 }
 0x639   :  { %v11201_v14 = vpop.eup %7544  ;;  %v2884_v40 = vor.u32 1.1754944e-38, %v2883_v31  ;;  %7548 = vrcp.f32 %v11176_v30  ;;  %v3125_v57 = vmul.f32 %v11164_v17, %v10995_v10  ;;  %v3090_v26 = vsel %vm11207_vm3, %v11038_v36, %v3086_v13 }
 0x63a   :  { %v3121_v34 = vand.u32 2147483648, %v11091_v59  ;;  %vm2882_vm4 = vcmp.eq.f32.partialorder %v2881_v61, 8.507059e+37  ;;  %v2888_v18 = vsub.f32 1.0, %v2887_v52  ;;  %v2871_v16 = vsel %vm11137_vm10, %v2870_v4, %v2866_v15 }
 0x63b   :  { %v2885_v49 = vsel %vm2882_vm4, %v2884_v40, %v2880_v33  ;;  %v3099_v31 = vmul.f32 %v11116_v22, %v3098_v44  ;;  %v2897_v37 = vand.u32 2147483648, %v11093_v1  ;;  %v3139_v0 = vmul.f32 %v11201_v14, %v11010_v43 }
 0x63c   :  { %v2889_v60 = vmul.f32 %v7543_v5, %v2888_v18  ;;  %vm2892_vm5 = vweird.f32 %v7543_v5  ;;  %v2895_v36 = vand.u32 2147483647, %v11093_v1  ;;  %v3095_v13 = vsel %vm11157_vm13, %v3094_v62, %v3090_v26  ;;  %v11253_v26 = vpop.xlane.xlu2 %2732 }
 0x63d   :  { %3600 = vperm.xlu1 %7227, %v11184_v7   ;;  %v3112_v61 = vsub.f32 1.0, %v3111_v38  ;;  %v3126_v52 = vsub.f32 1.0, %v3125_v57  ;;  %7550 = vrcp.f32 %v11178_v25  ;;  %v3105_v4 = vand.u32 2147483647, %v10909_v63  ;;  %v11244_v38 = vpop.xlane.xlu0 %2744 }
 0x63e   :  { %v11231_v42 = vpop.eup %7546  ;;  %v3107_v44 = vand.u32 2147483648, %v10909_v63  ;;  %v2890_v15 = vadd.f32 %v7543_v5, %v2889_v60  ;;  %vm2891_vm6 = vweird.f32 %v11093_v1  ;;  %v11239_v51 = vmul.f32 %v10505_v54, %v2885_v49  ;;  %v11247_v1 = vpop.xlane.xlu1 %2738 }
 0x63f   :  { %v11236_v33 = vpop.eup %7548  ;;  %v3100_v58 = vadd.f32 %v11116_v22, %v3099_v31  ;;  %vm3102_vm8 = vweird.f32 %v11116_v22  ;;  %vm2893_vm9 = vmor %vm2891_vm6, %vm2892_vm5  ;;  %v2898_v62 = vor.u32 1.1754944e-38, %v2897_v37  ;;  %v3140_v40 = vsub.f32 1.0, %v3139_v0 }
 0x640   :  { %16352 = vst [vmem:[#allocation215_spill] sm:$0xff] %v11239_v51  ;;  %v2894_v57 = vsel %vm2893_vm9, %v7543_v5, %v2890_v15  ;;  %vm2896_vm10 = vcmp.eq.f32.partialorder %v2895_v36, 8.507059e+37  ;;  %7552 = vrcp.f32 %v11162_v2  ;;  %v11250_v60 = vmul.f32 %v10481_v50, %v2871_v16 }
 0x641   :  { %v3127_v54 = vmul.f32 %v11164_v17, %v3126_v52  ;;  %v3167_v18 = vmul.f32 %v11231_v42, %v11087_v23  ;;  %v2899_v49 = vsel %vm2896_vm10, %v2898_v62, %v2894_v57  ;;  %v11258_v31 = vor.u32 1.1754944e-38, %v3121_v34 }
 0x642   :  { %16353 = vst [vmem:[#allocation89_spill] sm:$0xff] %v11250_v60  ;;  %vm3101_vm7 = vweird.f32 %v10909_v63  ;;  %v3153_v5 = vmul.f32 %v11236_v33, %v11176_v30  ;;  %v11264_v50 = vmul.f32 %v10537_v29, %v2899_v49  ;;  %v11270_v37 = vmul.f32 %v10490_v56, %v3095_v13 }
 0x643   :  { %v11267_v16 = vpop.eup %7550  ;;  %v3113_v0 = vmul.f32 %v11154_v3, %v3112_v61  ;;  %vm11275_vm11 = vmor %vm3101_vm7, %vm3102_vm8  ;;  %vm11279_vm12 = vcmp.eq.f32.partialorder %v3105_v4, 8.507059e+37  ;;  %v3108_v29 = vor.u32 1.1754944e-38, %v3107_v44  ;;  %v3141_v56 = vmul.f32 %v11201_v14, %v3140_v40 }
 0x644   :  { %16354 = vst [vmem:[#allocation115_spill] sm:$0xff] %v11264_v50  ;;  %v3104_v36 = vsel %vm11275_vm11, %v11116_v22, %v3100_v58  ;;  %7554 = vrcp.f32 %v11253_v26  ;;  %v3181_v13 = vmul.f32 %v11267_v16, %v11178_v25  ;;  %3545 = vperm.xlu0 %7225, %v11264_v50   ;;  %v3128_v61 = vadd.f32 %v11164_v17, %v3127_v54 }
 0x645   :  { %3540 = vperm.xlu1 %7227, %v11239_v51   ;;  %16355 = vst [vmem:[#allocation218_spill] sm:$0xff] %v11270_v37  ;;  %vm3130_vm13 = vweird.f32 %v11164_v17  ;;  %v3168_v52 = vsub.f32 1.0, %v3167_v18  ;;  %7556 = vrcp.f32 %v11244_v38  ;;  %v3154_v44 = vsub.f32 1.0, %v3153_v5  ;;  %v11319_v63 = vpop.xlane.xlu0 %2753 }
 0x646   :  { %3520 = vperm.xlu2 %7226, %v11021_v39   ;;  %v11294_v4 = vpop.eup %7552  ;;  %v3135_v15 = vand.u32 2147483648, %v10995_v10  ;;  %7558 = vrcp.f32 %v11247_v1  ;;  %v3109_v58 = vsel %vm11279_vm12, %v3108_v29, %v3104_v36  ;;  %vm3129_vm14 = vweird.f32 %v10995_v10 }
 0x647   :  { %v3133_v62 = vand.u32 2147483647, %v10995_v10  ;;  %v3149_v40 = vand.u32 2147483648, %v11010_v43  ;;  %v3163_v57 = vand.u32 2147483648, %v11176_v30  ;;  %vm11305_vm15 = vmor %vm3129_vm14, %vm3130_vm13  ;;  %v3142_v18 = vadd.f32 %v11201_v14, %v3141_v56 }
 0x648   :  { %vm3144_vm0 = vweird.f32 %v11201_v14  ;;  %v3182_v49 = vsub.f32 1.0, %v3181_v13  ;;  %vm3116_vm2 = vweird.f32 %v11154_v3  ;;  %v3132_v5 = vsel %vm11305_vm15, %v11164_v17, %v3128_v61  ;;  %v11329_v61 = vpop.xlane.xlu1 %2747 }
 0x649   :  { %vm3143_vm3 = vweird.f32 %v11010_v43  ;;  %v3169_v10 = vmul.f32 %v11231_v42, %v3168_v52  ;;  %v3209_v34 = vmul.f32 %v11294_v4, %v11162_v2  ;;  %v11325_v36 = vmul.f32 %v10507_v27, %v3109_v58 }
 0x64a   :  { %v11322_v29 = vpop.eup %7554  ;;  %v3155_v56 = vmul.f32 %v11236_v33, %v3154_v44  ;;  %v3136_v13 = vor.u32 1.1754944e-38, %v3135_v15  ;;  %v3147_v17 = vand.u32 2147483647, %v11010_v43  ;;  %v11335_v54 = vadd.f32 %v11154_v3, %v3113_v0  ;;  %vm11343_vm8 = vmor %vm3143_vm3, %vm3144_vm0 }
 0x64b   :  { %v11332_v52 = vpop.eup %7556  ;;  %vm3115_vm4 = vweird.f32 %v11091_v59  ;;  %vm3158_vm5 = vweird.f32 %v11236_v33  ;;  %vm3134_vm6 = vcmp.eq.f32.partialorder %v3133_v62, 8.507059e+37  ;;  %v3150_v44 = vor.u32 1.1754944e-38, %v3149_v40 }
 0x64c   :  { %v11347_v15 = vpop.eup %7558  ;;  %vm3157_vm9 = vweird.f32 %v11176_v30  ;;  %v3137_v0 = vsel %vm3134_vm6, %v3136_v13, %v3132_v5  ;;  %v3146_v58 = vsel %vm11343_vm8, %v11201_v14, %v3142_v18  ;;  %v3177_v62 = vand.u32 2147483648, %v11087_v23  ;;  %3620 = vperm.xlu0 %7225, %v11325_v36   ;;  %vm11413_vm6 = vmor %vm3115_vm4, %vm3116_vm2 }
 0x64d   :  { %3615 = vperm.xlu1 %7227, %v11270_v37   ;;  %v3183_v22 = vmul.f32 %v11267_v16, %v3182_v49  ;;  %v3170_v43 = vadd.f32 %v11231_v42, %v3169_v10  ;;  %vm3172_vm10 = vweird.f32 %v11231_v42  ;;  %v3210_v40 = vsub.f32 1.0, %v3209_v34  ;;  %vm11435_vm2 = vmor %vm3157_vm9, %vm3158_vm5 }
 0x64e   :  { %3525 = vperm.xlu2 %7226, %v11110_v46   ;;  %v3223_v37 = vmul.f32 %v11347_v15, %v11247_v1  ;;  %v11361_v5 = vadd.f32 %v11236_v33, %v3155_v56  ;;  %vm3148_vm7 = vcmp.eq.f32.partialorder %v3147_v17, 8.507059e+37  ;;  %vm3171_vm11 = vweird.f32 %v11087_v23 }
 0x64f   :  { %v3175_v14 = vand.u32 2147483647, %v11087_v23  ;;  %v3151_v18 = vsel %vm3148_vm7, %v3150_v44, %v3146_v58  ;;  %v11367_v49 = vmul.f32 %v11322_v29, %v11253_v26  ;;  %v3251_v10 = vmul.f32 %v11332_v52, %v11244_v38  ;;  %vm11375_vm12 = vmor %vm3171_vm11, %vm3172_vm10 }
 0x650   :  { %7560 = vrcp.f32 %v11319_v63  ;;  %v11373_v34 = vmul.f32 %v10520_v55, %v3137_v0  ;;  %v3184_v13 = vadd.f32 %v11267_v16, %v3183_v22  ;;  %vm3186_vm13 = vweird.f32 %v11267_v16 }
 0x651   :  { %v3224_v23 = vsub.f32 1.0, %v3223_v37  ;;  %v3174_v17 = vsel %vm11375_vm12, %v11231_v42, %v3170_v43  ;;  %v3178_v27 = vor.u32 1.1754944e-38, %v3177_v62  ;;  %v3211_v44 = vmul.f32 %v11294_v4, %v3210_v40  ;;  %v11407_v43 = vpop.xlane.xlu0 %2762 }
 0x652   :  { %v3191_v58 = vand.u32 2147483648, %v11178_v25  ;;  %v11388_v55 = vmul.f32 %v10522_v6, %v3151_v18  ;;  %vm3185_vm14 = vweird.f32 %v11178_v25  ;;  %v3189_v22 = vand.u32 2147483647, %v11178_v25 }
 0x653   :  { %7562 = vrcp.f32 %v11329_v61  ;;  %v16366_v42 = vand.u32 2147483647, %v11091_v59  ;;  %v3164_v0 = vor.u32 1.1754944e-38, %v3163_v57  ;;  %vm3176_vm0 = vcmp.eq.f32.partialorder %v3175_v14, 8.507059e+37  ;;  %vm11403_vm3 = vmor %vm3185_vm14, %vm3186_vm13 }
 0x654   :  { %v3217_v62 = vand.u32 2147483647, %v11162_v2  ;;  %v3252_v25 = vsub.f32 1.0, %v3251_v10  ;;  %v3179_v57 = vsel %vm3176_vm0, %v3178_v27, %v3174_v17  ;;  %v3219_v14 = vand.u32 2147483648, %v11162_v2  ;;  %v11422_v10 = vpop.xlane.xlu1 %2756  ;;  %3635 = vperm.xlu0 %7225, %v11388_v55  }
 0x655   :  { %3630 = vperm.xlu1 %7227, %v11373_v34   ;;  %vm11396_vm15 = vcmp.eq.f32.partialorder %v16366_v42, 8.507059e+37  ;;  %v3188_v18 = vsel %vm11403_vm3, %v11267_v16, %v3184_v13  ;;  %v3225_v56 = vmul.f32 %v11347_v15, %v3224_v23  ;;  %v3118_v59 = vsel %vm11413_vm6, %v11154_v3, %v11335_v54 }
 0x656   :  { %3580 = vperm.xlu2 %7226, %v10999_v28   ;;  %v11425_v42 = vpop.eup %7560  ;;  %v16375_v16 = vand.u32 2147483647, %v11176_v30  ;;  %v3212_v23 = vadd.f32 %v11294_v4, %v3211_v44  ;;  %vm3214_vm8 = vweird.f32 %v11294_v4  ;;  %v3192_v27 = vor.u32 1.1754944e-38, %v3191_v58 }
 0x657   :  { %v3160_v3 = vsel %vm11435_vm2, %v11236_v33, %v11361_v5  ;;  %v3196_v54 = vsub.f32 1.0, %v11367_v49  ;;  %vm3213_vm5 = vweird.f32 %v11162_v2  ;;  %vm3190_vm9 = vcmp.eq.f32.partialorder %v3189_v22, 8.507059e+37 }
 0x658   :  { %vm11441_vm4 = vcmp.eq.f32.partialorder %v16375_v16, 8.507059e+37  ;;  %v11454_v30 = vmul.f32 %v10535_v35, %v3179_v57  ;;  %vm11456_vm10 = vcmp.eq.f32.partialorder %v3217_v62, 8.507059e+37  ;;  %v3193_v44 = vsel %vm3190_vm9, %v3192_v27, %v3188_v18  ;;  %vm11463_vm7 = vmor %vm3213_vm5, %vm3214_vm8  ;;  %v11479_v62 = vpop.xlane.xlu2 %2741 }
 0x659   :  { %v3253_v58 = vmul.f32 %v11332_v52, %v3252_v25  ;;  %v11461_v40 = vpop.eup %7562  ;;  %v3220_v33 = vor.u32 1.1754944e-38, %v3219_v14  ;;  %v3226_v2 = vadd.f32 %v11347_v15, %v3225_v56  ;;  %vm3228_vm11 = vweird.f32 %v11347_v15  ;;  %v11509_v17 = vpop.xlane.xlu0 %2771 }
 0x65a   :  { %16378 = vst [vmem:[#allocation118_spill] sm:$0xff] %v11454_v30  ;;  %v3293_v35 = vmul.f32 %v11425_v42, %v11319_v63  ;;  %v3216_v5 = vsel %vm11463_vm7, %v11294_v4, %v3212_v23  ;;  %v3233_v49 = vand.u32 2147483648, %v11247_v1  ;;  %v3265_v22 = vmul.f32 %v11461_v40, %v11329_v61 }
 0x65b   :  { %7564 = vrcp.f32 %v11407_v43  ;;  %v11482_v25 = vmul.f32 %v10552_v21, %v3193_v44  ;;  %v3259_v57 = vand.u32 2147483647, %v11244_v38  ;;  %vm3227_vm12 = vweird.f32 %v11247_v1 }
 0x65c   :  { %v3231_v4 = vand.u32 2147483647, %v11247_v1  ;;  %v3254_v14 = vadd.f32 %v11332_v52, %v3253_v58  ;;  %vm3256_vm13 = vweird.f32 %v11332_v52  ;;  %vm11492_vm14 = vmor %vm3227_vm12, %vm3228_vm11  ;;  %v3266_v21 = vsub.f32 1.0, %v3265_v22 }
 0x65d   :  { %16383 = vst [vmem:[#allocation126_spill] sm:$0xff] %v11482_v25  ;;  %3645 = vperm.xlu1 %7227, %v11454_v30   ;;  %7566 = vrcp.f32 %v11422_v10  ;;  %v3123_v56 = vsel %vm11396_vm15, %v11258_v31, %v3118_v59  ;;  %v3221_v1 = vsel %vm11456_vm10, %v3220_v33, %v3216_v5  ;;  %v3230_v16 = vsel %vm11492_vm14, %v11347_v15, %v3226_v2 }
 0x65e   :  { %3535 = vperm.xlu2 %7226, %v11250_v60   ;;  %v3294_v23 = vsub.f32 1.0, %v3293_v35  ;;  %3650 = vperm.xlu0 %7225, %v11482_v25   ;;  %vm3255_vm0 = vweird.f32 %v11244_v38  ;;  %v3261_v27 = vand.u32 2147483648, %v11244_v38  ;;  %v3234_v44 = vor.u32 1.1754944e-38, %v3233_v49  ;;  %v11521_v38 = vpop.xlane.xlu1 %2765 }
 0x65f   :  { %v3267_v58 = vmul.f32 %v11461_v40, %v3266_v21  ;;  %v3165_v31 = vsel %vm11441_vm4, %v3164_v0, %v3160_v3  ;;  %v3197_v37 = vmul.f32 %v11322_v29, %v3196_v54  ;;  %7568 = vrcp.f32 %v11479_v62  ;;  %vm11517_vm15 = vmor %vm3255_vm0, %vm3256_vm13 }
 0x660   :  { %vm3232_vm3 = vcmp.eq.f32.partialorder %v3231_v4, 8.507059e+37  ;;  %v11526_v6 = vmul.f32 %v10550_v41, %v3221_v1  ;;  %v3258_v0 = vsel %vm11517_vm15, %v11332_v52, %v3254_v14  ;;  %vm11531_vm6 = vcmp.eq.f32.partialorder %v3259_v57, 8.507059e+37  ;;  %v11570_v21 = vpop.xlane.xlu2 %2750 }
 0x661   :  { %v11523_v59 = vpop.eup %7564  ;;  %v3235_v3 = vsel %vm3232_vm3, %v3234_v44, %v3230_v16  ;;  %v3295_v54 = vmul.f32 %v11425_v42, %v3294_v23  ;;  %v3268_v33 = vadd.f32 %v11461_v40, %v3267_v58  ;;  %vm3270_vm2 = vweird.f32 %v11461_v40 }
 0x662   :  { %16388 = vst [vmem:[#allocation221_spill] sm:$0xff] %v11526_v6  ;;  %7570 = vrcp.f32 %v11509_v17  ;;  %v3262_v41 = vor.u32 1.1754944e-38, %v3261_v27  ;;  %vm3269_vm4 = vweird.f32 %v11329_v61  ;;  %v3275_v52 = vand.u32 2147483648, %v11329_v61 }
 0x663   :  { %v11539_v2 = vpop.eup %7566  ;;  %7572 = vrcp.f32 %v11521_v38  ;;  %v11546_v35 = vmul.f32 %v10567_v19, %v3235_v3  ;;  %v3273_v5 = vand.u32 2147483647, %v11329_v61  ;;  %v3335_v49 = vmul.f32 %v11523_v59, %v11407_v43  ;;  %vm11563_vm8 = vmor %vm3269_vm4, %vm3270_vm2  ;;  %v11602_v3 = vpop.xlane.xlu0 %2780 }
 0x664   :  { %v3307_v22 = vmul.f32 %v11539_v2, %v11422_v10  ;;  %v11555_v57 = vmul.f32 %v10496_v53, %v3123_v56  ;;  %v3203_v4 = vand.u32 2147483647, %v11253_v26  ;;  %v3205_v14 = vand.u32 2147483648, %v11253_v26 }
 0x665   :  { %16391 = vst [vmem:[#allocation163_spill] sm:$0xff] %v11546_v35  ;;  %3660 = vperm.xlu1 %7227, %v11526_v6   ;;  %v3263_v19 = vsel %vm11531_vm6, %v3262_v41, %v3258_v0  ;;  %v11567_v18 = vpop.eup %7568  ;;  %vm3199_vm5 = vweird.f32 %v11253_v26  ;;  %v3296_v53 = vadd.f32 %v11425_v42, %v3295_v54  ;;  %vm3298_vm9 = vweird.f32 %v11425_v42 }
 0x666   :  { %3595 = vperm.xlu2 %7226, %v11059_v45   ;;  %v3272_v56 = vsel %vm11563_vm8, %v11461_v40, %v3268_v33  ;;  %v3308_v1 = vsub.f32 1.0, %v3307_v22  ;;  %3665 = vperm.xlu0 %7225, %v11546_v35   ;;  %v11579_v16 = vmul.f32 %v10511_v47, %v3165_v31  ;;  %v11582_v23 = vadd.f32 %v11322_v29, %v3197_v37  ;;  %v11611_v41 = vpop.xlane.xlu1 %2774 }
 0x667   :  { %vm3200_vm10 = vweird.f32 %v11322_v29  ;;  %v3276_v27 = vor.u32 1.1754944e-38, %v3275_v52  ;;  %vm3297_vm7 = vweird.f32 %v11319_v63  ;;  %vm3274_vm11 = vcmp.eq.f32.partialorder %v3273_v5, 8.507059e+37 }
 0x668   :  { %v11585_v44 = vpop.eup %7570  ;;  %v3336_v58 = vsub.f32 1.0, %v3335_v49  ;;  %v3309_v40 = vmul.f32 %v11539_v2, %v3308_v1  ;;  %v11592_v0 = vmul.f32 %v10565_v11, %v3263_v19  ;;  %vm11596_vm12 = vmor %vm3297_vm7, %vm3298_vm9  ;;  %v3301_v31 = vand.u32 2147483647, %v11319_v63 }
 0x669   :  { %v11589_v15 = vpop.eup %7572  ;;  %v3303_v37 = vand.u32 2147483648, %v11319_v63  ;;  %v3277_v13 = vsel %vm3274_vm11, %v3276_v27, %v3272_v56  ;;  %v3300_v54 = vsel %vm11596_vm12, %v11425_v42, %v3296_v53  ;;  %vm3312_vm13 = vweird.f32 %v11539_v2  ;;  %vm11647_vm6 = vmor %vm3199_vm5, %vm3200_vm10 }
 0x66a   :  { %16394 = vst [vmem:[#allocation92_spill] sm:$0xff] %v11592_v0  ;;  %v3310_v11 = vadd.f32 %v11539_v2, %v3309_v40  ;;  %v3349_v33 = vmul.f32 %v11589_v15, %v11521_v38  ;;  %vm3311_vm14 = vweird.f32 %v11422_v10  ;;  %v3315_v63 = vand.u32 2147483647, %v11422_v10  ;;  %v11656_v40 = vpop.xlane.xlu2 %2759 }
 0x66b   :  { %v3317_v52 = vand.u32 2147483648, %v11422_v10  ;;  %v3377_v5 = vmul.f32 %v11585_v44, %v11509_v17  ;;  %v11620_v42 = vmul.f32 %v10583_v8, %v3277_v13  ;;  %v3337_v49 = vmul.f32 %v11523_v59, %v3336_v58  ;;  %vm11633_vm15 = vmor %vm3311_vm14, %vm3312_vm13 }
 0x66c   :  { %v3350_v22 = vsub.f32 1.0, %v3349_v33  ;;  %7574 = vrcp.f32 %v11602_v3  ;;  %vm11625_vm0 = vcmp.eq.f32.partialorder %v3203_v4, 8.507059e+37  ;;  %v3206_v10 = vor.u32 1.1754944e-38, %v3205_v14 }
 0x66d   :  { %16397 = vst [vmem:[#allocation90_spill] sm:$0xff] %v11620_v42  ;;  %3675 = vperm.xlu1 %7227, %v11592_v0   ;;  %v3237_v61 = vmul.f32 %v11567_v18, %v11479_v62  ;;  %v3304_v53 = vor.u32 1.1754944e-38, %v3303_v37  ;;  %7576 = vrcp.f32 %v11570_v21  ;;  %vm3302_vm3 = vcmp.eq.f32.partialorder %v3301_v31, 8.507059e+37 }
 0x66e   :  { %3610 = vperm.xlu2 %7226, %v11181_v32   ;;  %v3314_v4 = vsel %vm11633_vm15, %v11539_v2, %v3310_v11  ;;  %v3351_v56 = vmul.f32 %v11589_v15, %v3350_v22  ;;  %3680 = vperm.xlu0 %7225, %v11620_v42   ;;  %v3318_v27 = vor.u32 1.1754944e-38, %v3317_v52  ;;  %v3378_v58 = vsub.f32 1.0, %v3377_v5 }
 0x66f   :  { %v3305_v1 = vsel %vm3302_vm3, %v3304_v53, %v3300_v54  ;;  %7578 = vrcp.f32 %v11611_v41  ;;  %v3202_v2 = vsel %vm11647_vm6, %v11322_v29, %v11582_v23  ;;  %v3338_v47 = vadd.f32 %v11523_v59, %v3337_v49  ;;  %v16404_v54 = vld [vmem:[#allocation91_spill] sm:$0xff]  ;;  %v11670_v33 = vpop.xlane.xlu1 %2783 }
 0x670   :  { %vm3340_vm2 = vweird.f32 %v11523_v59  ;;  %vm3316_vm4 = vcmp.eq.f32.partialorder %v3315_v63, 8.507059e+37  ;;  %v3238_v26 = vsub.f32 1.0, %v3237_v61  ;;  %vm3339_vm8 = vweird.f32 %v11407_v43  ;;  %v16408_v61 = vld [vmem:[#allocation84_spill] sm:$0xff] }
 0x671   :  { %v3345_v31 = vand.u32 2147483648, %v11407_v43  ;;  %v3319_v37 = vsel %vm3316_vm4, %v3318_v27, %v3314_v4  ;;  %v11665_v11 = vmul.f32 %v16404_v54, %v3305_v1  ;;  %v3343_v29 = vand.u32 2147483647, %v11407_v43  ;;  %vm11673_vm9 = vmor %vm3339_vm8, %vm3340_vm2 }
 0x672   :  { %v11662_v13 = vpop.eup %7574  ;;  %v3352_v23 = vadd.f32 %v11589_v15, %v3351_v56  ;;  %vm3354_vm5 = vweird.f32 %v11589_v15  ;;  %v3245_v63 = vand.u32 2147483647, %v11479_v62  ;;  %v3379_v5 = vmul.f32 %v11585_v44, %v3378_v58 }
 0x673   :  { %16405 = vst [vmem:[#allocation99_spill] sm:$0xff] %v11665_v11  ;;  %vm3353_vm10 = vweird.f32 %v11521_v38  ;;  %v3359_v49 = vand.u32 2147483648, %v11521_v38  ;;  %v11681_v43 = vpop.eup %7576  ;;  %v3342_v22 = vsel %vm11673_vm9, %v11523_v59, %v3338_v47  ;;  %v11687_v53 = vmul.f32 %v16408_v61, %v3319_v37  ;;  %v16416_v59 = vld [vmem:[#allocation97_spill] sm:$0xff] }
 0x674   :  { %v3357_v8 = vand.u32 2147483647, %v11521_v38  ;;  %v3419_v4 = vmul.f32 %v11662_v13, %v11602_v3  ;;  %v3207_v14 = vsel %vm11625_vm0, %v3206_v10, %v3202_v2  ;;  %v3247_v1 = vand.u32 2147483648, %v11479_v62  ;;  %vm11700_vm7 = vmor %vm3353_vm10, %vm3354_vm5 }
 0x675   :  { %16409 = vst [vmem:[#allocation96_spill] sm:$0xff] %v11687_v53  ;;  %3690 = vperm.xlu1 %7227, %v11665_v11   ;;  %v11693_v56 = vpop.eup %7578  ;;  %v3346_v27 = vor.u32 1.1754944e-38, %v3345_v31  ;;  %7580 = vrcp.f32 %v11670_v33  ;;  %v3239_v38 = vmul.f32 %v11567_v18, %v3238_v26  ;;  %vm3242_vm11 = vweird.f32 %v11567_v18 }
 0x676   :  { %3625 = vperm.xlu2 %7226, %v11555_v57   ;;  %vm3344_vm12 = vcmp.eq.f32.partialorder %v3343_v29, 8.507059e+37  ;;  %v3356_v19 = vsel %vm11700_vm7, %v11589_v15, %v3352_v23  ;;  %v3391_v10 = vmul.f32 %v11693_v56, %v11611_v41  ;;  %3695 = vperm.xlu0 %7225, %v11687_v53   ;;  %v3380_v2 = vadd.f32 %v11585_v44, %v3379_v5  ;;  %v11721_v29 = vpop.xlane.xlu2 %2768  ;;  %v16412_v23 = vld [vmem:[#allocation185_spill] sm:$0xff] }
 0x677   :  { %v3347_v58 = vsel %vm3344_vm12, %v3346_v27, %v3342_v22  ;;  %vm3382_vm13 = vweird.f32 %v11585_v44  ;;  %v3360_v47 = vor.u32 1.1754944e-38, %v3359_v49  ;;  %vm3241_vm14 = vweird.f32 %v11479_v62 }
 0x678   :  { %v3279_v26 = vmul.f32 %v11681_v43, %v11570_v21  ;;  %vm3358_vm0 = vcmp.eq.f32.partialorder %v3357_v8, 8.507059e+37  ;;  %v3420_v31 = vsub.f32 1.0, %v3419_v4  ;;  %v3392_v37 = vsub.f32 1.0, %v3391_v10  ;;  %vm11776_vm12 = vmor %vm3241_vm14, %vm3242_vm11 }
 0x679   :  { %7582 = vrcp.f32 %v11656_v40  ;;  %vm3381_vm15 = vweird.f32 %v11509_v17  ;;  %v3387_v15 = vand.u32 2147483648, %v11509_v17  ;;  %v3361_v54 = vsel %vm3358_vm0, %v3360_v47, %v3356_v19 }
 0x67a   :  { %v11724_v52 = vmul.f32 %v16412_v23, %v3347_v58  ;;  %vm11726_vm3 = vmor %vm3381_vm15, %vm3382_vm13  ;;  %v3385_v49 = vand.u32 2147483647, %v11509_v17  ;;  %v3393_v22 = vmul.f32 %v11693_v56, %v3392_v37  ;;  %vm3396_vm6 = vweird.f32 %v11693_v56 }
 0x67b   :  { %v11733_v61 = vpop.eup %7580  ;;  %v3384_v8 = vsel %vm11726_vm3, %v11585_v44, %v3380_v2  ;;  %vm3395_vm2 = vweird.f32 %v11611_v41  ;;  %v3399_v4 = vand.u32 2147483647, %v11611_v41  ;;  %v3401_v27 = vand.u32 2147483648, %v11611_v41  ;;  %v16418_v44 = vld [vmem:[#allocation182_spill] sm:$0xff] }
 0x67c   :  { %16413 = vst [vmem:[#allocation95_spill] sm:$0xff] %v11724_v52  ;;  %v11743_v17 = vmul.f32 %v16416_v59, %v3361_v54  ;;  %v3421_v19 = vmul.f32 %v11662_v13, %v3420_v31  ;;  %v3394_v10 = vadd.f32 %v11693_v56, %v3393_v22  ;;  %v3433_v58 = vmul.f32 %v11733_v61, %v11670_v33  ;;  %vm11756_vm4 = vmor %vm3395_vm2, %vm3396_vm6 }
 0x67d   :  { %3705 = vperm.xlu1 %7227, %v11724_v52   ;;  %v11751_v2 = vmul.f32 %v16418_v44, %v3207_v14  ;;  %v3240_v47 = vadd.f32 %v11567_v18, %v3239_v38  ;;  %v3280_v41 = vsub.f32 1.0, %v3279_v26  ;;  %v3388_v37 = vor.u32 1.1754944e-38, %v3387_v15 }
 0x67e   :  { %3640 = vperm.xlu2 %7226, %v11579_v16   ;;  %16417 = vst [vmem:[#allocation102_spill] sm:$0xff] %v11743_v17  ;;  %7584 = vrcp.f32 %v11721_v29  ;;  %vm3386_vm8 = vcmp.eq.f32.partialorder %v3385_v49, 8.507059e+37  ;;  %v3398_v31 = vsel %vm11756_vm4, %v11693_v56, %v3394_v10  ;;  %v3434_v23 = vsub.f32 1.0, %v3433_v58  ;;  %3710 = vperm.xlu0 %7225, %v11743_v17  }
 0x67f   :  { %v11765_v14 = vpop.eup %7582  ;;  %v3389_v38 = vsel %vm3386_vm8, %v3388_v37, %v3384_v8  ;;  %vm3423_vm5 = vweird.f32 %v11602_v3  ;;  %vm3424_vm9 = vweird.f32 %v11662_v13  ;;  %v3402_v26 = vor.u32 1.1754944e-38, %v3401_v27 }
 0x680   :  { %v3422_v15 = vadd.f32 %v11662_v13, %v3421_v19  ;;  %vm3400_vm10 = vcmp.eq.f32.partialorder %v3399_v4, 8.507059e+37  ;;  %v3435_v5 = vmul.f32 %v11733_v61, %v3434_v23  ;;  %vm3438_vm7 = vweird.f32 %v11733_v61  ;;  %v16423_v4 = vld [vmem:[#allocation94_spill] sm:$0xff]  ;;  %v11786_v19 = vpop.xlane.xlu2 %2777  ;;  %vm11788_vm13 = vmor %vm3423_vm5, %vm3424_vm9 }
 0x681   :  { %v3427_v49 = vand.u32 2147483647, %v11602_v3  ;;  %v3429_v22 = vand.u32 2147483648, %v11602_v3  ;;  %v3403_v8 = vsel %vm3400_vm10, %v3402_v26, %v3398_v31  ;;  %v3443_v27 = vand.u32 2147483648, %v11670_v33 }
 0x682   :  { %v11784_v59 = vmul.f32 %v16423_v4, %v3389_v38  ;;  %v3436_v58 = vadd.f32 %v11733_v61, %v3435_v5  ;;  %vm3437_vm11 = vweird.f32 %v11670_v33  ;;  %v3441_v44 = vand.u32 2147483647, %v11670_v33  ;;  %v11829_v4 = vpop.permute.xlu0 %3510 }
 0x683   :  { %v3244_v3 = vsel %vm11776_vm12, %v11567_v18, %v3240_v47  ;;  %v3281_v37 = vmul.f32 %v11681_v43, %v3280_v41  ;;  %v3321_v54 = vmul.f32 %v11765_v14, %v11656_v40  ;;  %vm11803_vm14 = vmor %vm3437_vm11, %vm3438_vm7  ;;  %v3248_v33 = vor.u32 1.1754944e-38, %v3247_v1  ;;  %v16429_v47 = vld [vmem:[#allocation171_spill] sm:$0xff]  ;;  %16432 = vst [vmem:[#allocation104_spill] sm:$0xff] %v11829_v4 }
 0x684   :  { %16424 = vst [vmem:[#allocation225_spill] sm:$0xff] %v11784_v59  ;;  %v11808_v23 = vpop.eup %7584  ;;  %v3426_v18 = vsel %vm11788_vm13, %v11662_v13, %v3422_v15  ;;  %v11816_v41 = vmul.f32 %v16429_v47, %v3403_v8  ;;  %v3440_v38 = vsel %vm11803_vm14, %v11733_v61, %v3436_v58  ;;  %vm3246_vm0 = vcmp.eq.f32.partialorder %v3245_v63, 8.507059e+37  ;;  %v16433_v63 = vld [vmem:[#allocation77_spill] sm:$0xff]  ;;  %v16437_v58 = vld [vmem:[#allocation188_spill] sm:$0xff] }
 0x685   :  { %3720 = vperm.xlu1 %7227, %v11784_v59   ;;  %v3430_v26 = vor.u32 1.1754944e-38, %v3429_v22  ;;  %v3444_v5 = vor.u32 1.1754944e-38, %v3443_v27  ;;  %v3249_v56 = vsel %vm3246_vm0, %v3248_v33, %v3244_v3  ;;  %vm3284_vm15 = vweird.f32 %v11681_v43  ;;  %v16435_v27 = vld [vmem:[#allocation100_spill] sm:$0xff] }
 0x686   :  { %3655 = vperm.xlu2 %7226, %v11751_v2   ;;  %16430 = vst [vmem:[#allocation222_spill] sm:$0xff] %v11816_v41  ;;  %vm3428_vm3 = vcmp.eq.f32.partialorder %v3427_v49, 8.507059e+37  ;;  %vm3442_vm6 = vcmp.eq.f32.partialorder %v3441_v44, 8.507059e+37  ;;  %3725 = vperm.xlu0 %7225, %v11816_v41   ;;  %v3282_v1 = vadd.f32 %v11681_v43, %v3281_v37  ;;  %v3322_v15 = vsub.f32 1.0, %v3321_v54 }
 0x687   :  { %v11826_v13 = vpop.permute.xlu1 %3555  ;;  %v3431_v61 = vsel %vm3428_vm3, %v3430_v26, %v3426_v18  ;;  %v3445_v8 = vsel %vm3442_vm6, %v3444_v5, %v3440_v38  ;;  %v3289_v62 = vand.u32 2147483648, %v11570_v21  ;;  %v11833_v22 = vmul.f32 %v16433_v63, %v3249_v56  ;;  %v16441_v5 = vld [vmem:[#allocation74_spill] sm:$0xff] }
 0x688   :  { %16431 = vst [vmem:[#allocation98_spill] sm:$0xff] %v11826_v13  ;;  %vm3283_vm2 = vweird.f32 %v11570_v21  ;;  %v3287_v49 = vand.u32 2147483647, %v11570_v21  ;;  %7586 = vrcp.f32 %v11786_v19  ;;  %v11839_v10 = vmul.f32 %v16435_v27, %v3431_v61  ;;  %v11849_v21 = vpop.permute.xlu2 %3550  ;;  %v16444_v27 = vld [vmem:[#allocation81_spill] sm:$0xff] }
 0x689   :  { %16434 = vst [vmem:[#allocation228_spill] sm:$0xff] %v11833_v22  ;;  %vm3285_vm4 = vmor %vm3283_vm2, %vm3284_vm15  ;;  %v11842_v44 = vmul.f32 %v16437_v58, %v3445_v8  ;;  %v3323_v37 = vmul.f32 %v11765_v14, %v3322_v15  ;;  %v3363_v54 = vmul.f32 %v11808_v23, %v11721_v29  ;;  %v3290_v31 = vor.u32 1.1754944e-38, %v3289_v62 }
 0x68a   :  { %16436 = vst [vmem:[#allocation101_spill] sm:$0xff] %v11839_v10  ;;  %v3286_v3 = vsel %vm3285_vm4, %v11681_v43, %v3282_v1  ;;  %vm3288_vm8 = vcmp.eq.f32.partialorder %v3287_v49, 8.507059e+37  ;;  %vm3326_vm5 = vweird.f32 %v11765_v14  ;;  %v3331_v26 = vand.u32 2147483648, %v11656_v40  ;;  %v11863_v15 = vpop.permute.xlu0 %3560 }
 0x68b   :  { %16438 = vst [vmem:[#allocation107_spill] sm:$0xff] %v11842_v44  ;;  %v3291_v33 = vsel %vm3288_vm8, %v3290_v31, %v3286_v3  ;;  %v3324_v43 = vadd.f32 %v11765_v14, %v3323_v37  ;;  %v3364_v47 = vsub.f32 1.0, %v3363_v54  ;;  %vm3325_vm9 = vweird.f32 %v11656_v40  ;;  %v16447_v31 = vld [vmem:[#allocation78_spill] sm:$0xff] }
 0x68c   :  { %16439 = vst [vmem:[#allocation231_spill] sm:$0xff] %v11849_v21  ;;  %v11859_v56 = vmul.f32 %v16441_v5, %v3291_v33  ;;  %v3329_v1 = vand.u32 2147483647, %v11656_v40  ;;  %vm3327_vm10 = vmor %vm3325_vm9, %vm3326_vm5  ;;  %v3332_v63 = vor.u32 1.1754944e-38, %v3331_v26  ;;  %v15242_v49 = vmov 1  }
 0x68d   :  { %3735 = vperm.xlu1 %7227, %v11839_v10   ;;  %16443 = vst [vmem:[#allocation45_spill] sm:$0xff] %v11863_v15  ;;  %v3328_v61 = vsel %vm3327_vm10, %v11765_v14, %v3324_v43  ;;  %v3365_v8 = vmul.f32 %v11808_v23, %v3364_v47  ;;  %v15238_v3 = vmov 3   ;;  %vm3368_vm12 = vweird.f32 %v11808_v23  ;;  %v16448_v43 = vld [vmem:[#allocation80_spill] sm:$0xff] }
 0x68e   :  { %3670 = vperm.xlu2 %7226, %v11833_v22   ;;  %3740 = vperm.xlu0 %7225, %v11842_v44   ;;  %v7587_v38 = vpop.eup %7586  ;;  %16442 = vst [vmem:[#allocation149_spill] sm:$0xff] %v11859_v56  ;;  %vm3330_vm7 = vcmp.eq.f32.partialorder %v3329_v1, 8.507059e+37  ;;  %v3373_v33 = vand.u32 2147483648, %v11721_v29  ;;  %vm3367_vm13 = vweird.f32 %v11721_v29  ;;  %v3371_v26 = vand.u32 2147483647, %v11721_v29 }
 0x68f   :  { %v11853_v18 = vpop.permute.xlu1 %3515  ;;  %v3405_v62 = vmul.f32 %v7587_v38, %v11786_v19  ;;  %v3333_v58 = vsel %vm3330_vm7, %v3332_v63, %v3328_v61  ;;  %v3366_v37 = vadd.f32 %v11808_v23, %v3365_v8  ;;  %vm3369_vm11 = vmor %vm3367_vm13, %vm3368_vm12  ;;  %vm3410_vm0 = vweird.f32 %v7587_v38 }
 0x690   :  { %16440 = vst [vmem:[#allocation143_spill] sm:$0xff] %v11853_v18  ;;  %v11871_v40 = vpop.permute.xlu2 %3565  ;;  %v11881_v47 = vmul.f32 %v16448_v43, %v3333_v58  ;;  %v3374_v8 = vor.u32 1.1754944e-38, %v3373_v33  ;;  %vm3372_vm14 = vcmp.eq.f32.partialorder %v3371_v26, 8.507059e+37  ;;  %v3415_v29 = vand.u32 2147483648, %v11786_v19 }
 0x691   :  { %16445 = vst [vmem:[#allocation219_spill] sm:$0xff] %v11871_v40  ;;  %v3406_v54 = vsub.f32 1.0, %v3405_v62  ;;  %v3370_v5 = vsel %vm3369_vm11, %v11808_v23, %v3366_v37  ;;  %v16452_v23 = vld [vmem:[#allocation212_spill] sm:$0xff]  ;;  %vm3409_vm15 = vweird.f32 %v11786_v19  ;;  %v3413_v33 = vand.u32 2147483647, %v11786_v19  ;;  %v16459_v19 = vld [vmem:[#allocation123_spill] sm:$0xff] }
 0x692   :  { %16449 = vst [vmem:[#allocation110_spill] sm:$0xff] %v11881_v47  ;;  %v11886_v61 = vpop.permute.xlu0 %3575  ;;  %v3375_v62 = vsel %vm3372_vm14, %v3374_v8, %v3370_v5  ;;  %v16453_v37 = vld [vmem:[#allocation88_spill] sm:$0xff]  ;;  %vm3411_vm3 = vmor %vm3409_vm15, %vm3410_vm0  ;;  %v3416_v5 = vor.u32 1.1754944e-38, %v3415_v29  ;;  %vm6719_vm9 = vcmask 523264  }
 0x693   :  { %v3407_v1 = vmul.f32 %v7587_v38, %v3406_v54  ;;  %16450 = vst [vmem:[#allocation108_spill] sm:$0xff] %v11886_v61  ;;  %v11896_v54 = vmul.f32 %v16453_v37, %v3375_v62  ;;  %vm3414_vm6 = vcmp.eq.f32.partialorder %v3413_v33, 8.507059e+37  ;;  %v16458_v37 = vld [vmem:[#allocation109_spill] sm:$0xff]  ;;  %v16461_v29 = vld [vmem:[#allocation140_spill] sm:$0xff] }
 0x695   :  { %7228 = vset.pattern.permute.xlu1 %v15242_v49  ;;  %v3408_v43 = vadd.f32 %v7587_v38, %v3407_v1  ;;  %16454 = vst [vmem:[#allocation128_spill] sm:$0xff] %v11896_v54 }
 0x696   :  { %3685 = vperm.xlu2 %7226, %v11859_v56   ;;  %3749 = vperm.xlu1 %7228, %v16444_v27  }
 0x697   :  { %7241 = vset.pattern.permute.xlu0 %v15238_v3  ;;  %v11874_v14 = vpop.permute.xlu1 %3570  ;;  %v15240_v3 = vmov 4   ;;  %v3412_v26 = vsel %vm3411_vm3, %v7587_v38, %v3408_v43 }
 0x698   :  { %16446 = vst [vmem:[#allocation85_spill] sm:$0xff] %v11874_v14  ;;  %4177 = vperm.xlu0 %7241, %v16447_v31  }
 0x69a   :  { %v11901_v8 = vpop.permute.xlu0 %3590 }
 0x69b   :  { %16455 = vst [vmem:[#allocation125_spill] sm:$0xff] %v11901_v8  ;;  %v16557_v8 = vld [vmem:[#allocation18_spill] sm:$0xff] }
 0x69e   :  { %3700 = vperm.xlu2 %7226, %v11881_v47   ;;  %3761 = vperm.xlu1 %7228, %v11110_v46   ;;  %v16471_v46 = vmov 0  }
 0x69f   :  { %v11890_v63 = vpop.permute.xlu1 %3585 }
 0x6a0   :  { %16451 = vst [vmem:[#allocation113_spill] sm:$0xff] %v11890_v63  ;;  %7250 = vset.pattern.permute.xlu0 %v15240_v3  ;;  %v3417_v3 = vsel %vm3414_vm6, %v3416_v5, %v3412_v26  ;;  %v15255_v5 = vmov 2  }
 0x6a1   :  { %v2787_v58 = vpop.xlane.xlu2 %2786  ;;  %4377 = vperm.xlu0 %7250, %v16452_v23   ;;  %v11910_v4 = vmul.f32 %v16459_v19, %v3417_v3  ;;  %v16466_v19 = vmov 1  }
 0x6a2   :  { %7588 = vrcp.f32 %v2787_v58  ;;  %v11918_v26 = vpop.permute.xlu0 %3605  ;;  %v3457_v3 = vand.u32 2147483648, %v2787_v58  ;;  %vm3451_vm4 = vweird.f32 %v2787_v58 }
 0x6a3   :  { %16460 = vst [vmem:[#allocation217_spill] sm:$0xff] %v11910_v4 }
 0x6a4   :  { %16464 = vst [vmem:[#allocation220_spill] sm:$0xff] %v11918_v26 }
 0x6a6   :  { %3715 = vperm.xlu2 %7226, %v11896_v54   ;;  %3769 = vperm.xlu1 %7228, %v11250_v60  }
 0x6a7   :  { %v11904_v18 = vpop.permute.xlu1 %3530 }
 0x6a8   :  { %v7589_v1 = vpop.eup %7588  ;;  %16456 = vst [vmem:[#allocation116_spill] sm:$0xff] %v11904_v18 }
 0x6a9   :  { %v3447_v49 = vmul.f32 %v7589_v1, %v2787_v58  ;;  %v11906_v62 = vpop.permute.xlu2 %3520  ;;  %4389 = vperm.xlu0 %7250, %v16458_v37   ;;  %vm3452_vm2 = vweird.f32 %v7589_v1 }
 0x6aa   :  { %16457 = vst [vmem:[#allocation131_spill] sm:$0xff] %v11906_v62  ;;  %v16465_v62 = vld [vmem:[#allocation83_spill] sm:$0xff]  ;;  %vm3453_vm8 = vmor %vm3451_vm4, %vm3452_vm2 }
 0x6ab   :  { %v3448_v38 = vsub.f32 1.0, %v3447_v49  ;;  %v3455_v49 = vand.u32 2147483647, %v2787_v58 }
 0x6ad   :  { %v3449_v43 = vmul.f32 %v7589_v1, %v3448_v38  ;;  %vm3456_vm5 = vcmp.eq.f32.partialorder %v3455_v49, 8.507059e+37 }
 0x6ae   :  { %3730 = vperm.xlu2 %7226, %v11910_v4   ;;  %3781 = vperm.xlu1 %7228, %v16461_v29  }
 0x6af   :  { %v11914_v33 = vpop.permute.xlu1 %3600  ;;  %v3450_v18 = vadd.f32 %v7589_v1, %v3449_v43 }
 0x6b0   :  { %16462 = vst [vmem:[#allocation119_spill] sm:$0xff] %v11914_v33 }
 0x6b1   :  { %v11916_v60 = vpop.permute.xlu2 %3525  ;;  %7263 = vset.pattern.permute.xlu0 %v15255_v5  ;;  %v3454_v38 = vsel %vm3453_vm8, %v7589_v1, %v3450_v18 }
 0x6b2   :  { %16463 = vst [vmem:[#allocation134_spill] sm:$0xff] %v11916_v60  ;;  %3977 = vperm.xlu0 %7263, %v16465_v62   ;;  %v3458_v60 = vor.u32 1.1754944e-38, %v3457_v3 }
 0x6b4   :  { %v3459_v43 = vsel %vm3456_vm5, %v3458_v60, %v3454_v38 }
 0x6b5   :  { %v11933_v58 = vmul.f32 %v10867_v20, %v3459_v43 }
 0x6b6   :  { %7229 = vset.pattern.permute.xlu2 %v16466_v19  ;;  %3793 = vperm.xlu1 %7228, %v16447_v31   ;;  %v11929_v5 = vpop.permute.xlu0 %3545 }
 0x6b7   :  { %3757 = vperm.xlu2 %7229, %v11021_v39   ;;  %v11925_v44 = vpop.permute.xlu1 %3540  ;;  %16469 = vst [vmem:[#allocation223_spill] sm:$0xff] %v11929_v5 }
 0x6b8   :  { %16467 = vst [vmem:[#allocation137_spill] sm:$0xff] %v11925_v44  ;;  %v15265_v44 = vmov 5  }
 0x6b9   :  { %v11927_v10 = vpop.permute.xlu2 %3580  ;;  %16470 = vst [vmem:[#allocation187_spill] sm:$0xff] %v11933_v58 }
 0x6ba   :  { %16468 = vst [vmem:[#allocation167_spill] sm:$0xff] %v11927_v10  ;;  %3989 = vperm.xlu0 %7263, %v10984_v9  }
 0x6be   :  { %3805 = vperm.xlu1 %7228, %v10999_v28   ;;  %v11942_v3 = vpop.permute.xlu0 %3620 }
 0x6bf   :  { %7230 = vset.pattern.permute.xlu2 %v16471_v46  ;;  %v11938_v18 = vpop.permute.xlu1 %3615  ;;  %16474 = vst [vmem:[#allocation120_spill] sm:$0xff] %v11942_v3 }
 0x6c0   :  { %3745 = vperm.xlu2 %7230, %v11933_v58   ;;  %16472 = vst [vmem:[#allocation117_spill] sm:$0xff] %v11938_v18 }
 0x6c1   :  { %v11940_v1 = vpop.permute.xlu2 %3535 }
 0x6c2   :  { %16473 = vst [vmem:[#allocation114_spill] sm:$0xff] %v11940_v1  ;;  %4017 = vperm.xlu0 %7263, %v10907_v12   ;;  %v16482_v1 = vld [vmem:[#allocation213_spill] sm:$0xff] }
 0x6c6   :  { %3817 = vperm.xlu1 %7228, %v11059_v45   ;;  %v11952_v60 = vpop.permute.xlu0 %3635 }
 0x6c7   :  { %v11947_v20 = vpop.permute.xlu1 %3630  ;;  %16477 = vst [vmem:[#allocation122_spill] sm:$0xff] %v11952_v60 }
 0x6c8   :  { %7231 = vset.pattern.permute.xlu2 %v16466_v19  ;;  %16475 = vst [vmem:[#allocation148_spill] sm:$0xff] %v11947_v20 }
 0x6c9   :  { %3765 = vperm.xlu2 %7231, %v11126_v24   ;;  %v11950_v46 = vpop.permute.xlu2 %3595 }
 0x6ca   :  { %16476 = vst [vmem:[#allocation145_spill] sm:$0xff] %v11950_v46  ;;  %4029 = vperm.xlu0 %7263, %v11325_v36  }
 0x6ce   :  { %3829 = vperm.xlu1 %7228, %v11181_v32  }
 0x6cf   :  { %v11956_v49 = vpop.permute.xlu1 %3645 }
 0x6d0   :  { %16478 = vst [vmem:[#allocation151_spill] sm:$0xff] %v11956_v49  ;;  %v11961_v43 = vpop.permute.xlu0 %3650 }
 0x6d1   :  { %3777 = vperm.xlu2 %7231, %v11264_v50   ;;  %v11959_v38 = vpop.permute.xlu2 %3610  ;;  %16480 = vst [vmem:[#allocation154_spill] sm:$0xff] %v11961_v43  ;;  %v16499_v50 = vld [vmem:[#allocation106_spill] sm:$0xff] }
 0x6d2   :  { %16479 = vst [vmem:[#allocation124_spill] sm:$0xff] %v11959_v38  ;;  %7280 = vset.pattern.permute.xlu0 %v15265_v44 }
 0x6d3   :  { %4549 = vperm.xlu0 %7280, %v16461_v29  }
 0x6d6   :  { %3841 = vperm.xlu1 %7228, %v11555_v57  }
 0x6d7   :  { %v11966_v5 = vpop.permute.xlu1 %3660 }
 0x6d8   :  { %16481 = vst [vmem:[#allocation157_spill] sm:$0xff] %v11966_v5  ;;  %v11971_v49 = vpop.permute.xlu0 %3665 }
 0x6d9   :  { %3789 = vperm.xlu2 %7231, %v16482_v1   ;;  %v11969_v60 = vpop.permute.xlu2 %3625  ;;  %16484 = vst [vmem:[#allocation160_spill] sm:$0xff] %v11971_v49 }
 0x6da   :  { %16483 = vst [vmem:[#allocation173_spill] sm:$0xff] %v11969_v60 }
 0x6db   :  { %4577 = vperm.xlu0 %7280, %v11032_v48  }
 0x6de   :  { %3853 = vperm.xlu1 %7228, %v11579_v16  }
 0x6df   :  { %v11975_v43 = vpop.permute.xlu1 %3675 }
 0x6e0   :  { %16485 = vst [vmem:[#allocation129_spill] sm:$0xff] %v11975_v43  ;;  %v11980_v20 = vpop.permute.xlu0 %3680  ;;  %v16491_v43 = vmov 2  }
 0x6e1   :  { %3801 = vperm.xlu2 %7231, %v16452_v23   ;;  %v11978_v44 = vpop.permute.xlu2 %3640  ;;  %16487 = vst [vmem:[#allocation136_spill] sm:$0xff] %v11980_v20 }
 0x6e2   :  { %16486 = vst [vmem:[#allocation127_spill] sm:$0xff] %v11978_v44 }
 0x6e3   :  { %4589 = vperm.xlu0 %7280, %v11184_v7  }
 0x6e6   :  { %3865 = vperm.xlu1 %7228, %v11751_v2  }
 0x6e7   :  { %v11984_v5 = vpop.permute.xlu1 %3690 }
 0x6e8   :  { %16488 = vst [vmem:[#allocation133_spill] sm:$0xff] %v11984_v5  ;;  %v11989_v3 = vpop.permute.xlu0 %3695 }
 0x6e9   :  { %3813 = vperm.xlu2 %7231, %v16458_v37   ;;  %v11987_v49 = vpop.permute.xlu2 %3655  ;;  %16490 = vst [vmem:[#allocation139_spill] sm:$0xff] %v11989_v3 }
 0x6ea   :  { %16489 = vst [vmem:[#allocation132_spill] sm:$0xff] %v11987_v49  ;;  %v16496_v49 = vmov 3  }
 0x6eb   :  { %4617 = vperm.xlu0 %7280, %v11388_v55  }
 0x6ee   :  { %7232 = vset.pattern.permute.xlu1 %v16491_v43 }
 0x6ef   :  { %v11993_v60 = vpop.permute.xlu1 %3705  ;;  %3973 = vperm.xlu1 %7232, %v16461_v29  }
 0x6f0   :  { %16492 = vst [vmem:[#allocation172_spill] sm:$0xff] %v11993_v60  ;;  %v11999_v44 = vpop.permute.xlu0 %3710 }
 0x6f1   :  { %3825 = vperm.xlu2 %7231, %v10907_v12   ;;  %v11997_v20 = vpop.permute.xlu2 %3670  ;;  %16494 = vst [vmem:[#allocation135_spill] sm:$0xff] %v11999_v44 }
 0x6f2   :  { %16493 = vst [vmem:[#allocation169_spill] sm:$0xff] %v11997_v20 }
 0x6f3   :  { %4629 = vperm.xlu0 %7280, %v11482_v25  }
 0x6f7   :  { %v12002_v5 = vpop.permute.xlu1 %3720  ;;  %7234 = vset.pattern.permute.xlu1 %v16496_v49 }
 0x6f8   :  { %16495 = vst [vmem:[#allocation142_spill] sm:$0xff] %v12002_v5  ;;  %4169 = vperm.xlu1 %7234, %v16465_v62   ;;  %v12009_v60 = vpop.permute.xlu0 %3725  ;;  %v16502_v5 = vmov 4  }
 0x6f9   :  { %3837 = vperm.xlu2 %7231, %v11325_v36   ;;  %v12006_v3 = vpop.permute.xlu2 %3685  ;;  %16498 = vst [vmem:[#allocation138_spill] sm:$0xff] %v12009_v60 }
 0x6fa   :  { %16497 = vst [vmem:[#allocation175_spill] sm:$0xff] %v12006_v3 }
 0x6fb   :  { %7305 = vset.pattern.permute.xlu0 %v16466_v19 }
 0x6fc   :  { %3753 = vperm.xlu0 %7305, %v16499_v50  }
 0x6ff   :  { %v12013_v20 = vpop.permute.xlu1 %3735 }
 0x700   :  { %16500 = vst [vmem:[#allocation144_spill] sm:$0xff] %v12013_v20  ;;  %7236 = vset.pattern.permute.xlu1 %v16502_v5  ;;  %v12019_v38 = vpop.permute.xlu0 %3740 }
 0x701   :  { %3849 = vperm.xlu2 %7231, %v11388_v55   ;;  %v12016_v44 = vpop.permute.xlu2 %3700  ;;  %16503 = vst [vmem:[#allocation141_spill] sm:$0xff] %v12019_v38  ;;  %4361 = vperm.xlu1 %7236, %v16465_v62  }
 0x702   :  { %16501 = vst [vmem:[#allocation178_spill] sm:$0xff] %v12016_v44 }
 0x704   :  { %3773 = vperm.xlu0 %7305, %v11239_v51  }
 0x708   :  { %v12026_v3 = vpop.permute.xlu1 %3749 }
 0x709   :  { %3861 = vperm.xlu2 %7231, %v11482_v25   ;;  %v12024_v60 = vpop.permute.xlu2 %3715  ;;  %16505 = vst [vmem:[#allocation181_spill] sm:$0xff] %v12026_v3  ;;  %7238 = vset.pattern.permute.xlu1 %v16491_v43 }
 0x70a   :  { %16504 = vst [vmem:[#allocation146_spill] sm:$0xff] %v12024_v60  ;;  %v12029_v20 = vpop.permute.xlu0 %4177  ;;  %3981 = vperm.xlu1 %7238, %v16482_v1  }
 0x70b   :  { %16506 = vst [vmem:[#allocation184_spill] sm:$0xff] %v12029_v20 }
 0x70c   :  { %3785 = vperm.xlu0 %7305, %v16465_v62  }
 0x710   :  { %v12036_v44 = vpop.permute.xlu1 %3761 }
 0x711   :  { %3873 = vperm.xlu2 %7231, %v11546_v35   ;;  %v12034_v38 = vpop.permute.xlu2 %3730  ;;  %16508 = vst [vmem:[#allocation150_spill] sm:$0xff] %v12036_v44 }
 0x712   :  { %16507 = vst [vmem:[#allocation152_spill] sm:$0xff] %v12034_v38  ;;  %7240 = vset.pattern.permute.xlu1 %v16496_v49 }
 0x713   :  { %v12039_v51 = vpop.permute.xlu0 %4377  ;;  %4173 = vperm.xlu1 %7240, %v16482_v1  }
 0x714   :  { %16509 = vst [vmem:[#allocation155_spill] sm:$0xff] %v12039_v51  ;;  %3797 = vperm.xlu0 %7305, %v10984_v9  }
 0x718   :  { %v12046_v3 = vpop.permute.xlu1 %3769 }
 0x719   :  { %7233 = vset.pattern.permute.xlu2 %v16496_v49  ;;  %v12044_v60 = vpop.permute.xlu2 %3757  ;;  %16511 = vst [vmem:[#allocation205_spill] sm:$0xff] %v12046_v3 }
 0x71a   :  { %16510 = vst [vmem:[#allocation208_spill] sm:$0xff] %v12044_v60  ;;  %4165 = vperm.xlu2 %7233, %v16461_v29   ;;  %v16516_v60 = vmov 5  }
 0x71b   :  { %v12049_v18 = vpop.permute.xlu0 %4389  ;;  %7243 = vset.pattern.permute.xlu1 %v16502_v5 }
 0x71c   :  { %16512 = vst [vmem:[#allocation158_spill] sm:$0xff] %v12049_v18  ;;  %3809 = vperm.xlu0 %7305, %v11032_v48   ;;  %4369 = vperm.xlu1 %7243, %v16447_v31   ;;  %v16552_v18 = vld [vmem:[#allocation10_spill] sm:$0xff] }
 0x720   :  { %v12056_v44 = vpop.permute.xlu1 %3781 }
 0x721   :  { %v12054_v38 = vpop.permute.xlu2 %3745  ;;  %16514 = vst [vmem:[#allocation161_spill] sm:$0xff] %v12056_v44 }
 0x722   :  { %16513 = vst [vmem:[#allocation211_spill] sm:$0xff] %v12054_v38  ;;  %7235 = vset.pattern.permute.xlu2 %v16502_v5  ;;  %v16519_v38 = vld [vmem:[#allocation218_spill] sm:$0xff] }
 0x723   :  { %4357 = vperm.xlu2 %7235, %v16461_v29  }
 0x724   :  { %3821 = vperm.xlu0 %7305, %v11184_v7   ;;  %v12061_v3 = vpop.permute.xlu0 %3977  ;;  %7245 = vset.pattern.permute.xlu1 %v16516_v60 }
 0x725   :  { %16515 = vst [vmem:[#allocation214_spill] sm:$0xff] %v12061_v3  ;;  %4561 = vperm.xlu1 %7245, %v16447_v31  }
 0x728   :  { %v12067_v25 = vpop.permute.xlu1 %3793 }
 0x729   :  { %v12065_v58 = vpop.permute.xlu2 %3765  ;;  %16518 = vst [vmem:[#allocation49_spill] sm:$0xff] %v12067_v25 }
 0x72a   :  { %16517 = vst [vmem:[#allocation164_spill] sm:$0xff] %v12065_v58 }
 0x72b   :  { %7237 = vset.pattern.permute.xlu2 %v16516_v60 }
 0x72c   :  { %4553 = vperm.xlu2 %7237, %v16465_v62   ;;  %3833 = vperm.xlu0 %7305, %v16519_v38   ;;  %v12072_v33 = vpop.permute.xlu0 %3989 }
 0x72d   :  { %16520 = vst [vmem:[#allocation216_spill] sm:$0xff] %v12072_v33  ;;  %7247 = vset.pattern.permute.xlu1 %v16496_v49 }
 0x72e   :  { %4181 = vperm.xlu1 %7247, %v10984_v9  }
 0x730   :  { %v12078_v26 = vpop.permute.xlu1 %3805 }
 0x731   :  { %v12076_v29 = vpop.permute.xlu2 %3777  ;;  %16522 = vst [vmem:[#allocation156_spill] sm:$0xff] %v12078_v26 }
 0x732   :  { %16521 = vst [vmem:[#allocation159_spill] sm:$0xff] %v12076_v29 }
 0x734   :  { %7239 = vset.pattern.permute.xlu2 %v16491_v43  ;;  %3845 = vperm.xlu0 %7305, %v11373_v34   ;;  %v12083_v58 = vpop.permute.xlu0 %4017 }
 0x735   :  { %3985 = vperm.xlu2 %7239, %v16447_v31   ;;  %16523 = vst [vmem:[#allocation195_spill] sm:$0xff] %v12083_v58 }
 0x736   :  { %7249 = vset.pattern.permute.xlu1 %v16502_v5 }
 0x737   :  { %4373 = vperm.xlu1 %7249, %v10984_v9  }
 0x738   :  { %v12089_v17 = vpop.permute.xlu1 %3817 }
 0x739   :  { %v12087_v62 = vpop.permute.xlu2 %3789  ;;  %16525 = vst [vmem:[#allocation162_spill] sm:$0xff] %v12089_v17  ;;  %v16555_v17 = vld [vmem:[#allocation3_spill] sm:$0xff] }
 0x73a   :  { %16524 = vst [vmem:[#allocation192_spill] sm:$0xff] %v12087_v62 }
 0x73c   :  { %3857 = vperm.xlu0 %7305, %v11454_v30   ;;  %v12093_v29 = vpop.permute.xlu0 %4029 }
 0x73d   :  { %7242 = vset.pattern.permute.xlu2 %v16502_v5  ;;  %16526 = vst [vmem:[#allocation198_spill] sm:$0xff] %v12093_v29 }
 0x73e   :  { %4365 = vperm.xlu2 %7242, %v16482_v1  }
 0x73f   :  { %7252 = vset.pattern.permute.xlu1 %v16516_v60 }
 0x740   :  { %v12099_v58 = vpop.permute.xlu1 %3829  ;;  %4569 = vperm.xlu1 %7252, %v16452_v23  }
 0x741   :  { %v12097_v31 = vpop.permute.xlu2 %3801  ;;  %16528 = vst [vmem:[#allocation201_spill] sm:$0xff] %v12099_v58 }
 0x742   :  { %16527 = vst [vmem:[#allocation165_spill] sm:$0xff] %v12097_v31 }
 0x744   :  { %3869 = vperm.xlu0 %7305, %v11526_v6  }
 0x745   :  { %v12104_v47 = vpop.permute.xlu0 %4549 }
 0x746   :  { %7244 = vset.pattern.permute.xlu2 %v16516_v60  ;;  %16529 = vst [vmem:[#allocation168_spill] sm:$0xff] %v12104_v47 }
 0x747   :  { %4557 = vperm.xlu2 %7244, %v16482_v1  }
 0x748   :  { %v12109_v29 = vpop.permute.xlu1 %3841  ;;  %7254 = vset.pattern.permute.xlu1 %v16491_v43 }
 0x749   :  { %v12107_v11 = vpop.permute.xlu2 %3813  ;;  %16531 = vst [vmem:[#allocation170_spill] sm:$0xff] %v12109_v29  ;;  %4001 = vperm.xlu1 %7254, %v11032_v48  }
 0x74a   :  { %16530 = vst [vmem:[#allocation204_spill] sm:$0xff] %v12107_v11 }
 0x74c   :  { %3877 = vperm.xlu0 %7305, %v11833_v22  }
 0x74d   :  { %v12114_v58 = vpop.permute.xlu0 %4577 }
 0x74e   :  { %16532 = vst [vmem:[#allocation207_spill] sm:$0xff] %v12114_v58 }
 0x74f   :  { %7246 = vset.pattern.permute.xlu2 %v16491_v43 }
 0x750   :  { %3993 = vperm.xlu2 %7246, %v16452_v23   ;;  %v12120_v19 = vpop.permute.xlu1 %3853 }
 0x751   :  { %v12118_v6 = vpop.permute.xlu2 %3825  ;;  %16534 = vst [vmem:[#allocation191_spill] sm:$0xff] %v12120_v19  ;;  %7256 = vset.pattern.permute.xlu1 %v16502_v5 }
 0x752   :  { %16533 = vst [vmem:[#allocation194_spill] sm:$0xff] %v12118_v6  ;;  %4381 = vperm.xlu1 %7256, %v10999_v28  }
 0x754   :  { %3885 = vperm.xlu0 %7305, %v11620_v42  }
 0x755   :  { %v12125_v1 = vpop.permute.xlu0 %4589 }
 0x756   :  { %16535 = vst [vmem:[#allocation227_spill] sm:$0xff] %v12125_v1 }
 0x758   :  { %7248 = vset.pattern.permute.xlu2 %v16496_v49  ;;  %v12131_v29 = vpop.permute.xlu1 %3865 }
 0x759   :  { %4185 = vperm.xlu2 %7248, %v16452_v23   ;;  %v12129_v22 = vpop.permute.xlu2 %3837  ;;  %16537 = vst [vmem:[#allocation197_spill] sm:$0xff] %v12131_v29 }
 0x75a   :  { %16536 = vst [vmem:[#allocation224_spill] sm:$0xff] %v12129_v22  ;;  %7258 = vset.pattern.permute.xlu1 %v16516_v60 }
 0x75b   :  { %4573 = vperm.xlu1 %7258, %v10999_v28  }
 0x75c   :  { %7322 = vset.pattern.permute.xlu0 %v16496_v49 }
 0x75d   :  { %v12136_v19 = vpop.permute.xlu0 %4617  ;;  %4189 = vperm.xlu0 %7322, %v10999_v28  }
 0x75e   :  { %16538 = vst [vmem:[#allocation230_spill] sm:$0xff] %v12136_v19 }
 0x761   :  { %7251 = vset.pattern.permute.xlu2 %v16516_v60  ;;  %v12140_v42 = vpop.permute.xlu2 %3849  ;;  %v12143_v23 = vpop.permute.xlu1 %3973 }
 0x762   :  { %16539 = vst [vmem:[#allocation200_spill] sm:$0xff] %v12140_v42  ;;  %4565 = vperm.xlu2 %7251, %v10984_v9   ;;  %v4860_v30 = vmul.f32 %v12143_v23, %v16552_v18 }
 0x763   :  { %16540 = vst [vmem:[#allocation203_spill] sm:$0xff] %v12143_v23  ;;  %7260 = vset.pattern.permute.xlu1 %v16491_v43 }
 0x764   :  { %4009 = vperm.xlu1 %7260, %v11059_v45  }
 0x765   :  { %v12147_v29 = vpop.permute.xlu0 %4629  ;;  %4217 = vperm.xlu0 %7322, %v16519_v38  }
 0x766   :  { %16541 = vst [vmem:[#allocation206_spill] sm:$0xff] %v12147_v29  ;;  %v7205_v29 = vld [vmem:[%s15067_s1 + $0xc8] sm:$0xff] }
 0x767   :  { %7217 = vmatpush.bf16.msra.mxu3 %v7205_v29  ;;  %5355 = vmatpush.bf16.msrb.mxu1 %v7205_v29  ;;  %v16549_v29 = vld [vmem:[#allocation2_spill] sm:$0xff] }
 0x769   :  { %v12150_v22 = vpop.permute.xlu2 %3861 }
 0x76a   :  { %16542 = vst [vmem:[#allocation54_spill] sm:$0xff] %v12150_v22  ;;  %7253 = vset.pattern.permute.xlu2 %v16491_v43  ;;  %v12154_v19 = vpop.permute.xlu1 %4169 }
 0x76b   :  { %3997 = vperm.xlu2 %7253, %v10999_v28   ;;  %16543 = vst [vmem:[#allocation229_spill] sm:$0xff] %v12154_v19 }
 0x76c   :  { %7262 = vset.pattern.permute.xlu1 %v16496_v49 }
 0x76d   :  { %4229 = vperm.xlu0 %7322, %v11373_v34   ;;  %4201 = vperm.xlu1 %7262, %v11059_v45  }
 0x76e   :  { %v12159_v9 = vpop.permute.xlu0 %3753 }
 0x76f   :  { %16544 = vst [vmem:[#allocation226_spill] sm:$0xff] %v12159_v9 }
 0x771   :  { %v12161_v42 = vpop.permute.xlu2 %3873 }
 0x772   :  { %16545 = vst [vmem:[#allocation47_spill] sm:$0xff] %v12161_v42  ;;  %v7204_v42 = vld [vmem:[%s15067_s1 + $0xc0] sm:$0xff] }
 0x773   :  { %7255 = vset.pattern.permute.xlu2 %v16496_v49  ;;  %v12168_v28 = vpop.permute.xlu1 %4361  ;;  %7218 = vmatpush.bf16.msra.mxu3 %v7204_v42 }
 0x774   :  { %4193 = vperm.xlu2 %7255, %v11032_v48   ;;  %16546 = vst [vmem:[#allocation62_spill] sm:$0xff] %v12168_v28  ;;  %5356 = vmatpush.bf16.msrb.mxu1 %v7204_v42 }
 0x775   :  { %4257 = vperm.xlu0 %7322, %v11546_v35   ;;  %7265 = vset.pattern.permute.xlu1 %v16516_v60  ;;  %v4764_v35 = vmul.f32 %v12056_v44, %v16549_v29  ;;  %v16559_v29 = vld [vmem:[#allocation32_spill] sm:$0xff] }
 0x776   :  { %v12172_v22 = vpop.permute.xlu0 %3773  ;;  %4581 = vperm.xlu1 %7265, %v16458_v37  }
 0x777   :  { %16547 = vst [vmem:[#allocation103_spill] sm:$0xff] %v12172_v22  ;;  %v16551_v22 = vld [vmem:[#allocation20_spill] sm:$0xff] }
 0x778   :  { %v4716_v6 = vmul.f32 %v11849_v21, %v16551_v22  ;;  %v16558_v22 = vld [vmem:[#allocation11_spill] sm:$0xff] }
 0x779   :  { %v12175_v9 = vpop.permute.xlu2 %4165  ;;  %v4861_v23 = vmul.f32 %v12061_v3, %v16558_v22  ;;  %v16579_v3 = vld [vmem:[#allocation12_spill] sm:$0xff] }
 0x77a   :  { %16548 = vst [vmem:[#allocation56_spill] sm:$0xff] %v12175_v9  ;;  %v4956_v21 = vmul.f32 %v12175_v9, %v16557_v8  ;;  %v16562_v9 = vld [vmem:[#allocation33_spill] sm:$0xff] }
 0x77c   :  { %7257 = vset.pattern.permute.xlu2 %v16502_v5  ;;  %v12184_v1 = vpop.permute.xlu1 %3981 }
 0x77d   :  { %4385 = vperm.xlu2 %7257, %v11032_v48   ;;  %16550 = vst [vmem:[#allocation48_spill] sm:$0xff] %v12184_v1  ;;  %4265 = vperm.xlu0 %7322, %v11592_v0   ;;  %v16554_v48 = vld [vmem:[#allocation21_spill] sm:$0xff]  ;;  %v4812_v0 = vadd.f32 %v4764_v35, %v4716_v6 }
 0x77e   :  { %v12191_v46 = vpop.permute.xlu0 %3785  ;;  %7267 = vset.pattern.permute.xlu1 %v16491_v43  ;;  %v4717_v24 = vmul.f32 %v11826_v13, %v16554_v48  ;;  %v16560_v13 = vld [vmem:[#allocation19_spill] sm:$0xff] }
 0x77f   :  { %16553 = vst [vmem:[#allocation65_spill] sm:$0xff] %v12191_v46  ;;  %v4765_v44 = vmul.f32 %v12191_v46, %v16555_v17  ;;  %4013 = vperm.xlu1 %7267, %v11184_v7   ;;  %v4908_v11 = vadd.f32 %v4860_v30, %v4812_v0  ;;  %v4957_v48 = vmul.f32 %v12154_v19, %v16560_v13 }
 0x781   :  { %v12199_v42 = vpop.permute.xlu2 %4357  ;;  %v4813_v18 = vadd.f32 %v4765_v44, %v4717_v24  ;;  %v5004_v17 = vadd.f32 %v4956_v21, %v4908_v11  ;;  %v5053_v24 = vmul.f32 %v12168_v28, %v16562_v9 }
 0x782   :  { %16556 = vst [vmem:[#allocation53_spill] sm:$0xff] %v12199_v42  ;;  %v5052_v41 = vmul.f32 %v12199_v42, %v16559_v29 }
 0x783   :  { %v4909_v46 = vadd.f32 %v4861_v23, %v4813_v18  ;;  %v16565_v18 = vld [vmem:[#allocation43_spill] sm:$0xff] }
 0x784   :  { %v5100_v0 = vadd.f32 %v5052_v41, %v5004_v17  ;;  %v5148_v11 = vmul.f32 %v12104_v47, %v16565_v18 }
 0x785   :  { %7259 = vset.pattern.permute.xlu2 %v16491_v43  ;;  %v5005_v6 = vadd.f32 %v4957_v48, %v4909_v46  ;;  %4273 = vperm.xlu0 %7322, %v11859_v56   ;;  %v12212_v35 = vpop.permute.xlu1 %4173  ;;  %v16566_v46 = vld [vmem:[#allocation44_spill] sm:$0xff] }
 0x786   :  { %4005 = vperm.xlu2 %7259, %v16458_v37   ;;  %16561 = vst [vmem:[#allocation87_spill] sm:$0xff] %v12212_v35  ;;  %v12216_v30 = vpop.permute.xlu0 %3797  ;;  %v5196_v42 = vadd.f32 %v5148_v11, %v5100_v0  ;;  %v16572_v11 = vld [vmem:[#allocation13_spill] sm:$0xff] }
 0x787   :  { %16563 = vst [vmem:[#allocation70_spill] sm:$0xff] %v12216_v30  ;;  %7269 = vset.pattern.permute.xlu1 %v16496_v49  ;;  %v5101_v21 = vadd.f32 %v5053_v24, %v5005_v6  ;;  %v16570_v24 = vld [vmem:[#allocation5_spill] sm:$0xff] }
 0x788   :  { %4209 = vperm.xlu1 %7269, %v10907_v12  }
 0x789   :  { %v12219_v44 = vpop.permute.xlu2 %4553 }
 0x78a   :  { %16564 = vst [vmem:[#allocation52_spill] sm:$0xff] %v12219_v44  ;;  %v5149_v23 = vmul.f32 %v12219_v44, %v16566_v46  ;;  %v4767_v44 = vmul.f32 %v12067_v25, %v16570_v24 }
 0x78c   :  { %v5197_v48 = vadd.f32 %v5149_v23, %v5101_v21 }
 0x78d   :  { %4281 = vperm.xlu0 %7322, %v11687_v53   ;;  %v16580_v53 = vld [vmem:[#allocation22_spill] sm:$0xff] }
 0x78e   :  { %7261 = vset.pattern.permute.xlu2 %v16496_v49  ;;  %v5240_v28 = vpack.c.bf16 %v5197_v48, %v5196_v42  ;;  %v12229_v17 = vpop.permute.xlu0 %3809  ;;  %v12231_v41 = vpop.permute.xlu1 %4369  ;;  %v16571_v42 = vld [vmem:[#allocation27_spill] sm:$0xff] }
 0x78f   :  { %4197 = vperm.xlu2 %7261, %v16458_v37   ;;  %16567 = vst [vmem:[#allocation55_spill] sm:$0xff] %v12229_v17  ;;  %v4719_v0 = vmul.f32 %v11871_v40, %v16571_v42  ;;  %v16577_v40 = vld [vmem:[#allocation24_spill] sm:$0xff] }
 0x790   :  { %16568 = vst [vmem:[#allocation69_spill] sm:$0xff] %v12231_v41  ;;  %7061 = vmatmul.msk.bf16.vlgmr.msra.gmra.mxu3 %vm756_vm1, %v5240_v28  ;;  %7271 = vset.pattern.permute.xlu1 %v16502_v5  ;;  %v16573_v28 = vld [vmem:[#allocation4_spill] sm:$0xff] }
 0x791   :  { %v12234_v6 = vpop.permute.xlu2 %3985  ;;  %4401 = vperm.xlu1 %7271, %v10907_v12   ;;  %v4815_v21 = vadd.f32 %v4767_v44, %v4719_v0  ;;  %v4766_v23 = vmul.f32 %v12087_v62, %v16573_v28  ;;  %v16578_v44 = vld [vmem:[#allocation23_spill] sm:$0xff] }
 0x792   :  { %16569 = vst [vmem:[#allocation76_spill] sm:$0xff] %v12234_v6  ;;  %v4863_v37 = vmul.f32 %v12234_v6, %v16572_v11  ;;  %v4718_v6 = vmul.f32 %v11863_v15, %v16577_v40  ;;  %v4959_v0 = vmul.f32 %v12029_v20, %v16578_v44  ;;  %v16581_v11 = vld [vmem:[#allocation37_spill] sm:$0xff]  ;;  %v16582_v15 = vld [vmem:[#allocation36_spill] sm:$0xff] }
 0x793   :  { %v5055_v42 = vmul.f32 %v12231_v41, %v16581_v11  ;;  %v16587_v41 = vld [vmem:[#allocation50_spill] sm:$0xff] }
 0x794   :  { %v4911_v25 = vadd.f32 %v4863_v37, %v4815_v21  ;;  %v4814_v62 = vadd.f32 %v4766_v23, %v4718_v6  ;;  %v4958_v37 = vmul.f32 %v12212_v35, %v16580_v53  ;;  %v16584_v23 = vld [vmem:[#allocation51_spill] sm:$0xff] }
 0x795   :  { %4289 = vperm.xlu0 %7322, %v11724_v52   ;;  %v4862_v52 = vmul.f32 %v12184_v1, %v16579_v3 }
 0x796   :  { %v12248_v48 = vpop.permute.xlu0 %3821  ;;  %v5007_v21 = vadd.f32 %v4959_v0, %v4911_v25 }
 0x797   :  { %7264 = vset.pattern.permute.xlu2 %v16502_v5  ;;  %16574 = vst [vmem:[#allocation111_spill] sm:$0xff] %v12248_v48  ;;  %v12251_v47 = vpop.permute.xlu1 %4561  ;;  %v4910_v56 = vadd.f32 %v4862_v52, %v4814_v62 }
 0x798   :  { %4393 = vperm.xlu2 %7264, %v11059_v45   ;;  %16575 = vst [vmem:[#allocation130_spill] sm:$0xff] %v12251_v47  ;;  %v5103_v6 = vadd.f32 %v5055_v42, %v5007_v21  ;;  %v5151_v25 = vmul.f32 %v12251_v47, %v16584_v23 }
 0x799   :  { %v12253_v19 = vpop.permute.xlu2 %4365  ;;  %7273 = vset.pattern.permute.xlu1 %v16491_v43  ;;  %v5006_v20 = vadd.f32 %v4958_v37, %v4910_v56 }
 0x79a   :  { %16576 = vst [vmem:[#allocation46_spill] sm:$0xff] %v12253_v19  ;;  %4021 = vperm.xlu1 %7273, %v11181_v32   ;;  %v5054_v40 = vmul.f32 %v12253_v19, %v16582_v15  ;;  %v5199_v37 = vadd.f32 %v5151_v25, %v5103_v6  ;;  %v16593_v25 = vld [vmem:[#allocation31_spill] sm:$0xff] }
 0x79c   :  { %v5102_v62 = vadd.f32 %v5054_v40, %v5006_v20  ;;  %v16591_v20 = vld [vmem:[#allocation7_spill] sm:$0xff] }
 0x79d   :  { %7343 = vset.pattern.permute.xlu0 %v16502_v5 }
 0x79e   :  { %v12270_v1 = vpop.permute.xlu0 %3833  ;;  %4417 = vperm.xlu0 %7343, %v11555_v57  }
 0x79f   :  { %16583 = vst [vmem:[#allocation73_spill] sm:$0xff] %v12270_v1 }
 0x7a0   :  { %7266 = vset.pattern.permute.xlu2 %v16516_v60  ;;  %v12279_v0 = vpop.permute.xlu1 %4181 }
 0x7a1   :  { %4585 = vperm.xlu2 %7266, %v11059_v45   ;;  %v12277_v52 = vpop.permute.xlu2 %4557  ;;  %16586 = vst [vmem:[#allocation82_spill] sm:$0xff] %v12279_v0 }
 0x7a2   :  { %16585 = vst [vmem:[#allocation57_spill] sm:$0xff] %v12277_v52  ;;  %v5150_v56 = vmul.f32 %v12277_v52, %v16587_v41  ;;  %7275 = vset.pattern.permute.xlu1 %v16496_v49  ;;  %v16596_v52 = vld [vmem:[#allocation28_spill] sm:$0xff] }
 0x7a3   :  { %4213 = vperm.xlu1 %7275, %v11181_v32   ;;  %v4720_v35 = vmul.f32 %v11874_v14, %v16596_v52 }
 0x7a4   :  { %v5198_v19 = vadd.f32 %v5150_v56, %v5102_v62  ;;  %v4721_v62 = vmul.f32 %v11886_v61, %v16593_v25  ;;  %v16594_v56 = vld [vmem:[#allocation6_spill] sm:$0xff] }
 0x7a6   :  { %v5241_v42 = vpack.c.bf16 %v5199_v37, %v5198_v19  ;;  %v12285_v21 = vpop.permute.xlu0 %3845  ;;  %4429 = vperm.xlu0 %7343, %v11579_v16   ;;  %v4769_v19 = vmul.f32 %v12097_v31, %v16591_v20  ;;  %v4768_v37 = vmul.f32 %v12216_v30, %v16594_v56 }
 0x7a7   :  { %16588 = vst [vmem:[#allocation79_spill] sm:$0xff] %v12285_v21 }
 0x7a8   :  { %7062 = vmatmul.msk.bf16.gmra.mxu3 %vm756_vm1, %v5241_v42  ;;  %v16595_v42 = vld [vmem:[#allocation15_spill] sm:$0xff]  ;;  %v4817_v21 = vadd.f32 %v4769_v19, %v4721_v62  ;;  %v4816_v25 = vadd.f32 %v4768_v37, %v4720_v35 }
 0x7a9   :  { %7268 = vset.pattern.permute.xlu2 %v16496_v49  ;;  %v12293_v40 = vpop.permute.xlu1 %4373  ;;  %v16603_v62 = vld [vmem:[#allocation39_spill] sm:$0xff] }
 0x7aa   :  { %4205 = vperm.xlu2 %7268, %v11184_v7   ;;  %v12291_v45 = vpop.permute.xlu2 %3993  ;;  %16590 = vst [vmem:[#allocation121_spill] sm:$0xff] %v12293_v40 }
 0x7ab   :  { %16589 = vst [vmem:[#allocation190_spill] sm:$0xff] %v12291_v45  ;;  %7277 = vset.pattern.permute.xlu1 %v16502_v5  ;;  %v4865_v47 = vmul.f32 %v12291_v45, %v16595_v42  ;;  %v16600_v45 = vld [vmem:[#allocation14_spill] sm:$0xff]  ;;  %v16601_v42 = vld [vmem:[#allocation25_spill] sm:$0xff] }
 0x7ac   :  { %4409 = vperm.xlu1 %7277, %v16519_v38   ;;  %v4864_v56 = vmul.f32 %v12072_v33, %v16600_v45  ;;  %v4960_v14 = vmul.f32 %v12279_v0, %v16601_v42  ;;  %v16606_v0 = vld [vmem:[#allocation59_spill] sm:$0xff] }
 0x7ad   :  { %v4913_v30 = vadd.f32 %v4865_v47, %v4817_v21  ;;  %v16604_v47 = vld [vmem:[#allocation38_spill] sm:$0xff] }
 0x7ae   :  { %v12299_v6 = vpop.permute.xlu0 %3857  ;;  %4325 = vperm.xlu0 %7343, %v16444_v27   ;;  %v4912_v35 = vadd.f32 %v4864_v56, %v4816_v25  ;;  %v5056_v21 = vmul.f32 %v12293_v40, %v16604_v47 }
 0x7af   :  { %16592 = vst [vmem:[#allocation64_spill] sm:$0xff] %v12299_v6  ;;  %v16599_v6 = vld [vmem:[#allocation26_spill] sm:$0xff] }
 0x7b0   :  { %v5008_v37 = vadd.f32 %v4960_v14, %v4912_v35 }
 0x7b2   :  { %7270 = vset.pattern.permute.xlu2 %v16502_v5  ;;  %v12314_v27 = vpop.permute.xlu1 %4569 }
 0x7b3   :  { %4397 = vperm.xlu2 %7270, %v11184_v7   ;;  %v12312_v31 = vpop.permute.xlu2 %4185  ;;  %16598 = vst [vmem:[#allocation209_spill] sm:$0xff] %v12314_v27  ;;  %v5153_v33 = vmul.f32 %v12314_v27, %v16606_v0  ;;  %v16618_v27 = vld [vmem:[#allocation9_spill] sm:$0xff] }
 0x7b4   :  { %16597 = vst [vmem:[#allocation153_spill] sm:$0xff] %v12312_v31  ;;  %v4961_v61 = vmul.f32 %v12312_v31, %v16599_v6  ;;  %7279 = vset.pattern.permute.xlu1 %v16516_v60  ;;  %v5057_v31 = vmul.f32 %v12039_v51, %v16603_v62 }
 0x7b5   :  { %4601 = vperm.xlu1 %7279, %v16519_v38  }
 0x7b6   :  { %v5009_v19 = vadd.f32 %v4961_v61, %v4913_v30  ;;  %v12324_v7 = vpop.permute.xlu0 %3869  ;;  %4493 = vperm.xlu0 %7343, %v11784_v59   ;;  %v5104_v30 = vadd.f32 %v5056_v21, %v5008_v37  ;;  %v16614_v37 = vld [vmem:[#allocation34_spill] sm:$0xff] }
 0x7b7   :  { %16602 = vst [vmem:[#allocation61_spill] sm:$0xff] %v12324_v7  ;;  %v16608_v7 = vld [vmem:[#allocation58_spill] sm:$0xff] }
 0x7b8   :  { %v5105_v6 = vadd.f32 %v5057_v31, %v5009_v19 }
 0x7ba   :  { %v5201_v14 = vadd.f32 %v5153_v33, %v5105_v6  ;;  %v16613_v6 = vld [vmem:[#allocation8_spill] sm:$0xff] }
 0x7bb   :  { %7272 = vset.pattern.permute.xlu2 %v16516_v60  ;;  %v12337_v59 = vpop.permute.xlu1 %4001  ;;  %v4770_v21 = vmul.f32 %v12078_v26, %v16613_v6 }
 0x7bc   :  { %4593 = vperm.xlu2 %7272, %v10907_v12   ;;  %v12333_v61 = vpop.permute.xlu2 %4565  ;;  %16607 = vst [vmem:[#allocation93_spill] sm:$0xff] %v12337_v59 }
 0x7bd   :  { %16605 = vst [vmem:[#allocation189_spill] sm:$0xff] %v12333_v61  ;;  %v5152_v25 = vmul.f32 %v12333_v61, %v16608_v7  ;;  %7282 = vset.pattern.permute.xlu1 %v16496_v49  ;;  %v4771_v61 = vmul.f32 %v12229_v17, %v16618_v27  ;;  %v16623_v17 = vld [vmem:[#allocation30_spill] sm:$0xff] }
 0x7be   :  { %v12342_v31 = vpop.permute.xlu0 %3877  ;;  %7365 = vset.pattern.permute.xlu0 %v16491_v43  ;;  %4221 = vperm.xlu1 %7282, %v11325_v36  }
 0x7bf   :  { %v5200_v56 = vadd.f32 %v5152_v25, %v5104_v30  ;;  %16609 = vst [vmem:[#allocation196_spill] sm:$0xff] %v12342_v31  ;;  %4057 = vperm.xlu0 %7365, %v11751_v2   ;;  %v16615_v30 = vld [vmem:[#allocation16_spill] sm:$0xff] }
 0x7c1   :  { %v5242_v12 = vpack.c.bf16 %v5201_v14, %v5200_v56 }
 0x7c3   :  { %7063 = vmatmul.msk.bf16.gmra.mxu3 %vm756_vm1, %v5242_v12 }
 0x7c4   :  { %7274 = vset.pattern.permute.xlu2 %v16491_v43  ;;  %v12352_v35 = vpop.permute.xlu1 %4381 }
 0x7c5   :  { %4025 = vperm.xlu2 %7274, %v16519_v38   ;;  %v12350_v19 = vpop.permute.xlu2 %3997  ;;  %16611 = vst [vmem:[#allocation71_spill] sm:$0xff] %v12352_v35  ;;  %v4722_v38 = vmul.f32 %v11927_v10, %v16614_v37  ;;  %v16620_v10 = vld [vmem:[#allocation35_spill] sm:$0xff]  ;;  %v16625_v37 = vld [vmem:[#allocation40_spill] sm:$0xff] }
 0x7c6   :  { %16610 = vst [vmem:[#allocation166_spill] sm:$0xff] %v12350_v19  ;;  %v12354_v33 = vpop.permute.xlu0 %3885  ;;  %7284 = vset.pattern.permute.xlu1 %v16502_v5  ;;  %v4866_v25 = vmul.f32 %v12350_v19, %v16615_v30  ;;  %v4723_v26 = vmul.f32 %v11890_v63, %v16620_v10  ;;  %v16621_v19 = vld [vmem:[#allocation17_spill] sm:$0xff] }
 0x7c7   :  { %16612 = vst [vmem:[#allocation75_spill] sm:$0xff] %v12354_v33  ;;  %4105 = vperm.xlu0 %7365, %v11896_v54   ;;  %4413 = vperm.xlu1 %7284, %v11325_v36   ;;  %v4818_v12 = vadd.f32 %v4770_v21, %v4722_v38  ;;  %v4867_v40 = vmul.f32 %v12337_v59, %v16621_v19  ;;  %v16622_v21 = vld [vmem:[#allocation29_spill] sm:$0xff] }
 0x7c8   :  { %v4819_v54 = vadd.f32 %v4771_v61, %v4723_v26 }
 0x7c9   :  { %v4914_v33 = vadd.f32 %v4866_v25, %v4818_v12  ;;  %v5058_v25 = vmul.f32 %v12352_v35, %v16625_v37  ;;  %v16626_v12 = vld [vmem:[#allocation66_spill] sm:$0xff] }
 0x7ca   :  { %v4915_v30 = vadd.f32 %v4867_v40, %v4819_v54  ;;  %v16629_v54 = vld [vmem:[#allocation67_spill] sm:$0xff] }
 0x7cb   :  { %v5155_v40 = vmul.f32 %v12114_v58, %v16629_v54  ;;  %v16641_v58 = vld [vmem:[#allocation162_spill] sm:$0xff] }
 0x7cd   :  { %7276 = vset.pattern.permute.xlu2 %v16502_v5  ;;  %v12369_v14 = vpop.permute.xlu1 %4573 }
 0x7ce   :  { %4405 = vperm.xlu2 %7276, %v11181_v32   ;;  %v12367_v56 = vpop.permute.xlu2 %4193  ;;  %16617 = vst [vmem:[#allocation174_spill] sm:$0xff] %v12369_v14  ;;  %v5154_v26 = vmul.f32 %v12369_v14, %v16626_v12 }
 0x7cf   :  { %16616 = vst [vmem:[#allocation177_spill] sm:$0xff] %v12367_v56  ;;  %v12373_v51 = vpop.permute.xlu0 %4189  ;;  %3949 = vperm.xlu0 %7365, %v11021_v39   ;;  %7286 = vset.pattern.permute.xlu1 %v16516_v60  ;;  %v4963_v31 = vmul.f32 %v12367_v56, %v16623_v17 }
 0x7d0   :  { %16619 = vst [vmem:[#allocation180_spill] sm:$0xff] %v12373_v51  ;;  %4609 = vperm.xlu1 %7286, %v11555_v57   ;;  %v4962_v38 = vmul.f32 %v12373_v51, %v16622_v21  ;;  %v16628_v51 = vld [vmem:[#allocation41_spill] sm:$0xff] }
 0x7d1   :  { %v5011_v61 = vadd.f32 %v4963_v31, %v4915_v30 }
 0x7d2   :  { %v5010_v39 = vadd.f32 %v4962_v38, %v4914_v33 }
 0x7d6   :  { %7278 = vset.pattern.permute.xlu2 %v16516_v60  ;;  %v12394_v59 = vpop.permute.xlu1 %4009 }
 0x7d7   :  { %4597 = vperm.xlu2 %7278, %v11181_v32   ;;  %v12388_v63 = vpop.permute.xlu2 %4385  ;;  %16627 = vst [vmem:[#allocation183_spill] sm:$0xff] %v12394_v59  ;;  %4117 = vperm.xlu0 %7365, %v11910_v4   ;;  %v5106_v32 = vadd.f32 %v5058_v25, %v5010_v39  ;;  %v16636_v25 = vld [vmem:[#allocation204_spill] sm:$0xff] }
 0x7d8   :  { %16624 = vst [vmem:[#allocation186_spill] sm:$0xff] %v12388_v63  ;;  %v5059_v56 = vmul.f32 %v12388_v63, %v16628_v51  ;;  %7288 = vset.pattern.permute.xlu1 %v16491_v43 }
 0x7d9   :  { %4041 = vperm.xlu1 %7288, %v11388_v55   ;;  %v5202_v38 = vadd.f32 %v5154_v26, %v5106_v32 }
 0x7da   :  { %v5107_v33 = vadd.f32 %v5059_v56, %v5011_v61  ;;  %v16637_v61 = vld [vmem:[#allocation20_spill] sm:$0xff] }
 0x7dc   :  { %v5203_v35 = vadd.f32 %v5155_v40, %v5107_v33  ;;  %v16638_v40 = vld [vmem:[#allocation125_spill] sm:$0xff]  ;;  %v16639_v33 = vld [vmem:[#allocation10_spill] sm:$0xff] }
 0x7dd   :  { %v4724_v32 = vmul.f32 %v16638_v40, %v16637_v61  ;;  %v16645_v40 = vld [vmem:[#allocation21_spill] sm:$0xff] }
 0x7de   :  { %v5243_v14 = vpack.c.bf16 %v5203_v35, %v5202_v38  ;;  %v16633_v35 = vld [vmem:[#allocation222_spill] sm:$0xff]  ;;  %v16646_v61 = vld [vmem:[#allocation145_spill] sm:$0xff] }
 0x7df   :  { %7281 = vset.pattern.permute.xlu2 %v16491_v43  ;;  %7372 = vset.pattern.permute.xlu0 %v16516_v60  ;;  %v12409_v30 = vpop.permute.xlu1 %4201 }
 0x7e0   :  { %4033 = vperm.xlu2 %7281, %v11555_v57   ;;  %7064 = vmatmul.msk.bf16.gmra.mxu3 %vm756_vm1, %v5243_v14  ;;  %v12406_v31 = vpop.permute.xlu2 %4005  ;;  %16631 = vst [vmem:[#allocation63_spill] sm:$0xff] %v12409_v30  ;;  %v16635_v14 = vld [vmem:[#allocation2_spill] sm:$0xff] }
 0x7e1   :  { %16630 = vst [vmem:[#allocation193_spill] sm:$0xff] %v12406_v31  ;;  %4521 = vperm.xlu0 %7372, %v16499_v50   ;;  %7290 = vset.pattern.permute.xlu1 %v16502_v5  ;;  %v4772_v26 = vmul.f32 %v16636_v25, %v16635_v14  ;;  %v4868_v38 = vmul.f32 %v12406_v31, %v16639_v33 }
 0x7e2   :  { %4421 = vperm.xlu1 %7290, %v11373_v34   ;;  %v4725_v31 = vmul.f32 %v16646_v61, %v16645_v40  ;;  %v4869_v33 = vmul.f32 %v12394_v59, %v16558_v22  ;;  %v16649_v59 = vmov 1  }
 0x7e3   :  { %v4820_v4 = vadd.f32 %v4772_v26, %v4724_v32  ;;  %v4965_v32 = vmul.f32 %v12409_v30, %v16560_v13 }
 0x7e5   :  { %v4916_v12 = vadd.f32 %v4868_v38, %v4820_v4  ;;  %v16650_v4 = vld [vmem:[#allocation99_spill] sm:$0xff]  ;;  %v16654_v38 = vld [vmem:[#allocation110_spill] sm:$0xff] }
 0x7e8   :  { %7283 = vset.pattern.permute.xlu2 %v16496_v49  ;;  %v12419_v56 = vpop.permute.xlu1 %4581 }
 0x7e9   :  { %4225 = vperm.xlu2 %7283, %v11555_v57   ;;  %v12416_v39 = vpop.permute.xlu2 %4197  ;;  %4689 = vperm.xlu0 %7372, %v16633_v35   ;;  %16634 = vst [vmem:[#allocation176_spill] sm:$0xff] %v12419_v56  ;;  %v16640_v57 = vld [vmem:[#allocation3_spill] sm:$0xff]  ;;  %v16642_v35 = vld [vmem:[#allocation112_spill] sm:$0xff] }
 0x7ea   :  { %16632 = vst [vmem:[#allocation60_spill] sm:$0xff] %v12416_v39  ;;  %7292 = vset.pattern.permute.xlu1 %v16516_v60  ;;  %v4773_v63 = vmul.f32 %v16641_v58, %v16640_v57  ;;  %v4964_v50 = vmul.f32 %v12416_v39, %v16557_v8  ;;  %v16647_v58 = vld [vmem:[#allocation118_spill] sm:$0xff] }
 0x7eb   :  { %4613 = vperm.xlu1 %7292, %v11373_v34  }
 0x7ec   :  { %v4821_v26 = vadd.f32 %v4773_v63, %v4725_v31  ;;  %v5012_v39 = vadd.f32 %v4964_v50, %v4916_v12  ;;  %v5156_v63 = vmul.f32 %v12419_v56, %v16565_v18 }
 0x7ee   :  { %v4917_v8 = vadd.f32 %v4869_v33, %v4821_v26  ;;  %v12466_v33 = vpop.permute.xlu0 %4217  ;;  %v16658_v26 = vld [vmem:[#allocation194_spill] sm:$0xff] }
 0x7ef   :  { %16653 = vst [vmem:[#allocation199_spill] sm:$0xff] %v12466_v33 }
 0x7f0   :  { %v5013_v40 = vadd.f32 %v4965_v32, %v4917_v8  ;;  %v4775_v32 = vmul.f32 %v16658_v26, %v16570_v24 }
 0x7f1   :  { %7285 = vset.pattern.permute.xlu2 %v16516_v60  ;;  %4533 = vperm.xlu0 %7372, %v16642_v35   ;;  %v12438_v14 = vpop.permute.xlu1 %4013 }
 0x7f2   :  { %4605 = vperm.xlu2 %7285, %v11325_v36   ;;  %v12436_v25 = vpop.permute.xlu2 %4393  ;;  %16644 = vst [vmem:[#allocation68_spill] sm:$0xff] %v12438_v14  ;;  %v16648_v36 = vld [vmem:[#allocation158_spill] sm:$0xff] }
 0x7f3   :  { %16643 = vst [vmem:[#allocation210_spill] sm:$0xff] %v12436_v25  ;;  %7294 = vset.pattern.permute.xlu1 %v16491_v43  ;;  %v5060_v35 = vmul.f32 %v16648_v36, %v16559_v29  ;;  %v5061_v61 = vmul.f32 %v12436_v25, %v16562_v9  ;;  %v4870_v25 = vmul.f32 %v12438_v14, %v16579_v3 }
 0x7f4   :  { %4049 = vperm.xlu1 %7294, %v16647_v58  }
 0x7f5   :  { %v5108_v57 = vadd.f32 %v5060_v35, %v5012_v39  ;;  %v5109_v12 = vadd.f32 %v5061_v61, %v5013_v40 }
 0x7f7   :  { %v5204_v35 = vadd.f32 %v5156_v63, %v5108_v57  ;;  %v12478_v57 = vpop.permute.xlu0 %4229  ;;  %v4774_v63 = vmul.f32 %v12248_v48, %v16573_v28 }
 0x7f8   :  { %16657 = vst [vmem:[#allocation202_spill] sm:$0xff] %v12478_v57 }
 0x7f9   :  { %7377 = vset.pattern.permute.xlu0 %v16649_v59 }
 0x7fa   :  { %7287 = vset.pattern.permute.xlu2 %v16491_v43  ;;  %3893 = vperm.xlu0 %7377, %v16650_v4   ;;  %v12460_v31 = vpop.permute.xlu1 %4209 }
 0x7fb   :  { %4037 = vperm.xlu2 %7287, %v11373_v34   ;;  %v12456_v50 = vpop.permute.xlu2 %4585  ;;  %16652 = vst [vmem:[#allocation105_spill] sm:$0xff] %v12460_v31  ;;  %v4967_v14 = vmul.f32 %v12460_v31, %v16578_v44 }
 0x7fc   :  { %16651 = vst [vmem:[#allocation72_spill] sm:$0xff] %v12456_v50  ;;  %v5157_v8 = vmul.f32 %v12456_v50, %v16566_v46  ;;  %7296 = vset.pattern.permute.xlu1 %v16496_v49  ;;  %v16663_v50 = vld [vmem:[#allocation119_spill] sm:$0xff] }
 0x7fd   :  { %4241 = vperm.xlu1 %7296, %v16647_v58  }
 0x7fe   :  { %v5205_v39 = vadd.f32 %v5157_v8, %v5109_v12  ;;  %v16659_v12 = vld [vmem:[#allocation102_spill] sm:$0xff]  ;;  %v16660_v8 = vld [vmem:[#allocation27_spill] sm:$0xff] }
 0x800   :  { %v5244_v34 = vpack.c.bf16 %v5205_v39, %v5204_v35  ;;  %v16661_v39 = vld [vmem:[#allocation220_spill] sm:$0xff] }
 0x801   :  { %v4727_v35 = vmul.f32 %v16661_v39, %v16660_v8  ;;  %v16666_v39 = vld [vmem:[#allocation13_spill] sm:$0xff]  ;;  %v16668_v8 = vld [vmem:[#allocation126_spill] sm:$0xff] }
 0x802   :  { %7065 = vmatmul.msk.bf16.gmra.mxu3 %vm756_vm1, %v5244_v34  ;;  %3901 = vperm.xlu0 %7377, %v16654_v38   ;;  %v16662_v34 = vld [vmem:[#allocation24_spill] sm:$0xff]  ;;  %v16667_v38 = vld [vmem:[#allocation195_spill] sm:$0xff] }
 0x803   :  { %7289 = vset.pattern.permute.xlu2 %v16496_v49  ;;  %v12474_v40 = vpop.permute.xlu1 %4401  ;;  %v4726_v56 = vmul.f32 %v16663_v50, %v16662_v34  ;;  %v4823_v48 = vadd.f32 %v4775_v32, %v4727_v35  ;;  %v4871_v4 = vmul.f32 %v16667_v38, %v16666_v39  ;;  %v12510_v35 = vpop.permute.xlu0 %4257 }
 0x804   :  { %4233 = vperm.xlu2 %7289, %v11388_v55   ;;  %v12472_v61 = vpop.permute.xlu2 %4205  ;;  %16656 = vst [vmem:[#allocation147_spill] sm:$0xff] %v12474_v40 }
 0x805   :  { %16655 = vst [vmem:[#allocation179_spill] sm:$0xff] %v12472_v61  ;;  %7298 = vset.pattern.permute.xlu1 %v16516_v60  ;;  %v4822_v30 = vadd.f32 %v4774_v63, %v4726_v56  ;;  %v4919_v24 = vadd.f32 %v4871_v4, %v4823_v48  ;;  %v5063_v56 = vmul.f32 %v12474_v40, %v16581_v11  ;;  %v16669_v63 = vld [vmem:[#allocation187_spill] sm:$0xff] }
 0x806   :  { %4621 = vperm.xlu1 %7298, %v11579_v16   ;;  %16670 = vst [vmem:[#allocation185_spill] sm:$0xff] %v12510_v35  ;;  %v16690_v35 = vld [vmem:[#allocation221_spill] sm:$0xff] }
 0x807   :  { %v4918_v50 = vadd.f32 %v4870_v25, %v4822_v30  ;;  %v16672_v25 = vld [vmem:[#allocation227_spill] sm:$0xff] }
 0x80a   :  { %3909 = vperm.xlu0 %7377, %v16659_v12   ;;  %v4966_v12 = vmul.f32 %v12472_v61, %v16580_v53  ;;  %v5015_v61 = vadd.f32 %v4967_v14, %v4919_v24 }
 0x80c   :  { %7291 = vset.pattern.permute.xlu2 %v16502_v5  ;;  %v12495_v26 = vpop.permute.xlu1 %4021  ;;  %v5014_v32 = vadd.f32 %v4966_v12, %v4918_v50  ;;  %v5111_v48 = vadd.f32 %v5063_v56, %v5015_v61 }
 0x80d   :  { %4425 = vperm.xlu2 %7291, %v11388_v55   ;;  %v12493_v36 = vpop.permute.xlu2 %4397  ;;  %16665 = vst [vmem:[#allocation84_spill] sm:$0xff] %v12495_v26 }
 0x80e   :  { %16664 = vst [vmem:[#allocation91_spill] sm:$0xff] %v12493_v36  ;;  %7300 = vset.pattern.permute.xlu1 %v16491_v43  ;;  %v5062_v55 = vmul.f32 %v12493_v36, %v16582_v15  ;;  %v5158_v36 = vmul.f32 %v16672_v25, %v16587_v41 }
 0x80f   :  { %4053 = vperm.xlu1 %7300, %v16668_v8  }
 0x810   :  { %v5110_v38 = vadd.f32 %v5062_v55, %v5014_v32  ;;  %v16674_v55 = vld [vmem:[#allocation86_spill] sm:$0xff]  ;;  %v12527_v32 = vpop.permute.xlu0 %4265 }
 0x811   :  { %16675 = vst [vmem:[#allocation94_spill] sm:$0xff] %v12527_v32 }
 0x812   :  { %3937 = vperm.xlu0 %7377, %v16669_v63   ;;  %v5206_v24 = vadd.f32 %v5158_v36, %v5110_v38  ;;  %v4777_v36 = vmul.f32 %v12270_v1, %v16591_v20  ;;  %v16678_v38 = vld [vmem:[#allocation101_spill] sm:$0xff] }
 0x815   :  { %7293 = vset.pattern.permute.xlu2 %v16491_v43  ;;  %v12518_v4 = vpop.permute.xlu1 %4213 }
 0x816   :  { %4045 = vperm.xlu2 %7293, %v11579_v16   ;;  %v12514_v30 = vpop.permute.xlu2 %4593  ;;  %16673 = vst [vmem:[#allocation182_spill] sm:$0xff] %v12518_v4 }
 0x817   :  { %16671 = vst [vmem:[#allocation97_spill] sm:$0xff] %v12514_v30  ;;  %v5159_v50 = vmul.f32 %v12514_v30, %v16584_v23  ;;  %7302 = vset.pattern.permute.xlu1 %v16496_v49  ;;  %v16683_v30 = vld [vmem:[#allocation201_spill] sm:$0xff] }
 0x818   :  { %4249 = vperm.xlu1 %7302, %v11751_v2   ;;  %v12547_v31 = vpop.permute.xlu0 %4273 }
 0x819   :  { %v5207_v12 = vadd.f32 %v5159_v50, %v5111_v48  ;;  %v16679_v48 = vld [vmem:[#allocation31_spill] sm:$0xff]  ;;  %v16680_v50 = vld [vmem:[#allocation117_spill] sm:$0xff]  ;;  %16684 = vst [vmem:[#allocation100_spill] sm:$0xff] %v12547_v31 }
 0x81a   :  { %7381 = vset.pattern.permute.xlu0 %v16496_v49  ;;  %v16689_v31 = vld [vmem:[#allocation215_spill] sm:$0xff] }
 0x81b   :  { %v5245_v14 = vpack.c.bf16 %v5207_v12, %v5206_v24  ;;  %4145 = vperm.xlu0 %7381, %v16674_v55   ;;  %v4729_v12 = vmul.f32 %v16680_v50, %v16679_v48  ;;  %v16681_v24 = vld [vmem:[#allocation15_spill] sm:$0xff] }
 0x81d   :  { %7066 = vmatmul.msk.bf16.gmra.mxu3 %vm756_vm1, %v5245_v14  ;;  %v4825_v40 = vadd.f32 %v4777_v36, %v4729_v12  ;;  %v4968_v12 = vmul.f32 %v12518_v4, %v16601_v42 }
 0x81e   :  { %7295 = vset.pattern.permute.xlu2 %v16496_v49  ;;  %v12533_v56 = vpop.permute.xlu1 %4409 }
 0x81f   :  { %4237 = vperm.xlu2 %7295, %v11579_v16   ;;  %v12531_v61 = vpop.permute.xlu2 %4025  ;;  %16677 = vst [vmem:[#allocation77_spill] sm:$0xff] %v12533_v56  ;;  %v16682_v16 = vld [vmem:[#allocation6_spill] sm:$0xff] }
 0x820   :  { %16676 = vst [vmem:[#allocation171_spill] sm:$0xff] %v12531_v61  ;;  %7304 = vset.pattern.permute.xlu1 %v16502_v5  ;;  %v4873_v14 = vmul.f32 %v12531_v61, %v16681_v24  ;;  %v4776_v25 = vmul.f32 %v16683_v30, %v16682_v16  ;;  %v4872_v61 = vmul.f32 %v12495_v26, %v16600_v45  ;;  %v16688_v30 = vld [vmem:[#allocation26_spill] sm:$0xff] }
 0x821   :  { %4441 = vperm.xlu1 %7304, %v11751_v2   ;;  %v4969_v36 = vmul.f32 %v12466_v33, %v16688_v30 }
 0x822   :  { %v4921_v55 = vadd.f32 %v4873_v14, %v4825_v40  ;;  %v5065_v40 = vmul.f32 %v12533_v56, %v16603_v62  ;;  %v12575_v14 = vpop.permute.xlu0 %4281  ;;  %v16703_v56 = vld [vmem:[#allocation34_spill] sm:$0xff] }
 0x823   :  { %4313 = vperm.xlu0 %7381, %v16678_v38   ;;  %v16687_v38 = vld [vmem:[#allocation124_spill] sm:$0xff]  ;;  %16692 = vst [vmem:[#allocation80_spill] sm:$0xff] %v12575_v14 }
 0x824   :  { %v4728_v50 = vmul.f32 %v16687_v38, %v16596_v52  ;;  %v5017_v48 = vadd.f32 %v4969_v36, %v4921_v55 }
 0x826   :  { %v4824_v32 = vadd.f32 %v4776_v25, %v4728_v50 }
 0x827   :  { %7297 = vset.pattern.permute.xlu2 %v16502_v5  ;;  %v12552_v1 = vpop.permute.xlu1 %4601 }
 0x828   :  { %4433 = vperm.xlu2 %7297, %v16647_v58   ;;  %v12550_v63 = vpop.permute.xlu2 %4405  ;;  %16686 = vst [vmem:[#allocation74_spill] sm:$0xff] %v12552_v1  ;;  %v4920_v24 = vadd.f32 %v4872_v61, %v4824_v32  ;;  %v5161_v25 = vmul.f32 %v12552_v1, %v16606_v0  ;;  %v5113_v32 = vadd.f32 %v5065_v40, %v5017_v48  ;;  %v16694_v1 = vld [vmem:[#allocation115_spill] sm:$0xff] }
 0x829   :  { %16685 = vst [vmem:[#allocation188_spill] sm:$0xff] %v12550_v63  ;;  %7307 = vset.pattern.permute.xlu1 %v16491_v43  ;;  %v5064_v38 = vmul.f32 %v12550_v63, %v16604_v47  ;;  %v16698_v40 = vld [vmem:[#allocation107_spill] sm:$0xff]  ;;  %v16704_v63 = vld [vmem:[#allocation120_spill] sm:$0xff] }
 0x82a   :  { %4061 = vperm.xlu1 %7307, %v16690_v35   ;;  %v5016_v26 = vadd.f32 %v4968_v12, %v4920_v24  ;;  %v5209_v36 = vadd.f32 %v5161_v25, %v5113_v32  ;;  %v12592_v48 = vpop.permute.xlu0 %4289  ;;  %v16699_v25 = vld [vmem:[#allocation163_spill] sm:$0xff]  ;;  %v16700_v32 = vld [vmem:[#allocation170_spill] sm:$0xff]  ;;  %v4730_v33 = vmul.f32 %v16704_v63, %v16703_v56 }
 0x82b   :  { %4157 = vperm.xlu0 %7381, %v16689_v31   ;;  %16697 = vst [vmem:[#allocation123_spill] sm:$0xff] %v12592_v48  ;;  %v16709_v48 = vld [vmem:[#allocation198_spill] sm:$0xff] }
 0x82c   :  { %v5112_v55 = vadd.f32 %v5064_v38, %v5016_v26 }
 0x830   :  { %7299 = vset.pattern.permute.xlu2 %v16516_v60  ;;  %v12577_v61 = vpop.permute.xlu1 %4221 }
 0x831   :  { %4625 = vperm.xlu2 %7299, %v16647_v58   ;;  %v12573_v50 = vpop.permute.xlu2 %4597  ;;  %16693 = vst [vmem:[#allocation212_spill] sm:$0xff] %v12577_v61 }
 0x832   :  { %16691 = vst [vmem:[#allocation78_spill] sm:$0xff] %v12573_v50  ;;  %v5160_v24 = vmul.f32 %v12573_v50, %v16608_v7  ;;  %7309 = vset.pattern.permute.xlu1 %v16496_v49 }
 0x833   :  { %7387 = vset.pattern.permute.xlu0 %v16502_v5  ;;  %4253 = vperm.xlu1 %7309, %v16690_v35  }
 0x834   :  { %v5208_v12 = vadd.f32 %v5160_v24, %v5112_v55  ;;  %4353 = vperm.xlu0 %7387, %v16694_v1   ;;  %v4779_v55 = vmul.f32 %v16700_v32, %v16618_v27  ;;  %v16701_v24 = vld [vmem:[#allocation173_spill] sm:$0xff] }
 0x836   :  { %v5246_v58 = vpack.c.bf16 %v5209_v36, %v5208_v12  ;;  %v4731_v36 = vmul.f32 %v16701_v24, %v16620_v10  ;;  %v16702_v12 = vld [vmem:[#allocation224_spill] sm:$0xff] }
 0x838   :  { %7067 = vmatmul.msk.bf16.gmra.mxu3 %vm756_vm1, %v5246_v58  ;;  %v4778_v58 = vmul.f32 %v16702_v12, %v16613_v6  ;;  %v4827_v4 = vadd.f32 %v4779_v55, %v4731_v36  ;;  %v4970_v55 = vmul.f32 %v12577_v61, %v16622_v21  ;;  %v16712_v61 = vld [vmem:[#allocation66_spill] sm:$0xff] }
 0x839   :  { %7301 = vset.pattern.permute.xlu2 %v16496_v49  ;;  %v12590_v38 = vpop.permute.xlu1 %4413 }
 0x83a   :  { %4245 = vperm.xlu2 %7301, %v16668_v8   ;;  %v12588_v26 = vpop.permute.xlu2 %4033  ;;  %16696 = vst [vmem:[#allocation109_spill] sm:$0xff] %v12590_v38  ;;  %v4826_v1 = vadd.f32 %v4778_v58, %v4730_v33  ;;  %v5066_v33 = vmul.f32 %v12590_v38, %v16625_v37 }
 0x83b   :  { %16695 = vst [vmem:[#allocation88_spill] sm:$0xff] %v12588_v26  ;;  %7311 = vset.pattern.permute.xlu1 %v16502_v5  ;;  %v4875_v50 = vmul.f32 %v12588_v26, %v16621_v19  ;;  %v16708_v26 = vld [vmem:[#allocation16_spill] sm:$0xff] }
 0x83c   :  { %7391 = vset.pattern.permute.xlu0 %v16516_v60  ;;  %4449 = vperm.xlu1 %7311, %v16699_v25   ;;  %v4874_v14 = vmul.f32 %v16709_v48, %v16708_v26  ;;  %v16725_v48 = vld [vmem:[#allocation21_spill] sm:$0xff] }
 0x83d   :  { %4701 = vperm.xlu0 %7391, %v16698_v40   ;;  %v4923_v12 = vadd.f32 %v4875_v50, %v4827_v4  ;;  %v12616_v40 = vpop.permute.xlu0 %4417 }
 0x83e   :  { %16707 = vst [vmem:[#allocation213_spill] sm:$0xff] %v12616_v40  ;;  %v5067_v36 = vmul.f32 %v12616_v40, %v16628_v51  ;;  %v4922_v63 = vadd.f32 %v4874_v14, %v4826_v1 }
 0x840   :  { %v5018_v4 = vadd.f32 %v4970_v55, %v4922_v63  ;;  %v16713_v55 = vld [vmem:[#allocation228_spill] sm:$0xff] }
 0x842   :  { %7303 = vset.pattern.permute.xlu2 %v16502_v5  ;;  %v12612_v32 = vpop.permute.xlu1 %4609 }
 0x843   :  { %4437 = vperm.xlu2 %7303, %v16668_v8   ;;  %v12610_v31 = vpop.permute.xlu2 %4225  ;;  %16706 = vst [vmem:[#allocation83_spill] sm:$0xff] %v12612_v32 }
 0x844   :  { %16705 = vst [vmem:[#allocation140_spill] sm:$0xff] %v12610_v31  ;;  %v4971_v24 = vmul.f32 %v12610_v31, %v16623_v17  ;;  %7313 = vset.pattern.permute.xlu1 %v16516_v60  ;;  %v5114_v31 = vadd.f32 %v5066_v33, %v5018_v4  ;;  %v16717_v33 = vld [vmem:[#allocation79_spill] sm:$0xff] }
 0x845   :  { %4641 = vperm.xlu1 %7313, %v16699_v25  }
 0x846   :  { %v5019_v8 = vadd.f32 %v4971_v24, %v4923_v12  ;;  %v5163_v24 = vmul.f32 %v12612_v32, %v16629_v54  ;;  %v16723_v32 = vld [vmem:[#allocation3_spill] sm:$0xff] }
 0x848   :  { %v5115_v50 = vadd.f32 %v5067_v36, %v5019_v8 }
 0x84a   :  { %v5211_v63 = vadd.f32 %v5163_v24, %v5115_v50  ;;  %v16718_v50 = vld [vmem:[#allocation20_spill] sm:$0xff] }
 0x84b   :  { %7306 = vset.pattern.permute.xlu2 %v16516_v60  ;;  %v12634_v12 = vpop.permute.xlu1 %4041  ;;  %v16719_v24 = vld [vmem:[#allocation148_spill] sm:$0xff] }
 0x84c   :  { %4633 = vperm.xlu2 %7306, %v11751_v2   ;;  %v12630_v58 = vpop.permute.xlu2 %4605  ;;  %16711 = vst [vmem:[#allocation19_spill] sm:$0xff] %v12634_v12 }
 0x84d   :  { %16710 = vst [vmem:[#allocation218_spill] sm:$0xff] %v12630_v58  ;;  %v5162_v1 = vmul.f32 %v12630_v58, %v16712_v61  ;;  %7315 = vset.pattern.permute.xlu1 %v16491_v43  ;;  %v16724_v58 = vld [vmem:[#allocation200_spill] sm:$0xff]  ;;  %v16728_v61 = vld [vmem:[#allocation18_spill] sm:$0xff] }
 0x84e   :  { %4069 = vperm.xlu1 %7315, %v16713_v55   ;;  %v4781_v40 = vmul.f32 %v16724_v58, %v16723_v32  ;;  %v4972_v54 = vmul.f32 %v12478_v57, %v16728_v61  ;;  %v16744_v57 = vld [vmem:[#allocation27_spill] sm:$0xff] }
 0x84f   :  { %v5210_v14 = vadd.f32 %v5162_v1, %v5114_v31  ;;  %v16716_v31 = vld [vmem:[#allocation2_spill] sm:$0xff]  ;;  %v4732_v1 = vmul.f32 %v16719_v24, %v16718_v50  ;;  %v4877_v24 = vmul.f32 %v12634_v12, %v16558_v22 }
 0x850   :  { %v4780_v4 = vmul.f32 %v16717_v33, %v16716_v31  ;;  %v16726_v33 = vld [vmem:[#allocation122_spill] sm:$0xff] }
 0x851   :  { %v5247_v8 = vpack.c.bf16 %v5211_v63, %v5210_v14  ;;  %v16720_v14 = vld [vmem:[#allocation10_spill] sm:$0xff]  ;;  %v4733_v31 = vmul.f32 %v16726_v33, %v16725_v48 }
 0x852   :  { %v4828_v38 = vadd.f32 %v4780_v4, %v4732_v1 }
 0x853   :  { %7068 = vmatmul.msk.bf16.gmra.mxu3 %vm756_vm1, %v5247_v8 }
 0x854   :  { %7308 = vset.pattern.permute.xlu2 %v16491_v43  ;;  %v12645_v36 = vpop.permute.xlu1 %4421 }
 0x855   :  { %4065 = vperm.xlu2 %7308, %v16699_v25   ;;  %v12643_v2 = vpop.permute.xlu2 %4037  ;;  %16715 = vst [vmem:[#allocation126_spill] sm:$0xff] %v12645_v36 }
 0x856   :  { %16714 = vst [vmem:[#allocation118_spill] sm:$0xff] %v12643_v2  ;;  %7317 = vset.pattern.permute.xlu1 %v16496_v49  ;;  %v4876_v63 = vmul.f32 %v12643_v2, %v16720_v14  ;;  %v16727_v2 = vld [vmem:[#allocation92_spill] sm:$0xff]  ;;  %v4829_v14 = vadd.f32 %v4781_v40, %v4733_v31 }
 0x857   :  { %4261 = vperm.xlu1 %7317, %v16713_v55  }
 0x858   :  { %v4924_v50 = vadd.f32 %v4876_v63, %v4828_v38  ;;  %v4925_v58 = vadd.f32 %v4877_v24, %v4829_v14  ;;  %v5068_v38 = vmul.f32 %v12645_v36, %v16559_v29 }
 0x85a   :  { %v5020_v4 = vadd.f32 %v4972_v54, %v4924_v50  ;;  %v16731_v54 = vld [vmem:[#allocation230_spill] sm:$0xff] }
 0x85b   :  { %v5165_v50 = vmul.f32 %v16731_v54, %v16566_v46 }
 0x85c   :  { %v5116_v24 = vadd.f32 %v5068_v38, %v5020_v4 }
 0x85d   :  { %7310 = vset.pattern.permute.xlu2 %v16502_v5  ;;  %v12659_v8 = vpop.permute.xlu1 %4613 }
 0x85e   :  { %4445 = vperm.xlu2 %7310, %v16690_v35   ;;  %v12657_v25 = vpop.permute.xlu2 %4233  ;;  %16722 = vst [vmem:[#allocation163_spill] sm:$0xff] %v12659_v8  ;;  %v5164_v40 = vmul.f32 %v12659_v8, %v16565_v18 }
 0x85f   :  { %16721 = vst [vmem:[#allocation221_spill] sm:$0xff] %v12657_v25  ;;  %7319 = vset.pattern.permute.xlu1 %v16502_v5  ;;  %v4973_v51 = vmul.f32 %v12657_v25, %v16560_v13 }
 0x860   :  { %4457 = vperm.xlu1 %7319, %v16727_v2  }
 0x861   :  { %v5021_v31 = vadd.f32 %v4973_v51, %v4925_v58 }
 0x866   :  { %7312 = vset.pattern.permute.xlu2 %v16516_v60  ;;  %v12681_v63 = vpop.permute.xlu1 %4049 }
 0x867   :  { %4637 = vperm.xlu2 %7312, %v16690_v35   ;;  %v12675_v1 = vpop.permute.xlu2 %4425  ;;  %16730 = vst [vmem:[#allocation92_spill] sm:$0xff] %v12681_v63  ;;  %v5212_v35 = vadd.f32 %v5164_v40, %v5116_v24  ;;  %v12708_v40 = vpop.permute.xlu0 %4429 }
 0x868   :  { %16729 = vst [vmem:[#allocation228_spill] sm:$0xff] %v12675_v1  ;;  %v5069_v33 = vmul.f32 %v12675_v1, %v16562_v9  ;;  %7321 = vset.pattern.permute.xlu1 %v16516_v60 }
 0x869   :  { %4649 = vperm.xlu1 %7321, %v16727_v2   ;;  %16738 = vst [vmem:[#allocation234_spill] sm:$0xff] %v12708_v40 }
 0x86a   :  { %v5117_v14 = vadd.f32 %v5069_v33, %v5021_v31  ;;  %v16734_v33 = vld [vmem:[#allocation90_spill] sm:$0xff]  ;;  %v16739_v31 = vld [vmem:[#allocation127_spill] sm:$0xff] }
 0x86c   :  { %v5213_v36 = vadd.f32 %v5165_v50, %v5117_v14  ;;  %v4734_v50 = vmul.f32 %v16739_v31, %v16662_v34  ;;  %v16740_v14 = vld [vmem:[#allocation5_spill] sm:$0xff]  ;;  %v16745_v31 = vld [vmem:[#allocation151_spill] sm:$0xff] }
 0x86d   :  { %v4735_v12 = vmul.f32 %v16745_v31, %v16744_v57 }
 0x86e   :  { %v5248_v25 = vpack.c.bf16 %v5213_v36, %v5212_v35  ;;  %v16741_v35 = vld [vmem:[#allocation64_spill] sm:$0xff] }
 0x86f   :  { %7314 = vset.pattern.permute.xlu2 %v16649_v59  ;;  %v12694_v58 = vpop.permute.xlu1 %4241  ;;  %v4783_v54 = vmul.f32 %v16741_v35, %v16740_v14  ;;  %v16746_v35 = vld [vmem:[#allocation149_spill] sm:$0xff]  ;;  %v12734_v34 = vpop.permute.xlu0 %4325 }
 0x870   :  { %3881 = vperm.xlu2 %7314, %v16727_v2   ;;  %7069 = vmatmul.msk.bf16.gmra.mxu3 %vm756_vm1, %v5248_v25  ;;  %v12692_v51 = vpop.permute.xlu2 %4045  ;;  %16733 = vst [vmem:[#allocation232_spill] sm:$0xff] %v12694_v58  ;;  %v16737_v25 = vld [vmem:[#allocation191_spill] sm:$0xff] }
 0x871   :  { %16732 = vst [vmem:[#allocation18_spill] sm:$0xff] %v12692_v51  ;;  %7324 = vset.pattern.permute.xlu1 %v16491_v43  ;;  %v4782_v38 = vmul.f32 %v16737_v25, %v16573_v28  ;;  %v4878_v24 = vmul.f32 %v12692_v51, %v16579_v3  ;;  %v4879_v51 = vmul.f32 %v12681_v63, %v16666_v39 }
 0x872   :  { %4077 = vperm.xlu1 %7324, %v16734_v33   ;;  %16747 = vst [vmem:[#allocation149_spill] sm:$0xff] %v12734_v34 }
 0x878   :  { %7316 = vset.pattern.permute.xlu2 %v16491_v43  ;;  %v12702_v36 = vpop.permute.xlu1 %4621 }
 0x879   :  { %4073 = vperm.xlu2 %7316, %v16727_v2   ;;  %v12700_v4 = vpop.permute.xlu2 %4237  ;;  %16736 = vst [vmem:[#allocation233_spill] sm:$0xff] %v12702_v36  ;;  %v4830_v2 = vadd.f32 %v4782_v38, %v4734_v50  ;;  %v4831_v38 = vadd.f32 %v4783_v54, %v4735_v12  ;;  %v4975_v50 = vmul.f32 %v12694_v58, %v16578_v44  ;;  %v16762_v58 = vld [vmem:[#allocation15_spill] sm:$0xff] }
 0x87a   :  { %16735 = vst [vmem:[#allocation90_spill] sm:$0xff] %v12700_v4  ;;  %7326 = vset.pattern.permute.xlu1 %v16496_v49  ;;  %v4974_v8 = vmul.f32 %v12700_v4, %v16580_v53  ;;  %v5070_v53 = vmul.f32 %v12708_v40, %v16582_v15 }
 0x87b   :  { %4269 = vperm.xlu1 %7326, %v16734_v33   ;;  %v4926_v3 = vadd.f32 %v4878_v24, %v4830_v2  ;;  %v4927_v28 = vadd.f32 %v4879_v51, %v4831_v38  ;;  %v16754_v38 = vld [vmem:[#allocation54_spill] sm:$0xff] }
 0x87d   :  { %v5022_v4 = vadd.f32 %v4974_v8, %v4926_v3  ;;  %v5023_v63 = vadd.f32 %v4975_v50, %v4927_v28  ;;  %v5166_v3 = vmul.f32 %v12702_v36, %v16587_v41  ;;  %v4784_v50 = vmul.f32 %v16754_v38, %v16682_v16  ;;  %v16760_v38 = vld [vmem:[#allocation31_spill] sm:$0xff]  ;;  %v16761_v36 = vld [vmem:[#allocation132_spill] sm:$0xff] }
 0x87f   :  { %v5118_v24 = vadd.f32 %v5070_v53, %v5022_v4  ;;  %v12750_v4 = vpop.permute.xlu0 %4493 }
 0x880   :  { %16750 = vst [vmem:[#allocation239_spill] sm:$0xff] %v12750_v4 }
 0x881   :  { %7318 = vset.pattern.permute.xlu2 %v16502_v5  ;;  %v12722_v1 = vpop.permute.xlu1 %4053  ;;  %v5214_v28 = vadd.f32 %v5166_v3, %v5118_v24  ;;  %v16756_v3 = vld [vmem:[#allocation154_spill] sm:$0xff] }
 0x882   :  { %4453 = vperm.xlu2 %7318, %v16713_v55   ;;  %v12720_v25 = vpop.permute.xlu2 %4433  ;;  %16743 = vst [vmem:[#allocation236_spill] sm:$0xff] %v12722_v1 }
 0x883   :  { %16742 = vst [vmem:[#allocation235_spill] sm:$0xff] %v12720_v25  ;;  %7328 = vset.pattern.permute.xlu1 %v16502_v5  ;;  %v5071_v31 = vmul.f32 %v12720_v25, %v16581_v11  ;;  %v4737_v25 = vmul.f32 %v16761_v36, %v16760_v38 }
 0x884   :  { %4465 = vperm.xlu1 %7328, %v16746_v35  }
 0x885   :  { %v5119_v8 = vadd.f32 %v5071_v31, %v5023_v63  ;;  %v16753_v31 = vld [vmem:[#allocation99_spill] sm:$0xff] }
 0x887   :  { %v12763_v24 = vpop.permute.xlu0 %4057 }
 0x888   :  { %16755 = vst [vmem:[#allocation99_spill] sm:$0xff] %v12763_v24  ;;  %v4881_v4 = vmul.f32 %v12763_v24, %v16762_v58 }
 0x88a   :  { %7320 = vset.pattern.permute.xlu2 %v16516_v60  ;;  %v12744_v54 = vpop.permute.xlu1 %4249 }
 0x88b   :  { %4645 = vperm.xlu2 %7320, %v16713_v55   ;;  %v12740_v12 = vpop.permute.xlu2 %4625  ;;  %16749 = vst [vmem:[#allocation238_spill] sm:$0xff] %v12744_v54 }
 0x88c   :  { %16748 = vst [vmem:[#allocation237_spill] sm:$0xff] %v12740_v12  ;;  %v5167_v51 = vmul.f32 %v12740_v12, %v16584_v23  ;;  %7330 = vset.pattern.permute.xlu1 %v16516_v60 }
 0x88d   :  { %4657 = vperm.xlu1 %7330, %v16746_v35  }
 0x88e   :  { %v5215_v2 = vadd.f32 %v5167_v51, %v5119_v8  ;;  %v4736_v8 = vmul.f32 %v16756_v3, %v16596_v52  ;;  %v16757_v51 = vld [vmem:[#allocation197_spill] sm:$0xff] }
 0x890   :  { %v5249_v53 = vpack.c.bf16 %v5215_v2, %v5214_v28  ;;  %v4785_v2 = vmul.f32 %v16757_v51, %v16591_v20  ;;  %v4880_v28 = vmul.f32 %v12722_v1, %v16600_v45  ;;  %v4832_v40 = vadd.f32 %v4784_v50, %v4736_v8 }
 0x892   :  { %7070 = vmatmul.msk.bf16.gmra.mxu3 %vm756_vm1, %v5249_v53  ;;  %v4833_v51 = vadd.f32 %v4785_v2, %v4737_v25  ;;  %v4928_v1 = vadd.f32 %v4880_v28, %v4832_v40  ;;  %v16764_v40 = vld [vmem:[#allocation206_spill] sm:$0xff] }
 0x893   :  { %7323 = vset.pattern.permute.xlu2 %v16649_v59  ;;  %v12757_v63 = vpop.permute.xlu1 %4441  ;;  %v5168_v2 = vmul.f32 %v16764_v40, %v16608_v7  ;;  %v16776_v40 = vld [vmem:[#allocation110_spill] sm:$0xff] }
 0x894   :  { %3889 = vperm.xlu2 %7323, %v16746_v35   ;;  %v12755_v55 = vpop.permute.xlu2 %4245  ;;  %16752 = vst [vmem:[#allocation241_spill] sm:$0xff] %v12757_v63  ;;  %v4929_v36 = vadd.f32 %v4881_v4, %v4833_v51  ;;  %v5073_v50 = vmul.f32 %v12757_v63, %v16603_v62 }
 0x895   :  { %16751 = vst [vmem:[#allocation240_spill] sm:$0xff] %v12755_v55  ;;  %7332 = vset.pattern.permute.xlu1 %v16491_v43  ;;  %v4976_v3 = vmul.f32 %v12755_v55, %v16601_v42 }
 0x896   :  { %4085 = vperm.xlu1 %7332, %v16753_v31  }
 0x897   :  { %v5024_v8 = vadd.f32 %v4976_v3, %v4928_v1 }
 0x89c   :  { %7325 = vset.pattern.permute.xlu2 %v16491_v43  ;;  %v12775_v12 = vpop.permute.xlu1 %4061 }
 0x89d   :  { %4081 = vperm.xlu2 %7325, %v16746_v35   ;;  %v12773_v53 = vpop.permute.xlu2 %4437  ;;  %16759 = vst [vmem:[#allocation243_spill] sm:$0xff] %v12775_v12  ;;  %v4977_v35 = vmul.f32 %v12744_v54, %v16688_v30 }
 0x89e   :  { %16758 = vst [vmem:[#allocation242_spill] sm:$0xff] %v12773_v53  ;;  %7334 = vset.pattern.permute.xlu1 %v16496_v49  ;;  %v5072_v34 = vmul.f32 %v12773_v53, %v16604_v47 }
 0x89f   :  { %4277 = vperm.xlu1 %7334, %v16753_v31   ;;  %v5025_v24 = vadd.f32 %v4977_v35, %v4929_v36  ;;  %v16769_v35 = vld [vmem:[#allocation47_spill] sm:$0xff] }
 0x8a0   :  { %v5120_v45 = vadd.f32 %v5072_v34, %v5024_v8  ;;  %v16766_v34 = vld [vmem:[#allocation96_spill] sm:$0xff] }
 0x8a1   :  { %v5121_v28 = vadd.f32 %v5073_v50, %v5025_v24  ;;  %v16770_v50 = vld [vmem:[#allocation160_spill] sm:$0xff] }
 0x8a2   :  { %v5216_v1 = vadd.f32 %v5168_v2, %v5120_v45  ;;  %v4787_v45 = vmul.f32 %v16769_v35, %v16618_v27  ;;  %v4739_v8 = vmul.f32 %v16770_v50, %v16620_v10  ;;  %v4882_v50 = vmul.f32 %v12775_v12, %v16708_v26 }
 0x8a5   :  { %7327 = vset.pattern.permute.xlu2 %v16502_v5  ;;  %v12797_v53 = vpop.permute.xlu1 %4253 }
 0x8a6   :  { %4461 = vperm.xlu2 %7327, %v16734_v33   ;;  %v12793_v25 = vpop.permute.xlu2 %4633  ;;  %16765 = vst [vmem:[#allocation245_spill] sm:$0xff] %v12797_v53 }
 0x8a7   :  { %16763 = vst [vmem:[#allocation244_spill] sm:$0xff] %v12793_v25  ;;  %v5169_v4 = vmul.f32 %v12793_v25, %v16606_v0  ;;  %7336 = vset.pattern.permute.xlu1 %v16502_v5 }
 0x8a8   :  { %4473 = vperm.xlu1 %7336, %v16766_v34  }
 0x8a9   :  { %v5217_v51 = vadd.f32 %v5169_v4, %v5121_v28  ;;  %v16771_v28 = vld [vmem:[#allocation61_spill] sm:$0xff] }
 0x8aa   :  { %v4786_v4 = vmul.f32 %v16771_v28, %v16613_v6  ;;  %v4978_v28 = vmul.f32 %v12797_v53, %v16622_v21 }
 0x8ab   :  { %v5250_v36 = vpack.c.bf16 %v5217_v51, %v5216_v1 }
 0x8ad   :  { %7071 = vmatmul.msk.bf16.gmra.mxu3 %vm756_vm1, %v5250_v36  ;;  %v16774_v36 = vld [vmem:[#allocation157_spill] sm:$0xff] }
 0x8ae   :  { %7329 = vset.pattern.permute.xlu2 %v16516_v60  ;;  %v12808_v24 = vpop.permute.xlu1 %4449  ;;  %v4738_v35 = vmul.f32 %v16774_v36, %v16703_v56  ;;  %v16777_v56 = vld [vmem:[#allocation41_spill] sm:$0xff] }
 0x8af   :  { %4653 = vperm.xlu2 %7329, %v16734_v33   ;;  %v12806_v3 = vpop.permute.xlu2 %4065  ;;  %16768 = vst [vmem:[#allocation246_spill] sm:$0xff] %v12808_v24  ;;  %v4835_v33 = vadd.f32 %v4787_v45, %v4739_v8  ;;  %v16775_v45 = vld [vmem:[#allocation185_spill] sm:$0xff] }
 0x8b0   :  { %16767 = vst [vmem:[#allocation96_spill] sm:$0xff] %v12806_v3  ;;  %7338 = vset.pattern.permute.xlu1 %v16516_v60  ;;  %v4883_v2 = vmul.f32 %v12806_v3, %v16621_v19  ;;  %v4834_v3 = vadd.f32 %v4786_v4, %v4738_v35  ;;  %v4979_v8 = vmul.f32 %v16775_v45, %v16623_v17 }
 0x8b1   :  { %4665 = vperm.xlu1 %7338, %v16766_v34  }
 0x8b2   :  { %v4931_v25 = vadd.f32 %v4883_v2, %v4835_v33  ;;  %v4930_v63 = vadd.f32 %v4882_v50, %v4834_v3  ;;  %v5075_v2 = vmul.f32 %v12808_v24, %v16777_v56  ;;  %v16778_v33 = vld [vmem:[#allocation67_spill] sm:$0xff]  ;;  %v16792_v24 = vld [vmem:[#allocation20_spill] sm:$0xff] }
 0x8b4   :  { %v5027_v54 = vadd.f32 %v4979_v8, %v4931_v25  ;;  %v5026_v55 = vadd.f32 %v4978_v28, %v4930_v63  ;;  %v16781_v25 = vld [vmem:[#allocation66_spill] sm:$0xff] }
 0x8b6   :  { %v5123_v45 = vadd.f32 %v5075_v2, %v5027_v54  ;;  %v16787_v2 = vld [vmem:[#allocation129_spill] sm:$0xff] }
 0x8b7   :  { %7331 = vset.pattern.permute.xlu2 %v16649_v59  ;;  %v12824_v1 = vpop.permute.xlu1 %4641 }
 0x8b8   :  { %3897 = vperm.xlu2 %7331, %v16766_v34   ;;  %v12822_v51 = vpop.permute.xlu2 %4445  ;;  %16773 = vst [vmem:[#allocation248_spill] sm:$0xff] %v12824_v1  ;;  %v5171_v35 = vmul.f32 %v12824_v1, %v16778_v33 }
 0x8b9   :  { %16772 = vst [vmem:[#allocation247_spill] sm:$0xff] %v12822_v51  ;;  %7340 = vset.pattern.permute.xlu1 %v16491_v43  ;;  %v5074_v36 = vmul.f32 %v12822_v51, %v16625_v37  ;;  %v16793_v51 = vld [vmem:[#allocation169_spill] sm:$0xff] }
 0x8ba   :  { %4093 = vperm.xlu1 %7340, %v16776_v40   ;;  %v5219_v63 = vadd.f32 %v5171_v35, %v5123_v45  ;;  %v4741_v35 = vmul.f32 %v16787_v2, %v16725_v48  ;;  %v4740_v12 = vmul.f32 %v16793_v51, %v16792_v24 }
 0x8bb   :  { %v5122_v53 = vadd.f32 %v5074_v36, %v5026_v55 }
 0x8c0   :  { %7333 = vset.pattern.permute.xlu2 %v16491_v43  ;;  %v12846_v3 = vpop.permute.xlu1 %4069 }
 0x8c1   :  { %4089 = vperm.xlu2 %7333, %v16766_v34   ;;  %v12844_v4 = vpop.permute.xlu2 %4637  ;;  %16780 = vst [vmem:[#allocation249_spill] sm:$0xff] %v12846_v3  ;;  %v16784_v34 = vld [vmem:[#allocation95_spill] sm:$0xff] }
 0x8c2   :  { %16779 = vst [vmem:[#allocation110_spill] sm:$0xff] %v12844_v4  ;;  %v5170_v50 = vmul.f32 %v12844_v4, %v16781_v25  ;;  %7342 = vset.pattern.permute.xlu1 %v16496_v49 }
 0x8c3   :  { %4285 = vperm.xlu1 %7342, %v16776_v40  }
 0x8c4   :  { %v5218_v28 = vadd.f32 %v5170_v50, %v5122_v53 }
 0x8c6   :  { %v5251_v8 = vpack.c.bf16 %v5219_v63, %v5218_v28  ;;  %v16789_v63 = vld [vmem:[#allocation196_spill] sm:$0xff] }
 0x8c8   :  { %7072 = vmatmul.msk.bf16.gmra.mxu3 %vm756_vm1, %v5251_v8 }
 0x8c9   :  { %7335 = vset.pattern.permute.xlu2 %v16502_v5  ;;  %v12857_v55 = vpop.permute.xlu1 %4261 }
 0x8ca   :  { %4469 = vperm.xlu2 %7335, %v16753_v31   ;;  %v12855_v54 = vpop.permute.xlu2 %3881  ;;  %16783 = vst [vmem:[#allocation251_spill] sm:$0xff] %v12857_v55 }
 0x8cb   :  { %16782 = vst [vmem:[#allocation250_spill] sm:$0xff] %v12855_v54  ;;  %7345 = vset.pattern.permute.xlu1 %v16502_v5  ;;  %v4789_v45 = vmul.f32 %v12855_v54, %v16723_v32  ;;  %v16794_v54 = vld [vmem:[#allocation10_spill] sm:$0xff]  ;;  %v12893_v32 = vpop.f32.mrf.mxu3 }
 0x8cc   :  { %4481 = vperm.xlu1 %7345, %v16784_v34   ;;  %v4884_v2 = vmul.f32 %v12846_v3, %v16794_v54  ;;  %16797 = vst [vmem:[#allocation10_spill] sm:$0xff] %v12893_v32  ;;  %v16817_v32 = vld [vmem:[#allocation136_spill] sm:$0xff] }
 0x8cd   :  { %v4837_v8 = vadd.f32 %v4789_v45, %v4741_v35  ;;  %v4980_v45 = vmul.f32 %v12857_v55, %v16728_v61  ;;  %v16796_v35 = vld [vmem:[#allocation81_spill] sm:$0xff] }
 0x8d2   :  { %7337 = vset.pattern.permute.xlu2 %v16516_v60  ;;  %v12865_v36 = vpop.permute.xlu1 %4457 }
 0x8d3   :  { %4661 = vperm.xlu2 %7337, %v16753_v31   ;;  %v12863_v53 = vpop.permute.xlu2 %4073  ;;  %16786 = vst [vmem:[#allocation252_spill] sm:$0xff] %v12865_v36  ;;  %v16788_v31 = vld [vmem:[#allocation2_spill] sm:$0xff] }
 0x8d4   :  { %16785 = vst [vmem:[#allocation95_spill] sm:$0xff] %v12863_v53  ;;  %7347 = vset.pattern.permute.xlu1 %v16516_v60  ;;  %v4885_v50 = vmul.f32 %v12863_v53, %v16558_v22  ;;  %v4788_v28 = vmul.f32 %v16789_v63, %v16788_v31  ;;  %v16795_v22 = vld [vmem:[#allocation94_spill] sm:$0xff] }
 0x8d5   :  { %4673 = vperm.xlu1 %7347, %v16784_v34   ;;  %v4981_v63 = vmul.f32 %v16795_v22, %v16560_v13 }
 0x8d6   :  { %v4933_v48 = vadd.f32 %v4885_v50, %v4837_v8  ;;  %v4836_v53 = vadd.f32 %v4788_v28, %v4740_v12  ;;  %v5077_v50 = vmul.f32 %v12865_v36, %v16562_v9  ;;  %v12902_v28 = vpop.permute.xlu0 %4105  ;;  %v16801_v36 = vld [vmem:[#allocation102_spill] sm:$0xff] }
 0x8d7   :  { %16798 = vst [vmem:[#allocation81_spill] sm:$0xff] %v12902_v28 }
 0x8d8   :  { %v4932_v31 = vadd.f32 %v4884_v2, %v4836_v53  ;;  %v5029_v25 = vadd.f32 %v4981_v63, %v4933_v48 }
 0x8da   :  { %v5028_v3 = vadd.f32 %v4980_v45, %v4932_v31  ;;  %v5125_v53 = vadd.f32 %v5077_v50, %v5029_v25 }
 0x8db   :  { %7339 = vset.pattern.permute.xlu2 %v16649_v59  ;;  %v12881_v4 = vpop.permute.xlu1 %4649 }
 0x8dc   :  { %3905 = vperm.xlu2 %7339, %v16784_v34   ;;  %v12879_v1 = vpop.permute.xlu2 %4453  ;;  %16791 = vst [vmem:[#allocation254_spill] sm:$0xff] %v12881_v4  ;;  %v5173_v12 = vmul.f32 %v12881_v4, %v16566_v46 }
 0x8dd   :  { %16790 = vst [vmem:[#allocation253_spill] sm:$0xff] %v12879_v1  ;;  %7349 = vset.pattern.permute.xlu1 %v16491_v43  ;;  %v5076_v51 = vmul.f32 %v12879_v1, %v16559_v29  ;;  %v12912_v1 = vpop.f32.mrf.mxu3 }
 0x8de   :  { %3941 = vperm.xlu1 %7349, %v16796_v35   ;;  %v5221_v63 = vadd.f32 %v5173_v12, %v5125_v53  ;;  %16802 = vst [vmem:[#allocation102_spill] sm:$0xff] %v12912_v1  ;;  %v16810_v53 = vld [vmem:[#allocation128_spill] sm:$0xff] }
 0x8df   :  { %v5124_v48 = vadd.f32 %v5076_v51, %v5028_v3  ;;  %v12919_v51 = vpop.permute.xlu0 %3949 }
 0x8e0   :  { %16804 = vst [vmem:[#allocation258_spill] sm:$0xff] %v12919_v51  ;;  %v16818_v51 = vld [vmem:[#allocation12_spill] sm:$0xff] }
 0x8e4   :  { %7341 = vset.pattern.permute.xlu2 %v16491_v43  ;;  %v12907_v2 = vpop.permute.xlu1 %4077 }
 0x8e5   :  { %4097 = vperm.xlu2 %7341, %v16784_v34   ;;  %v12905_v8 = vpop.permute.xlu2 %4645  ;;  %16800 = vst [vmem:[#allocation256_spill] sm:$0xff] %v12907_v2  ;;  %v16806_v34 = vld [vmem:[#allocation106_spill] sm:$0xff]  ;;  %v12960_v28 = vpop.f32.mrf.mxu3 }
 0x8e6   :  { %16799 = vst [vmem:[#allocation255_spill] sm:$0xff] %v12905_v8  ;;  %v5172_v31 = vmul.f32 %v12905_v8, %v16565_v18  ;;  %4101 = vperm.xlu1 %7349, %v16801_v36   ;;  %v16813_v8 = vld [vmem:[#allocation75_spill] sm:$0xff] }
 0x8e7   :  { %v12931_v12 = vpop.permute.xlu0 %4117  ;;  %16822 = vst [vmem:[#allocation264_spill] sm:$0xff] %v12960_v28 }
 0x8e8   :  { %v5220_v45 = vadd.f32 %v5172_v31, %v5124_v48  ;;  %16809 = vst [vmem:[#allocation261_spill] sm:$0xff] %v12931_v12  ;;  %v16811_v31 = vld [vmem:[#allocation175_spill] sm:$0xff] }
 0x8ea   :  { %v5252_v4 = vpack.c.bf16 %v5221_v63, %v5220_v45  ;;  %v4743_v63 = vmul.f32 %v16811_v31, %v16744_v57 }
 0x8ec   :  { %7073 = vmatmul.msk.bf16.gmra.mxu3 %vm756_vm1, %v5252_v4 }
 0x8ed   :  { %7344 = vset.pattern.permute.xlu2 %v16502_v5  ;;  %v12921_v3 = vpop.permute.xlu1 %4269 }
 0x8ee   :  { %4477 = vperm.xlu2 %7344, %v16776_v40   ;;  %v12917_v25 = vpop.permute.xlu2 %3889  ;;  %16805 = vst [vmem:[#allocation259_spill] sm:$0xff] %v12921_v3  ;;  %7352 = vset.pattern.permute.xlu1 %v16496_v49 }
 0x8ef   :  { %16803 = vst [vmem:[#allocation257_spill] sm:$0xff] %v12917_v25  ;;  %4137 = vperm.xlu1 %7352, %v16806_v34   ;;  %v4791_v48 = vmul.f32 %v12917_v25, %v16740_v14  ;;  %v16816_v25 = vld [vmem:[#allocation24_spill] sm:$0xff]  ;;  %v12954_v57 = vpop.permute.xlu0 %4521  ;;  %v16821_v14 = vld [vmem:[#allocation22_spill] sm:$0xff] }
 0x8f0   :  { %v4742_v31 = vmul.f32 %v16817_v32, %v16816_v25  ;;  %16819 = vst [vmem:[#allocation263_spill] sm:$0xff] %v12954_v57 }
 0x8f1   :  { %v4839_v55 = vadd.f32 %v4791_v48, %v4743_v63  ;;  %v16820_v63 = vld [vmem:[#allocation100_spill] sm:$0xff] }
 0x8f6   :  { %7346 = vset.pattern.permute.xlu2 %v16516_v60  ;;  %v12929_v4 = vpop.permute.xlu1 %4465 }
 0x8f7   :  { %4669 = vperm.xlu2 %7346, %v16776_v40   ;;  %v12927_v50 = vpop.permute.xlu2 %4081  ;;  %16808 = vst [vmem:[#allocation260_spill] sm:$0xff] %v12929_v4  ;;  %4297 = vperm.xlu1 %7352, %v16810_v53   ;;  %v16812_v40 = vld [vmem:[#allocation4_spill] sm:$0xff] }
 0x8f8   :  { %16807 = vst [vmem:[#allocation106_spill] sm:$0xff] %v12927_v50  ;;  %v4887_v45 = vmul.f32 %v12927_v50, %v16666_v39  ;;  %v4790_v22 = vmul.f32 %v16813_v8, %v16812_v40  ;;  %v4886_v50 = vmul.f32 %v12907_v2, %v16818_v51  ;;  %v4983_v8 = vmul.f32 %v16820_v63, %v16578_v44 }
 0x8f9   :  { %v4982_v40 = vmul.f32 %v12921_v3, %v16821_v14 }
 0x8fa   :  { %v4935_v39 = vadd.f32 %v4887_v45, %v4839_v55  ;;  %v4838_v48 = vadd.f32 %v4790_v22, %v4742_v31  ;;  %v5079_v55 = vmul.f32 %v12929_v4, %v16581_v11 }
 0x8fc   :  { %v4934_v46 = vadd.f32 %v4886_v50, %v4838_v48  ;;  %v5031_v9 = vadd.f32 %v4983_v8, %v4935_v39 }
 0x8fe   :  { %v5030_v2 = vadd.f32 %v4982_v40, %v4934_v46  ;;  %v5127_v45 = vadd.f32 %v5079_v55, %v5031_v9  ;;  %v12978_v40 = vpop.permute.xlu0 %4689 }
 0x8ff   :  { %7348 = vset.pattern.permute.xlu2 %v16649_v59  ;;  %v12946_v1 = vpop.permute.xlu1 %4657  ;;  %7354 = vset.pattern.permute.xlu1 %v16502_v5  ;;  %16825 = vst [vmem:[#allocation267_spill] sm:$0xff] %v12978_v40 }
 0x900   :  { %3913 = vperm.xlu2 %7348, %v16810_v53   ;;  %v12944_v12 = vpop.permute.xlu2 %4461  ;;  %16815 = vst [vmem:[#allocation262_spill] sm:$0xff] %v12946_v1  ;;  %4485 = vperm.xlu1 %7354, %v16801_v36   ;;  %v5175_v22 = vmul.f32 %v12946_v1, %v16584_v23  ;;  %v12980_v1 = vpop.f32.mrf.mxu3 }
 0x901   :  { %16814 = vst [vmem:[#allocation128_spill] sm:$0xff] %v12944_v12  ;;  %v5078_v32 = vmul.f32 %v12944_v12, %v16582_v15  ;;  %v16838_v12 = vld [vmem:[#allocation225_spill] sm:$0xff] }
 0x902   :  { %v5223_v39 = vadd.f32 %v5175_v22, %v5127_v45  ;;  %16826 = vst [vmem:[#allocation268_spill] sm:$0xff] %v12980_v1  ;;  %v16833_v45 = vld [vmem:[#allocation222_spill] sm:$0xff] }
 0x903   :  { %v5126_v63 = vadd.f32 %v5078_v32, %v5030_v2  ;;  %v16841_v1 = vld [vmem:[#allocation14_spill] sm:$0xff] }
 0x906   :  { %v12990_v2 = vpop.permute.xlu0 %4533 }
 0x907   :  { %16829 = vst [vmem:[#allocation271_spill] sm:$0xff] %v12990_v2 }
 0x908   :  { %7350 = vset.pattern.permute.xlu2 %v16491_v43  ;;  %v12972_v50 = vpop.permute.xlu1 %4085  ;;  %7355 = vset.pattern.permute.xlu1 %v16516_v60  ;;  %v12996_v55 = vpop.f32.mrf.mxu3 }
 0x909   :  { %3945 = vperm.xlu2 %7350, %v16806_v34   ;;  %v12970_v31 = vpop.permute.xlu2 %4653  ;;  %16824 = vst [vmem:[#allocation266_spill] sm:$0xff] %v12972_v50  ;;  %4517 = vperm.xlu1 %7355, %v16796_v35  }
 0x90a   :  { %16823 = vst [vmem:[#allocation265_spill] sm:$0xff] %v12970_v31  ;;  %v5174_v46 = vmul.f32 %v12970_v31, %v16587_v41 }
 0x90b   :  { %16831 = vst [vmem:[#allocation273_spill] sm:$0xff] %v12996_v55 }
 0x90c   :  { %v5222_v8 = vadd.f32 %v5174_v46, %v5126_v63 }
 0x90e   :  { %v5253_v48 = vpack.c.bf16 %v5223_v39, %v5222_v8  ;;  %v13003_v46 = vpop.permute.xlu0 %3893  ;;  %v16835_v39 = vld [vmem:[#allocation139_spill] sm:$0xff] }
 0x90f   :  { %16834 = vst [vmem:[#allocation222_spill] sm:$0xff] %v13003_v46  ;;  %v4745_v8 = vmul.f32 %v16835_v39, %v16760_v38  ;;  %v4792_v55 = vmul.f32 %v13003_v46, %v16682_v16  ;;  %v16839_v39 = vld [vmem:[#allocation133_spill] sm:$0xff]  ;;  %v16842_v46 = vld [vmem:[#allocation80_spill] sm:$0xff] }
 0x910   :  { %7074 = vmatmul.msk.bf16.gmra.mxu3 %vm756_vm1, %v5253_v48  ;;  %v4744_v3 = vmul.f32 %v16839_v39, %v16596_v52 }
 0x911   :  { %7351 = vset.pattern.permute.xlu2 %v16496_v49  ;;  %v12987_v32 = vpop.permute.xlu1 %4277  ;;  %4681 = vperm.xlu1 %7355, %v16810_v53  }
 0x912   :  { %4133 = vperm.xlu2 %7351, %v16796_v35   ;;  %v12985_v9 = vpop.permute.xlu2 %3897  ;;  %16828 = vst [vmem:[#allocation270_spill] sm:$0xff] %v12987_v32 }
 0x913   :  { %16827 = vst [vmem:[#allocation269_spill] sm:$0xff] %v12985_v9  ;;  %v4793_v35 = vmul.f32 %v12985_v9, %v16591_v20 }
 0x915   :  { %v4841_v31 = vadd.f32 %v4793_v35, %v4745_v8  ;;  %v4985_v35 = vmul.f32 %v16842_v46, %v16688_v30  ;;  %v4840_v8 = vadd.f32 %v4792_v55, %v4744_v3 }
 0x919   :  { %7358 = vset.pattern.permute.xlu1 %v16649_v59 }
 0x91a   :  { %4293 = vperm.xlu2 %7351, %v16801_v36   ;;  %v12998_v22 = vpop.permute.xlu1 %4473  ;;  %3921 = vperm.xlu1 %7358, %v16833_v45  }
 0x91b   :  { %v12994_v63 = vpop.permute.xlu2 %4089  ;;  %16832 = vst [vmem:[#allocation274_spill] sm:$0xff] %v12998_v22 }
 0x91c   :  { %16830 = vst [vmem:[#allocation272_spill] sm:$0xff] %v12994_v63  ;;  %v4889_v48 = vmul.f32 %v12994_v63, %v16762_v58  ;;  %v13021_v63 = vpop.f32.mrf.mxu3  ;;  %v4984_v58 = vmul.f32 %v12987_v32, %v16601_v42  ;;  %v16859_v32 = vld [vmem:[#allocation123_spill] sm:$0xff] }
 0x91d   :  { %16840 = vst [vmem:[#allocation225_spill] sm:$0xff] %v13021_v63  ;;  %v5081_v63 = vmul.f32 %v12998_v22, %v16603_v62  ;;  %v16858_v22 = vld [vmem:[#allocation178_spill] sm:$0xff] }
 0x91e   :  { %v4937_v28 = vadd.f32 %v4889_v48, %v4841_v31 }
 0x920   :  { %v5033_v38 = vadd.f32 %v4985_v35, %v4937_v28  ;;  %v16846_v35 = vld [vmem:[#allocation42_spill] sm:$0xff] }
 0x922   :  { %7353 = vset.pattern.permute.xlu2 %v16502_v5  ;;  %7360 = vset.pattern.permute.xlu1 %v16491_v43  ;;  %v5129_v48 = vadd.f32 %v5081_v63, %v5033_v38 }
 0x923   :  { %4329 = vperm.xlu2 %7353, %v16806_v34   ;;  %v13016_v9 = vpop.permute.xlu1 %4665  ;;  %4109 = vperm.xlu1 %7360, %v16838_v12   ;;  %v4888_v34 = vmul.f32 %v12972_v50, %v16841_v1  ;;  %v4987_v50 = vmul.f32 %v16859_v32, %v16623_v17  ;;  %v16880_v32 = vld [vmem:[#allocation226_spill] sm:$0xff]  ;;  %v16887_v17 = vld [vmem:[#allocation11_spill] sm:$0xff] }
 0x924   :  { %v13014_v4 = vpop.permute.xlu2 %4469  ;;  %16837 = vst [vmem:[#allocation276_spill] sm:$0xff] %v13016_v9  ;;  %v5177_v31 = vmul.f32 %v13016_v9, %v16606_v0  ;;  %v13039_v55 = vpop.f32.mrf.mxu3 }
 0x925   :  { %16836 = vst [vmem:[#allocation275_spill] sm:$0xff] %v13014_v4  ;;  %v4936_v2 = vadd.f32 %v4888_v34, %v4840_v8  ;;  %v5080_v16 = vmul.f32 %v13014_v4, %v16604_v47 }
 0x926   :  { %16844 = vst [vmem:[#allocation278_spill] sm:$0xff] %v13039_v55 }
 0x927   :  { %v5032_v39 = vadd.f32 %v4984_v58, %v4936_v2 }
 0x929   :  { %v5128_v28 = vadd.f32 %v5080_v16, %v5032_v39  ;;  %v16850_v39 = vld [vmem:[#allocation86_spill] sm:$0xff] }
 0x92b   :  { %4489 = vperm.xlu2 %7353, %v16810_v53   ;;  %7361 = vset.pattern.permute.xlu1 %v16496_v49  ;;  %v5225_v53 = vadd.f32 %v5177_v31, %v5129_v48 }
 0x92c   :  { %v13041_v34 = vpop.permute.xlu1 %4093  ;;  %4141 = vperm.xlu1 %7361, %v16846_v35   ;;  %v13054_v63 = vpop.f32.mrf.mxu3 }
 0x92d   :  { %v13037_v3 = vpop.permute.xlu2 %4661  ;;  %16845 = vst [vmem:[#allocation279_spill] sm:$0xff] %v13041_v34 }
 0x92e   :  { %16843 = vst [vmem:[#allocation277_spill] sm:$0xff] %v13037_v3  ;;  %v5176_v58 = vmul.f32 %v13037_v3, %v16608_v7  ;;  %v16857_v3 = vld [vmem:[#allocation34_spill] sm:$0xff] }
 0x92f   :  { %16849 = vst [vmem:[#allocation281_spill] sm:$0xff] %v13054_v63 }
 0x930   :  { %v5224_v2 = vadd.f32 %v5176_v58, %v5128_v28  ;;  %v13068_v58 = vpop.permute.xlu0 %3901 }
 0x931   :  { %16853 = vst [vmem:[#allocation283_spill] sm:$0xff] %v13068_v58  ;;  %v4794_v63 = vmul.f32 %v13068_v58, %v16613_v6 }
 0x932   :  { %v5254_v8 = vpack.c.bf16 %v5225_v53, %v5224_v2  ;;  %v16854_v53 = vld [vmem:[#allocation172_spill] sm:$0xff] }
 0x933   :  { %7356 = vset.pattern.permute.xlu2 %v16516_v60  ;;  %v4747_v2 = vmul.f32 %v16854_v53, %v16620_v10  ;;  %v4746_v53 = vmul.f32 %v16858_v22, %v16857_v3 }
 0x934   :  { %4677 = vperm.xlu2 %7356, %v16801_v36   ;;  %7075 = vmatmul.msk.bf16.gmra.mxu3 %vm756_vm1, %v5254_v8  ;;  %v13062_v36 = vpop.f32.mrf.mxu3 }
 0x935   :  { %4305 = vperm.xlu1 %7361, %v16833_v45   ;;  %v13052_v16 = vpop.permute.xlu1 %4285  ;;  %v4842_v58 = vadd.f32 %v4794_v63, %v4746_v53 }
 0x936   :  { %v13050_v38 = vpop.permute.xlu2 %3905  ;;  %16848 = vst [vmem:[#allocation280_spill] sm:$0xff] %v13052_v16 }
 0x937   :  { %16847 = vst [vmem:[#allocation42_spill] sm:$0xff] %v13050_v38  ;;  %v4795_v28 = vmul.f32 %v13050_v38, %v16618_v27 }
 0x939   :  { %v4843_v55 = vadd.f32 %v4795_v28, %v4747_v2  ;;  %v4986_v28 = vmul.f32 %v13052_v16, %v16622_v21 }
 0x93c   :  { %7357 = vset.pattern.permute.xlu2 %v16649_v59  ;;  %v13086_v4 = vpop.f32.mrf.mxu3 }
 0x93d   :  { %3917 = vperm.xlu2 %7357, %v16838_v12   ;;  %7364 = vset.pattern.permute.xlu1 %v16502_v5 }
 0x93e   :  { %4337 = vperm.xlu1 %7364, %v16850_v39   ;;  %v13064_v48 = vpop.permute.xlu1 %4481 }
 0x93f   :  { %v13060_v31 = vpop.permute.xlu2 %4097  ;;  %16852 = vst [vmem:[#allocation282_spill] sm:$0xff] %v13064_v48  ;;  %v5083_v3 = vmul.f32 %v13064_v48, %v16777_v56  ;;  %v16885_v56 = vld [vmem:[#allocation143_spill] sm:$0xff] }
 0x940   :  { %16851 = vst [vmem:[#allocation86_spill] sm:$0xff] %v13060_v31  ;;  %v4891_v8 = vmul.f32 %v13060_v31, %v16621_v19  ;;  %v4890_v31 = vmul.f32 %v13041_v34, %v16708_v26 }
 0x942   :  { %v4939_v46 = vadd.f32 %v4891_v8, %v4843_v55  ;;  %v4938_v2 = vadd.f32 %v4890_v31, %v4842_v58  ;;  %v16863_v58 = vld [vmem:[#allocation66_spill] sm:$0xff] }
 0x944   :  { %v5035_v19 = vadd.f32 %v4987_v50, %v4939_v46  ;;  %v5034_v22 = vadd.f32 %v4986_v28, %v4938_v2  ;;  %v13104_v53 = vpop.f32.mrf.mxu3 }
 0x945   :  { %7359 = vset.pattern.permute.xlu2 %v16491_v43  ;;  %16861 = vst [vmem:[#allocation287_spill] sm:$0xff] %v13104_v53 }
 0x946   :  { %3953 = vperm.xlu2 %7359, %v16850_v39   ;;  %7366 = vset.pattern.permute.xlu1 %v16516_v60  ;;  %v5131_v31 = vadd.f32 %v5083_v3, %v5035_v19  ;;  %v16868_v3 = vld [vmem:[#allocation89_spill] sm:$0xff] }
 0x947   :  { %4525 = vperm.xlu1 %7366, %v16846_v35   ;;  %v13082_v9 = vpop.permute.xlu1 %4673 }
 0x948   :  { %v13080_v38 = vpop.permute.xlu2 %4477  ;;  %16856 = vst [vmem:[#allocation285_spill] sm:$0xff] %v13082_v9  ;;  %v5179_v55 = vmul.f32 %v13082_v9, %v16778_v33  ;;  %v16864_v9 = vld [vmem:[#allocation101_spill] sm:$0xff] }
 0x949   :  { %16855 = vst [vmem:[#allocation284_spill] sm:$0xff] %v13080_v38  ;;  %v5082_v10 = vmul.f32 %v13080_v38, %v16625_v37 }
 0x94a   :  { %v5227_v28 = vadd.f32 %v5179_v55, %v5131_v31  ;;  %v16872_v31 = vld [vmem:[#allocation112_spill] sm:$0xff] }
 0x94b   :  { %v5130_v50 = vadd.f32 %v5082_v10, %v5034_v22 }
 0x94c   :  { %v13119_v22 = vpop.f32.mrf.mxu3 }
 0x94d   :  { %16867 = vst [vmem:[#allocation290_spill] sm:$0xff] %v13119_v22 }
 0x94e   :  { %4113 = vperm.xlu2 %7359, %v16833_v45  }
 0x94f   :  { %4685 = vperm.xlu1 %7366, %v16838_v12  }
 0x950   :  { %v13106_v46 = vpop.permute.xlu1 %3941 }
 0x951   :  { %v13102_v63 = vpop.permute.xlu2 %4669  ;;  %16862 = vst [vmem:[#allocation288_spill] sm:$0xff] %v13106_v46 }
 0x952   :  { %16860 = vst [vmem:[#allocation286_spill] sm:$0xff] %v13102_v63  ;;  %v5178_v8 = vmul.f32 %v13102_v63, %v16863_v58  ;;  %v16878_v63 = vld [vmem:[#allocation181_spill] sm:$0xff]  ;;  %v16883_v58 = vld [vmem:[#allocation104_spill] sm:$0xff] }
 0x953   :  { %v4708_v33 = vmul.f32 %v16883_v58, %v16792_v24 }
 0x954   :  { %v5226_v2 = vadd.f32 %v5178_v8, %v5130_v50 }
 0x956   :  { %v5255_v38 = vpack.c.bf16 %v5227_v28, %v5226_v2  ;;  %7362 = vset.pattern.permute.xlu2 %v16496_v49  ;;  %v16876_v28 = vld [vmem:[#allocation217_spill] sm:$0xff]  ;;  %v16877_v2 = vld [vmem:[#allocation2_spill] sm:$0xff] }
 0x957   :  { %4301 = vperm.xlu2 %7362, %v16838_v12   ;;  %7369 = vset.pattern.permute.xlu1 %v16649_v59  ;;  %v4756_v48 = vmul.f32 %v16878_v63, %v16877_v2 }
 0x958   :  { %7076 = vmatmul.msk.bf16.gmra.mxu3 %vm756_vm1, %v5255_v38  ;;  %3929 = vperm.xlu1 %7369, %v16864_v9   ;;  %v13115_v19 = vpop.permute.xlu1 %4101  ;;  %v13129_v38 = vpop.f32.mrf.mxu3 }
 0x959   :  { %16865 = vst [vmem:[#allocation101_spill] sm:$0xff] %v13115_v19  ;;  %v4804_v22 = vadd.f32 %v4756_v48, %v4708_v33  ;;  %v16890_v33 = vld [vmem:[#allocation149_spill] sm:$0xff] }
 0x95a   :  { %v13117_v10 = vpop.permute.xlu2 %3913  ;;  %16871 = vst [vmem:[#allocation292_spill] sm:$0xff] %v13129_v38 }
 0x95b   :  { %16866 = vst [vmem:[#allocation289_spill] sm:$0xff] %v13117_v10 }
 0x95f   :  { %7363 = vset.pattern.permute.xlu2 %v16502_v5 }
 0x960   :  { %4333 = vperm.xlu2 %7363, %v16846_v35   ;;  %7371 = vset.pattern.permute.xlu1 %v16491_v43  ;;  %v13138_v35 = vpop.f32.mrf.mxu3 }
 0x961   :  { %3961 = vperm.xlu1 %7371, %v16868_v3   ;;  %v13125_v12 = vpop.permute.xlu1 %4137  ;;  %16875 = vst [vmem:[#allocation294_spill] sm:$0xff] %v13138_v35  ;;  %v16884_v35 = vld [vmem:[#allocation21_spill] sm:$0xff] }
 0x962   :  { %16869 = vst [vmem:[#allocation89_spill] sm:$0xff] %v13125_v12  ;;  %v4709_v37 = vmul.f32 %v16885_v56, %v16884_v35 }
 0x963   :  { %v13127_v55 = vpop.permute.xlu2 %3945 }
 0x964   :  { %16870 = vst [vmem:[#allocation291_spill] sm:$0xff] %v13127_v55  ;;  %v4853_v26 = vmul.f32 %v13127_v55, %v16887_v17 }
 0x968   :  { %4497 = vperm.xlu2 %7363, %v16833_v45   ;;  %v16879_v45 = vld [vmem:[#allocation3_spill] sm:$0xff]  ;;  %v13155_v21 = vpop.f32.mrf.mxu3 }
 0x969   :  { %7373 = vset.pattern.permute.xlu1 %v16496_v49  ;;  %v13134_v50 = vpop.permute.xlu1 %4297  ;;  %v4757_v16 = vmul.f32 %v16880_v32, %v16879_v45  ;;  %16886 = vst [vmem:[#allocation181_spill] sm:$0xff] %v13155_v21  ;;  %v4949_v21 = vmul.f32 %v13125_v12, %v16560_v13  ;;  %v4797_v62 = vmul.f32 %v13117_v10, %v16879_v45 }
 0x96a   :  { %4149 = vperm.xlu1 %7373, %v16872_v31   ;;  %16873 = vst [vmem:[#allocation112_spill] sm:$0xff] %v13134_v50 }
 0x96b   :  { %v4805_v53 = vadd.f32 %v4757_v16, %v4709_v37  ;;  %v5044_v16 = vmul.f32 %v16890_v33, %v16559_v29 }
 0x96c   :  { %v13136_v8 = vpop.permute.xlu2 %4133 }
 0x96d   :  { %16874 = vst [vmem:[#allocation293_spill] sm:$0xff] %v13136_v8  ;;  %v4948_v6 = vmul.f32 %v13136_v8, %v16728_v61  ;;  %v4901_v0 = vadd.f32 %v4853_v26, %v4805_v53  ;;  %v16891_v53 = vld [vmem:[#allocation33_spill] sm:$0xff] }
 0x96f   :  { %v4997_v48 = vadd.f32 %v4949_v21, %v4901_v0  ;;  %v16894_v0 = vld [vmem:[#allocation146_spill] sm:$0xff] }
 0x970   :  { %7367 = vset.pattern.permute.xlu2 %v16516_v60  ;;  %v4749_v21 = vmul.f32 %v16894_v0, %v16884_v35 }
 0x971   :  { %4529 = vperm.xlu2 %7367, %v16850_v39   ;;  %v4852_v39 = vmul.f32 %v13106_v46, %v16794_v54 }
 0x972   :  { %4309 = vperm.xlu1 %7373, %v16876_v28   ;;  %v13147_v34 = vpop.permute.xlu1 %4485 }
 0x973   :  { %16881 = vst [vmem:[#allocation217_spill] sm:$0xff] %v13147_v34  ;;  %v4900_v27 = vadd.f32 %v4852_v39, %v4804_v22  ;;  %v16892_v39 = vld [vmem:[#allocation44_spill] sm:$0xff] }
 0x974   :  { %v13149_v38 = vpop.permute.xlu2 %4293  ;;  %v5141_v12 = vmul.f32 %v12954_v57, %v16892_v39 }
 0x975   :  { %16882 = vst [vmem:[#allocation2_spill] sm:$0xff] %v13149_v38  ;;  %v4996_v56 = vadd.f32 %v4948_v6, %v4900_v27  ;;  %v13181_v27 = vpop.permute.xlu0 %3909  ;;  %v13183_v6 = vpop.f32.mrf.mxu3 }
 0x976   :  { %16893 = vst [vmem:[#allocation11_spill] sm:$0xff] %v13183_v6 }
 0x977   :  { %v5092_v58 = vadd.f32 %v5044_v16, %v4996_v56  ;;  %v16895_v56 = vld [vmem:[#allocation135_spill] sm:$0xff] }
 0x978   :  { %v4748_v16 = vmul.f32 %v16895_v56, %v16792_v24 }
 0x979   :  { %7368 = vset.pattern.permute.xlu2 %v16649_v59 }
 0x97a   :  { %3925 = vperm.xlu2 %7368, %v16876_v28   ;;  %7376 = vset.pattern.permute.xlu1 %v16502_v5 }
 0x97b   :  { %4345 = vperm.xlu1 %7376, %v16868_v3   ;;  %v13169_v55 = vpop.permute.xlu1 %4517 }
 0x97c   :  { %16888 = vst [vmem:[#allocation3_spill] sm:$0xff] %v13169_v55  ;;  %v5140_v26 = vmul.f32 %v13169_v55, %v16565_v18  ;;  %v4796_v55 = vmul.f32 %v13181_v27, %v16877_v2 }
 0x97d   :  { %v13171_v37 = vpop.permute.xlu2 %4329  ;;  %v13209_v0 = vpop.f32.mrf.mxu3 }
 0x97e   :  { %16889 = vst [vmem:[#allocation226_spill] sm:$0xff] %v13171_v37  ;;  %v5045_v22 = vmul.f32 %v13171_v37, %v16891_v53  ;;  %v5188_v33 = vadd.f32 %v5140_v26, %v5092_v58  ;;  %v4892_v58 = vmul.f32 %v13115_v19, %v16794_v54  ;;  %v4844_v6 = vadd.f32 %v4796_v55, %v4748_v16 }
 0x97f   :  { %v5084_v55 = vmul.f32 %v13147_v34, %v16559_v29  ;;  %v16923_v34 = vld [vmem:[#allocation138_spill] sm:$0xff] }
 0x980   :  { %v5093_v8 = vadd.f32 %v5045_v22, %v4997_v48  ;;  %v16898_v48 = vld [vmem:[#allocation81_spill] sm:$0xff]  ;;  %v4940_v37 = vadd.f32 %v4892_v58, %v4844_v6 }
 0x981   :  { %v4893_v22 = vmul.f32 %v16898_v48, %v16887_v17 }
 0x982   :  { %v5189_v46 = vadd.f32 %v5141_v12, %v5093_v8  ;;  %7370 = vset.pattern.permute.xlu2 %v16491_v43  ;;  %v4845_v12 = vadd.f32 %v4797_v62, %v4749_v21 }
 0x983   :  { %3957 = vperm.xlu2 %7370, %v16872_v31   ;;  %4505 = vperm.xlu1 %7376, %v16864_v9   ;;  %v13198_v8 = vpop.permute.xlu1 %4681 }
 0x984   :  { %v5236_v57 = vpack.c.bf16 %v5189_v46, %v5188_v33  ;;  %16896 = vst [vmem:[#allocation295_spill] sm:$0xff] %v13198_v8  ;;  %v4989_v46 = vmul.f32 %v13134_v50, %v16560_v13  ;;  %v4988_v33 = vmul.f32 %v13149_v38, %v16728_v61  ;;  %v4941_v62 = vadd.f32 %v4893_v22, %v4845_v12  ;;  %v13285_v38 = vpop.permute.xlu0 %3937 }
 0x985   :  { %v13200_v26 = vpop.permute.xlu2 %4489  ;;  %16924 = vst [vmem:[#allocation308_spill] sm:$0xff] %v13285_v38 }
 0x986   :  { %16897 = vst [vmem:[#allocation296_spill] sm:$0xff] %v13200_v26  ;;  %7057 = vmatmul.msk.bf16.vlgmr.msrb.gmra.mxu1 %vm756_vm1, %v5236_v57  ;;  %v5085_v21 = vmul.f32 %v13200_v26, %v16891_v53  ;;  %v5037_v35 = vadd.f32 %v4989_v46, %v4941_v62  ;;  %v5036_v56 = vadd.f32 %v4988_v33, %v4940_v37  ;;  %v7207_v57 = vld [vmem:[%s15067_s1 + $0x108] sm:$0xff]  ;;  %v13229_v62 = vpop.f32.mrf.mxu3  ;;  %v16925_v53 = vld [vmem:[#allocation13_spill] sm:$0xff] }
 0x987   :  { %6221 = vmatpush.bf16.msrb.mxu0 %v7207_v57  ;;  %v5181_v37 = vmul.f32 %v13198_v8, %v16892_v39  ;;  %v16918_v8 = vld [vmem:[#allocation5_spill] sm:$0xff]  ;;  %v16919_v39 = vld [vmem:[#allocation215_spill] sm:$0xff] }
 0x988   :  { %v5133_v16 = vadd.f32 %v5085_v21, %v5037_v35  ;;  %v5132_v12 = vadd.f32 %v5084_v55, %v5036_v56  ;;  %v16901_v35 = vld [vmem:[#allocation107_spill] sm:$0xff] }
 0x989   :  { %v16905_v55 = vld [vmem:[#allocation115_spill] sm:$0xff] }
 0x98a   :  { %v5229_v46 = vadd.f32 %v5181_v37, %v5133_v16  ;;  %v16909_v37 = vld [vmem:[#allocation187_spill] sm:$0xff] }
 0x98b   :  { %4121 = vperm.xlu2 %7370, %v16864_v9   ;;  %7379 = vset.pattern.permute.xlu1 %v16516_v60 }
 0x98c   :  { %4693 = vperm.xlu1 %7379, %v16876_v28   ;;  %v13221_v6 = vpop.permute.xlu1 %3921 }
 0x98d   :  { %16899 = vst [vmem:[#allocation81_spill] sm:$0xff] %v13221_v6 }
 0x98e   :  { %v13223_v58 = vpop.permute.xlu2 %4677  ;;  %v13240_v57 = vpop.f32.mrf.mxu3 }
 0x98f   :  { %16900 = vst [vmem:[#allocation297_spill] sm:$0xff] %v13223_v58  ;;  %v5180_v22 = vmul.f32 %v13223_v58, %v16565_v18  ;;  %v4799_v58 = vmul.f32 %v13221_v6, %v16918_v8 }
 0x990   :  { %16904 = vst [vmem:[#allocation299_spill] sm:$0xff] %v13240_v57 }
 0x991   :  { %v5228_v33 = vadd.f32 %v5180_v22, %v5132_v12 }
 0x993   :  { %v5256_v26 = vpack.c.bf16 %v5229_v46, %v5228_v33  ;;  %7374 = vset.pattern.permute.xlu2 %v16496_v49 }
 0x994   :  { %4153 = vperm.xlu2 %7374, %v16868_v3   ;;  %7380 = vset.pattern.permute.xlu1 %v16649_v59 }
 0x995   :  { %7077 = vmatmul.msk.bf16.gmra.mxu3 %vm756_vm1, %v5256_v26  ;;  %3933 = vperm.xlu1 %7380, %v16901_v35   ;;  %v13236_v21 = vpop.permute.xlu1 %4109 }
 0x996   :  { %16902 = vst [vmem:[#allocation107_spill] sm:$0xff] %v13236_v21  ;;  %v13250_v26 = vpop.f32.mrf.mxu3 }
 0x997   :  { %v13238_v56 = vpop.permute.xlu2 %3917  ;;  %16908 = vst [vmem:[#allocation301_spill] sm:$0xff] %v13250_v26  ;;  %v16916_v26 = vld [vmem:[#allocation4_spill] sm:$0xff] }
 0x998   :  { %16903 = vst [vmem:[#allocation298_spill] sm:$0xff] %v13238_v56  ;;  %v4798_v57 = vmul.f32 %v13238_v56, %v16916_v26 }
 0x99c   :  { %7375 = vset.pattern.permute.xlu2 %v16502_v5 }
 0x99d   :  { %4341 = vperm.xlu2 %7375, %v16872_v31   ;;  %7383 = vset.pattern.permute.xlu1 %v16491_v43 }
 0x99e   :  { %3969 = vperm.xlu1 %7383, %v16905_v55   ;;  %v13246_v16 = vpop.permute.xlu1 %4141  ;;  %v13258_v46 = vpop.f32.mrf.mxu3 }
 0x99f   :  { %16906 = vst [vmem:[#allocation115_spill] sm:$0xff] %v13246_v16 }
 0x9a0   :  { %v13248_v59 = vpop.permute.xlu2 %3953  ;;  %16912 = vst [vmem:[#allocation303_spill] sm:$0xff] %v13258_v46  ;;  %v16917_v46 = vld [vmem:[#allocation142_spill] sm:$0xff] }
 0x9a1   :  { %16907 = vst [vmem:[#allocation300_spill] sm:$0xff] %v13248_v59 }
 0x9a5   :  { %4501 = vperm.xlu2 %7375, %v16876_v28  }
 0x9a6   :  { %4129 = vperm.xlu1 %7383, %v16909_v37   ;;  %v13268_v28 = vpop.f32.mrf.mxu3 }
 0x9a7   :  { %v13254_v12 = vpop.permute.xlu1 %4305  ;;  %16915 = vst [vmem:[#allocation306_spill] sm:$0xff] %v13268_v28  ;;  %v16922_v28 = vld [vmem:[#allocation27_spill] sm:$0xff] }
 0x9a8   :  { %16910 = vst [vmem:[#allocation187_spill] sm:$0xff] %v13254_v12  ;;  %v13256_v22 = vpop.permute.xlu2 %4113 }
 0x9a9   :  { %16911 = vst [vmem:[#allocation302_spill] sm:$0xff] %v13256_v22  ;;  %v4895_v29 = vmul.f32 %v13256_v22, %v16925_v53 }
 0x9ad   :  { %7378 = vset.pattern.permute.xlu2 %v16516_v60 }
 0x9ae   :  { %4537 = vperm.xlu2 %7378, %v16868_v3   ;;  %7385 = vset.pattern.permute.xlu1 %v16496_v49  ;;  %v4750_v3 = vmul.f32 %v16917_v46, %v16816_v25  ;;  %v4894_v46 = vmul.f32 %v13236_v21, %v16818_v51  ;;  %v13293_v19 = vpop.f32.mrf.mxu3 }
 0x9af   :  { %4317 = vperm.xlu1 %7385, %v16901_v35   ;;  %16926 = vst [vmem:[#allocation309_spill] sm:$0xff] %v13293_v19  ;;  %v16929_v19 = vld [vmem:[#allocation131_spill] sm:$0xff] }
 0x9b0   :  { %v13264_v31 = vpop.permute.xlu1 %4337  ;;  %v4846_v56 = vadd.f32 %v4798_v57, %v4750_v3  ;;  %v16927_v57 = vld [vmem:[#allocation150_spill] sm:$0xff] }
 0x9b1   :  { %16913 = vst [vmem:[#allocation304_spill] sm:$0xff] %v13264_v31  ;;  %v13266_v33 = vpop.permute.xlu2 %4301  ;;  %v4759_v3 = vmul.f32 %v16927_v57, %v16918_v8 }
 0x9b2   :  { %16914 = vst [vmem:[#allocation305_spill] sm:$0xff] %v13266_v33  ;;  %v4990_v6 = vmul.f32 %v13266_v33, %v16821_v14  ;;  %v4942_v47 = vadd.f32 %v4894_v46, %v4846_v56  ;;  %v4710_v33 = vmul.f32 %v16929_v19, %v16816_v25  ;;  %v4855_v46 = vmul.f32 %v13248_v59, %v16925_v53  ;;  %v13326_v53 = vpop.permute.xlu0 %4145 }
 0x9b3   :  { %v5183_v59 = vmul.f32 %v12978_v40, %v16584_v23  ;;  %16935 = vst [vmem:[#allocation312_spill] sm:$0xff] %v13326_v53 }
 0x9b4   :  { %v5038_v22 = vadd.f32 %v4990_v6, %v4942_v47  ;;  %v16934_v47 = vld [vmem:[#allocation239_spill] sm:$0xff] }
 0x9b5   :  { %v5086_v6 = vmul.f32 %v16934_v47, %v16582_v15 }
 0x9b6   :  { %4697 = vperm.xlu2 %7378, %v16864_v9   ;;  %v4751_v9 = vmul.f32 %v16923_v34, %v16922_v28  ;;  %v16928_v34 = vld [vmem:[#allocation208_spill] sm:$0xff] }
 0x9b7   :  { %7386 = vset.pattern.permute.xlu1 %v16502_v5 }
 0x9b8   :  { %4349 = vperm.xlu1 %7386, %v16919_v39   ;;  %v4847_v10 = vadd.f32 %v4799_v58, %v4751_v9  ;;  %v4758_v58 = vmul.f32 %v16928_v34, %v16916_v26  ;;  %v4991_v9 = vmul.f32 %v13254_v12, %v16578_v44  ;;  %v5134_v34 = vadd.f32 %v5086_v6, %v5038_v22  ;;  %v16999_v26 = vld [vmem:[#allocation229_spill] sm:$0xff] }
 0x9b9   :  { %v13279_v18 = vpop.permute.xlu1 %4525 }
 0x9ba   :  { %16920 = vst [vmem:[#allocation215_spill] sm:$0xff] %v13279_v18  ;;  %v13281_v50 = vpop.permute.xlu2 %4333  ;;  %v4943_v24 = vadd.f32 %v4895_v29, %v4847_v10  ;;  %v16931_v10 = vld [vmem:[#allocation258_spill] sm:$0xff]  ;;  %v4806_v25 = vadd.f32 %v4758_v58, %v4710_v33  ;;  %v4951_v33 = vmul.f32 %v13326_v53, %v16578_v44 }
 0x9bb   :  { %16921 = vst [vmem:[#allocation307_spill] sm:$0xff] %v13281_v50  ;;  %v4854_v56 = vmul.f32 %v16931_v10, %v16818_v51  ;;  %v4950_v10 = vmul.f32 %v13246_v16, %v16821_v14  ;;  %v16981_v16 = vld [vmem:[#allocation15_spill] sm:$0xff] }
 0x9bc   :  { %v5039_v19 = vadd.f32 %v4991_v9, %v4943_v24  ;;  %v5046_v24 = vmul.f32 %v13281_v50, %v16582_v15  ;;  %v16977_v50 = vld [vmem:[#allocation203_spill] sm:$0xff]  ;;  %v16987_v15 = vld [vmem:[#allocation249_spill] sm:$0xff] }
 0x9bd   :  { %v4902_v47 = vadd.f32 %v4854_v56, %v4806_v25 }
 0x9be   :  { %7382 = vset.pattern.permute.xlu2 %v16491_v43  ;;  %v16930_v43 = vld [vmem:[#allocation134_spill] sm:$0xff] }
 0x9bf   :  { %3965 = vperm.xlu2 %7382, %v16919_v39   ;;  %v4711_v29 = vmul.f32 %v16930_v43, %v16922_v28  ;;  %v4998_v58 = vadd.f32 %v4950_v10, %v4902_v47 }
 0x9c0   :  { %4513 = vperm.xlu1 %7386, %v16909_v37  }
 0x9c1   :  { %v13312_v21 = vpop.permute.xlu1 %4685  ;;  %v4807_v28 = vadd.f32 %v4759_v3, %v4711_v29  ;;  %v13333_v3 = vpop.f32.mrf.mxu3  ;;  %v5047_v29 = vmul.f32 %v13264_v31, %v16581_v11  ;;  %v5094_v22 = vadd.f32 %v5046_v24, %v4998_v58  ;;  %v16979_v31 = vld [vmem:[#allocation118_spill] sm:$0xff] }
 0x9c2   :  { %16932 = vst [vmem:[#allocation310_spill] sm:$0xff] %v13312_v21  ;;  %v13314_v57 = vpop.permute.xlu2 %4497  ;;  %v5182_v12 = vmul.f32 %v13312_v21, %v16587_v41 }
 0x9c3   :  { %16933 = vst [vmem:[#allocation311_spill] sm:$0xff] %v13314_v57  ;;  %v5087_v43 = vmul.f32 %v13314_v57, %v16581_v11  ;;  %v4903_v38 = vadd.f32 %v4855_v46, %v4807_v28 }
 0x9c4   :  { %v5230_v9 = vadd.f32 %v5182_v12, %v5134_v34  ;;  %16936 = vst [vmem:[#allocation313_spill] sm:$0xff] %v13333_v3  ;;  %v5142_v12 = vmul.f32 %v13279_v18, %v16587_v41  ;;  %v16958_v3 = vld [vmem:[#allocation31_spill] sm:$0xff] }
 0x9c5   :  { %v5135_v51 = vadd.f32 %v5087_v43, %v5039_v19  ;;  %v4999_v19 = vadd.f32 %v4951_v33, %v4903_v38 }
 0x9c6   :  { %v5190_v43 = vadd.f32 %v5142_v12, %v5094_v22 }
 0x9c7   :  { %v5231_v21 = vadd.f32 %v5183_v59, %v5135_v51  ;;  %4125 = vperm.xlu2 %7382, %v16901_v35   ;;  %v5095_v59 = vadd.f32 %v5047_v29, %v4999_v19 }
 0x9c8   :  { %7390 = vset.pattern.permute.xlu1 %v16516_v60 }
 0x9c9   :  { %v5257_v25 = vpack.c.bf16 %v5231_v21, %v5230_v9  ;;  %4545 = vperm.xlu1 %7390, %v16905_v55   ;;  %v13349_v38 = vpop.f32.mrf.mxu3 }
 0x9ca   :  { %v13339_v34 = vpop.permute.xlu1 %3929 }
 0x9cb   :  { %16937 = vst [vmem:[#allocation314_spill] sm:$0xff] %v13339_v34  ;;  %7078 = vmatmul.msk.bf16.gmra.mxu3 %vm756_vm1, %v5257_v25  ;;  %v13342_v51 = vpop.permute.xlu2 %4529  ;;  %v16949_v25 = vld [vmem:[#allocation10_spill] sm:$0xff] }
 0x9cc   :  { %16938 = vst [vmem:[#allocation315_spill] sm:$0xff] %v13342_v51  ;;  %v5143_v28 = vmul.f32 %v13342_v51, %v16584_v23 }
 0x9ce   :  { %v5191_v10 = vadd.f32 %v5143_v28, %v5095_v59  ;;  %v16952_v59 = vld [vmem:[#allocation205_spill] sm:$0xff]  ;;  %v16954_v28 = vld [vmem:[#allocation164_spill] sm:$0xff] }
 0x9cf   :  { %7384 = vset.pattern.permute.xlu2 %v16496_v49  ;;  %v4761_v12 = vmul.f32 %v16952_v59, %v16591_v20 }
 0x9d0   :  { %v5237_v21 = vpack.c.bf16 %v5191_v10, %v5190_v43  ;;  %4161 = vperm.xlu2 %7384, %v16905_v55   ;;  %v5494_v10 = vmax.f32 %v13062_v36, 0.0  ;;  %v16963_v36 = vld [vmem:[#allocation152_spill] sm:$0xff] }
 0x9d1   :  { %v13358_v47 = vpop.f32.mrf.mxu3 }
 0x9d2   :  { %7058 = vmatmul.msk.bf16.gmra.mxu1 %vm756_vm1, %v5237_v21 }
 0x9d3   :  { %v13353_v56 = vpop.permute.xlu1 %3961 }
 0x9d4   :  { %16939 = vst [vmem:[#allocation316_spill] sm:$0xff] %v13353_v56  ;;  %v13355_v46 = vpop.permute.xlu2 %3925 }
 0x9d5   :  { %16940 = vst [vmem:[#allocation317_spill] sm:$0xff] %v13355_v46 }
 0x9d8   :  { %4321 = vperm.xlu2 %7384, %v16909_v37  }
 0x9d9   :  { %v13366_v49 = vpop.f32.mrf.mxu3 }
 0x9da   :  { %16943 = vst [vmem:[#allocation320_spill] sm:$0xff] %v13366_v49 }
 0x9dc   :  { %v13360_v6 = vpop.permute.xlu1 %4149 }
 0x9dd   :  { %16941 = vst [vmem:[#allocation318_spill] sm:$0xff] %v13360_v6  ;;  %v13362_v24 = vpop.permute.xlu2 %3957 }
 0x9de   :  { %16942 = vst [vmem:[#allocation319_spill] sm:$0xff] %v13362_v24 }
 0x9e0   :  { %7388 = vset.pattern.permute.xlu2 %v16502_v5  ;;  %v5486_v5 = vmax.f32 %v16949_v25, 0.0  ;;  %v16957_v25 = vld [vmem:[#allocation116_spill] sm:$0xff] }
 0x9e1   :  { %4509 = vperm.xlu2 %7388, %v16901_v35   ;;  %v13374_v33 = vpop.f32.mrf.mxu3  ;;  %v16950_v35 = vld [vmem:[#allocation102_spill] sm:$0xff] }
 0x9e2   :  { %16946 = vst [vmem:[#allocation323_spill] sm:$0xff] %v13374_v33  ;;  %v5487_v19 = vmax.f32 %v16950_v35, 0.0  ;;  %v13390_v43 = vadd.f32 %v5486_v5, %v16877_v2  ;;  %v16959_v35 = vld [vmem:[#allocation114_spill] sm:$0xff]  ;;  %v16962_v2 = vld [vmem:[#allocation144_spill] sm:$0xff] }
 0x9e3   :  { %v4713_v40 = vmul.f32 %v16959_v35, %v16958_v3  ;;  %v13407_v5 = vmul.f32 %v16962_v2, %v16958_v3  ;;  %v16965_v35 = vld [vmem:[#allocation161_spill] sm:$0xff]  ;;  %v16988_v33 = vld [vmem:[#allocation250_spill] sm:$0xff] }
 0x9e4   :  { %v13368_v55 = vpop.permute.xlu1 %4309  ;;  %16955 = vst [vmem:[#allocation102_spill] sm:$0xff] %v13390_v43  ;;  %v13403_v59 = vadd.f32 %v5487_v19, %v16879_v45  ;;  %v13420_v45 = vmul.f32 %v13390_v43, %v16965_v35  ;;  %v16966_v19 = vld [vmem:[#allocation204_spill] sm:$0xff]  ;;  %v16970_v35 = vld [vmem:[#allocation65_spill] sm:$0xff] }
 0x9e5   :  { %16944 = vst [vmem:[#allocation321_spill] sm:$0xff] %v13368_v55  ;;  %v13370_v9 = vpop.permute.xlu2 %4121  ;;  %v4809_v23 = vadd.f32 %v4761_v12, %v4713_v40  ;;  %v13424_v2 = vmul.f32 %v13390_v43, %v16966_v19  ;;  %v5502_v40 = vmax.f32 %v13209_v0, 0.0  ;;  %v16968_v12 = vld [vmem:[#allocation79_spill] sm:$0xff]  ;;  %v16971_v0 = vld [vmem:[#allocation162_spill] sm:$0xff]  ;;  %v16972_v19 = vld [vmem:[#allocation261_spill] sm:$0xff] }
 0x9e6   :  { %16945 = vst [vmem:[#allocation322_spill] sm:$0xff] %v13370_v9 }
 0x9e7   :  { %16961 = vst [vmem:[#allocation328_spill] sm:$0xff] %v13403_v59 }
 0x9e9   :  { %7389 = vset.pattern.permute.xlu2 %v16516_v60  ;;  %v13383_v22 = vpop.f32.mrf.mxu3  ;;  %v16953_v60 = vld [vmem:[#allocation6_spill] sm:$0xff] }
 0x9ea   :  { %4541 = vperm.xlu2 %7389, %v16919_v39   ;;  %16951 = vst [vmem:[#allocation10_spill] sm:$0xff] %v13383_v22  ;;  %v4760_v39 = vmul.f32 %v16954_v28, %v16953_v60  ;;  %v5495_v22 = vmax.f32 %v13086_v4, 0.0  ;;  %v4752_v28 = vmul.f32 %v16963_v36, %v16596_v52  ;;  %v13416_v4 = vmul.f32 %v13390_v43, %v16878_v63 }
 0x9ec   :  { %v13427_v3 = vadd.f32 %v5495_v22, %v16887_v17  ;;  %v13446_v17 = vmul.f32 %v13403_v59, %v16970_v35  ;;  %v13450_v22 = vmul.f32 %v13403_v59, %v16971_v0  ;;  %v13467_v35 = vmul.f32 %v13390_v43, %v13181_v27 }
 0x9ed   :  { %v13376_v58 = vpop.permute.xlu1 %4345  ;;  %v4857_v27 = vmul.f32 %v13353_v56, %v16981_v16 }
 0x9ee   :  { %16947 = vst [vmem:[#allocation324_spill] sm:$0xff] %v13376_v58  ;;  %v13378_v29 = vpop.permute.xlu2 %4153  ;;  %v13510_v53 = vmul.f32 %v13427_v3, %v16898_v48  ;;  %v4800_v48 = vmul.f32 %v13355_v46, %v16953_v60 }
 0x9ef   :  { %16948 = vst [vmem:[#allocation325_spill] sm:$0xff] %v13378_v29  ;;  %v4905_v44 = vadd.f32 %v4857_v27, %v4809_v23  ;;  %v7206_v23 = vld [vmem:[%s15067_s1 + $0x100] sm:$0xff]  ;;  %v16998_v27 = vld [vmem:[#allocation251_spill] sm:$0xff] }
 0x9f0   :  { %16967 = vst [vmem:[#allocation161_spill] sm:$0xff] %v13427_v3  ;;  %6222 = vmatpush.bf16.msrb.mxu0 %v7206_v23  ;;  %v17014_v23 = vld [vmem:[#allocation104_spill] sm:$0xff] }
 0x9f1   :  { %v13469_v0 = vpop.f32.mrf.mxu3 }
 0x9f2   :  { %4705 = vperm.xlu2 %7389, %v16909_v37   ;;  %v4712_v37 = vmul.f32 %v16957_v25, %v16596_v52  ;;  %v13412_v25 = vadd.f32 %v5494_v10, %v16794_v54  ;;  %v13432_v54 = vmul.f32 %v13390_v43, %v16968_v12  ;;  %v4856_v10 = vmul.f32 %v13362_v24, %v16841_v1  ;;  %v13458_v24 = vpop.permute.xlu0 %4313  ;;  %v16975_v52 = vld [vmem:[#allocation200_spill] sm:$0xff] }
 0x9f3   :  { %v4896_v12 = vmul.f32 %v16972_v19, %v16841_v1  ;;  %16974 = vst [vmem:[#allocation204_spill] sm:$0xff] %v13458_v24  ;;  %v13463_v57 = vmul.f32 %v13403_v59, %v16975_v52  ;;  %v13484_v52 = vadd.f32 %v5502_v40, %v16728_v61  ;;  %v16986_v40 = vld [vmem:[#allocation19_spill] sm:$0xff] }
 0x9f4   :  { %v4808_v18 = vadd.f32 %v4760_v39, %v4712_v37  ;;  %16964 = vst [vmem:[#allocation329_spill] sm:$0xff] %v13412_v25  ;;  %v16969_v39 = vld [vmem:[#allocation196_spill] sm:$0xff]  ;;  %v13442_v37 = vmul.f32 %v13403_v59, %v16880_v32  ;;  %v5503_v32 = vmax.f32 %v13229_v62, 0.0  ;;  %v13473_v19 = vmul.f32 %v13412_v25, %v16977_v50  ;;  %v16984_v50 = vld [vmem:[#allocation214_spill] sm:$0xff] }
 0x9f5   :  { %v13393_v21 = vpop.permute.xlu1 %4505  ;;  %v13436_v63 = vmul.f32 %v13390_v43, %v16969_v39  ;;  %v16973_v39 = vld [vmem:[#allocation271_spill] sm:$0xff]  ;;  %16976 = vst [vmem:[#allocation79_spill] sm:$0xff] %v13469_v0  ;;  %v13481_v62 = vmul.f32 %v13412_v25, %v16979_v31  ;;  %v13494_v41 = vmul.f32 %v13427_v3, %v16984_v50  ;;  %v13502_v31 = vmul.f32 %v13458_v24, %v16688_v30  ;;  %v16991_v24 = vld [vmem:[#allocation38_spill] sm:$0xff] }
 0x9f6   :  { %16956 = vst [vmem:[#allocation326_spill] sm:$0xff] %v13393_v21  ;;  %v13456_v36 = vmul.f32 %v16973_v39, %v16608_v7  ;;  %v16978_v39 = vld [vmem:[#allocation193_spill] sm:$0xff]  ;;  %v4904_v61 = vadd.f32 %v4856_v10, %v4808_v18  ;;  %v13506_v56 = vmul.f32 %v13427_v3, %v16986_v40  ;;  %v5750_v50 = vmul.f32 %v13412_v25, %v16987_v15  ;;  %v16990_v10 = vld [vmem:[#allocation95_spill] sm:$0xff] }
 0x9f7   :  { %v13400_v51 = vpop.permute.xlu2 %4341  ;;  %v13477_v1 = vmul.f32 %v13412_v25, %v16978_v39  ;;  %16980 = vst [vmem:[#allocation196_spill] sm:$0xff] %v13484_v52  ;;  %v16985_v39 = vld [vmem:[#allocation183_spill] sm:$0xff]  ;;  %v13519_v49 = vadd.f32 %v5503_v32, %v16560_v13  ;;  %v4953_v18 = vmul.f32 %v13378_v29, %v16688_v30  ;;  %v13525_v40 = vmul.f32 %v13427_v3, %v16990_v10  ;;  %v16992_v13 = vld [vmem:[#allocation56_spill] sm:$0xff]  ;;  %v16996_v10 = vld [vmem:[#allocation202_spill] sm:$0xff] }
 0x9f8   :  { %16960 = vst [vmem:[#allocation327_spill] sm:$0xff] %v13400_v51  ;;  %v13498_v11 = vmul.f32 %v13427_v3, %v16985_v39  ;;  %v13516_v39 = vmul.f32 %v13403_v59, %v16988_v33  ;;  %v4952_v15 = vmul.f32 %v13360_v6, %v16601_v42  ;;  %v5048_v33 = vmul.f32 %v13400_v51, %v16991_v24  ;;  %v16994_v29 = vld [vmem:[#allocation60_spill] sm:$0xff] }
 0x9f9   :  { %16989 = vst [vmem:[#allocation200_spill] sm:$0xff] %v13519_v49  ;;  %v13535_v32 = vmul.f32 %v13484_v52, %v16992_v13  ;;  %v13539_v30 = vmul.f32 %v13484_v52, %v16994_v29  ;;  %v13543_v8 = vmul.f32 %v13484_v52, %v16996_v10  ;;  %v4801_v6 = vmul.f32 %v13339_v34, %v16591_v20 }
 0x9fa   :  { %v5000_v46 = vadd.f32 %v4952_v15, %v4904_v61  ;;  %v5846_v13 = vmul.f32 %v13484_v52, %v16998_v27  ;;  %v5001_v51 = vadd.f32 %v4953_v18, %v4905_v44  ;;  %v13554_v29 = vmul.f32 %v13519_v49, %v16999_v26  ;;  %v13564_v15 = vpop.f32.mrf.mxu3  ;;  %v17006_v44 = vld [vmem:[#allocation20_spill] sm:$0xff] }
 0x9fb   :  { %16993 = vst [vmem:[#allocation203_spill] sm:$0xff] %v13535_v32  ;;  %v4897_v34 = vmul.f32 %v13370_v9, %v16981_v16  ;;  %v17007_v26 = vld [vmem:[#allocation288_spill] sm:$0xff] }
 0x9fc   :  { %16995 = vst [vmem:[#allocation193_spill] sm:$0xff] %v13539_v30  ;;  %v17001_v30 = vld [vmem:[#allocation63_spill] sm:$0xff]  ;;  %v5096_v27 = vadd.f32 %v5048_v33, %v5000_v46  ;;  %v5718_v20 = vmul.f32 %v13412_v25, %v17007_v26  ;;  %v17013_v46 = vld [vmem:[#allocation293_spill] sm:$0xff]  ;;  %v4849_v33 = vadd.f32 %v4801_v6, %v13407_v5 }
 0x9fd   :  { %16997 = vst [vmem:[#allocation118_spill] sm:$0xff] %v13543_v8  ;;  %v13558_v10 = vmul.f32 %v13519_v49, %v17001_v30  ;;  %v17003_v8 = vld [vmem:[#allocation221_spill] sm:$0xff] }
 0x9fe   :  { %v13488_v43 = vpop.permute.xlu1 %4693  ;;  %17000 = vst [vmem:[#allocation214_spill] sm:$0xff] %v13554_v29  ;;  %v13562_v61 = vmul.f32 %v13519_v49, %v17003_v8  ;;  %v17008_v29 = vld [vmem:[#allocation101_spill] sm:$0xff] }
 0x9ff   :  { %16982 = vst [vmem:[#allocation65_spill] sm:$0xff] %v13488_v43  ;;  %v13490_v0 = vpop.permute.xlu2 %4501  ;;  %v5758_v30 = vmul.f32 %v13412_v25, %v17008_v29  ;;  %v4992_v25 = vmul.f32 %v13368_v55, %v16601_v42  ;;  %v17019_v55 = vld [vmem:[#allocation135_spill] sm:$0xff] }
 0xa00   :  { %16983 = vst [vmem:[#allocation162_spill] sm:$0xff] %v13490_v0  ;;  %v5088_v5 = vmul.f32 %v13490_v0, %v16991_v24  ;;  %v17198_v0 = vld [vmem:[#allocation305_spill] sm:$0xff]  ;;  %v17202_v24 = vld [vmem:[#allocation119_spill] sm:$0xff] }
 0xa01   :  { %17002 = vst [vmem:[#allocation183_spill] sm:$0xff] %v13558_v10  ;;  %v17009_v10 = vld [vmem:[#allocation39_spill] sm:$0xff] }
 0xa02   :  { %17004 = vst [vmem:[#allocation19_spill] sm:$0xff] %v13562_v61  ;;  %v5049_v8 = vmul.f32 %v13376_v58, %v17009_v10  ;;  %v17010_v61 = vld [vmem:[#allocation94_spill] sm:$0xff]  ;;  %v17017_v58 = vld [vmem:[#allocation59_spill] sm:$0xff] }
 0xa03   :  { %v5358_v14 = vpop.f32.mrf.mxu1  ;;  %17005 = vst [vmem:[#allocation249_spill] sm:$0xff] %v13564_v15 }
 0xa04   :  { %v5478_v60 = vmax.f32 %v5358_v14, 0.0  ;;  %v4848_v14 = vadd.f32 %v4800_v48, %v4752_v28  ;;  %v13577_v28 = vmul.f32 %v13519_v49, %v17010_v61  ;;  %v17012_v48 = vld [vmem:[#allocation289_spill] sm:$0xff]  ;;  %v5097_v61 = vadd.f32 %v5049_v8, %v5001_v51 }
 0xa05   :  { %v13581_v15 = vmul.f32 %v13403_v59, %v17012_v48  ;;  %v17018_v48 = vld [vmem:[#allocation169_spill] sm:$0xff]  ;;  %v5510_v8 = vmax.f32 %v13349_v38, 0.0 }
 0xa06   :  { %v5526_v18 = vadd.f32 %v5478_v60, %v17006_v44  ;;  %17011 = vst [vmem:[#allocation250_spill] sm:$0xff] %v13577_v28  ;;  %v5814_v60 = vmul.f32 %v13484_v52, %v17013_v46  ;;  %v4944_v16 = vadd.f32 %v4896_v12, %v4848_v14  ;;  %v4945_v28 = vadd.f32 %v4897_v34, %v4849_v33 }
 0xa07   :  { %v13587_v26 = vpop.permute.xlu1 %3933  ;;  %v5192_v46 = vadd.f32 %v13456_v36, %v5096_v27  ;;  %v5511_v33 = vmax.f32 %v13358_v47, 0.0 }
 0xa08   :  { %v5574_v44 = vmul.f32 %v5526_v18, %v17014_v23  ;;  %17015 = vst [vmem:[#allocation95_spill] sm:$0xff] %v13587_v26  ;;  %v13589_v29 = vpop.permute.xlu2 %4537  ;;  %v5606_v59 = vmul.f32 %v5526_v18, %v17018_v48  ;;  %v5614_v51 = vmul.f32 %v5526_v18, %v17019_v55  ;;  %v5089_v48 = vmul.f32 %v13393_v21, %v17009_v10  ;;  %v17021_v55 = vld [vmem:[#allocation89_spill] sm:$0xff]  ;;  %v17199_v10 = vld [vmem:[#allocation307_spill] sm:$0xff] }
 0xa09   :  { %17016 = vst [vmem:[#allocation56_spill] sm:$0xff] %v13589_v29  ;;  %v5145_v9 = vmul.f32 %v13589_v29, %v17017_v58  ;;  %v5040_v14 = vadd.f32 %v4992_v25, %v4944_v16  ;;  %v5815_v38 = vmul.f32 %v13519_v49, %v17021_v55  ;;  %v17022_v25 = vld [vmem:[#allocation291_spill] sm:$0xff]  ;;  %v17035_v55 = vld [vmem:[#allocation145_spill] sm:$0xff] }
 0xa0a   :  { %v5670_v6 = vadd.f32 %v13416_v4, %v5574_v44  ;;  %v5702_v32 = vadd.f32 %v13436_v63, %v5606_v59  ;;  %v5710_v4 = vadd.f32 %v13467_v35, %v5614_v51  ;;  %v17020_v44 = vld [vmem:[#allocation21_spill] sm:$0xff]  ;;  %v5719_v35 = vmul.f32 %v13427_v3, %v17022_v25  ;;  %v17037_v3 = vld [vmem:[#allocation2_spill] sm:$0xff]  ;;  %v17182_v29 = vld [vmem:[#allocation147_spill] sm:$0xff] }
 0xa0b   :  { %v5193_v23 = vadd.f32 %v5145_v9, %v5097_v61  ;;  %v5360_v26 = vpop.f32.mrf.mxu1  ;;  %v5041_v9 = vadd.f32 %v13502_v31, %v4945_v28  ;;  %v5136_v61 = vadd.f32 %v5088_v5, %v5040_v14  ;;  %v17024_v31 = vld [vmem:[#allocation143_spill] sm:$0xff] }
 0xa0c   :  { %v5479_v12 = vmax.f32 %v5360_v26, 0.0  ;;  %v5766_v34 = vadd.f32 %v5718_v20, %v5670_v6  ;;  %v5798_v27 = vadd.f32 %v5750_v50, %v5702_v32  ;;  %v5806_v16 = vadd.f32 %v5758_v30, %v5710_v4  ;;  %v13618_v50 = vpop.f32.mrf.mxu3  ;;  %v17028_v30 = vld [vmem:[#allocation125_spill] sm:$0xff] }
 0xa0d   :  { %v5238_v36 = vpack.c.bf16 %v5193_v23, %v5192_v46  ;;  %17023 = vst [vmem:[#allocation60_spill] sm:$0xff] %v13618_v50  ;;  %v5137_v47 = vadd.f32 %v5089_v48, %v5041_v9  ;;  %v5184_v46 = vmul.f32 %v13488_v43, %v16608_v7  ;;  %v5590_v5 = vmul.f32 %v5526_v18, %v17028_v30  ;;  %v17029_v23 = vld [vmem:[#allocation148_spill] sm:$0xff]  ;;  %v17183_v43 = vld [vmem:[#allocation239_spill] sm:$0xff] }
 0xa0e   :  { %v5527_v59 = vadd.f32 %v5479_v12, %v17020_v44  ;;  %v13609_v63 = vadd.f32 %v5814_v60, %v5766_v34  ;;  %v13614_v20 = vadd.f32 %v5846_v13, %v5798_v27  ;;  %v17026_v60 = vld [vmem:[#allocation231_spill] sm:$0xff]  ;;  %v5598_v51 = vmul.f32 %v5526_v18, %v17029_v23  ;;  %v17030_v12 = vld [vmem:[#allocation32_spill] sm:$0xff]  ;;  %v17032_v34 = vld [vmem:[#allocation33_spill] sm:$0xff] }
 0xa0f   :  { %7059 = vmatmul.msk.bf16.gmra.mxu1 %vm756_vm1, %v5238_v36  ;;  %v5582_v26 = vmul.f32 %v5526_v18, %v17026_v60  ;;  %v13633_v48 = vadd.f32 %v5510_v8, %v17030_v12  ;;  %v13636_v14 = vadd.f32 %v5511_v33, %v17032_v34  ;;  %v17034_v27 = vld [vmem:[#allocation98_spill] sm:$0xff]  ;;  %v5232_v9 = vadd.f32 %v5184_v46, %v5136_v61  ;;  %v17038_v23 = vld [vmem:[#allocation129_spill] sm:$0xff]  ;;  %v17145_v50 = vld [vmem:[#allocation76_spill] sm:$0xff] }
 0xa10   :  { %v5575_v32 = vmul.f32 %v5527_v59, %v17024_v31  ;;  %v13621_v28 = vpop.permute.xlu2 %4697  ;;  %v13626_v6 = vpop.permute.xlu1 %3969  ;;  %v5583_v4 = vmul.f32 %v5527_v59, %v17034_v27  ;;  %v5591_v25 = vmul.f32 %v5527_v59, %v17035_v55  ;;  %v17036_v31 = vld [vmem:[#allocation122_spill] sm:$0xff]  ;;  %v5854_v30 = vmul.f32 %v13484_v52, %v17037_v3  ;;  %v17045_v55 = vld [vmem:[#allocation149_spill] sm:$0xff]  ;;  %v17197_v7 = vld [vmem:[#allocation304_spill] sm:$0xff] }
 0xa11   :  { %17025 = vst [vmem:[#allocation202_spill] sm:$0xff] %v13621_v28  ;;  %v5185_v13 = vmul.f32 %v13621_v28, %v17017_v58  ;;  %v5599_v60 = vmul.f32 %v5527_v59, %v17036_v31  ;;  %v5678_v8 = vadd.f32 %v13420_v45, %v5582_v26  ;;  %v5607_v12 = vmul.f32 %v5527_v59, %v17038_v23  ;;  %v17039_v33 = vld [vmem:[#allocation226_spill] sm:$0xff]  ;;  %v17191_v58 = vld [vmem:[#allocation300_spill] sm:$0xff] }
 0xa12   :  { %17027 = vst [vmem:[#allocation251_spill] sm:$0xff] %v13626_v6  ;;  %v5671_v36 = vadd.f32 %v13442_v37, %v5575_v32  ;;  %v5911_v34 = vmul.f32 %v13636_v14, %v17039_v33  ;;  %v5686_v32 = vadd.f32 %v13424_v2, %v5590_v5  ;;  %v5694_v61 = vadd.f32 %v13432_v54, %v5598_v51  ;;  %v17040_v27 = vld [vmem:[#allocation146_spill] sm:$0xff] }
 0xa13   :  { %17031 = vst [vmem:[#allocation229_spill] sm:$0xff] %v13633_v48  ;;  %v5233_v44 = vadd.f32 %v5185_v13, %v5137_v47  ;;  %v5679_v46 = vadd.f32 %v13446_v17, %v5583_v4  ;;  %v5703_v13 = vadd.f32 %v13516_v39, %v5607_v12  ;;  %v5615_v3 = vmul.f32 %v5527_v59, %v17040_v27  ;;  %v17050_v23 = vld [vmem:[#allocation62_spill] sm:$0xff]  ;;  %v17057_v27 = vld [vmem:[#allocation296_spill] sm:$0xff] }
 0xa14   :  { %17033 = vst [vmem:[#allocation63_spill] sm:$0xff] %v13636_v14  ;;  %v5767_v18 = vadd.f32 %v5719_v35, %v5671_v36  ;;  %v17041_v35 = vld [vmem:[#allocation217_spill] sm:$0xff]  ;;  %v5687_v26 = vadd.f32 %v13450_v22, %v5591_v25  ;;  %v5695_v36 = vadd.f32 %v13463_v57, %v5599_v60  ;;  %v5774_v54 = vadd.f32 %v13473_v19, %v5678_v8  ;;  %v17047_v60 = vld [vmem:[#allocation158_spill] sm:$0xff] }
 0xa15   :  { %v5258_v37 = vpack.c.bf16 %v5233_v44, %v5232_v9  ;;  %v5950_v45 = vmul.f32 %v13633_v48, %v17041_v35  ;;  %v5902_v9 = vadd.f32 %v5854_v30, %v5806_v16  ;;  %v5799_v17 = vadd.f32 %v13525_v40, %v5703_v13  ;;  %v17044_v16 = vld [vmem:[#allocation112_spill] sm:$0xff]  ;;  %v17046_v25 = vld [vmem:[#allocation53_spill] sm:$0xff]  ;;  %v17051_v33 = vld [vmem:[#allocation126_spill] sm:$0xff] }
 0xa16   :  { %v5863_v47 = vadd.f32 %v5815_v38, %v5767_v18  ;;  %v5711_v39 = vadd.f32 %v13581_v15, %v5615_v3  ;;  %v5782_v4 = vadd.f32 %v13477_v1, %v5686_v32  ;;  %v5790_v22 = vadd.f32 %v13481_v62, %v5694_v61  ;;  %v17048_v18 = vld [vmem:[#allocation43_spill] sm:$0xff]  ;;  %v17054_v61 = vld [vmem:[#allocation193_spill] sm:$0xff]  ;;  %v17058_v35 = vld [vmem:[#allocation214_spill] sm:$0xff] }
 0xa17   :  { %7079 = vmatmul.msk.bf16.gmra.mxu3 %vm756_vm1, %v5258_v37  ;;  %v5998_v57 = vadd.f32 %v5950_v45, %v5902_v9  ;;  %v5855_v44 = vmul.f32 %v13519_v49, %v17044_v16  ;;  %v5910_v19 = vmul.f32 %v13633_v48, %v17045_v55  ;;  %v5775_v40 = vadd.f32 %v13494_v41, %v5679_v46  ;;  %v17055_v46 = vld [vmem:[#allocation210_spill] sm:$0xff]  ;;  %v17063_v55 = vld [vmem:[#allocation252_spill] sm:$0xff] }
 0xa18   :  { %v5458_v2 = vpop.f32.mrf.mxu3  ;;  %v13658_v5 = vadd.f32 %v5911_v34, %v5863_v47  ;;  %v13663_v59 = vpop.permute.xlu1 %4129  ;;  %v5918_v15 = vmul.f32 %v13633_v48, %v17046_v25  ;;  %v5783_v31 = vadd.f32 %v13498_v11, %v5687_v26  ;;  %v5926_v30 = vmul.f32 %v13633_v48, %v17047_v60  ;;  %v17052_v34 = vld [vmem:[#allocation253_spill] sm:$0xff]  ;;  %v17053_v11 = vld [vmem:[#allocation203_spill] sm:$0xff]  ;;  %v17059_v26 = vld [vmem:[#allocation228_spill] sm:$0xff] }
 0xa19   :  { %17042 = vst [vmem:[#allocation221_spill] sm:$0xff] %v13663_v59  ;;  %v5518_v38 = vmax.f32 %v5458_v2, 0.0  ;;  %v13665_v51 = vpop.permute.xlu2 %3965  ;;  %v5791_v1 = vadd.f32 %v13506_v56, %v5695_v36  ;;  %v5807_v62 = vadd.f32 %v13510_v53, %v5711_v39  ;;  %v5919_v12 = vmul.f32 %v13636_v14, %v17050_v23  ;;  %v17056_v53 = vld [vmem:[#allocation118_spill] sm:$0xff]  ;;  %v17060_v2 = vld [vmem:[#allocation183_spill] sm:$0xff]  ;;  %v17118_v49 = vld [vmem:[#allocation12_spill] sm:$0xff] }
 0xa1a   :  { %17043 = vst [vmem:[#allocation20_spill] sm:$0xff] %v13665_v51  ;;  %v5934_v41 = vmul.f32 %v13633_v48, %v17051_v33  ;;  %v5942_v37 = vmul.f32 %v13633_v48, %v17052_v34  ;;  %v5870_v32 = vadd.f32 %v17053_v11, %v5774_v54  ;;  %v5878_v47 = vadd.f32 %v17054_v61, %v5782_v4  ;;  %v17062_v16 = vld [vmem:[#allocation250_spill] sm:$0xff] }
 0xa1b   :  { %v13682_v8 = vadd.f32 %v5518_v38, %v17048_v18  ;;  %v5927_v56 = vmul.f32 %v13636_v14, %v17055_v46  ;;  %v5886_v13 = vadd.f32 %v17056_v53, %v5790_v22  ;;  %v5951_v3 = vmul.f32 %v13636_v14, %v17057_v27  ;;  %v17061_v38 = vld [vmem:[#allocation19_spill] sm:$0xff]  ;;  %v17068_v46 = vld [vmem:[#allocation176_spill] sm:$0xff] }
 0xa1c   :  { %v5871_v45 = vadd.f32 %v17058_v35, %v5775_v40  ;;  %v5935_v36 = vmul.f32 %v13636_v14, %v17059_v26  ;;  %v5903_v9 = vadd.f32 %v5855_v44, %v5807_v62  ;;  %v5879_v39 = vadd.f32 %v17060_v2, %v5783_v31  ;;  %v17064_v18 = vld [vmem:[#allocation3_spill] sm:$0xff]  ;;  %v17065_v40 = vld [vmem:[#allocation168_spill] sm:$0xff] }
 0xa1d   :  { %17049 = vst [vmem:[#allocation288_spill] sm:$0xff] %v13682_v8  ;;  %v5887_v54 = vadd.f32 %v17061_v38, %v5791_v1  ;;  %v5895_v4 = vadd.f32 %v17062_v16, %v5799_v17  ;;  %v5943_v25 = vmul.f32 %v13636_v14, %v17063_v55  ;;  %v5958_v22 = vadd.f32 %v5910_v19, %v13609_v63  ;;  %v17069_v63 = vld [vmem:[#allocation163_spill] sm:$0xff]  ;;  %v17070_v35 = vld [vmem:[#allocation44_spill] sm:$0xff]  ;;  %v17115_v14 = vld [vmem:[#allocation17_spill] sm:$0xff] }
 0xa1e   :  { %v6006_v23 = vmul.f32 %v13682_v8, %v17064_v18  ;;  %v6014_v33 = vmul.f32 %v13682_v8, %v17065_v40  ;;  %v5999_v34 = vadd.f32 %v5951_v3, %v5903_v9  ;;  %v5966_v31 = vadd.f32 %v5918_v15, %v5870_v32  ;;  %v17074_v32 = vld [vmem:[#allocation297_spill] sm:$0xff]  ;;  %v17076_v38 = vld [vmem:[#allocation52_spill] sm:$0xff] }
 0xa1f   :  { %v5974_v1 = vadd.f32 %v5926_v30, %v5878_v47  ;;  %v5982_v11 = vadd.f32 %v5934_v41, %v5886_v13  ;;  %v5967_v61 = vadd.f32 %v5919_v12, %v5871_v45  ;;  %v6022_v53 = vmul.f32 %v13682_v8, %v17068_v46  ;;  %v17073_v41 = vld [vmem:[#allocation255_spill] sm:$0xff] }
 0xa20   :  { %v5460_v60 = vpop.f32.mrf.mxu3  ;;  %v6030_v19 = vmul.f32 %v13682_v8, %v17069_v63  ;;  %v5990_v27 = vadd.f32 %v5942_v37, %v13614_v20  ;;  %v5975_v3 = vadd.f32 %v5927_v56, %v5879_v39  ;;  %v5983_v9 = vadd.f32 %v5935_v36, %v5887_v54  ;;  %v17075_v13 = vld [vmem:[#allocation263_spill] sm:$0xff]  ;;  %v17077_v37 = vld [vmem:[#allocation72_spill] sm:$0xff]  ;;  %v17078_v36 = vld [vmem:[#allocation230_spill] sm:$0xff] }
 0xa21   :  { %v5519_v44 = vmax.f32 %v5460_v60, 0.0  ;;  %v13710_v62 = vpop.permute.xlu2 %4125  ;;  %v13712_v17 = vpop.permute.xlu1 %4317  ;;  %v5991_v2 = vadd.f32 %v5943_v25, %v5895_v4  ;;  %v6054_v15 = vadd.f32 %v6006_v23, %v5958_v22  ;;  %v13722_v30 = vadd.f32 %v6014_v33, %v5966_v31  ;;  %v17081_v4 = vld [vmem:[#allocation254_spill] sm:$0xff]  ;;  %v17082_v25 = vld [vmem:[#allocation295_spill] sm:$0xff] }
 0xa22   :  { %17066 = vst [vmem:[#allocation101_spill] sm:$0xff] %v13710_v62  ;;  %v6038_v12 = vmul.f32 %v13682_v8, %v17073_v41  ;;  %v6046_v47 = vmul.f32 %v13682_v8, %v17074_v32  ;;  %v13736_v54 = vadd.f32 %v6022_v53, %v5974_v1  ;;  %v13738_v16 = vadd.f32 %v6030_v19, %v5982_v11  ;;  %v7209_v46 = vld [vmem:[%s15067_s1 + $0x148] sm:$0xff]  ;;  %v17096_v41 = vld [vmem:[#allocation9_spill] sm:$0xff] }
 0xa23   :  { %17067 = vst [vmem:[#allocation94_spill] sm:$0xff] %v13712_v17  ;;  %v13720_v26 = vadd.f32 %v5519_v44, %v17070_v35  ;;  %6521 = vmatpush.bf16.msrb.mxu2 %v7209_v46 }
 0xa24   :  { %17072 = vst [vmem:[#allocation293_spill] sm:$0xff] %v13722_v30  ;;  %v13751_v33 = vadd.f32 %v6038_v12, %v5990_v27  ;;  %v13755_v31 = vadd.f32 %v6046_v47, %v5998_v57  ;;  %v13777_v27 = vpop.permute.xlu0 %4157  ;;  %v17097_v12 = vld [vmem:[#allocation159_spill] sm:$0xff]  ;;  %v17098_v47 = vld [vmem:[#allocation8_spill] sm:$0xff]  ;;  %v17129_v30 = vld [vmem:[#allocation194_spill] sm:$0xff] }
 0xa25   :  { %17071 = vst [vmem:[#allocation289_spill] sm:$0xff] %v13720_v26  ;;  %v6007_v45 = vmul.f32 %v13720_v26, %v17075_v13  ;;  %v6015_v20 = vmul.f32 %v13720_v26, %v17076_v38  ;;  %v6023_v56 = vmul.f32 %v13720_v26, %v17077_v37  ;;  %v6031_v39 = vmul.f32 %v13720_v26, %v17078_v36  ;;  %v17099_v13 = vld [vmem:[#allocation103_spill] sm:$0xff]  ;;  %v17103_v36 = vld [vmem:[#allocation34_spill] sm:$0xff] }
 0xa26   :  { %17079 = vst [vmem:[#allocation104_spill] sm:$0xff] %v13736_v54  ;;  %v6039_v55 = vmul.f32 %v13720_v26, %v17081_v4  ;;  %v6047_v60 = vmul.f32 %v13720_v26, %v17082_v25  ;;  %v4763_v32 = vmul.f32 %v17097_v12, %v17096_v41  ;;  %v17102_v37 = vld [vmem:[#allocation223_spill] sm:$0xff]  ;;  %v17113_v26 = vld [vmem:[#allocation308_spill] sm:$0xff] }
 0xa27   :  { %17080 = vst [vmem:[#allocation169_spill] sm:$0xff] %v13738_v16  ;;  %v6055_v22 = vadd.f32 %v6007_v45, %v13658_v5  ;;  %v13745_v18 = vadd.f32 %v6015_v20, %v5967_v61  ;;  %v13747_v23 = vadd.f32 %v6023_v56, %v5975_v3  ;;  %v13749_v40 = vadd.f32 %v6031_v39, %v5983_v9  ;;  %v17094_v3 = vld [vmem:[#allocation264_spill] sm:$0xff]  ;;  %v17101_v20 = vld [vmem:[#allocation35_spill] sm:$0xff]  ;;  %v17104_v39 = vld [vmem:[#allocation137_spill] sm:$0xff] }
 0xa28   :  { %17086 = vst [vmem:[#allocation291_spill] sm:$0xff] %v13751_v33  ;;  %v13753_v44 = vadd.f32 %v6039_v55, %v5991_v2  ;;  %v13757_v1 = vadd.f32 %v6047_v60, %v5999_v34  ;;  %v5488_v9 = vmax.f32 %v17094_v3, 0.0  ;;  %v17095_v2 = vld [vmem:[#allocation268_spill] sm:$0xff]  ;;  %v4762_v45 = vmul.f32 %v17099_v13, %v17098_v47  ;;  %v17107_v60 = vld [vmem:[#allocation287_spill] sm:$0xff] }
 0xa29   :  { %17083 = vst [vmem:[#allocation135_spill] sm:$0xff] %v13745_v18  ;;  %v6102_v11 = vpack.c.bf16 %v6055_v22, %v6054_v15  ;;  %v5489_v15 = vmax.f32 %v17095_v2, 0.0  ;;  %v4715_v56 = vmul.f32 %v17102_v37, %v17101_v20  ;;  %v4714_v4 = vmul.f32 %v17104_v39, %v17103_v36  ;;  %v17105_v55 = vld [vmem:[#allocation4_spill] sm:$0xff]  ;;  %v17111_v2 = vld [vmem:[#allocation141_spill] sm:$0xff]  ;;  %v17112_v57 = vld [vmem:[#allocation211_spill] sm:$0xff] }
 0xa2a   :  { %17084 = vst [vmem:[#allocation21_spill] sm:$0xff] %v13747_v23  ;;  %v13768_v63 = vpop.permute.xlu2 %4161  ;;  %v13775_v19 = vpop.permute.xlu1 %4349  ;;  %v13794_v25 = vadd.f32 %v5488_v9, %v17105_v55  ;;  %v5496_v22 = vmax.f32 %v17107_v60, 0.0  ;;  %v4754_v34 = vmul.f32 %v17111_v2, %v17103_v36  ;;  %v4755_v53 = vmul.f32 %v17112_v57, %v17101_v20  ;;  %v17114_v9 = vld [vmem:[#allocation290_spill] sm:$0xff]  ;;  %v17131_v37 = vld [vmem:[#allocation13_spill] sm:$0xff] }
 0xa2b   :  { %17085 = vst [vmem:[#allocation89_spill] sm:$0xff] %v13749_v40  ;;  %7093 = vmatmul.msk.bf16.vlgmr.msrb.gmra.mxu0 %vm756_vm1, %v6102_v11  ;;  %v17108_v11 = vld [vmem:[#allocation5_spill] sm:$0xff]  ;;  %v4811_v61 = vadd.f32 %v4763_v32, %v4715_v56  ;;  %v4810_v5 = vadd.f32 %v4762_v45, %v4714_v4  ;;  %v4803_v8 = vmul.f32 %v17113_v26, %v17096_v41  ;;  %v5497_v55 = vmax.f32 %v17114_v9, 0.0  ;;  %v17121_v45 = vld [vmem:[#allocation192_spill] sm:$0xff]  ;;  %v17122_v4 = vld [vmem:[#allocation111_spill] sm:$0xff] }
 0xa2c   :  { %17087 = vst [vmem:[#allocation143_spill] sm:$0xff] %v13753_v44  ;;  %v13798_v46 = vadd.f32 %v5489_v15, %v17108_v11  ;;  %v13800_v3 = vpop.permute.xlu0 %4353  ;;  %v4859_v60 = vmul.f32 %v13626_v6, %v17115_v14  ;;  %v17116_v15 = vld [vmem:[#allocation16_spill] sm:$0xff]  ;;  %v13816_v52 = vadd.f32 %v5496_v22, %v17118_v49  ;;  %v13824_v56 = vmul.f32 %v13794_v25, %v17121_v45  ;;  %v17124_v44 = vld [vmem:[#allocation150_spill] sm:$0xff]  ;;  %v17125_v49 = vld [vmem:[#allocation191_spill] sm:$0xff] }
 0xa2d   :  { %17088 = vst [vmem:[#allocation231_spill] sm:$0xff] %v13755_v31  ;;  %v4858_v11 = vmul.f32 %v13665_v51, %v17116_v15  ;;  %v17120_v31 = vld [vmem:[#allocation208_spill] sm:$0xff]  ;;  %v13828_v9 = vmul.f32 %v13794_v25, %v17122_v4  ;;  %v13838_v22 = vmul.f32 %v13794_v25, %v17125_v49  ;;  %v17127_v45 = vld [vmem:[#allocation95_spill] sm:$0xff]  ;;  %v17128_v4 = vld [vmem:[#allocation49_spill] sm:$0xff]  ;;  %v4851_v49 = vadd.f32 %v4803_v8, %v4755_v53 }
 0xa2e   :  { %17089 = vst [vmem:[#allocation125_spill] sm:$0xff] %v13757_v1  ;;  %v13820_v32 = vmul.f32 %v13794_v25, %v17120_v31  ;;  %v17123_v1 = vld [vmem:[#allocation30_spill] sm:$0xff]  ;;  %v13834_v16 = vmul.f32 %v13798_v46, %v17124_v44  ;;  %v17126_v31 = vld [vmem:[#allocation75_spill] sm:$0xff]  ;;  %v4802_v54 = vmul.f32 %v17127_v45, %v17098_v47  ;;  %v13848_v23 = vmul.f32 %v13798_v46, %v17128_v4  ;;  %v17130_v44 = vld [vmem:[#allocation64_spill] sm:$0xff] }
 0xa2f   :  { %17090 = vst [vmem:[#allocation148_spill] sm:$0xff] %v13768_v63  ;;  %v4955_v33 = vmul.f32 %v13768_v63, %v17123_v1  ;;  %v13842_v40 = vmul.f32 %v13794_v25, %v17126_v31  ;;  %v13852_v18 = vmul.f32 %v13798_v46, %v17129_v30  ;;  %v13856_v57 = vmul.f32 %v13798_v46, %v17130_v44  ;;  %v17133_v20 = vld [vmem:[#allocation29_spill] sm:$0xff]  ;;  %v17134_v51 = vld [vmem:[#allocation299_spill] sm:$0xff]  ;;  %v17136_v39 = vld [vmem:[#allocation258_spill] sm:$0xff] }
 0xa30   :  { %17091 = vst [vmem:[#allocation32_spill] sm:$0xff] %v13775_v19  ;;  %v13859_v63 = vadd.f32 %v5497_v55, %v17131_v37  ;;  %v4907_v31 = vadd.f32 %v4859_v60, %v4811_v61  ;;  %v4906_v6 = vadd.f32 %v4858_v11, %v4810_v5  ;;  %v4954_v2 = vmul.f32 %v13777_v27, %v17133_v20  ;;  %v17137_v8 = vld [vmem:[#allocation40_spill] sm:$0xff]  ;;  %v17140_v60 = vld [vmem:[#allocation301_spill] sm:$0xff]  ;;  %v17144_v26 = vld [vmem:[#allocation67_spill] sm:$0xff] }
 0xa31   :  { %17092 = vst [vmem:[#allocation33_spill] sm:$0xff] %v13777_v27  ;;  %v5504_v4 = vmax.f32 %v17134_v51, 0.0  ;;  %v4898_v45 = vmul.f32 %v13710_v62, %v17116_v15  ;;  %v13870_v44 = vmul.f32 %v13816_v52, %v17136_v39  ;;  %v5050_v53 = vmul.f32 %v13775_v19, %v17137_v8  ;;  %v17138_v61 = vld [vmem:[#allocation48_spill] sm:$0xff]  ;;  %v17141_v39 = vld [vmem:[#allocation18_spill] sm:$0xff]  ;;  %v17142_v19 = vld [vmem:[#allocation41_spill] sm:$0xff] }
 0xa32   :  { %v13779_v35 = vpop.permute.xlu2 %4321  ;;  %v13787_v38 = vpop.permute.xlu1 %4513  ;;  %17106 = vst [vmem:[#allocation122_spill] sm:$0xff] %v13794_v25  ;;  %v5003_v37 = vadd.f32 %v4955_v33, %v4907_v31  ;;  %v13876_v5 = vmul.f32 %v13816_v52, %v17138_v61  ;;  %v17139_v55 = vld [vmem:[#allocation68_spill] sm:$0xff]  ;;  %v5505_v11 = vmax.f32 %v17140_v60, 0.0  ;;  %v4850_v62 = vadd.f32 %v4802_v54, %v4754_v34  ;;  %v17146_v54 = vld [vmem:[#allocation22_spill] sm:$0xff] }
 0xa33   :  { %17093 = vst [vmem:[#allocation98_spill] sm:$0xff] %v13779_v35  ;;  %v13880_v51 = vmul.f32 %v13816_v52, %v17139_v55  ;;  %v4899_v36 = vmul.f32 %v13663_v59, %v17115_v14  ;;  %v13887_v27 = vmul.f32 %v13816_v52, %v17141_v39  ;;  %v5051_v33 = vmul.f32 %v13800_v3, %v17142_v19  ;;  %v17149_v39 = vld [vmem:[#allocation195_spill] sm:$0xff]  ;;  %v17151_v14 = vld [vmem:[#allocation66_spill] sm:$0xff] }
 0xa34   :  { %17100 = vst [vmem:[#allocation145_spill] sm:$0xff] %v13787_v38  ;;  %v13891_v31 = vpop.permute.xlu0 %4701  ;;  %v5002_v61 = vadd.f32 %v4954_v2, %v4906_v6  ;;  %v13897_v60 = vmul.f32 %v13859_v63, %v17145_v50  ;;  %v13900_v34 = vadd.f32 %v5504_v4, %v17146_v54  ;;  %v4946_v59 = vadd.f32 %v4898_v45, %v4850_v62  ;;  %v17152_v45 = vld [vmem:[#allocation23_spill] sm:$0xff] }
 0xa35   :  { %17109 = vst [vmem:[#allocation2_spill] sm:$0xff] %v13798_v46  ;;  %v13906_v13 = vmul.f32 %v13859_v63, %v17149_v39  ;;  %v5099_v50 = vadd.f32 %v5051_v33, %v5003_v37  ;;  %v5186_v62 = vmul.f32 %v13891_v31, %v17151_v14  ;;  %v13919_v54 = vadd.f32 %v5505_v11, %v17152_v45  ;;  %v17154_v39 = vld [vmem:[#allocation320_spill] sm:$0xff]  ;;  %v17157_v11 = vld [vmem:[#allocation106_spill] sm:$0xff] }
 0xa36   :  { %17110 = vst [vmem:[#allocation129_spill] sm:$0xff] %v13800_v3  ;;  %v17150_v3 = vld [vmem:[#allocation92_spill] sm:$0xff]  ;;  %v5098_v2 = vadd.f32 %v5050_v53, %v5002_v61  ;;  %v5512_v15 = vmax.f32 %v17154_v39, 0.0  ;;  %v4947_v41 = vadd.f32 %v4899_v36, %v4851_v49  ;;  %v13936_v45 = vmul.f32 %v13859_v63, %v17157_v11  ;;  %v17158_v36 = vld [vmem:[#allocation323_spill] sm:$0xff] }
 0xa37   :  { %17119 = vst [vmem:[#allocation146_spill] sm:$0xff] %v13816_v52  ;;  %v13910_v6 = vmul.f32 %v13859_v63, %v17150_v3  ;;  %v4994_v3 = vmul.f32 %v13712_v17, %v17133_v20  ;;  %v17155_v33 = vld [vmem:[#allocation256_spill] sm:$0xff]  ;;  %v5513_v49 = vmax.f32 %v17158_v36, 0.0  ;;  %v17163_v17 = vld [vmem:[#allocation90_spill] sm:$0xff]  ;;  %v5721_v21 = vmul.f32 %v13859_v63, %v17191_v58 }
 0xa38   :  { %17132 = vst [vmem:[#allocation217_spill] sm:$0xff] %v13859_v63  ;;  %v13952_v11 = vmul.f32 %v13900_v34, %v17163_v17  ;;  %v17167_v17 = vld [vmem:[#allocation37_spill] sm:$0xff]  ;;  %v17177_v20 = vld [vmem:[#allocation46_spill] sm:$0xff] }
 0xa39   :  { %17143 = vst [vmem:[#allocation149_spill] sm:$0xff] %v13891_v31 }
 0xa3a   :  { %17147 = vst [vmem:[#allocation53_spill] sm:$0xff] %v13900_v34 }
 0xa3b   :  { %v13813_v48 = vpop.permute.xlu2 %4509  ;;  %v13866_v30 = vpop.permute.xlu1 %4545  ;;  %17153 = vst [vmem:[#allocation43_spill] sm:$0xff] %v13919_v54 }
 0xa3c   :  { %17117 = vst [vmem:[#allocation226_spill] sm:$0xff] %v13813_v48  ;;  %v5147_v55 = vmul.f32 %v13866_v30, %v17144_v26  ;;  %v5090_v61 = vmul.f32 %v13813_v48, %v17137_v8  ;;  %v17162_v48 = vld [vmem:[#allocation179_spill] sm:$0xff] }
 0xa3d   :  { %17135 = vst [vmem:[#allocation112_spill] sm:$0xff] %v13866_v30  ;;  %v4995_v30 = vmul.f32 %v13779_v35, %v17123_v1  ;;  %v17156_v35 = vld [vmem:[#allocation257_spill] sm:$0xff]  ;;  %v17164_v8 = vld [vmem:[#allocation259_spill] sm:$0xff] }
 0xa3e   :  { %v5195_v53 = vadd.f32 %v5147_v55, %v5099_v50  ;;  %v13932_v31 = vmul.f32 %v13798_v46, %v17156_v35  ;;  %v5042_v55 = vadd.f32 %v4994_v3, %v4946_v59  ;;  %v13948_v35 = vmul.f32 %v13900_v34, %v17162_v48  ;;  %v17166_v48 = vld [vmem:[#allocation184_spill] sm:$0xff] }
 0xa3f   :  { %v5043_v39 = vadd.f32 %v4995_v30, %v4947_v41  ;;  %v13956_v41 = vmul.f32 %v13900_v34, %v17164_v8  ;;  %v5091_v59 = vmul.f32 %v13787_v38, %v17142_v19  ;;  %v13967_v3 = vmul.f32 %v13919_v54, %v17166_v48  ;;  %v17170_v8 = vld [vmem:[#allocation105_spill] sm:$0xff]  ;;  %v17176_v19 = vld [vmem:[#allocation298_spill] sm:$0xff] }
 0xa40   :  { %v13976_v36 = vmul.f32 %v13919_v54, %v17170_v8  ;;  %v5664_v1 = vmul.f32 %v13794_v25, %v17176_v19  ;;  %v17181_v25 = vld [vmem:[#allocation69_spill] sm:$0xff] }
 0xa41   :  { %v5139_v38 = vadd.f32 %v5091_v59, %v5043_v39 }
 0xa44   :  { %v13902_v12 = vpop.permute.xlu2 %4541 }
 0xa45   :  { %17148 = vst [vmem:[#allocation158_spill] sm:$0xff] %v13902_v12  ;;  %v5146_v4 = vmul.f32 %v13902_v12, %v17151_v14  ;;  %v13928_v12 = vmul.f32 %v13816_v52, %v17155_v33  ;;  %v17159_v14 = vld [vmem:[#allocation87_spill] sm:$0xff] }
 0xa47   :  { %v5194_v37 = vadd.f32 %v5146_v4, %v5098_v2  ;;  %v13941_v2 = vmul.f32 %v13900_v34, %v17159_v14  ;;  %v17160_v4 = vld [vmem:[#allocation36_spill] sm:$0xff]  ;;  %v5138_v14 = vadd.f32 %v5090_v61, %v5042_v55 }
 0xa48   :  { %v13944_v33 = vadd.f32 %v5512_v15, %v17160_v4  ;;  %v17165_v15 = vld [vmem:[#allocation312_spill] sm:$0xff] }
 0xa49   :  { %v5239_v50 = vpack.c.bf16 %v5195_v53, %v5194_v37  ;;  %v13963_v30 = vmul.f32 %v13919_v54, %v17165_v15  ;;  %v13970_v53 = vadd.f32 %v5513_v49, %v17167_v17  ;;  %v17171_v61 = vld [vmem:[#allocation232_spill] sm:$0xff]  ;;  %v17174_v15 = vld [vmem:[#allocation81_spill] sm:$0xff]  ;;  %v17175_v49 = vld [vmem:[#allocation107_spill] sm:$0xff] }
 0xa4a   :  { %17161 = vst [vmem:[#allocation62_spill] sm:$0xff] %v13944_v33  ;;  %v13980_v55 = vmul.f32 %v13919_v54, %v17171_v61  ;;  %v13988_v48 = vmul.f32 %v13798_v46, %v17174_v15  ;;  %v5760_v17 = vmul.f32 %v13816_v52, %v17175_v49  ;;  %v5920_v47 = vmul.f32 %v13944_v33, %v17177_v20  ;;  %v17179_v15 = vld [vmem:[#allocation234_spill] sm:$0xff] }
 0xa4b   :  { %7060 = vmatmul.msk.bf16.gmra.mxu1 %vm756_vm1, %v5239_v50  ;;  %17168 = vst [vmem:[#allocation126_spill] sm:$0xff] %v13970_v53  ;;  %v17172_v50 = vld [vmem:[#allocation100_spill] sm:$0xff]  ;;  %v14004_v46 = vmul.f32 %v13944_v33, %v17179_v15  ;;  %v5234_v49 = vadd.f32 %v5186_v62, %v5138_v14  ;;  %v14012_v20 = vmul.f32 %v13970_v53, %v17181_v25  ;;  %v17185_v62 = vld [vmem:[#allocation50_spill] sm:$0xff] }
 0xa4c   :  { %v13972_v37 = vpop.permute.xlu2 %4705  ;;  %v13984_v4 = vmul.f32 %v13919_v54, %v17172_v50  ;;  %v17178_v50 = vld [vmem:[#allocation91_spill] sm:$0xff]  ;;  %v14020_v15 = vmul.f32 %v13944_v33, %v17183_v43  ;;  %v5912_v58 = vmul.f32 %v13944_v33, %v17199_v10  ;;  %v17208_v10 = vld [vmem:[#allocation142_spill] sm:$0xff] }
 0xa4d   :  { %17169 = vst [vmem:[#allocation253_spill] sm:$0xff] %v13972_v37  ;;  %v5187_v8 = vmul.f32 %v13972_v37, %v17144_v26  ;;  %v14000_v28 = vmul.f32 %v13944_v33, %v17178_v50  ;;  %v17180_v37 = vld [vmem:[#allocation128_spill] sm:$0xff]  ;;  %v14016_v50 = vmul.f32 %v13970_v53, %v17182_v29  ;;  %v17192_v43 = vld [vmem:[#allocation187_spill] sm:$0xff] }
 0xa4e   :  { %17173 = vst [vmem:[#allocation203_spill] sm:$0xff] %v13984_v4  ;;  %v5463_v61 = vpop.f32.mrf.mxu3  ;;  %v14008_v26 = vmul.f32 %v13944_v33, %v17180_v37 }
 0xa4f   :  { %v5235_v39 = vadd.f32 %v5187_v8, %v5139_v38  ;;  %v5520_v59 = vmax.f32 %v5463_v61, 0.0  ;;  %v5363_v52 = vpop.f32.mrf.mxu1  ;;  %17184 = vst [vmem:[#allocation193_spill] sm:$0xff] %v14020_v15  ;;  %v17187_v8 = vld [vmem:[#allocation235_spill] sm:$0xff] }
 0xa50   :  { %v5480_v19 = vmax.f32 %v5363_v52, 0.0  ;;  %v14027_v37 = vmul.f32 %v13970_v53, %v17187_v8  ;;  %v17188_v52 = vld [vmem:[#allocation260_spill] sm:$0xff]  ;;  %v17190_v61 = vld [vmem:[#allocation115_spill] sm:$0xff] }
 0xa51   :  { %v5259_v38 = vpack.c.bf16 %v5235_v39, %v5234_v49  ;;  %v14023_v14 = vadd.f32 %v5520_v59, %v17185_v62  ;;  %v14031_v25 = vmul.f32 %v13970_v53, %v17188_v52  ;;  %v5816_v29 = vmul.f32 %v13900_v34, %v17190_v61  ;;  %v17194_v39 = vld [vmem:[#allocation24_spill] sm:$0xff]  ;;  %v17195_v62 = vld [vmem:[#allocation302_spill] sm:$0xff] }
 0xa52   :  { %v14039_v49 = vmul.f32 %v13919_v54, %v17192_v43  ;;  %v5528_v59 = vadd.f32 %v5480_v19, %v17194_v39  ;;  %v14044_v8 = vmul.f32 %v13859_v63, %v17195_v62  ;;  %v14048_v52 = vmul.f32 %v13970_v53, %v17197_v7  ;;  %v17200_v43 = vld [vmem:[#allocation131_spill] sm:$0xff]  ;;  %v17201_v19 = vld [vmem:[#allocation45_spill] sm:$0xff] }
 0xa53   :  { %17186 = vst [vmem:[#allocation210_spill] sm:$0xff] %v14023_v14  ;;  %v14052_v61 = vmul.f32 %v13900_v34, %v17198_v0  ;;  %7080 = vmatmul.msk.bf16.gmra.mxu3 %vm756_vm1, %v5259_v38  ;;  %v17203_v63 = vld [vmem:[#allocation127_spill] sm:$0xff]  ;;  %v17207_v34 = vld [vmem:[#allocation136_spill] sm:$0xff] }
 0xa54   :  { %17189 = vst [vmem:[#allocation118_spill] sm:$0xff] %v14031_v25  ;;  %v5576_v54 = vmul.f32 %v5528_v59, %v17200_v43  ;;  %v5584_v39 = vmul.f32 %v5528_v59, %v17201_v19  ;;  %v5592_v62 = vmul.f32 %v5528_v59, %v17202_v24  ;;  %v5600_v42 = vmul.f32 %v5528_v59, %v17203_v63  ;;  %v17206_v25 = vld [vmem:[#allocation215_spill] sm:$0xff] }
 0xa55   :  { %17193 = vst [vmem:[#allocation296_spill] sm:$0xff] %v14039_v49  ;;  %v17204_v49 = vld [vmem:[#allocation311_spill] sm:$0xff]  ;;  %v6008_v0 = vmul.f32 %v14023_v14, %v17206_v25  ;;  %v5608_v15 = vmul.f32 %v5528_v59, %v17207_v34  ;;  %v5616_v33 = vmul.f32 %v5528_v59, %v17208_v10 }
 0xa56   :  { %17196 = vst [vmem:[#allocation214_spill] sm:$0xff] %v14044_v8  ;;  %v14063_v7 = vmul.f32 %v13970_v53, %v17204_v49  ;;  %v5465_v38 = vpop.f32.mrf.mxu3  ;;  %v5672_v43 = vadd.f32 %v13820_v32, %v5576_v54  ;;  %v5680_v19 = vadd.f32 %v13824_v56, %v5584_v39  ;;  %v5688_v24 = vadd.f32 %v13828_v9, %v5592_v62  ;;  %v17209_v49 = vld [vmem:[#allocation57_spill] sm:$0xff]  ;;  %v17210_v56 = vld [vmem:[#allocation51_spill] sm:$0xff] }
 0xa57   :  { %v5696_v63 = vadd.f32 %v13838_v22, %v5600_v42  ;;  %v5521_v8 = vmax.f32 %v5465_v38, 0.0  ;;  %v5365_v4 = vpop.f32.mrf.mxu1  ;;  %v6016_v53 = vmul.f32 %v14023_v14, %v17209_v49  ;;  %v5704_v25 = vadd.f32 %v13842_v40, %v5608_v15  ;;  %v17212_v39 = vld [vmem:[#allocation27_spill] sm:$0xff]  ;;  %v17215_v15 = vld [vmem:[#allocation265_spill] sm:$0xff] }
 0xa58   :  { %17205 = vst [vmem:[#allocation228_spill] sm:$0xff] %v14063_v7  ;;  %v5712_v7 = vadd.f32 %v5664_v1, %v5616_v33  ;;  %v5481_v34 = vmax.f32 %v5365_v4, 0.0  ;;  %v5768_v59 = vadd.f32 %v13870_v44, %v5672_v43  ;;  %v5776_v10 = vadd.f32 %v13876_v5, %v5680_v19  ;;  %v17213_v44 = vld [vmem:[#allocation227_spill] sm:$0xff]  ;;  %v17214_v33 = vld [vmem:[#allocation233_spill] sm:$0xff]  ;;  %v17219_v19 = vld [vmem:[#allocation220_spill] sm:$0xff] }
 0xa59   :  { %v5784_v32 = vadd.f32 %v13880_v51, %v5688_v24  ;;  %v14080_v54 = vadd.f32 %v5521_v8, %v17210_v56  ;;  %v5792_v42 = vadd.f32 %v13887_v27, %v5696_v63  ;;  %v5800_v9 = vadd.f32 %v13928_v12, %v5704_v25  ;;  %v17216_v12 = vld [vmem:[#allocation134_spill] sm:$0xff] }
 0xa5a   :  { %v5808_v22 = vadd.f32 %v5760_v17, %v5712_v7  ;;  %v5529_v62 = vadd.f32 %v5481_v34, %v17212_v39  ;;  %v5864_v38 = vadd.f32 %v5816_v29, %v5768_v59  ;;  %v5872_v40 = vadd.f32 %v13941_v2, %v5776_v10  ;;  %v17217_v7 = vld [vmem:[#allocation219_spill] sm:$0xff]  ;;  %v17221_v59 = vld [vmem:[#allocation130_spill] sm:$0xff] }
 0xa5b   :  { %17211 = vst [vmem:[#allocation183_spill] sm:$0xff] %v14080_v54  ;;  %v5880_v1 = vadd.f32 %v13948_v35, %v5784_v32  ;;  %v6024_v5 = vmul.f32 %v14023_v14, %v17213_v44  ;;  %v5888_v51 = vadd.f32 %v13952_v11, %v5792_v42  ;;  %v6032_v4 = vmul.f32 %v14023_v14, %v17214_v33  ;;  %v17218_v2 = vld [vmem:[#allocation315_spill] sm:$0xff] }
 0xa5c   :  { %v6040_v27 = vmul.f32 %v14023_v14, %v17215_v15  ;;  %v5577_v17 = vmul.f32 %v5529_v62, %v17216_v12  ;;  %v5960_v8 = vadd.f32 %v5912_v58, %v5864_v38  ;;  %v5585_v29 = vmul.f32 %v5529_v62, %v17217_v7  ;;  %v17220_v11 = vld [vmem:[#allocation151_spill] sm:$0xff]  ;;  %v17222_v58 = vld [vmem:[#allocation97_spill] sm:$0xff]  ;;  %v17236_v7 = vld [vmem:[#allocation118_spill] sm:$0xff] }
 0xa5d   :  { %v5968_v43 = vadd.f32 %v5920_v47, %v5872_v40  ;;  %v6009_v35 = vmul.f32 %v14080_v54, %v17218_v2  ;;  %v5593_v24 = vmul.f32 %v5529_v62, %v17219_v19  ;;  %v5976_v63 = vadd.f32 %v14000_v28, %v5880_v1  ;;  %v17227_v15 = vld [vmem:[#allocation237_spill] sm:$0xff] }
 0xa5e   :  { %v5601_v49 = vmul.f32 %v5529_v62, %v17220_v11  ;;  %v5673_v25 = vadd.f32 %v13834_v16, %v5577_v17  ;;  %v5681_v34 = vadd.f32 %v13848_v23, %v5585_v29  ;;  %v6017_v10 = vmul.f32 %v14080_v54, %v17221_v59  ;;  %v17224_v16 = vld [vmem:[#allocation175_spill] sm:$0xff] }
 0xa5f   :  { %v6025_v32 = vmul.f32 %v14080_v54, %v17222_v58  ;;  %v6056_v47 = vadd.f32 %v6008_v0, %v5960_v8  ;;  %v5689_v56 = vadd.f32 %v13852_v18, %v5593_v24  ;;  %v5984_v39 = vadd.f32 %v14004_v46, %v5888_v51  ;;  %v17226_v46 = vld [vmem:[#allocation138_spill] sm:$0xff]  ;;  %v17235_v8 = vld [vmem:[#allocation193_spill] sm:$0xff]  ;;  %v17242_v59 = vld [vmem:[#allocation267_spill] sm:$0xff] }
 0xa60   :  { %v5697_v42 = vadd.f32 %v13856_v57, %v5601_v49  ;;  %v5769_v28 = vadd.f32 %v5721_v21, %v5673_v25  ;;  %v5777_v38 = vadd.f32 %v13897_v60, %v5681_v34  ;;  %v14111_v40 = vadd.f32 %v6016_v53, %v5968_v43  ;;  %v17237_v43 = vld [vmem:[#allocation296_spill] sm:$0xff]  ;;  %v17238_v24 = vld [vmem:[#allocation310_spill] sm:$0xff] }
 0xa61   :  { %v5609_v23 = vmul.f32 %v5529_v62, %v17224_v16  ;;  %v5785_v1 = vadd.f32 %v13906_v13, %v5689_v56  ;;  %v14115_v44 = vadd.f32 %v6024_v5, %v5976_v63  ;;  %v5896_v0 = vadd.f32 %v13956_v41, %v5800_v9  ;;  %v17241_v25 = vld [vmem:[#allocation228_spill] sm:$0xff] }
 0xa62   :  { %17223 = vst [vmem:[#allocation19_spill] sm:$0xff] %v14111_v40  ;;  %v5793_v33 = vadd.f32 %v13910_v6, %v5697_v42  ;;  %v5865_v18 = vadd.f32 %v13963_v30, %v5769_v28  ;;  %v5873_v57 = vadd.f32 %v13967_v3, %v5777_v38  ;;  %v5617_v60 = vmul.f32 %v5529_v62, %v17226_v46  ;;  %v17245_v42 = vld [vmem:[#allocation273_spill] sm:$0xff]  ;;  %v17247_v38 = vld [vmem:[#allocation292_spill] sm:$0xff] }
 0xa63   :  { %17225 = vst [vmem:[#allocation250_spill] sm:$0xff] %v14115_v44  ;;  %v5705_v21 = vadd.f32 %v13932_v31, %v5609_v23  ;;  %v5881_v53 = vadd.f32 %v13976_v36, %v5785_v1  ;;  %v6033_v13 = vmul.f32 %v14080_v54, %v17227_v15  ;;  %v5904_v5 = vadd.f32 %v14052_v61, %v5808_v22  ;;  %v17230_v61 = vld [vmem:[#allocation203_spill] sm:$0xff]  ;;  %v17248_v23 = vld [vmem:[#allocation6_spill] sm:$0xff]  ;;  %v17306_v58 = vld [vmem:[#allocation116_spill] sm:$0xff] }
 0xa64   :  { %v5889_v51 = vadd.f32 %v13980_v55, %v5793_v33  ;;  %v5961_v6 = vadd.f32 %v14048_v52, %v5865_v18  ;;  %v5969_v41 = vadd.f32 %v14012_v20, %v5873_v57  ;;  %v5713_v3 = vadd.f32 %v13988_v48, %v5617_v60  ;;  %v17231_v52 = vld [vmem:[#allocation214_spill] sm:$0xff]  ;;  %v17251_v18 = vld [vmem:[#allocation7_spill] sm:$0xff] }
 0xa65   :  { %v5801_v30 = vadd.f32 %v13936_v45, %v5705_v21  ;;  %v5977_v31 = vadd.f32 %v14016_v50, %v5881_v53  ;;  %v14134_v36 = vadd.f32 %v6032_v4, %v5984_v39  ;;  %v5992_v55 = vadd.f32 %v14008_v26, %v5896_v0  ;;  %v17234_v48 = vld [vmem:[#allocation262_spill] sm:$0xff]  ;;  %v17246_v39 = vld [vmem:[#allocation225_spill] sm:$0xff]  ;;  %v17253_v21 = vld [vmem:[#allocation303_spill] sm:$0xff] }
 0xa66   :  { %v5985_v9 = vadd.f32 %v14027_v37, %v5889_v51  ;;  %v6057_v62 = vadd.f32 %v6009_v35, %v5961_v6  ;;  %v14137_v12 = vadd.f32 %v6017_v10, %v5969_v41  ;;  %v5809_v17 = vadd.f32 %v17231_v52, %v5713_v3  ;;  %v17250_v33 = vld [vmem:[#allocation294_spill] sm:$0xff]  ;;  %v17256_v51 = vld [vmem:[#allocation15_spill] sm:$0xff]  ;;  %v17259_v6 = vld [vmem:[#allocation164_spill] sm:$0xff] }
 0xa67   :  { %17228 = vst [vmem:[#allocation252_spill] sm:$0xff] %v14134_v36  ;;  %v5897_v22 = vadd.f32 %v17230_v61, %v5801_v30  ;;  %v14141_v20 = vadd.f32 %v6025_v32, %v5977_v31  ;;  %v6041_v50 = vmul.f32 %v14080_v54, %v17234_v48  ;;  %v6000_v37 = vadd.f32 %v17235_v8, %v5904_v5  ;;  %v17254_v60 = vld [vmem:[#allocation14_spill] sm:$0xff]  ;;  %v17263_v61 = vld [vmem:[#allocation201_spill] sm:$0xff]  ;;  %v17267_v8 = vld [vmem:[#allocation79_spill] sm:$0xff] }
 0xa68   :  { %17229 = vst [vmem:[#allocation3_spill] sm:$0xff] %v14137_v12  ;;  %v14143_v45 = vadd.f32 %v6033_v13, %v5985_v9  ;;  %v6103_v4 = vpack.c.bf16 %v6057_v62, %v6056_v47  ;;  %v5905_v2 = vadd.f32 %v17237_v43, %v5809_v17  ;;  %v6048_v63 = vmul.f32 %v14023_v14, %v17238_v24  ;;  %v17258_v13 = vld [vmem:[#allocation306_spill] sm:$0xff]  ;;  %v17265_v48 = vld [vmem:[#allocation25_spill] sm:$0xff]  ;;  %v17308_v26 = vld [vmem:[#allocation124_spill] sm:$0xff] }
 0xa69   :  { %17232 = vst [vmem:[#allocation168_spill] sm:$0xff] %v14141_v20  ;;  %v5993_v29 = vadd.f32 %v17236_v7, %v5897_v22  ;;  %v14159_v11 = vadd.f32 %v6040_v27, %v5992_v55  ;;  %v6049_v10 = vmul.f32 %v14080_v54, %v17242_v59  ;;  %v5490_v27 = vmax.f32 %v17245_v42, 0.0  ;;  %v17260_v30 = vld [vmem:[#allocation70_spill] sm:$0xff]  ;;  %v17262_v55 = vld [vmem:[#allocation205_spill] sm:$0xff]  ;;  %v17314_v36 = vld [vmem:[#allocation152_spill] sm:$0xff] }
 0xa6a   :  { %17233 = vst [vmem:[#allocation176_spill] sm:$0xff] %v14143_v45  ;;  %7094 = vmatmul.msk.bf16.gmra.mxu0 %vm756_vm1, %v6103_v4  ;;  %v6001_v34 = vadd.f32 %v17241_v25, %v5905_v2  ;;  %v14168_v32 = vadd.f32 %v6048_v63, %v6000_v37  ;;  %v5491_v28 = vmax.f32 %v17246_v39, 0.0  ;;  %v5498_v16 = vmax.f32 %v17247_v38, 0.0  ;;  %v17261_v31 = vld [vmem:[#allocation10_spill] sm:$0xff]  ;;  %v17268_v4 = vld [vmem:[#allocation165_spill] sm:$0xff]  ;;  %v17271_v63 = vld [vmem:[#allocation216_spill] sm:$0xff] }
 0xa6b   :  { %17239 = vst [vmem:[#allocation163_spill] sm:$0xff] %v14159_v11  ;;  %v14161_v49 = vadd.f32 %v6041_v50, %v5993_v29  ;;  %v14178_v1 = vadd.f32 %v5490_v27, %v17248_v23  ;;  %v5499_v0 = vmax.f32 %v17250_v33, 0.0  ;;  %v5506_v46 = vmax.f32 %v17253_v21, 0.0  ;;  %v17264_v52 = vld [vmem:[#allocation54_spill] sm:$0xff]  ;;  %v17269_v29 = vld [vmem:[#allocation73_spill] sm:$0xff]  ;;  %v17315_v45 = vld [vmem:[#allocation319_spill] sm:$0xff] }
 0xa6c   :  { %17243 = vst [vmem:[#allocation255_spill] sm:$0xff] %v14168_v32  ;;  %v14170_v47 = vadd.f32 %v6049_v10, %v6001_v34  ;;  %v14182_v57 = vadd.f32 %v5491_v28, %v17251_v18  ;;  %v14186_v53 = vadd.f32 %v5498_v16, %v17254_v60  ;;  %v5507_v5 = vmax.f32 %v17258_v13, 0.0  ;;  %v17270_v2 = vld [vmem:[#allocation222_spill] sm:$0xff]  ;;  %v17272_v34 = vld [vmem:[#allocation84_spill] sm:$0xff]  ;;  %v17273_v10 = vld [vmem:[#allocation197_spill] sm:$0xff] }
 0xa6d   :  { %17240 = vst [vmem:[#allocation44_spill] sm:$0xff] %v14161_v49  ;;  %v14189_v15 = vadd.f32 %v5499_v0, %v17256_v51  ;;  %v5626_v41 = vmul.f32 %v14178_v1, %v17259_v6  ;;  %v5634_v3 = vmul.f32 %v14178_v1, %v17260_v30  ;;  %v5514_v9 = vmax.f32 %v17261_v31, 0.0  ;;  %v17274_v27 = vld [vmem:[#allocation26_spill] sm:$0xff]  ;;  %v17277_v16 = vld [vmem:[#allocation236_spill] sm:$0xff]  ;;  %v17278_v33 = vld [vmem:[#allocation261_spill] sm:$0xff] }
 0xa6e   :  { %17244 = vst [vmem:[#allocation297_spill] sm:$0xff] %v14170_v47  ;;  %v14199_v62 = vmul.f32 %v14182_v57, %v17262_v55  ;;  %v5642_v22 = vmul.f32 %v14178_v1, %v17263_v61  ;;  %v5650_v17 = vmul.f32 %v14178_v1, %v17264_v52  ;;  %v14206_v50 = vadd.f32 %v5506_v46, %v17265_v48  ;;  %v17276_v28 = vld [vmem:[#allocation190_spill] sm:$0xff]  ;;  %v17282_v51 = vld [vmem:[#allocation171_spill] sm:$0xff]  ;;  %v17284_v30 = vld [vmem:[#allocation269_spill] sm:$0xff] }
 0xa6f   :  { %17249 = vst [vmem:[#allocation263_spill] sm:$0xff] %v14178_v1  ;;  %v5515_v37 = vmax.f32 %v17267_v8, 0.0  ;;  %v14211_v7 = vmul.f32 %v14182_v57, %v17268_v4  ;;  %v14215_v43 = vmul.f32 %v14182_v57, %v17269_v29  ;;  %v5658_v24 = vmul.f32 %v14178_v1, %v17270_v2  ;;  %v17279_v18 = vld [vmem:[#allocation266_spill] sm:$0xff]  ;;  %v17285_v55 = vld [vmem:[#allocation272_spill] sm:$0xff]  ;;  %v17286_v52 = vld [vmem:[#allocation39_spill] sm:$0xff] }
 0xa70   :  { %17252 = vst [vmem:[#allocation52_spill] sm:$0xff] %v14182_v57  ;;  %v5730_v25 = vmul.f32 %v14186_v53, %v17271_v63  ;;  %v5738_v59 = vmul.f32 %v14186_v53, %v17272_v34  ;;  %v14225_v42 = vmul.f32 %v14182_v57, %v17273_v10  ;;  %v14228_v39 = vadd.f32 %v5507_v5, %v17274_v27  ;;  %v17280_v46 = vld [vmem:[#allocation38_spill] sm:$0xff]  ;;  %v17283_v5 = vld [vmem:[#allocation99_spill] sm:$0xff]  ;;  %v17290_v34 = vld [vmem:[#allocation240_spill] sm:$0xff] }
 0xa71   :  { %17255 = vst [vmem:[#allocation72_spill] sm:$0xff] %v14186_v53  ;;  %v14232_v38 = vmul.f32 %v14189_v15, %v17276_v28  ;;  %v5746_v23 = vmul.f32 %v14186_v53, %v17277_v16  ;;  %v5762_v0 = vmul.f32 %v14186_v53, %v17278_v33  ;;  %v5754_v21 = vmul.f32 %v14186_v53, %v17279_v18  ;;  %v17288_v8 = vld [vmem:[#allocation82_spill] sm:$0xff]  ;;  %v17292_v16 = vld [vmem:[#allocation153_spill] sm:$0xff] }
 0xa72   :  { %17257 = vst [vmem:[#allocation230_spill] sm:$0xff] %v14189_v15  ;;  %v14241_v60 = vadd.f32 %v5514_v9, %v17280_v46  ;;  %v14245_v13 = vmul.f32 %v14189_v15, %v17282_v51  ;;  %v14249_v6 = vmul.f32 %v14189_v15, %v17283_v5  ;;  %v14253_v31 = vmul.f32 %v14182_v57, %v17284_v30  ;;  %v17289_v2 = vld [vmem:[#allocation182_spill] sm:$0xff]  ;;  %v17295_v5 = vld [vmem:[#allocation80_spill] sm:$0xff]  ;;  %v17310_v32 = vld [vmem:[#allocation317_spill] sm:$0xff] }
 0xa73   :  { %17266 = vst [vmem:[#allocation254_spill] sm:$0xff] %v14206_v50  ;;  %v14257_v61 = vmul.f32 %v14189_v15, %v17285_v55  ;;  %v14260_v48 = vadd.f32 %v5515_v37, %v17286_v52  ;;  %v5826_v4 = vmul.f32 %v14206_v50, %v17288_v8  ;;  %v5834_v63 = vmul.f32 %v14206_v50, %v17289_v2  ;;  %v17291_v27 = vld [vmem:[#allocation270_spill] sm:$0xff]  ;;  %v17293_v37 = vld [vmem:[#allocation199_spill] sm:$0xff]  ;;  %v17297_v55 = vld [vmem:[#allocation28_spill] sm:$0xff] }
 0xa74   :  { %17275 = vst [vmem:[#allocation295_spill] sm:$0xff] %v14228_v39  ;;  %v5842_v10 = vmul.f32 %v14206_v50, %v17290_v34  ;;  %v5850_v28 = vmul.f32 %v14206_v50, %v17291_v27  ;;  %v14272_v33 = vmul.f32 %v14228_v39, %v17292_v16  ;;  %v14276_v18 = vmul.f32 %v14228_v39, %v17293_v37  ;;  %v17294_v46 = vld [vmem:[#allocation238_spill] sm:$0xff]  ;;  %v17299_v2 = vld [vmem:[#allocation188_spill] sm:$0xff]  ;;  %v17302_v37 = vld [vmem:[#allocation155_spill] sm:$0xff] }
 0xa75   :  { %17281 = vst [vmem:[#allocation264_spill] sm:$0xff] %v14241_v60  ;;  %v14280_v51 = vmul.f32 %v14228_v39, %v17294_v46  ;;  %v14284_v30 = vmul.f32 %v14228_v39, %v17295_v5  ;;  %v14293_v34 = vmul.f32 %v14241_v60, %v17299_v2  ;;  %v17300_v27 = vld [vmem:[#allocation204_spill] sm:$0xff]  ;;  %v14301_v46 = vmul.f32 %v14260_v48, %v17302_v37  ;;  %v17303_v5 = vld [vmem:[#allocation77_spill] sm:$0xff]  ;;  %v17309_v37 = vld [vmem:[#allocation154_spill] sm:$0xff] }
 0xa76   :  { %17287 = vst [vmem:[#allocation268_spill] sm:$0xff] %v14260_v48  ;;  %v14297_v16 = vmul.f32 %v14228_v39, %v17300_v27  ;;  %v14305_v56 = vmul.f32 %v14260_v48, %v17303_v5  ;;  %v17307_v27 = vld [vmem:[#allocation85_spill] sm:$0xff]  ;;  %v5666_v5 = vmul.f32 %v14178_v1, %v17310_v32 }
 0xa77   :  { %17296 = vst [vmem:[#allocation4_spill] sm:$0xff] %v14284_v30  ;;  %v17311_v47 = vld [vmem:[#allocation241_spill] sm:$0xff] }
 0xa78   :  { %17301 = vst [vmem:[#allocation287_spill] sm:$0xff] %v14297_v16  ;;  %v14323_v11 = vmul.f32 %v14260_v48, %v17311_v47  ;;  %v17317_v16 = vld [vmem:[#allocation318_spill] sm:$0xff] }
 0xa79   :  { %v5818_v47 = vmul.f32 %v14206_v50, %v17317_v16 }
 0xa7a   :  { %17312 = vst [vmem:[#allocation5_spill] sm:$0xff] %v14323_v11  ;;  %v17318_v11 = vld [vmem:[#allocation321_spill] sm:$0xff] }
 0xa8c   :  { %v5368_v9 = vpop.f32.mrf.mxu1 }
 0xa8d   :  { %v5482_v29 = vmax.f32 %v5368_v9, 0.0  ;;  %v17298_v9 = vld [vmem:[#allocation121_spill] sm:$0xff] }
 0xa8e   :  { %v14289_v8 = vmul.f32 %v14241_v60, %v17298_v9  ;;  %v17305_v9 = vld [vmem:[#allocation275_spill] sm:$0xff] }
 0xa8f   :  { %v5530_v52 = vadd.f32 %v5482_v29, %v17297_v55  ;;  %v17304_v29 = vld [vmem:[#allocation242_spill] sm:$0xff]  ;;  %v14313_v2 = vmul.f32 %v14241_v60, %v17305_v9 }
 0xa90   :  { %v14309_v55 = vmul.f32 %v14241_v60, %v17304_v29  ;;  %v17313_v29 = vld [vmem:[#allocation133_spill] sm:$0xff] }
 0xa91   :  { %v5578_v19 = vmul.f32 %v5530_v52, %v17306_v58  ;;  %v5586_v35 = vmul.f32 %v5530_v52, %v17307_v27  ;;  %v5594_v54 = vmul.f32 %v5530_v52, %v17308_v26  ;;  %v5602_v14 = vmul.f32 %v5530_v52, %v17309_v37  ;;  %v17316_v26 = vld [vmem:[#allocation314_spill] sm:$0xff] }
 0xa92   :  { %v5610_v49 = vmul.f32 %v5530_v52, %v17313_v29  ;;  %v5618_v9 = vmul.f32 %v5530_v52, %v17314_v36  ;;  %v5722_v58 = vmul.f32 %v14186_v53, %v17315_v45  ;;  %v5667_v37 = vmul.f32 %v14182_v57, %v17316_v26  ;;  %v17421_v53 = vld [vmem:[#allocation95_spill] sm:$0xff]  ;;  %v17424_v57 = vld [vmem:[#allocation141_spill] sm:$0xff] }
 0xa93   :  { %v5674_v44 = vadd.f32 %v5626_v41, %v5578_v19  ;;  %v5682_v27 = vadd.f32 %v5634_v3, %v5586_v35  ;;  %v5690_v20 = vadd.f32 %v5642_v22, %v5594_v54  ;;  %v5698_v12 = vadd.f32 %v5650_v17, %v5602_v14  ;;  %v17319_v54 = vld [vmem:[#allocation316_spill] sm:$0xff]  ;;  %v17320_v3 = vld [vmem:[#allocation327_spill] sm:$0xff] }
 0xa94   :  { %v5370_v40 = vpop.f32.mrf.mxu1  ;;  %v5706_v32 = vadd.f32 %v5658_v24, %v5610_v49  ;;  %v5714_v1 = vadd.f32 %v5666_v5, %v5618_v9  ;;  %v5858_v29 = vmul.f32 %v14206_v50, %v17318_v11  ;;  %v5723_v41 = vmul.f32 %v14189_v15, %v17319_v54  ;;  %v17321_v49 = vld [vmem:[#allocation31_spill] sm:$0xff]  ;;  %v17322_v24 = vld [vmem:[#allocation325_spill] sm:$0xff] }
 0xa95   :  { %v5483_v36 = vmax.f32 %v5370_v40, 0.0  ;;  %v5770_v52 = vadd.f32 %v5722_v58, %v5674_v44  ;;  %v5778_v30 = vadd.f32 %v5730_v25, %v5682_v27  ;;  %v5786_v45 = vadd.f32 %v5738_v59, %v5690_v20  ;;  %v17323_v44 = vld [vmem:[#allocation162_spill] sm:$0xff]  ;;  %v17326_v27 = vld [vmem:[#allocation117_spill] sm:$0xff] }
 0xa96   :  { %v5802_v19 = vadd.f32 %v5754_v21, %v5706_v32  ;;  %v5810_v35 = vadd.f32 %v5762_v0, %v5714_v1  ;;  %v5914_v14 = vmul.f32 %v14241_v60, %v17320_v3  ;;  %v5819_v16 = vmul.f32 %v14228_v39, %v17322_v24  ;;  %v17324_v25 = vld [vmem:[#allocation114_spill] sm:$0xff]  ;;  %v17325_v0 = vld [vmem:[#allocation108_spill] sm:$0xff] }
 0xa97   :  { %v5531_v22 = vadd.f32 %v5483_v36, %v17321_v49  ;;  %v5866_v17 = vadd.f32 %v5818_v47, %v5770_v52  ;;  %v5794_v5 = vadd.f32 %v5746_v23, %v5698_v12  ;;  %v5954_v20 = vmul.f32 %v14241_v60, %v17323_v44  ;;  %v17327_v47 = vld [vmem:[#allocation132_spill] sm:$0xff]  ;;  %v17334_v44 = vld [vmem:[#allocation274_spill] sm:$0xff]  ;;  %v17417_v60 = vld [vmem:[#allocation137_spill] sm:$0xff] }
 0xa98   :  { %v5898_v11 = vadd.f32 %v5850_v28, %v5802_v19  ;;  %v5906_v40 = vadd.f32 %v5858_v29, %v5810_v35  ;;  %v5874_v58 = vadd.f32 %v5826_v4, %v5778_v30  ;;  %v5882_v32 = vadd.f32 %v5834_v63, %v5786_v45  ;;  %v17328_v28 = vld [vmem:[#allocation139_spill] sm:$0xff]  ;;  %v17329_v3 = vld [vmem:[#allocation144_spill] sm:$0xff]  ;;  %v17330_v4 = vld [vmem:[#allocation58_spill] sm:$0xff] }
 0xa99   :  { %v5579_v1 = vmul.f32 %v5531_v22, %v17324_v25  ;;  %v5962_v59 = vadd.f32 %v5914_v14, %v5866_v17  ;;  %v5587_v21 = vmul.f32 %v5531_v22, %v17325_v0  ;;  %v5595_v26 = vmul.f32 %v5531_v22, %v17326_v27  ;;  %v17335_v25 = vld [vmem:[#allocation271_spill] sm:$0xff] }
 0xa9a   :  { %v5468_v9 = vpop.f32.mrf.mxu3  ;;  %v5603_v36 = vmul.f32 %v5531_v22, %v17327_v47  ;;  %v5611_v29 = vmul.f32 %v5531_v22, %v17328_v28  ;;  %v5890_v54 = vadd.f32 %v5842_v10, %v5794_v5  ;;  %v5619_v14 = vmul.f32 %v5531_v22, %v17329_v3  ;;  %v17333_v10 = vld [vmem:[#allocation324_spill] sm:$0xff]  ;;  %v17339_v47 = vld [vmem:[#allocation206_spill] sm:$0xff] }
 0xa9b   :  { %v5522_v52 = vmax.f32 %v5468_v9, 0.0  ;;  %v5675_v12 = vadd.f32 %v14199_v62, %v5579_v1  ;;  %v5683_v23 = vadd.f32 %v14211_v7, %v5587_v21  ;;  %v5691_v19 = vadd.f32 %v14215_v43, %v5595_v26  ;;  %v17332_v43 = vld [vmem:[#allocation322_spill] sm:$0xff] }
 0xa9c   :  { %v5699_v35 = vadd.f32 %v14225_v42, %v5603_v36  ;;  %v5707_v49 = vadd.f32 %v14253_v31, %v5611_v29  ;;  %v5715_v17 = vadd.f32 %v5667_v37, %v5619_v14  ;;  %v6002_v24 = vadd.f32 %v5954_v20, %v5906_v40  ;;  %v17337_v40 = vld [vmem:[#allocation326_spill] sm:$0xff]  ;;  %v17344_v29 = vld [vmem:[#allocation4_spill] sm:$0xff] }
 0xa9d   :  { %v14355_v30 = vadd.f32 %v5522_v52, %v17330_v4  ;;  %v5771_v63 = vadd.f32 %v5723_v41, %v5675_v12  ;;  %v5779_v45 = vadd.f32 %v14232_v38, %v5683_v23  ;;  %v5787_v62 = vadd.f32 %v14245_v13, %v5691_v19  ;;  %v17336_v13 = vld [vmem:[#allocation189_spill] sm:$0xff] }
 0xa9e   :  { %v5795_v7 = vadd.f32 %v14249_v6, %v5699_v35  ;;  %v5763_v42 = vmul.f32 %v14189_v15, %v17332_v43  ;;  %v5915_v22 = vmul.f32 %v14260_v48, %v17333_v10  ;;  %v5947_v41 = vmul.f32 %v14260_v48, %v17334_v44  ;;  %v17345_v35 = vld [vmem:[#allocation287_spill] sm:$0xff]  ;;  %v17354_v10 = vld [vmem:[#allocation276_spill] sm:$0xff]  ;;  %v17355_v44 = vld [vmem:[#allocation202_spill] sm:$0xff] }
 0xa9f   :  { %17331 = vst [vmem:[#allocation290_spill] sm:$0xff] %v14355_v30  ;;  %v5867_v5 = vadd.f32 %v5819_v16, %v5771_v63  ;;  %v6010_v38 = vmul.f32 %v14355_v30, %v17335_v25  ;;  %v5875_v31 = vadd.f32 %v14272_v33, %v5779_v45  ;;  %v6018_v6 = vmul.f32 %v14355_v30, %v17336_v13  ;;  %v17338_v16 = vld [vmem:[#allocation78_spill] sm:$0xff]  ;;  %v17351_v63 = vld [vmem:[#allocation209_spill] sm:$0xff] }
 0xaa0   :  { %v5883_v37 = vadd.f32 %v14276_v18, %v5787_v62  ;;  %v5955_v20 = vmul.f32 %v14260_v48, %v17337_v40  ;;  %v5970_v0 = vadd.f32 %v14289_v8, %v5874_v58  ;;  %v6026_v21 = vmul.f32 %v14355_v30, %v17338_v16  ;;  %v17414_v48 = vld [vmem:[#allocation186_spill] sm:$0xff] }
 0xaa1   :  { %v5963_v1 = vadd.f32 %v5915_v22, %v5867_v5  ;;  %v5978_v27 = vadd.f32 %v14293_v34, %v5882_v32  ;;  %v5891_v26 = vadd.f32 %v14280_v51, %v5795_v7  ;;  %v5986_v33 = vadd.f32 %v14309_v55, %v5890_v54  ;;  %v17341_v32 = vld [vmem:[#allocation59_spill] sm:$0xff]  ;;  %v17353_v7 = vld [vmem:[#allocation244_spill] sm:$0xff] }
 0xaa2   :  { %v5470_v9 = vpop.f32.mrf.mxu3  ;;  %v6034_v36 = vmul.f32 %v14355_v30, %v17339_v47  ;;  %v5803_v52 = vadd.f32 %v14257_v61, %v5707_v49  ;;  %v5994_v12 = vadd.f32 %v14313_v2, %v5898_v11  ;;  %v5811_v23 = vadd.f32 %v5763_v42, %v5715_v17  ;;  %v17346_v61 = vld [vmem:[#allocation5_spill] sm:$0xff]  ;;  %v17352_v49 = vld [vmem:[#allocation74_spill] sm:$0xff] }
 0xaa3   :  { %v5523_v18 = vmax.f32 %v5470_v9, 0.0  ;;  %v6058_v8 = vadd.f32 %v6010_v38, %v5962_v59  ;;  %v5971_v58 = vadd.f32 %v14301_v46, %v5875_v31  ;;  %v14386_v28 = vadd.f32 %v6018_v6, %v5970_v0  ;;  %v17348_v11 = vld [vmem:[#allocation277_spill] sm:$0xff] }
 0xaa4   :  { %v5979_v34 = vadd.f32 %v14305_v56, %v5883_v37  ;;  %v14392_v55 = vadd.f32 %v6026_v21, %v5978_v27  ;;  %v5899_v19 = vadd.f32 %v17344_v29, %v5803_v52  ;;  %v5907_v54 = vadd.f32 %v17345_v35, %v5811_v23  ;;  %v17349_v59 = vld [vmem:[#allocation65_spill] sm:$0xff]  ;;  %v17350_v56 = vld [vmem:[#allocation56_spill] sm:$0xff]  ;;  %v17408_v21 = vld [vmem:[#allocation34_spill] sm:$0xff] }
 0xaa5   :  { %17340 = vst [vmem:[#allocation12_spill] sm:$0xff] %v14386_v28  ;;  %v14390_v51 = vadd.f32 %v5523_v18, %v17341_v32  ;;  %v5987_v3 = vadd.f32 %v17346_v61, %v5891_v26  ;;  %v14397_v2 = vadd.f32 %v6034_v36, %v5986_v33  ;;  %v6042_v46 = vmul.f32 %v14355_v30, %v17348_v11  ;;  %v7213_v26 = vld [vmem:[%s15067_s1 + $0x198] sm:$0xff]  ;;  %v17363_v33 = vld [vmem:[#allocation278_spill] sm:$0xff]  ;;  %v17366_v23 = vld [vmem:[#allocation8_spill] sm:$0xff] }
 0xaa6   :  { %17343 = vst [vmem:[#allocation192_spill] sm:$0xff] %v14392_v55  ;;  %v6050_v14 = vmul.f32 %v14355_v30, %v17349_v59  ;;  %v5995_v42 = vadd.f32 %v5947_v41, %v5899_v19  ;;  %v6003_v5 = vadd.f32 %v5955_v20, %v5907_v54  ;;  %v5492_v47 = vmax.f32 %v17363_v33, 0.0  ;;  %v17364_v36 = vld [vmem:[#allocation281_spill] sm:$0xff]  ;;  %6784 = vmatpush.bf16.msrb.mxu3 %v7213_v26  ;;  %v17372_v54 = vld [vmem:[#allocation16_spill] sm:$0xff]  ;;  %v17384_v26 = vld [vmem:[#allocation170_spill] sm:$0xff] }
 0xaa7   :  { %17342 = vst [vmem:[#allocation208_spill] sm:$0xff] %v14390_v51  ;;  %v6011_v4 = vmul.f32 %v14390_v51, %v17350_v56  ;;  %v6019_v45 = vmul.f32 %v14390_v51, %v17351_v63  ;;  %v6027_v62 = vmul.f32 %v14390_v51, %v17352_v49  ;;  %v6035_v17 = vmul.f32 %v14390_v51, %v17353_v7  ;;  %v17365_v52 = vld [vmem:[#allocation181_spill] sm:$0xff]  ;;  %v17375_v56 = vld [vmem:[#allocation103_spill] sm:$0xff]  ;;  %v17376_v63 = vld [vmem:[#allocation156_spill] sm:$0xff] }
 0xaa8   :  { %17347 = vst [vmem:[#allocation111_spill] sm:$0xff] %v14397_v2  ;;  %v6224_v43 = vpop.f32.mrf.mxu0  ;;  %v6043_v22 = vmul.f32 %v14390_v51, %v17354_v10  ;;  %v6051_v25 = vmul.f32 %v14390_v51, %v17355_v44  ;;  %v14421_v37 = vadd.f32 %v6042_v46, %v5994_v12  ;;  %v14425_v0 = vadd.f32 %v6050_v14, %v6002_v24  ;;  %v17369_v32 = vld [vmem:[#allocation9_spill] sm:$0xff]  ;;  %v17378_v7 = vld [vmem:[#allocation159_spill] sm:$0xff] }
 0xaa9   :  { %v6059_v38 = vadd.f32 %v6011_v4, %v5963_v1  ;;  %v14415_v31 = vadd.f32 %v6019_v45, %v5971_v58  ;;  %v14417_v13 = vadd.f32 %v6027_v62, %v5979_v34  ;;  %v14419_v6 = vadd.f32 %v6035_v17, %v5987_v3  ;;  %v17368_v58 = vld [vmem:[#allocation11_spill] sm:$0xff]  ;;  %v17371_v19 = vld [vmem:[#allocation309_spill] sm:$0xff]  ;;  %v7208_v3 = vld [vmem:[%s15067_s1 + $0x140] sm:$0xff] }
 0xaaa   :  { %17359 = vst [vmem:[#allocation49_spill] sm:$0xff] %v14421_v37  ;;  %v14423_v40 = vadd.f32 %v6043_v22, %v5995_v42  ;;  %v14427_v41 = vadd.f32 %v6051_v25, %v6003_v5  ;;  %v5493_v18 = vmax.f32 %v17364_v36, 0.0  ;;  %v5500_v12 = vmax.f32 %v17365_v52, 0.0  ;;  %v17373_v11 = vld [vmem:[#allocation17_spill] sm:$0xff]  ;;  %6522 = vmatpush.bf16.msrb.mxu2 %v7208_v3  ;;  %v17379_v43 = vld [vmem:[#allocation224_spill] sm:$0xff]  ;;  %v17391_v3 = vld [vmem:[#allocation198_spill] sm:$0xff] }
 0xaab   :  { %17356 = vst [vmem:[#allocation150_spill] sm:$0xff] %v14415_v31  ;;  %v6104_v16 = vpack.c.bf16 %v6059_v38, %v6058_v8  ;;  %v14447_v8 = vadd.f32 %v5492_v47, %v17366_v23  ;;  %v5501_v34 = vmax.f32 %v17368_v58, 0.0  ;;  %v5508_v35 = vmax.f32 %v17371_v19, 0.0  ;;  %v17374_v59 = vld [vmem:[#allocation313_spill] sm:$0xff]  ;;  %v17382_v25 = vld [vmem:[#allocation60_spill] sm:$0xff]  ;;  %v17385_v47 = vld [vmem:[#allocation283_spill] sm:$0xff] }
 0xaac   :  { %17357 = vst [vmem:[#allocation191_spill] sm:$0xff] %v14417_v13  ;;  %v14451_v29 = vadd.f32 %v5493_v18, %v17369_v32  ;;  %v14455_v61 = vadd.f32 %v5500_v12, %v17372_v54  ;;  %v5509_v14 = vmax.f32 %v17374_v59, 0.0  ;;  %v17377_v49 = vld [vmem:[#allocation249_spill] sm:$0xff]  ;;  %v5517_v38 = vmax.f32 %v17382_v25, 0.0  ;;  %v17386_v18 = vld [vmem:[#allocation308_spill] sm:$0xff]  ;;  %v17387_v12 = vld [vmem:[#allocation166_spill] sm:$0xff] }
 0xaad   :  { %17358 = vst [vmem:[#allocation75_spill] sm:$0xff] %v14419_v6  ;;  %7095 = vmatmul.msk.bf16.gmra.mxu0 %vm756_vm1, %v6104_v16  ;;  %v14461_v46 = vadd.f32 %v5501_v34, %v17373_v11  ;;  %v5628_v4 = vmul.f32 %v14447_v8, %v17375_v56  ;;  %v5636_v45 = vmul.f32 %v14447_v8, %v17376_v63  ;;  %v5516_v62 = vmax.f32 %v17377_v49, 0.0  ;;  %v17380_v10 = vld [vmem:[#allocation61_spill] sm:$0xff]  ;;  %v17383_v16 = vld [vmem:[#allocation55_spill] sm:$0xff]  ;;  %v17389_v32 = vld [vmem:[#allocation30_spill] sm:$0xff] }
 0xaae   :  { %17360 = vst [vmem:[#allocation194_spill] sm:$0xff] %v14423_v40  ;;  %v14471_v17 = vmul.f32 %v14451_v29, %v17378_v7  ;;  %v5644_v42 = vmul.f32 %v14447_v8, %v17379_v43  ;;  %v5652_v22 = vmul.f32 %v14447_v8, %v17380_v10  ;;  %v17381_v5 = vld [vmem:[#allocation29_spill] sm:$0xff]  ;;  %v14487_v33 = vmul.f32 %v14451_v29, %v17384_v26  ;;  %v17388_v58 = vld [vmem:[#allocation47_spill] sm:$0xff]  ;;  %v17394_v7 = vld [vmem:[#allocation40_spill] sm:$0xff] }
 0xaaf   :  { %17361 = vst [vmem:[#allocation64_spill] sm:$0xff] %v14425_v0  ;;  %v14478_v44 = vadd.f32 %v5508_v35, %v17381_v5  ;;  %v5660_v36 = vmul.f32 %v14447_v8, %v17385_v47  ;;  %v14493_v52 = vmul.f32 %v14451_v29, %v17386_v18  ;;  %v5732_v23 = vmul.f32 %v14455_v61, %v17387_v12  ;;  %v17390_v35 = vld [vmem:[#allocation93_spill] sm:$0xff]  ;;  %v17392_v59 = vld [vmem:[#allocation243_spill] sm:$0xff]  ;;  %v17395_v10 = vld [vmem:[#allocation88_spill] sm:$0xff] }
 0xab0   :  { %17362 = vst [vmem:[#allocation13_spill] sm:$0xff] %v14427_v41  ;;  %v6225_v24 = vpop.f32.mrf.mxu0  ;;  %v14499_v34 = vmul.f32 %v14451_v29, %v17388_v58  ;;  %v14502_v19 = vadd.f32 %v5509_v14, %v17389_v32  ;;  %v14506_v54 = vmul.f32 %v14461_v46, %v17390_v35  ;;  %v5740_v11 = vmul.f32 %v14455_v61, %v17391_v3  ;;  %v17393_v63 = vld [vmem:[#allocation279_spill] sm:$0xff]  ;;  %v17396_v5 = vld [vmem:[#allocation96_spill] sm:$0xff]  ;;  %v17398_v47 = vld [vmem:[#allocation86_spill] sm:$0xff] }
 0xab1   :  { %17367 = vst [vmem:[#allocation299_spill] sm:$0xff] %v14447_v8  ;;  %v14483_v24 = vmul.f32 %v14451_v29, %v17383_v16  ;;  %v5748_v56 = vmul.f32 %v14455_v61, %v17392_v59  ;;  %v5756_v49 = vmul.f32 %v14455_v61, %v17393_v63  ;;  %v14515_v43 = vadd.f32 %v5516_v62, %v17394_v7  ;;  %v17397_v16 = vld [vmem:[#allocation42_spill] sm:$0xff]  ;;  %v17399_v12 = vld [vmem:[#allocation41_spill] sm:$0xff]  ;;  %v17401_v59 = vld [vmem:[#allocation180_spill] sm:$0xff] }
 0xab2   :  { %17370 = vst [vmem:[#allocation258_spill] sm:$0xff] %v14451_v29  ;;  %v14519_v14 = vmul.f32 %v14461_v46, %v17395_v10  ;;  %v14523_v25 = vmul.f32 %v14461_v46, %v17396_v5  ;;  %v14527_v26 = vmul.f32 %v14451_v29, %v17397_v16  ;;  %v14531_v18 = vmul.f32 %v14461_v46, %v17398_v47  ;;  %v17400_v32 = vld [vmem:[#allocation33_spill] sm:$0xff]  ;;  %v17402_v7 = vld [vmem:[#allocation212_spill] sm:$0xff]  ;;  %v17409_v1 = vld [vmem:[#allocation71_spill] sm:$0xff] }
 0xab3   :  { %v14534_v58 = vadd.f32 %v5517_v38, %v17399_v12  ;;  %v5820_v35 = vmul.f32 %v14478_v44, %v17400_v32  ;;  %v5828_v63 = vmul.f32 %v14478_v44, %v17401_v59  ;;  %v5836_v10 = vmul.f32 %v14478_v44, %v17402_v7  ;;  %v17403_v5 = vld [vmem:[#allocation245_spill] sm:$0xff]  ;;  %v17405_v38 = vld [vmem:[#allocation140_spill] sm:$0xff]  ;;  %v17411_v51 = vld [vmem:[#allocation123_spill] sm:$0xff] }
 0xab4   :  { %v5844_v16 = vmul.f32 %v14478_v44, %v17403_v5  ;;  %v17404_v27 = vld [vmem:[#allocation177_spill] sm:$0xff]  ;;  %v14550_v12 = vmul.f32 %v14502_v19, %v17405_v38  ;;  %v17407_v32 = vld [vmem:[#allocation280_spill] sm:$0xff]  ;;  %v14561_v5 = vmul.f32 %v14515_v43, %v17409_v1  ;;  %v14569_v38 = vmul.f32 %v14502_v19, %v17411_v51  ;;  %v17418_v51 = vld [vmem:[#allocation167_spill] sm:$0xff] }
 0xab5   :  { %v14546_v47 = vmul.f32 %v14502_v19, %v17404_v27  ;;  %v17406_v9 = vld [vmem:[#allocation185_spill] sm:$0xff]  ;;  %v5852_v59 = vmul.f32 %v14478_v44, %v17407_v32  ;;  %v14577_v32 = vmul.f32 %v14534_v58, %v17414_v48  ;;  %v17419_v0 = vld [vmem:[#allocation120_spill] sm:$0xff]  ;;  %v5668_v48 = vmul.f32 %v14447_v8, %v17421_v53  ;;  %v17427_v31 = vld [vmem:[#allocation94_spill] sm:$0xff] }
 0xab6   :  { %v17410_v20 = vld [vmem:[#allocation109_spill] sm:$0xff]  ;;  %17412 = vst [vmem:[#allocation48_spill] sm:$0xff] %v14569_v38  ;;  %v17422_v37 = vld [vmem:[#allocation20_spill] sm:$0xff] }
 0xab7   :  { %v14565_v27 = vmul.f32 %v14515_v43, %v17410_v20  ;;  %v17413_v30 = vld [vmem:[#allocation129_spill] sm:$0xff]  ;;  %v5724_v40 = vmul.f32 %v14455_v61, %v17422_v37  ;;  %v5860_v37 = vmul.f32 %v14478_v44, %v17427_v31  ;;  %v17432_v31 = vld [vmem:[#allocation148_spill] sm:$0xff] }
 0xab8   :  { %v17425_v13 = vld [vmem:[#allocation101_spill] sm:$0xff] }
 0xab9   :  { %v17426_v28 = vld [vmem:[#allocation213_spill] sm:$0xff] }
 0xac8   :  { %v5373_v62 = vpop.f32.mrf.mxu1 }
 0xac9   :  { %v5484_v3 = vmax.f32 %v5373_v62, 0.0  ;;  %v14554_v62 = vmul.f32 %v14502_v19, %v17406_v9  ;;  %v14573_v9 = vmul.f32 %v14534_v58, %v17413_v30  ;;  %v17420_v30 = vld [vmem:[#allocation157_spill] sm:$0xff] }
 0xacb   :  { %v5532_v7 = vadd.f32 %v5484_v3, %v17408_v21  ;;  %v17415_v21 = vld [vmem:[#allocation247_spill] sm:$0xff]  ;;  %v17416_v3 = vld [vmem:[#allocation284_spill] sm:$0xff] }
 0xacc   :  { %v14581_v1 = vmul.f32 %v14515_v43, %v17415_v21  ;;  %v14585_v20 = vmul.f32 %v14515_v43, %v17416_v3  ;;  %v17423_v21 = vld [vmem:[#allocation178_spill] sm:$0xff] }
 0xacd   :  { %v5580_v39 = vmul.f32 %v5532_v7, %v17417_v60  ;;  %v5588_v50 = vmul.f32 %v5532_v7, %v17418_v51  ;;  %v5596_v41 = vmul.f32 %v5532_v7, %v17419_v0  ;;  %v5604_v15 = vmul.f32 %v5532_v7, %v17420_v30 }
 0xace   :  { %v5612_v29 = vmul.f32 %v5532_v7, %v17423_v21  ;;  %v5620_v2 = vmul.f32 %v5532_v7, %v17424_v57  ;;  %v5764_v51 = vmul.f32 %v14455_v61, %v17425_v13  ;;  %v14601_v30 = vmul.f32 %v14534_v58, %v17426_v28  ;;  %v17430_v28 = vld [vmem:[#allocation246_spill] sm:$0xff]  ;;  %v17435_v7 = vld [vmem:[#allocation113_spill] sm:$0xff] }
 0xacf   :  { %v5676_v3 = vadd.f32 %v5628_v4, %v5580_v39  ;;  %v5684_v6 = vadd.f32 %v5636_v45, %v5588_v50  ;;  %v5692_v55 = vadd.f32 %v5644_v42, %v5596_v41  ;;  %v5700_v60 = vadd.f32 %v5652_v22, %v5604_v15  ;;  %v17428_v4 = vld [vmem:[#allocation32_spill] sm:$0xff]  ;;  %v17429_v45 = vld [vmem:[#allocation35_spill] sm:$0xff] }
 0xad0   :  { %v5375_v0 = vpop.f32.mrf.mxu1  ;;  %v5708_v53 = vadd.f32 %v5660_v36, %v5612_v29  ;;  %v5716_v8 = vadd.f32 %v5668_v48, %v5620_v2  ;;  %v5916_v13 = vmul.f32 %v14515_v43, %v17428_v4  ;;  %v5941_v29 = vmul.f32 %v14534_v58, %v17430_v28  ;;  %v17431_v2 = vld [vmem:[#allocation251_spill] sm:$0xff] }
 0xad1   :  { %v5485_v21 = vmax.f32 %v5375_v0, 0.0  ;;  %v5772_v38 = vadd.f32 %v5724_v40, %v5676_v3  ;;  %v5780_v57 = vadd.f32 %v5732_v23, %v5684_v6  ;;  %v5788_v39 = vadd.f32 %v5740_v11, %v5692_v55  ;;  %v17433_v23 = vld [vmem:[#allocation226_spill] sm:$0xff]  ;;  %v17434_v11 = vld [vmem:[#allocation223_spill] sm:$0xff]  ;;  %v17436_v3 = vld [vmem:[#allocation173_spill] sm:$0xff] }
 0xad2   :  { %v5796_v50 = vadd.f32 %v5748_v56, %v5700_v60  ;;  %v5804_v41 = vadd.f32 %v5756_v49, %v5708_v53  ;;  %v5812_v15 = vadd.f32 %v5764_v51, %v5716_v8  ;;  %v5725_v36 = vmul.f32 %v14461_v46, %v17431_v2  ;;  %v17437_v0 = vld [vmem:[#allocation160_spill] sm:$0xff] }
 0xad3   :  { %v5533_v42 = vadd.f32 %v5485_v21, %v17429_v45  ;;  %v5868_v22 = vadd.f32 %v5820_v35, %v5772_v38  ;;  %v5821_v40 = vmul.f32 %v14502_v19, %v17432_v31  ;;  %v5956_v8 = vmul.f32 %v14515_v43, %v17433_v23  ;;  %v17441_v23 = vld [vmem:[#allocation221_spill] sm:$0xff] }
 0xad4   :  { %v5900_v6 = vadd.f32 %v5852_v59, %v5804_v41  ;;  %v5908_v55 = vadd.f32 %v5860_v37, %v5812_v15  ;;  %v5876_v38 = vadd.f32 %v5828_v63, %v5780_v57  ;;  %v5884_v51 = vadd.f32 %v5836_v10, %v5788_v39  ;;  %v17438_v37 = vld [vmem:[#allocation172_spill] sm:$0xff]  ;;  %v17440_v63 = vld [vmem:[#allocation66_spill] sm:$0xff] }
 0xad5   :  { %v5581_v56 = vmul.f32 %v5533_v42, %v17434_v11  ;;  %v5964_v49 = vadd.f32 %v5916_v13, %v5868_v22  ;;  %v5589_v48 = vmul.f32 %v5533_v42, %v17435_v7  ;;  %v5597_v60 = vmul.f32 %v5533_v42, %v17436_v3  ;;  %v17439_v22 = vld [vmem:[#allocation211_spill] sm:$0xff]  ;;  %v17443_v11 = vld [vmem:[#allocation282_spill] sm:$0xff] }
 0xad6   :  { %v5473_v35 = vpop.f32.mrf.mxu3  ;;  %v5605_v53 = vmul.f32 %v5533_v42, %v17437_v0  ;;  %v5613_v41 = vmul.f32 %v5533_v42, %v17438_v37  ;;  %v5892_v45 = vadd.f32 %v5844_v16, %v5796_v50  ;;  %v5621_v28 = vmul.f32 %v5533_v42, %v17439_v22  ;;  %v17442_v16 = vld [vmem:[#allocation98_spill] sm:$0xff]  ;;  %v17452_v22 = vld [vmem:[#allocation149_spill] sm:$0xff] }
 0xad7   :  { %v5524_v21 = vmax.f32 %v5473_v35, 0.0  ;;  %v5677_v4 = vadd.f32 %v14471_v17, %v5581_v56  ;;  %v5685_v59 = vadd.f32 %v14483_v24, %v5589_v48  ;;  %v5693_v15 = vadd.f32 %v14487_v33, %v5597_v60  ;;  %v17445_v56 = vld [vmem:[#allocation174_spill] sm:$0xff] }
 0xad8   :  { %v5701_v13 = vadd.f32 %v14499_v34, %v5605_v53  ;;  %v5709_v2 = vadd.f32 %v14527_v26, %v5613_v41  ;;  %v5717_v31 = vadd.f32 %v14493_v52, %v5621_v28  ;;  %v6004_v33 = vadd.f32 %v5956_v8, %v5908_v55  ;;  %v17446_v55 = vld [vmem:[#allocation145_spill] sm:$0xff]  ;;  %v17447_v48 = vld [vmem:[#allocation218_spill] sm:$0xff] }
 0xad9   :  { %v14627_v57 = vadd.f32 %v5524_v21, %v17440_v63  ;;  %v5773_v10 = vadd.f32 %v5725_v36, %v5677_v4  ;;  %v5781_v39 = vadd.f32 %v14506_v54, %v5685_v59  ;;  %v5789_v17 = vadd.f32 %v14519_v14, %v5693_v15  ;;  %v17444_v54 = vld [vmem:[#allocation158_spill] sm:$0xff]  ;;  %v17450_v15 = vld [vmem:[#allocation48_spill] sm:$0xff] }
 0xada   :  { %v5797_v24 = vadd.f32 %v14523_v25, %v5701_v13  ;;  %v5765_v34 = vmul.f32 %v14461_v46, %v17441_v23  ;;  %v5861_v50 = vmul.f32 %v14502_v19, %v17442_v16  ;;  %v5949_v36 = vmul.f32 %v14534_v58, %v17443_v11  ;;  %v17448_v0 = vld [vmem:[#allocation110_spill] sm:$0xff] }
 0xadb   :  { %v5869_v42 = vadd.f32 %v5821_v40, %v5773_v10  ;;  %v6012_v26 = vmul.f32 %v14627_v57, %v17444_v54  ;;  %v5877_v14 = vadd.f32 %v14546_v47, %v5781_v39  ;;  %v6020_v25 = vmul.f32 %v14627_v57, %v17445_v56  ;;  %v17455_v10 = vld [vmem:[#allocation83_spill] sm:$0xff] }
 0xadc   :  { %v5885_v52 = vadd.f32 %v14550_v12, %v5789_v17  ;;  %v5957_v8 = vmul.f32 %v14534_v58, %v17446_v55  ;;  %v5972_v7 = vadd.f32 %v14561_v5, %v5876_v38  ;;  %v5980_v40 = vadd.f32 %v14565_v27, %v5884_v51 }
 0xadd   :  { %v6028_v35 = vmul.f32 %v14627_v57, %v17447_v48  ;;  %v5893_v60 = vadd.f32 %v14554_v62, %v5797_v24  ;;  %v5988_v47 = vadd.f32 %v14581_v1, %v5892_v45  ;;  %v6036_v53 = vmul.f32 %v14627_v57, %v17448_v0  ;;  %v17449_v62 = vld [vmem:[#allocation67_spill] sm:$0xff]  ;;  %v17457_v24 = vld [vmem:[#allocation285_spill] sm:$0xff] }
 0xade   :  { %v5475_v3 = vpop.f32.mrf.mxu3  ;;  %v5996_v12 = vadd.f32 %v14585_v20, %v5900_v6  ;;  %v5965_v4 = vadd.f32 %v14573_v9, %v5869_v42  ;;  %v5805_v5 = vadd.f32 %v14531_v18, %v5709_v2  ;;  %v5813_v38 = vadd.f32 %v5765_v34, %v5717_v31  ;;  %v17451_v9 = vld [vmem:[#allocation286_spill] sm:$0xff]  ;;  %v17456_v2 = vld [vmem:[#allocation248_spill] sm:$0xff]  ;;  %v17458_v34 = vld [vmem:[#allocation253_spill] sm:$0xff] }
 0xadf   :  { %v5525_v21 = vmax.f32 %v5475_v3, 0.0  ;;  %v6060_v27 = vadd.f32 %v6012_v26, %v5964_v49  ;;  %v5973_v51 = vadd.f32 %v14577_v32, %v5877_v14  ;;  %v6068_v59 = vadd.f32 %v6020_v25, %v5972_v7  ;;  %v17453_v32 = vld [vmem:[#allocation112_spill] sm:$0xff]  ;;  %v17459_v3 = vld [vmem:[#allocation135_spill] sm:$0xff] }
 0xae0   :  { %v5981_v37 = vadd.f32 %v14601_v30, %v5885_v52  ;;  %v6076_v1 = vadd.f32 %v6028_v35, %v5980_v40  ;;  %v5901_v13 = vadd.f32 %v17450_v15, %v5805_v5  ;;  %v5909_v45 = vadd.f32 %v5861_v50, %v5813_v38  ;;  %v17454_v30 = vld [vmem:[#allocation207_spill] sm:$0xff] }
 0xae1   :  { %v14662_v41 = vadd.f32 %v5525_v21, %v17449_v62  ;;  %v5989_v20 = vadd.f32 %v5941_v29, %v5893_v60  ;;  %v14665_v6 = vadd.f32 %v6036_v53, %v5988_v47  ;;  %v6044_v18 = vmul.f32 %v14627_v57, %v17451_v9  ;;  %v7212_v47 = vld [vmem:[%s15067_s1 + $0x190] sm:$0xff]  ;;  %v17462_v0 = vld [vmem:[#allocation3_spill] sm:$0xff]  ;;  %v17465_v21 = vld [vmem:[#allocation150_spill] sm:$0xff] }
 0xae2   :  { %v6052_v49 = vmul.f32 %v14627_v57, %v17452_v22  ;;  %v5997_v17 = vadd.f32 %v5949_v36, %v5901_v13  ;;  %v6005_v23 = vadd.f32 %v5957_v8, %v5909_v45  ;;  %6785 = vmatpush.bf16.msrb.mxu3 %v7212_v47  ;;  %v17463_v53 = vld [vmem:[#allocation19_spill] sm:$0xff]  ;;  %v17471_v62 = vld [vmem:[#allocation168_spill] sm:$0xff] }
 0xae3   :  { %v6013_v28 = vmul.f32 %v14662_v41, %v17453_v32  ;;  %v6021_v63 = vmul.f32 %v14662_v41, %v17454_v30  ;;  %v6029_v39 = vmul.f32 %v14662_v41, %v17455_v10  ;;  %v6037_v29 = vmul.f32 %v14662_v41, %v17456_v2  ;;  %v17474_v13 = vld [vmem:[#allocation191_spill] sm:$0xff]  ;;  %v17475_v45 = vld [vmem:[#allocation192_spill] sm:$0xff]  ;;  %v17478_v32 = vld [vmem:[#allocation169_spill] sm:$0xff] }
 0xae4   :  { %v6045_v31 = vmul.f32 %v14662_v41, %v17457_v24  ;;  %v6053_v16 = vmul.f32 %v14662_v41, %v17458_v34  ;;  %v14683_v26 = vadd.f32 %v6044_v18, %v5996_v12  ;;  %v14687_v56 = vadd.f32 %v6052_v49, %v6004_v33  ;;  %v17460_v33 = vld [vmem:[#allocation293_spill] sm:$0xff]  ;;  %v17483_v34 = vld [vmem:[#allocation252_spill] sm:$0xff] }
 0xae5   :  { %v6061_v50 = vadd.f32 %v6013_v28, %v5965_v4  ;;  %v6069_v42 = vadd.f32 %v6021_v63, %v5973_v51  ;;  %v6077_v11 = vadd.f32 %v6029_v39, %v5981_v37  ;;  %v6085_v54 = vadd.f32 %v6037_v29, %v5989_v20  ;;  %v17466_v4 = vld [vmem:[#allocation12_spill] sm:$0xff]  ;;  %v17468_v51 = vld [vmem:[#allocation21_spill] sm:$0xff]  ;;  %v17480_v39 = vld [vmem:[#allocation102_spill] sm:$0xff] }
 0xae6   :  { %v14685_v14 = vadd.f32 %v6045_v31, %v5997_v17  ;;  %v14689_v25 = vadd.f32 %v6053_v16, %v6005_v23  ;;  %v17461_v60 = vpack.c.bf16 %v17459_v3, %v17460_v33  ;;  %v17464_v12 = vpack.c.bf16 %v17462_v0, %v17463_v53  ;;  %v17477_v49 = vld [vmem:[#allocation89_spill] sm:$0xff]  ;;  %v17481_v29 = vld [vmem:[#allocation328_spill] sm:$0xff]  ;;  %v17487_v3 = vld [vmem:[#allocation75_spill] sm:$0xff] }
 0xae7   :  { %v6227_v36 = vpop.f32.mrf.mxu0  ;;  %v6105_v52 = vpack.c.bf16 %v6061_v50, %v6060_v27  ;;  %v6109_v55 = vpack.c.bf16 %v6069_v42, %v6068_v59  ;;  %v6113_v7 = vpack.c.bf16 %v6077_v11, %v6076_v1  ;;  %v6117_v8 = vpack.c.bf16 %v6085_v54, %v14665_v6  ;;  %v17469_v59 = vld [vmem:[#allocation104_spill] sm:$0xff]  ;;  %v17472_v1 = vld [vmem:[#allocation250_spill] sm:$0xff]  ;;  %v7211_v6 = vld [vmem:[%s15067_s1 + $0x188] sm:$0xff] }
 0xae8   :  { %v6121_v40 = vpack.c.bf16 %v14685_v14, %v14683_v26  ;;  %v6125_v48 = vpack.c.bf16 %v14689_v25, %v14687_v56  ;;  %v17467_v5 = vpack.c.bf16 %v17465_v21, %v17466_v4  ;;  %v17470_v37 = vpack.c.bf16 %v17468_v51, %v17469_v59  ;;  %6786 = vmatpush.bf16.msrb.mxu3 %v7211_v6  ;;  %v17482_v23 = vld [vmem:[#allocation176_spill] sm:$0xff]  ;;  %v17485_v54 = vld [vmem:[#allocation122_spill] sm:$0xff]  ;;  %v17488_v33 = vld [vmem:[#allocation111_spill] sm:$0xff] }
 0xae9   :  { %7096 = vmatmul.msk.bf16.gmra.mxu0 %vm756_vm1, %v6105_v52  ;;  %v17473_v15 = vpack.c.bf16 %v17471_v62, %v17472_v1  ;;  %v17476_v20 = vpack.c.bf16 %v17474_v13, %v17475_v45  ;;  %v17479_v28 = vpack.c.bf16 %v17477_v49, %v17478_v32  ;;  %v17484_v16 = vpack.c.bf16 %v17482_v23, %v17483_v34  ;;  %v17486_v52 = vld [vmem:[#allocation2_spill] sm:$0xff]  ;;  %v17491_v4 = vld [vmem:[#allocation52_spill] sm:$0xff]  ;;  %v17492_v1 = vld [vmem:[#allocation299_spill] sm:$0xff] }
 0xaea   :  { %v7210_v51 = vld [vmem:[%s15067_s1 + $0x180] sm:$0xff] }
 0xaeb   :  { %v17493_v13 = vld [vmem:[#allocation258_spill] sm:$0xff] }
 0xaec   :  { %6787 = vmatpush.bf16.msrb.mxu3 %v7210_v51 }
 0xaef   :  { %v6228_v35 = vpop.f32.mrf.mxu0 }
 0xaf9   :  { %7097 = vmatmul.msk.bf16.gmra.mxu0 %vm756_vm1, %v17461_v60  ;;  %v17489_v60 = vpack.c.bf16 %v17487_v3, %v17488_v33 }
 0xb09   :  { %7098 = vmatmul.msk.bf16.gmra.mxu0 %vm756_vm1, %v17464_v12  ;;  %v17490_v12 = vld [vmem:[#allocation263_spill] sm:$0xff] }
 0xb19   :  { %7099 = vmatmul.msk.bf16.gmra.mxu0 %vm756_vm1, %v17467_v5 }
 0xb29   :  { %7100 = vmatmul.msk.bf16.gmra.mxu0 %vm756_vm1, %v6109_v55 }
 0xb2a   :  { %v6230_v38 = vpop.f32.mrf.mxu0 }
 0xb32   :  { %v6231_v27 = vpop.f32.mrf.mxu0 }
 0xb39   :  { %7101 = vmatmul.msk.bf16.gmra.mxu0 %vm756_vm1, %v17470_v37 }
 0xb49   :  { %7102 = vmatmul.msk.bf16.gmra.mxu0 %vm756_vm1, %v17473_v15 }
 0xb59   :  { %7103 = vmatmul.msk.bf16.gmra.mxu0 %vm756_vm1, %v17476_v20 }
 0xb66   :  { %v6233_v9 = vpop.f32.mrf.mxu0 }
 0xb67   :  { %v17494_v9 = vld [vmem:[#allocation143_spill] sm:$0xff] }
 0xb69   :  { %7104 = vmatmul.msk.bf16.gmra.mxu0 %vm756_vm1, %v6113_v7 }
 0xb6e   :  { %v6234_v18 = vpop.f32.mrf.mxu0 }
 0xb6f   :  { %v17495_v18 = vld [vmem:[#allocation291_spill] sm:$0xff] }
 0xb76   :  { %v6236_v22 = vpop.f32.mrf.mxu0 }
 0xb77   :  { %v6336_v30 = vmax.f32 %v6236_v22, 0.0  ;;  %v17496_v22 = vpack.c.bf16 %v17494_v9, %v17495_v18  ;;  %v17514_v18 = vld [vmem:[#allocation297_spill] sm:$0xff] }
 0xb79   :  { %7105 = vmatmul.msk.bf16.gmra.mxu0 %vm756_vm1, %v17479_v28  ;;  %v6376_v2 = vadd.f32 %v6336_v30, %v17480_v39  ;;  %v17497_v28 = vld [vmem:[#allocation329_spill] sm:$0xff] }
 0xb7e   :  { %v6238_v63 = vpop.f32.mrf.mxu0 }
 0xb7f   :  { %v6337_v10 = vmax.f32 %v6238_v63, 0.0  ;;  %v17498_v63 = vld [vmem:[#allocation161_spill] sm:$0xff] }
 0xb81   :  { %v6377_v17 = vadd.f32 %v6337_v10, %v17481_v29  ;;  %v17499_v29 = vld [vmem:[#allocation44_spill] sm:$0xff] }
 0xb83   :  { %v6416_v24 = vpack.c.bf16 %v6377_v17, %v6376_v2  ;;  %v17500_v17 = vld [vmem:[#allocation163_spill] sm:$0xff] }
 0xb85   :  { %7129 = vmatmul.msk.bf16.vlgmr.msrb.gmra.mxu2 %vm756_vm1, %v6416_v24  ;;  %v17501_v24 = vpack.c.bf16 %v17499_v29, %v17500_v17  ;;  %v17518_v29 = vld [vmem:[#allocation43_spill] sm:$0xff] }
 0xb86   :  { %v6241_v31 = vpop.f32.mrf.mxu0 }
 0xb87   :  { %v6338_v50 = vmax.f32 %v6241_v31, 0.0 }
 0xb89   :  { %7106 = vmatmul.msk.bf16.gmra.mxu0 %vm756_vm1, %v17484_v16  ;;  %v6378_v36 = vadd.f32 %v6338_v50, %v17485_v54  ;;  %v17502_v16 = vld [vmem:[#allocation146_spill] sm:$0xff] }
 0xb8e   :  { %v6243_v42 = vpop.f32.mrf.mxu0 }
 0xb8f   :  { %v6339_v11 = vmax.f32 %v6243_v42, 0.0  ;;  %v17503_v42 = vld [vmem:[#allocation217_spill] sm:$0xff] }
 0xb91   :  { %v6379_v55 = vadd.f32 %v6339_v11, %v17486_v52  ;;  %v17504_v52 = vld [vmem:[#allocation194_spill] sm:$0xff] }
 0xb93   :  { %v6417_v7 = vpack.c.bf16 %v6379_v55, %v6378_v36  ;;  %v17505_v55 = vld [vmem:[#allocation49_spill] sm:$0xff] }
 0xb95   :  { %7130 = vmatmul.msk.bf16.gmra.mxu2 %vm756_vm1, %v6417_v7  ;;  %v17506_v7 = vpack.c.bf16 %v17504_v52, %v17505_v55 }
 0xb96   :  { %v6246_v35 = vpop.f32.mrf.mxu0 }
 0xb97   :  { %v6340_v47 = vmax.f32 %v6246_v35, 0.0 }
 0xb99   :  { %7107 = vmatmul.msk.bf16.gmra.mxu0 %vm756_vm1, %v17489_v60  ;;  %v6380_v21 = vadd.f32 %v6340_v47, %v17490_v12  ;;  %v17507_v60 = vld [vmem:[#allocation72_spill] sm:$0xff] }
 0xb9e   :  { %v6248_v0 = vpop.f32.mrf.mxu0 }
 0xb9f   :  { %v6341_v53 = vmax.f32 %v6248_v0, 0.0  ;;  %v17508_v0 = vld [vmem:[#allocation230_spill] sm:$0xff] }
 0xba1   :  { %v6381_v5 = vadd.f32 %v6341_v53, %v17491_v4 }
 0xba3   :  { %v6418_v38 = vpack.c.bf16 %v6381_v5, %v6380_v21 }
 0xba5   :  { %7131 = vmatmul.msk.bf16.gmra.mxu2 %vm756_vm1, %v6418_v38 }
 0xba6   :  { %v6251_v27 = vpop.f32.mrf.mxu0 }
 0xba7   :  { %v6342_v59 = vmax.f32 %v6251_v27, 0.0 }
 0xba9   :  { %7108 = vmatmul.msk.bf16.gmra.mxu0 %vm756_vm1, %v6117_v8  ;;  %v6382_v15 = vadd.f32 %v6342_v59, %v17492_v1  ;;  %v17510_v1 = vld [vmem:[#allocation231_spill] sm:$0xff] }
 0xbae   :  { %v6253_v37 = vpop.f32.mrf.mxu0 }
 0xbaf   :  { %v6343_v62 = vmax.f32 %v6253_v37, 0.0 }
 0xbb1   :  { %v6383_v45 = vadd.f32 %v6343_v62, %v17493_v13  ;;  %v17509_v62 = vld [vmem:[#allocation125_spill] sm:$0xff] }
 0xbb3   :  { %v6419_v20 = vpack.c.bf16 %v6383_v45, %v6382_v15  ;;  %v17511_v15 = vpack.c.bf16 %v17509_v62, %v17510_v1 }
 0xbb5   :  { %7132 = vmatmul.msk.bf16.gmra.mxu2 %vm756_vm1, %v6419_v20  ;;  %v17513_v20 = vld [vmem:[#allocation200_spill] sm:$0xff] }
 0xbb6   :  { %v6256_v6 = vpop.f32.mrf.mxu0 }
 0xbb7   :  { %v6344_v8 = vmax.f32 %v6256_v6, 0.0 }
 0xbb9   :  { %7109 = vmatmul.msk.bf16.gmra.mxu0 %vm756_vm1, %v17496_v22  ;;  %v6384_v30 = vadd.f32 %v6344_v8, %v17497_v28  ;;  %v17515_v22 = vld [vmem:[#allocation255_spill] sm:$0xff] }
 0xbba   :  { %v17516_v8 = vpack.c.bf16 %v17514_v18, %v17515_v22  ;;  %v17525_v18 = vld [vmem:[#allocation63_spill] sm:$0xff] }
 0xbbe   :  { %v6258_v49 = vpop.f32.mrf.mxu0 }
 0xbbf   :  { %v6345_v32 = vmax.f32 %v6258_v49, 0.0  ;;  %v14799_v49 = vld [vmem:[%s15069_s2 + $0x4] ss:$0 sm:$0xff] }
 0xbc1   :  { %v6385_v10 = vadd.f32 %v6345_v32, %v17498_v63 }
 0xbc3   :  { %v6420_v39 = vpack.c.bf16 %v6385_v10, %v6384_v30 }
 0xbc5   :  { %7133 = vmatmul.msk.bf16.gmra.mxu2 %vm756_vm1, %v6420_v39  ;;  %v17517_v39 = vld [vmem:[#allocation53_spill] sm:$0xff] }
 0xbc6   :  { %v6261_v2 = vpop.f32.mrf.mxu0 }
 0xbc7   :  { %v6346_v31 = vmax.f32 %v6261_v2, 0.0 }
 0xbc9   :  { %7110 = vmatmul.msk.bf16.gmra.mxu0 %vm756_vm1, %v17501_v24  ;;  %v6386_v50 = vadd.f32 %v6346_v31, %v17502_v16 }
 0xbce   :  { %v6263_v23 = vpop.f32.mrf.mxu0 }
 0xbcf   :  { %v6347_v34 = vmax.f32 %v6263_v23, 0.0 }
 0xbd1   :  { %v6387_v11 = vadd.f32 %v6347_v34, %v17503_v42 }
 0xbd3   :  { %v6421_v54 = vpack.c.bf16 %v6387_v11, %v6386_v50  ;;  %v17519_v11 = vld [vmem:[#allocation13_spill] sm:$0xff] }
 0xbd5   :  { %7134 = vmatmul.msk.bf16.gmra.mxu2 %vm756_vm1, %v6421_v54  ;;  %v17520_v54 = vld [vmem:[#allocation64_spill] sm:$0xff] }
 0xbd6   :  { %v6266_v36 = vpop.f32.mrf.mxu0 }
 0xbd7   :  { %v6348_v35 = vmax.f32 %v6266_v36, 0.0  ;;  %v17521_v36 = vpack.c.bf16 %v17519_v11, %v17520_v54 }
 0xbd9   :  { %7111 = vmatmul.msk.bf16.gmra.mxu0 %vm756_vm1, %v17506_v7  ;;  %v6388_v47 = vadd.f32 %v6348_v35, %v17507_v60 }
 0xbde   :  { %v6268_v3 = vpop.f32.mrf.mxu0 }
 0xbdf   :  { %v6349_v33 = vmax.f32 %v6268_v3, 0.0 }
 0xbe1   :  { %v6389_v53 = vadd.f32 %v6349_v33, %v17508_v0  ;;  %v17522_v33 = vld [vmem:[#allocation254_spill] sm:$0xff] }
 0xbe3   :  { %v6422_v12 = vpack.c.bf16 %v6389_v53, %v6388_v47  ;;  %v17523_v47 = vld [vmem:[#allocation295_spill] sm:$0xff] }
 0xbe5   :  { %7135 = vmatmul.msk.bf16.gmra.mxu2 %vm756_vm1, %v6422_v12 }
 0xbe6   :  { %v6271_v21 = vpop.f32.mrf.mxu0 }
 0xbe7   :  { %v6350_v4 = vmax.f32 %v6271_v21, 0.0 }
 0xbe9   :  { %7112 = vmatmul.msk.bf16.gmra.mxu0 %vm756_vm1, %v6121_v40  ;;  %v6390_v27 = vadd.f32 %v6350_v4, %v14455_v61  ;;  %v17512_v40 = vld [vmem:[#allocation196_spill] sm:$0xff] }
 0xbee   :  { %v6273_v5 = vpop.f32.mrf.mxu0 }
 0xbef   :  { %v6351_v38 = vmax.f32 %v6273_v5, 0.0 }
 0xbf1   :  { %v6391_v51 = vadd.f32 %v6351_v38, %v14461_v46 }
 0xbf3   :  { %v6423_v59 = vpack.c.bf16 %v6391_v51, %v6390_v27 }
 0xbf5   :  { %7136 = vmatmul.msk.bf16.gmra.mxu2 %vm756_vm1, %v6423_v59 }
 0xbf6   :  { %v6276_v37 = vpop.f32.mrf.mxu0 }
 0xbf7   :  { %v6352_v13 = vmax.f32 %v6276_v37, 0.0 }
 0xbf9   :  { %7113 = vmatmul.msk.bf16.gmra.mxu0 %vm756_vm1, %v17511_v15  ;;  %v6392_v45 = vadd.f32 %v6352_v13, %v17512_v40 }
 0xbfe   :  { %v6278_v26 = vpop.f32.mrf.mxu0 }
 0xbff   :  { %v6353_v14 = vmax.f32 %v6278_v26, 0.0 }
 0xc01   :  { %v6393_v6 = vadd.f32 %v6353_v14, %v17513_v20 }
 0xc03   :  { %v6424_v9 = vpack.c.bf16 %v6393_v6, %v6392_v45 }
 0xc05   :  { %7137 = vmatmul.msk.bf16.gmra.mxu2 %vm756_vm1, %v6424_v9 }
 0xc06   :  { %v6281_v61 = vpop.f32.mrf.mxu0 }
 0xc07   :  { %v6354_v32 = vmax.f32 %v6281_v61, 0.0 }
 0xc08   :  { %v6524_v46 = vpop.f32.mrf.mxu2 }
 0xc09   :  { %7114 = vmatmul.msk.bf16.gmra.mxu0 %vm756_vm1, %v17516_v8  ;;  %v6525_v30 = vadd.f32 %v14799_v49, %v6524_v46  ;;  %v6394_v2 = vadd.f32 %v6354_v32, %v17517_v39  ;;  %v17524_v46 = vld [vmem:[#allocation229_spill] sm:$0xff] }
 0xc0b   :  { %v6624_v31 = vmax.f32 %v6525_v30, 0.0 }
 0xc0e   :  { %v6283_v28 = vpop.f32.mrf.mxu0 }
 0xc0f   :  { %v6355_v63 = vmax.f32 %v6283_v28, 0.0 }
 0xc10   :  { %v6526_v10 = vpop.f32.mrf.mxu2 }
 0xc11   :  { %v6395_v17 = vadd.f32 %v6355_v63, %v17518_v29  ;;  %v6527_v24 = vadd.f32 %v14799_v49, %v6526_v10 }
 0xc13   :  { %v6425_v23 = vpack.c.bf16 %v6395_v17, %v6394_v2  ;;  %v6625_v34 = vmax.f32 %v6527_v24, 0.0 }
 0xc15   :  { %v6664_v16 = vpack.c.bf16 %v6625_v34, %v6624_v31  ;;  %7138 = vmatmul.msk.bf16.gmra.mxu2 %vm756_vm1, %v6425_v23  ;;  %v17526_v23 = vld [vmem:[#allocation62_spill] sm:$0xff] }
 0xc16   :  { %v6286_v50 = vpop.f32.mrf.mxu0 }
 0xc17   :  { %7173 = vmatmul.msk.bf16.vlgmr.msrb.gmra.mxu3 %vm6719_vm9, %v6664_v16  ;;  %v6356_v52 = vmax.f32 %v6286_v50, 0.0  ;;  %v17527_v16 = vld [vmem:[#allocation126_spill] sm:$0xff] }
 0xc18   :  { %v6529_v42 = vpop.f32.mrf.mxu2 }
 0xc19   :  { %7115 = vmatmul.msk.bf16.gmra.mxu0 %vm756_vm1, %v17521_v36  ;;  %v6530_v7 = vadd.f32 %v14799_v49, %v6529_v42  ;;  %v6396_v60 = vadd.f32 %v6356_v52, %v17522_v33 }
 0xc1b   :  { %v6626_v12 = vmax.f32 %v6530_v7, 0.0 }
 0xc1e   :  { %v6288_v55 = vpop.f32.mrf.mxu0 }
 0xc1f   :  { %v6357_v35 = vmax.f32 %v6288_v55, 0.0 }
 0xc20   :  { %v6531_v3 = vpop.f32.mrf.mxu2 }
 0xc21   :  { %v6397_v0 = vadd.f32 %v6357_v35, %v17523_v47  ;;  %v6532_v53 = vadd.f32 %v14799_v49, %v6531_v3 }
 0xc23   :  { %v6426_v21 = vpack.c.bf16 %v6397_v0, %v6396_v60  ;;  %v6627_v4 = vmax.f32 %v6532_v53, 0.0  ;;  %v17528_v0 = vld [vmem:[#allocation264_spill] sm:$0xff] }
 0xc25   :  { %v6665_v5 = vpack.c.bf16 %v6627_v4, %v6626_v12  ;;  %7139 = vmatmul.msk.bf16.gmra.mxu2 %vm756_vm1, %v6426_v21  ;;  %v17529_v12 = vld [vmem:[#allocation268_spill] sm:$0xff] }
 0xc26   :  { %v6291_v38 = vpop.f32.mrf.mxu0 }
 0xc27   :  { %7174 = vmatmul.msk.bf16.gmra.mxu3 %vm6719_vm9, %v6665_v5  ;;  %v6358_v51 = vmax.f32 %v6291_v38, 0.0 }
 0xc28   :  { %v6534_v27 = vpop.f32.mrf.mxu2 }
 0xc29   :  { %7116 = vmatmul.msk.bf16.gmra.mxu0 %vm756_vm1, %v6125_v48  ;;  %v6535_v37 = vadd.f32 %v14799_v49, %v6534_v27  ;;  %v6398_v15 = vadd.f32 %v6358_v51, %v14478_v44 }
 0xc2b   :  { %v6628_v14 = vmax.f32 %v6535_v37, 0.0 }
 0xc2e   :  { %v6293_v59 = vpop.f32.mrf.mxu0 }
 0xc2f   :  { %v6359_v62 = vmax.f32 %v6293_v59, 0.0 }
 0xc30   :  { %v6536_v1 = vpop.f32.mrf.mxu2 }
 0xc31   :  { %v6399_v13 = vadd.f32 %v6359_v62, %v14502_v19  ;;  %v6537_v26 = vadd.f32 %v14799_v49, %v6536_v1 }
 0xc33   :  { %v6427_v40 = vpack.c.bf16 %v6399_v13, %v6398_v15  ;;  %v6629_v45 = vmax.f32 %v6537_v26, 0.0 }
 0xc35   :  { %v6666_v20 = vpack.c.bf16 %v6629_v45, %v6628_v14  ;;  %7140 = vmatmul.msk.bf16.gmra.mxu2 %vm756_vm1, %v6427_v40 }
 0xc36   :  { %v6296_v56 = vpop.f32.mrf.mxu0 }
 0xc37   :  { %7175 = vmatmul.msk.bf16.gmra.mxu3 %vm6719_vm9, %v6666_v20  ;;  %v6360_v48 = vmax.f32 %v6296_v56, 0.0 }
 0xc38   :  { %v6539_v25 = vpop.f32.mrf.mxu2 }
 0xc39   :  { %v6540_v9 = vadd.f32 %v14799_v49, %v6539_v25  ;;  %v6400_v19 = vadd.f32 %v6360_v48, %v17524_v46 }
 0xc3b   :  { %v6630_v32 = vmax.f32 %v6540_v9, 0.0 }
 0xc3e   :  { %v6298_v6 = vpop.f32.mrf.mxu0 }
 0xc3f   :  { %v6361_v61 = vmax.f32 %v6298_v6, 0.0 }
 0xc40   :  { %v6541_v44 = vpop.f32.mrf.mxu2 }
 0xc41   :  { %v6401_v22 = vadd.f32 %v6361_v61, %v17525_v18  ;;  %v6542_v8 = vadd.f32 %v14799_v49, %v6541_v44  ;;  %v17530_v18 = vld [vmem:[#allocation288_spill] sm:$0xff] }
 0xc43   :  { %v6428_v28 = vpack.c.bf16 %v6401_v22, %v6400_v19  ;;  %v6631_v30 = vmax.f32 %v6542_v8, 0.0  ;;  %v17531_v22 = vld [vmem:[#allocation289_spill] sm:$0xff] }
 0xc45   :  { %v6667_v63 = vpack.c.bf16 %v6631_v30, %v6630_v32  ;;  %7141 = vmatmul.msk.bf16.gmra.mxu2 %vm756_vm1, %v6428_v28 }
 0xc46   :  { %v6301_v10 = vpop.f32.mrf.mxu0 }
 0xc47   :  { %7176 = vmatmul.msk.bf16.gmra.mxu3 %vm6719_vm9, %v6667_v63  ;;  %v6362_v2 = vmax.f32 %v6301_v10, 0.0 }
 0xc48   :  { %v6544_v39 = vpop.f32.mrf.mxu2 }
 0xc49   :  { %v6545_v17 = vadd.f32 %v14799_v49, %v6544_v39  ;;  %v6402_v34 = vadd.f32 %v6362_v2, %v17526_v23 }
 0xc4b   :  { %v6632_v11 = vmax.f32 %v6545_v17, 0.0 }
 0xc4e   :  { %v6303_v29 = vpop.f32.mrf.mxu0 }
 0xc4f   :  { %v6363_v24 = vmax.f32 %v6303_v29, 0.0 }
 0xc50   :  { %v6546_v31 = vpop.f32.mrf.mxu2 }
 0xc51   :  { %v6403_v50 = vadd.f32 %v6363_v24, %v17527_v16  ;;  %v6547_v42 = vadd.f32 %v14799_v49, %v6546_v31 }
 0xc53   :  { %v6429_v54 = vpack.c.bf16 %v6403_v50, %v6402_v34  ;;  %v6633_v36 = vmax.f32 %v6547_v42, 0.0  ;;  %v17532_v34 = vld [vmem:[#allocation210_spill] sm:$0xff]  ;;  %v17533_v50 = vld [vmem:[#allocation183_spill] sm:$0xff] }
 0xc55   :  { %v6668_v52 = vpack.c.bf16 %v6633_v36, %v6632_v11  ;;  %7142 = vmatmul.msk.bf16.gmra.mxu2 %vm756_vm1, %v6429_v54 }
 0xc56   :  { %v6306_v55 = vpop.f32.mrf.mxu0 }
 0xc57   :  { %7177 = vmatmul.msk.bf16.gmra.mxu3 %vm6719_vm9, %v6668_v52  ;;  %v6364_v35 = vmax.f32 %v6306_v55, 0.0 }
 0xc58   :  { %v6549_v7 = vpop.f32.mrf.mxu2 }
 0xc59   :  { %v6550_v33 = vadd.f32 %v14799_v49, %v6549_v7  ;;  %v6404_v53 = vadd.f32 %v6364_v35, %v17528_v0  ;;  %v14866_v35 = vld [vmem:[%s15069_s2 + $0x5] ss:$0 sm:$0xff] }
 0xc5b   :  { %v6634_v5 = vmax.f32 %v6550_v33, 0.0 }
 0xc5e   :  { %v6308_v3 = vpop.f32.mrf.mxu0 }
 0xc5f   :  { %v6365_v60 = vmax.f32 %v6308_v3, 0.0 }
 0xc60   :  { %v6551_v47 = vpop.f32.mrf.mxu2 }
 0xc61   :  { %v6405_v21 = vadd.f32 %v6365_v60, %v17529_v12  ;;  %v6552_v4 = vadd.f32 %v14799_v49, %v6551_v47 }
 0xc63   :  { %v6430_v38 = vpack.c.bf16 %v6405_v21, %v6404_v53  ;;  %v6635_v27 = vmax.f32 %v6552_v4, 0.0  ;;  %v17534_v4 = vld [vmem:[#allocation290_spill] sm:$0xff] }
 0xc65   :  { %v6669_v51 = vpack.c.bf16 %v6635_v27, %v6634_v5  ;;  %7143 = vmatmul.msk.bf16.gmra.mxu2 %vm756_vm1, %v6430_v38  ;;  %v17535_v38 = vld [vmem:[#allocation208_spill] sm:$0xff] }
 0xc66   :  { %v6311_v59 = vpop.f32.mrf.mxu0 }
 0xc67   :  { %7178 = vmatmul.msk.bf16.gmra.mxu3 %vm6719_vm9, %v6669_v51  ;;  %v6366_v62 = vmax.f32 %v6311_v59, 0.0 }
 0xc68   :  { %v6554_v37 = vpop.f32.mrf.mxu2 }
 0xc69   :  { %v6555_v15 = vadd.f32 %v14799_v49, %v6554_v37  ;;  %v6406_v14 = vadd.f32 %v6366_v62, %v14515_v43 }
 0xc6b   :  { %v6636_v20 = vmax.f32 %v6555_v15, 0.0 }
 0xc6e   :  { %v6313_v1 = vpop.f32.mrf.mxu0 }
 0xc6f   :  { %v6367_v13 = vmax.f32 %v6313_v1, 0.0 }
 0xc70   :  { %v6556_v26 = vpop.f32.mrf.mxu2 }
 0xc71   :  { %v6407_v40 = vadd.f32 %v6367_v13, %v14534_v58  ;;  %v6557_v45 = vadd.f32 %v14799_v49, %v6556_v26 }
 0xc73   :  { %v6431_v56 = vpack.c.bf16 %v6407_v40, %v6406_v14  ;;  %v6637_v25 = vmax.f32 %v6557_v45, 0.0 }
 0xc75   :  { %v6670_v48 = vpack.c.bf16 %v6637_v25, %v6636_v20  ;;  %7144 = vmatmul.msk.bf16.gmra.mxu2 %vm756_vm1, %v6431_v56 }
 0xc76   :  { %v6316_v6 = vpop.f32.mrf.mxu0 }
 0xc77   :  { %7179 = vmatmul.msk.bf16.gmra.mxu3 %vm6719_vm9, %v6670_v48  ;;  %v6368_v61 = vmax.f32 %v6316_v6, 0.0 }
 0xc78   :  { %v6559_v9 = vpop.f32.mrf.mxu2 }
 0xc79   :  { %v6560_v46 = vadd.f32 %v14799_v49, %v6559_v9  ;;  %v6408_v58 = vadd.f32 %v6368_v61, %v17530_v18 }
 0xc7b   :  { %v6638_v28 = vmax.f32 %v6560_v46, 0.0 }
 0xc7e   :  { %v6318_v44 = vpop.f32.mrf.mxu0 }
 0xc7f   :  { %v6369_v19 = vmax.f32 %v6318_v44, 0.0 }
 0xc80   :  { %v6561_v43 = vpop.f32.mrf.mxu2 }
 0xc81   :  { %v6409_v8 = vadd.f32 %v6369_v19, %v17531_v22  ;;  %v6562_v32 = vadd.f32 %v14799_v49, %v6561_v43 }
 0xc83   :  { %v6432_v30 = vpack.c.bf16 %v6409_v8, %v6408_v58  ;;  %v6639_v63 = vmax.f32 %v6562_v32, 0.0 }
 0xc85   :  { %v6671_v10 = vpack.c.bf16 %v6639_v63, %v6638_v28  ;;  %7145 = vmatmul.msk.bf16.gmra.mxu2 %vm756_vm1, %v6432_v30 }
 0xc86   :  { %v6321_v39 = vpop.f32.mrf.mxu0 }
 0xc87   :  { %7180 = vmatmul.msk.bf16.gmra.mxu3 %vm6719_vm9, %v6671_v10  ;;  %v6370_v29 = vmax.f32 %v6321_v39, 0.0 }
 0xc88   :  { %v6564_v2 = vpop.f32.mrf.mxu2 }
 0xc89   :  { %v6565_v24 = vadd.f32 %v14799_v49, %v6564_v2  ;;  %v6410_v16 = vadd.f32 %v6370_v29, %v17532_v34 }
 0xc8b   :  { %v6640_v54 = vmax.f32 %v6565_v24, 0.0 }
 0xc8e   :  { %v6323_v17 = vpop.f32.mrf.mxu0 }
 0xc8f   :  { %v6371_v31 = vmax.f32 %v6323_v17, 0.0 }
 0xc90   :  { %v6566_v23 = vpop.f32.mrf.mxu2 }
 0xc91   :  { %v6411_v42 = vadd.f32 %v6371_v31, %v17533_v50  ;;  %v6567_v11 = vadd.f32 %v14799_v49, %v6566_v23 }
 0xc93   :  { %v6433_v36 = vpack.c.bf16 %v6411_v42, %v6410_v16  ;;  %v6641_v52 = vmax.f32 %v6567_v11, 0.0 }
 0xc95   :  { %v6672_v55 = vpack.c.bf16 %v6641_v52, %v6640_v54  ;;  %7146 = vmatmul.msk.bf16.gmra.mxu2 %vm756_vm1, %v6433_v36 }
 0xc96   :  { %v6326_v7 = vpop.f32.mrf.mxu0 }
 0xc97   :  { %7181 = vmatmul.msk.bf16.gmra.mxu3 %vm6719_vm9, %v6672_v55  ;;  %v6372_v47 = vmax.f32 %v6326_v7, 0.0 }
 0xc98   :  { %v6569_v3 = vpop.f32.mrf.mxu2 }
 0xc99   :  { %v6570_v53 = vadd.f32 %v14799_v49, %v6569_v3  ;;  %v6412_v5 = vadd.f32 %v6372_v47, %v17534_v4 }
 0xc9a   :  { %v6789_v33 = vpop.f32.mrf.mxu3 }
 0xc9b   :  { %v6790_v60 = vadd.f32 %v14866_v35, %v6789_v33  ;;  %v6642_v37 = vmax.f32 %v6570_v53, 0.0 }
 0xc9d   :  { %6889 = vst [vmem:[%s15070_s3] sm:$0xff] %v6790_v60 }
 0xc9e   :  { %v6328_v0 = vpop.f32.mrf.mxu0 }
 0xc9f   :  { %v6373_v12 = vmax.f32 %v6328_v0, 0.0 }
 0xca0   :  { %v6571_v21 = vpop.f32.mrf.mxu2 }
 0xca1   :  { %v6413_v27 = vadd.f32 %v6373_v12, %v17535_v38  ;;  %v6572_v51 = vadd.f32 %v14799_v49, %v6571_v21 }
 0xca2   :  { %v6791_v59 = vpop.f32.mrf.mxu3 }
 0xca3   :  { %v6434_v62 = vpack.c.bf16 %v6413_v27, %v6412_v5  ;;  %v6643_v1 = vmax.f32 %v6572_v51, 0.0  ;;  %v6792_v15 = vadd.f32 %v14866_v35, %v6791_v59 }
 0xca5   :  { %v6673_v13 = vpack.c.bf16 %v6643_v1, %v6642_v37  ;;  %6890 = vst [vmem:[%s15070_s3 + $0x8] sm:$0xff] %v6792_v15  ;;  %7147 = vmatmul.msk.bf16.gmra.mxu2 %vm756_vm1, %v6434_v62 }
 0xca6   :  { %v6331_v26 = vpop.f32.mrf.mxu0 }
 0xca7   :  { %7182 = vmatmul.msk.bf16.gmra.mxu3 %vm6719_vm9, %v6673_v13  ;;  %v6374_v20 = vmax.f32 %v6331_v26, 0.0 }
 0xca8   :  { %v6574_v14 = vpop.f32.mrf.mxu2 }
 0xca9   :  { %v6575_v25 = vadd.f32 %v14799_v49, %v6574_v14  ;;  %v6414_v9 = vadd.f32 %v6374_v20, %v14627_v57 }
 0xcaa   :  { %v6794_v40 = vpop.f32.mrf.mxu3 }
 0xcab   :  { %v6795_v45 = vadd.f32 %v14866_v35, %v6794_v40  ;;  %v6644_v19 = vmax.f32 %v6575_v25, 0.0 }
 0xcad   :  { %6891 = vst [vmem:[%s15070_s3 + $0x10] sm:$0xff] %v6795_v45 }
 0xcae   :  { %v6333_v56 = vpop.f32.mrf.mxu0 }
 0xcaf   :  { %v6375_v48 = vmax.f32 %v6333_v56, 0.0 }
 0xcb0   :  { %v6576_v6 = vpop.f32.mrf.mxu2 }
 0xcb1   :  { %v6415_v61 = vadd.f32 %v6375_v48, %v14662_v41  ;;  %v6577_v44 = vadd.f32 %v14799_v49, %v6576_v6 }
 0xcb2   :  { %v6796_v46 = vpop.f32.mrf.mxu3 }
 0xcb3   :  { %v6435_v43 = vpack.c.bf16 %v6415_v61, %v6414_v9  ;;  %v6645_v18 = vmax.f32 %v6577_v44, 0.0  ;;  %v6797_v58 = vadd.f32 %v14866_v35, %v6796_v46 }
 0xcb5   :  { %v6674_v22 = vpack.c.bf16 %v6645_v18, %v6644_v19  ;;  %6892 = vst [vmem:[%s15070_s3 + $0x18] sm:$0xff] %v6797_v58  ;;  %7148 = vmatmul.msk.bf16.gmra.mxu2 %vm756_vm1, %v6435_v43 }
 0xcb7   :  { %7183 = vmatmul.msk.bf16.gmra.mxu3 %vm6719_vm9, %v6674_v22 }
 0xcb8   :  { %v6579_v57 = vpop.f32.mrf.mxu2 }
 0xcb9   :  { %v6580_v32 = vadd.f32 %v14799_v49, %v6579_v57 }
 0xcba   :  { %v6799_v8 = vpop.f32.mrf.mxu3 }
 0xcbb   :  { %v6800_v41 = vadd.f32 %v14866_v35, %v6799_v8  ;;  %v6646_v10 = vmax.f32 %v6580_v32, 0.0 }
 0xcbd   :  { %6893 = vst [vmem:[%s15070_s3 + $0x20] sm:$0xff] %v6800_v41 }
 0xcc0   :  { %v6581_v28 = vpop.f32.mrf.mxu2 }
 0xcc1   :  { %v6582_v30 = vadd.f32 %v14799_v49, %v6581_v28 }
 0xcc2   :  { %v6801_v63 = vpop.f32.mrf.mxu3 }
 0xcc3   :  { %v6647_v39 = vmax.f32 %v6582_v30, 0.0  ;;  %v6802_v2 = vadd.f32 %v14866_v35, %v6801_v63 }
 0xcc5   :  { %v6675_v29 = vpack.c.bf16 %v6647_v39, %v6646_v10  ;;  %6894 = vst [vmem:[%s15070_s3 + $0x28] sm:$0xff] %v6802_v2 }
 0xcc7   :  { %7184 = vmatmul.msk.bf16.gmra.mxu3 %vm6719_vm9, %v6675_v29 }
 0xcc8   :  { %v6584_v17 = vpop.f32.mrf.mxu2 }
 0xcc9   :  { %v6585_v23 = vadd.f32 %v14799_v49, %v6584_v17 }
 0xcca   :  { %v6804_v24 = vpop.f32.mrf.mxu3 }
 0xccb   :  { %v6805_v31 = vadd.f32 %v14866_v35, %v6804_v24  ;;  %v6648_v42 = vmax.f32 %v6585_v23, 0.0 }
 0xccd   :  { %6895 = vst [vmem:[%s15070_s3 + $0x30] sm:$0xff] %v6805_v31 }
 0xcd0   :  { %v6586_v34 = vpop.f32.mrf.mxu2 }
 0xcd1   :  { %v6587_v16 = vadd.f32 %v14799_v49, %v6586_v34 }
 0xcd2   :  { %v6806_v50 = vpop.f32.mrf.mxu3 }
 0xcd3   :  { %v6649_v11 = vmax.f32 %v6587_v16, 0.0  ;;  %v6807_v54 = vadd.f32 %v14866_v35, %v6806_v50 }
 0xcd5   :  { %v6676_v36 = vpack.c.bf16 %v6649_v11, %v6648_v42  ;;  %6896 = vst [vmem:[%s15070_s3 + $0x38] sm:$0xff] %v6807_v54 }
 0xcd7   :  { %7185 = vmatmul.msk.bf16.gmra.mxu3 %vm6719_vm9, %v6676_v36 }
 0xcd8   :  { %v6589_v52 = vpop.f32.mrf.mxu2 }
 0xcd9   :  { %v6590_v3 = vadd.f32 %v14799_v49, %v6589_v52 }
 0xcda   :  { %v6809_v55 = vpop.f32.mrf.mxu3 }
 0xcdb   :  { %v6810_v7 = vadd.f32 %v14866_v35, %v6809_v55  ;;  %v6650_v0 = vmax.f32 %v6590_v3, 0.0 }
 0xcdd   :  { %6897 = vst [vmem:[%s15070_s3 + $0x40] sm:$0xff] %v6810_v7 }
 0xce0   :  { %v6591_v33 = vpop.f32.mrf.mxu2 }
 0xce1   :  { %v6592_v60 = vadd.f32 %v14799_v49, %v6591_v33 }
 0xce2   :  { %v6811_v47 = vpop.f32.mrf.mxu3 }
 0xce3   :  { %v6651_v53 = vmax.f32 %v6592_v60, 0.0  ;;  %v6812_v12 = vadd.f32 %v14866_v35, %v6811_v47 }
 0xce5   :  { %v6677_v21 = vpack.c.bf16 %v6651_v53, %v6650_v0  ;;  %6898 = vst [vmem:[%s15070_s3 + $0x48] sm:$0xff] %v6812_v12 }
 0xce7   :  { %7186 = vmatmul.msk.bf16.gmra.mxu3 %vm6719_vm9, %v6677_v21 }
 0xce8   :  { %v6594_v4 = vpop.f32.mrf.mxu2 }
 0xce9   :  { %v6595_v27 = vadd.f32 %v14799_v49, %v6594_v4 }
 0xcea   :  { %v6814_v5 = vpop.f32.mrf.mxu3 }
 0xceb   :  { %v6815_v38 = vadd.f32 %v14866_v35, %v6814_v5  ;;  %v6652_v62 = vmax.f32 %v6595_v27, 0.0 }
 0xced   :  { %6899 = vst [vmem:[%s15070_s3 + $0x50] sm:$0xff] %v6815_v38 }
 0xcf0   :  { %v6596_v51 = vpop.f32.mrf.mxu2 }
 0xcf1   :  { %v6597_v59 = vadd.f32 %v14799_v49, %v6596_v51 }
 0xcf2   :  { %v6816_v37 = vpop.f32.mrf.mxu3 }
 0xcf3   :  { %v6653_v1 = vmax.f32 %v6597_v59, 0.0  ;;  %v6817_v15 = vadd.f32 %v14866_v35, %v6816_v37 }
 0xcf5   :  { %v6678_v13 = vpack.c.bf16 %v6653_v1, %v6652_v62  ;;  %6900 = vst [vmem:[%s15070_s3 + $0x58] sm:$0xff] %v6817_v15 }
 0xcf7   :  { %7187 = vmatmul.msk.bf16.gmra.mxu3 %vm6719_vm9, %v6678_v13 }
 0xcf8   :  { %v6599_v26 = vpop.f32.mrf.mxu2 }
 0xcf9   :  { %v6600_v45 = vadd.f32 %v14799_v49, %v6599_v26 }
 0xcfa   :  { %v6819_v14 = vpop.f32.mrf.mxu3 }
 0xcfb   :  { %v6820_v40 = vadd.f32 %v14866_v35, %v6819_v14  ;;  %v6654_v48 = vmax.f32 %v6600_v45, 0.0 }
 0xcfd   :  { %6901 = vst [vmem:[%s15070_s3 + $0x60] sm:$0xff] %v6820_v40 }
 0xd00   :  { %v6601_v20 = vpop.f32.mrf.mxu2 }
 0xd01   :  { %v6602_v56 = vadd.f32 %v14799_v49, %v6601_v20 }
 0xd02   :  { %v6821_v25 = vpop.f32.mrf.mxu3 }
 0xd03   :  { %v6655_v6 = vmax.f32 %v6602_v56, 0.0  ;;  %v6822_v9 = vadd.f32 %v14866_v35, %v6821_v25 }
 0xd05   :  { %v6679_v61 = vpack.c.bf16 %v6655_v6, %v6654_v48  ;;  %6902 = vst [vmem:[%s15070_s3 + $0x68] sm:$0xff] %v6822_v9 }
 0xd07   :  { %7188 = vmatmul.msk.bf16.gmra.mxu3 %vm6719_vm9, %v6679_v61 }
 0xd08   :  { %v6604_v44 = vpop.f32.mrf.mxu2 }
 0xd09   :  { %v6605_v43 = vadd.f32 %v14799_v49, %v6604_v44 }
 0xd0a   :  { %v6824_v46 = vpop.f32.mrf.mxu3 }
 0xd0b   :  { %v6825_v19 = vadd.f32 %v14866_v35, %v6824_v46  ;;  %v6656_v57 = vmax.f32 %v6605_v43, 0.0 }
 0xd0d   :  { %6903 = vst [vmem:[%s15070_s3 + $0x70] sm:$0xff] %v6825_v19 }
 0xd10   :  { %v6606_v18 = vpop.f32.mrf.mxu2 }
 0xd11   :  { %v6607_v58 = vadd.f32 %v14799_v49, %v6606_v18 }
 0xd12   :  { %v6826_v22 = vpop.f32.mrf.mxu3 }
 0xd13   :  { %v6657_v8 = vmax.f32 %v6607_v58, 0.0  ;;  %v6827_v41 = vadd.f32 %v14866_v35, %v6826_v22 }
 0xd15   :  { %v6680_v32 = vpack.c.bf16 %v6657_v8, %v6656_v57  ;;  %6904 = vst [vmem:[%s15070_s3 + $0x78] sm:$0xff] %v6827_v41 }
 0xd17   :  { %7189 = vmatmul.msk.bf16.gmra.mxu3 %vm6719_vm9, %v6680_v32 }
 0xd18   :  { %v6609_v28 = vpop.f32.mrf.mxu2 }
 0xd19   :  { %v6610_v10 = vadd.f32 %v14799_v49, %v6609_v28 }
 0xd1a   :  { %v6829_v30 = vpop.f32.mrf.mxu3 }
 0xd1b   :  { %v6830_v63 = vadd.f32 %v14866_v35, %v6829_v30  ;;  %v6658_v17 = vmax.f32 %v6610_v10, 0.0 }
 0xd1d   :  { %6905 = vst [vmem:[%s15070_s3 + $0x80] sm:$0xff] %v6830_v63 }
 0xd20   :  { %v6611_v39 = vpop.f32.mrf.mxu2 }
 0xd21   :  { %v6612_v2 = vadd.f32 %v14799_v49, %v6611_v39 }
 0xd22   :  { %v6831_v29 = vpop.f32.mrf.mxu3 }
 0xd23   :  { %v6659_v24 = vmax.f32 %v6612_v2, 0.0  ;;  %v6832_v31 = vadd.f32 %v14866_v35, %v6831_v29 }
 0xd25   :  { %v6681_v23 = vpack.c.bf16 %v6659_v24, %v6658_v17  ;;  %6906 = vst [vmem:[%s15070_s3 + $0x88] sm:$0xff] %v6832_v31 }
 0xd27   :  { %7190 = vmatmul.msk.bf16.gmra.mxu3 %vm6719_vm9, %v6681_v23 }
 0xd28   :  { %v6614_v34 = vpop.f32.mrf.mxu2 }
 0xd29   :  { %v6615_v42 = vadd.f32 %v14799_v49, %v6614_v34 }
 0xd2a   :  { %v6834_v16 = vpop.f32.mrf.mxu3 }
 0xd2b   :  { %v6835_v50 = vadd.f32 %v14866_v35, %v6834_v16  ;;  %v6660_v52 = vmax.f32 %v6615_v42, 0.0 }
 0xd2d   :  { %6907 = vst [vmem:[%s15070_s3 + $0x90] sm:$0xff] %v6835_v50 }
 0xd30   :  { %v6616_v11 = vpop.f32.mrf.mxu2 }
 0xd31   :  { %v6617_v54 = vadd.f32 %v14799_v49, %v6616_v11 }
 0xd32   :  { %v6836_v36 = vpop.f32.mrf.mxu3 }
 0xd33   :  { %v6661_v55 = vmax.f32 %v6617_v54, 0.0  ;;  %v6837_v7 = vadd.f32 %v14866_v35, %v6836_v36 }
 0xd35   :  { %v6682_v3 = vpack.c.bf16 %v6661_v55, %v6660_v52  ;;  %6908 = vst [vmem:[%s15070_s3 + $0x98] sm:$0xff] %v6837_v7 }
 0xd37   :  { %7191 = vmatmul.msk.bf16.gmra.mxu3 %vm6719_vm9, %v6682_v3 }
 0xd38   :  { %v6619_v33 = vpop.f32.mrf.mxu2 }
 0xd39   :  { %v6620_v0 = vadd.f32 %v14799_v49, %v6619_v33 }
 0xd3a   :  { %v6839_v60 = vpop.f32.mrf.mxu3 }
 0xd3b   :  { %v6840_v47 = vadd.f32 %v14866_v35, %v6839_v60  ;;  %v6662_v4 = vmax.f32 %v6620_v0, 0.0 }
 0xd3d   :  { %6909 = vst [vmem:[%s15070_s3 + $0xa0] sm:$0xff] %v6840_v47 }
 0xd40   :  { %v6621_v53 = vpop.f32.mrf.mxu2 }
 0xd41   :  { %v6622_v12 = vadd.f32 %v14799_v49, %v6621_v53 }
 0xd42   :  { %v6841_v21 = vpop.f32.mrf.mxu3 }
 0xd43   :  { %v6663_v5 = vmax.f32 %v6622_v12, 0.0  ;;  %v6842_v38 = vadd.f32 %v14866_v35, %v6841_v21 }
 0xd45   :  { %v6683_v27 = vpack.c.bf16 %v6663_v5, %v6662_v4  ;;  %6910 = vst [vmem:[%s15070_s3 + $0xa8] sm:$0xff] %v6842_v38 }
 0xd47   :  { %7192 = vmatmul.msk.bf16.gmra.mxu3 %vm6719_vm9, %v6683_v27 }
 0xd4a   :  { %v6844_v51 = vpop.f32.mrf.mxu3 }
 0xd4b   :  { %v6845_v59 = vadd.f32 %v14866_v35, %v6844_v51 }
 0xd4d   :  { %6911 = vst [vmem:[%s15070_s3 + $0xb0] sm:$0xff] %v6845_v59 }
 0xd52   :  { %v6846_v49 = vpop.f32.mrf.mxu3 }
 0xd53   :  { %v6847_v37 = vadd.f32 %v14866_v35, %v6846_v49 }
 0xd55   :  { %6912 = vst [vmem:[%s15070_s3 + $0xb8] sm:$0xff] %v6847_v37 }
 0xd5a   :  { %v6849_v62 = vpop.f32.mrf.mxu3 }
 0xd5b   :  { %v6850_v1 = vadd.f32 %v14866_v35, %v6849_v62 }
 0xd5d   :  { %6913 = vst [vmem:[%s15070_s3 + $0xc0] sm:$0xff] %v6850_v1 }
 0xd62   :  { %v6851_v15 = vpop.f32.mrf.mxu3 }
 0xd63   :  { %v6852_v13 = vadd.f32 %v14866_v35, %v6851_v15 }
 0xd65   :  { %6914 = vst [vmem:[%s15070_s3 + $0xc8] sm:$0xff] %v6852_v13 }
 0xd6a   :  { %v6854_v26 = vpop.f32.mrf.mxu3 }
 0xd6b   :  { %v6855_v14 = vadd.f32 %v14866_v35, %v6854_v26 }
 0xd6d   :  { %6915 = vst [vmem:[%s15070_s3 + $0xd0] sm:$0xff] %v6855_v14 }
 0xd72   :  { %v6856_v40 = vpop.f32.mrf.mxu3 }
 0xd73   :  { %v6857_v45 = vadd.f32 %v14866_v35, %v6856_v40 }
 0xd75   :  { %6916 = vst [vmem:[%s15070_s3 + $0xd8] sm:$0xff] %v6857_v45 }
 0xd7a   :  { %v6859_v20 = vpop.f32.mrf.mxu3 }
 0xd7b   :  { %v6860_v56 = vadd.f32 %v14866_v35, %v6859_v20 }
 0xd7d   :  { %6917 = vst [vmem:[%s15070_s3 + $0xe0] sm:$0xff] %v6860_v56 }
 0xd82   :  { %v6861_v25 = vpop.f32.mrf.mxu3 }
 0xd83   :  { %v6862_v48 = vadd.f32 %v14866_v35, %v6861_v25 }
 0xd85   :  { %6918 = vst [vmem:[%s15070_s3 + $0xe8] sm:$0xff] %v6862_v48 }
 0xd8a   :  { %v6864_v6 = vpop.f32.mrf.mxu3 }
 0xd8b   :  { %v6865_v9 = vadd.f32 %v14866_v35, %v6864_v6 }
 0xd8d   :  { %6919 = vst [vmem:[%s15070_s3 + $0xf0] sm:$0xff] %v6865_v9 }
 0xd92   :  { %v6866_v61 = vpop.f32.mrf.mxu3 }
 0xd93   :  { %v6867_v44 = vadd.f32 %v14866_v35, %v6866_v61 }
 0xd95   :  { %6920 = vst [vmem:[%s15070_s3 + $0xf8] sm:$0xff] %v6867_v44 }
 0xd9a   :  { %v6869_v46 = vpop.f32.mrf.mxu3 }
 0xd9b   :  { %v6870_v19 = vadd.f32 %v14866_v35, %v6869_v46 }
 0xd9d   :  { %6921 = vst [vmem:[%s15070_s3 + $0x100] sm:$0xff] %v6870_v19 }
 0xda2   :  { %v6871_v43 = vpop.f32.mrf.mxu3 }
 0xda3   :  { %v6872_v18 = vadd.f32 %v14866_v35, %v6871_v43 }
 0xda5   :  { %6922 = vst [vmem:[%s15070_s3 + $0x108] sm:$0xff] %v6872_v18 }
 0xdaa   :  { %v6874_v58 = vpop.f32.mrf.mxu3 }
 0xdab   :  { %v6875_v22 = vadd.f32 %v14866_v35, %v6874_v58 }
 0xdad   :  { %6923 = vst [vmem:[%s15070_s3 + $0x110] sm:$0xff] %v6875_v22 }
 0xdb2   :  { %v6876_v57 = vpop.f32.mrf.mxu3 }
 0xdb3   :  { %v6877_v8 = vadd.f32 %v14866_v35, %v6876_v57 }
 0xdb5   :  { %6924 = vst [vmem:[%s15070_s3 + $0x118] sm:$0xff] %v6877_v8 }
 0xdba   :  { %v6879_v41 = vpop.f32.mrf.mxu3 }
 0xdbb   :  { %v6880_v32 = vadd.f32 %v14866_v35, %v6879_v41 }
 0xdbd   :  { %6925 = vst [vmem:[%s15070_s3 + $0x120] sm:$0xff] %v6880_v32 }
 0xdc2   :  { %v6881_v28 = vpop.f32.mrf.mxu3 }
 0xdc3   :  { %v6882_v30 = vadd.f32 %v14866_v35, %v6881_v28 }
 0xdc5   :  { %6926 = vst [vmem:[%s15070_s3 + $0x128] sm:$0xff] %v6882_v30 }
 0xdca   :  { %v6884_v63 = vpop.f32.mrf.mxu3 }
 0xdcb   :  { %v6885_v10 = vadd.f32 %v14866_v35, %v6884_v63 }
 0xdcd   :  { %6927 = vst [vmem:[%s15070_s3 + $0x130] sm:$0xff] %v6885_v10 }
 0xdd2   :  { %v6886_v39 = vpop.f32.mrf.mxu3 }
 0xdd3   :  { %v6887_v2 = vadd.f32 %v14866_v35, %v6886_v39 }
 0xdd5   :  { %6928 = vst [vmem:[%s15070_s3 + $0x138] sm:$0xff] %v6887_v2 }

</bundles_post_ra>
